<compile_context>
chip_gen: v5e
topology: v5e:2x2
jax: 0.10.0
libtpu: 0.0.40
codegen_flags: <defaults>
</compile_context>

<pallas_src>
import jax
import jax.numpy as jnp
import numpy as np
from jax.experimental import pallas as pl
from jax.experimental.pallas import tpu as pltpu


LAYER_SPECS = [(3, 64), (64, 64), (64, 64), (64, 128), (128, 128), (128, 68)]


# ----------------------------- in-kernel helpers -----------------------------


def _conv_bn_relu(x, w_ref, b_ref):
  """Fused 3x3 conv (pad=1) + folded-BN bias + ReLU on one image.

  x:     (H, W, Cin) f32 value (activation, resident in VMEM/vregs)
  w_ref: (9*Cin, Cout) bf16  -- conv weights with BN scale folded, tap-major K
  b_ref: (1, Cout) f32       -- bias with BN shift folded
  returns (H, W, Cout) f32
  """
  H, W, Cin = x.shape
  Cout = w_ref.shape[-1]

  # Zero-pad H and W by 1 on each side, entirely in-kernel (no HBM traffic).
  zc = jnp.zeros((H, 1, Cin), jnp.float32)
  xp = jnp.concatenate([zc, x, zc], axis=1)            # (H, W+2, Cin)
  zr = jnp.zeros((1, W + 2, Cin), jnp.float32)
  xp = jnp.concatenate([zr, xp, zr], axis=0)           # (H+2, W+2, Cin)

  # im2col: concatenate the 9 taps along the contraction dim so each layer is
  # a single big-K MXU matmul (K = 9*Cin) instead of 9 small-K matmuls.
  cols = []
  for dy in range(3):
    for dx in range(3):
      p = xp[dy:dy + H, dx:dx + W, :]                  # (H, W, Cin)
      cols.append(p.reshape(H * W, Cin))
  patches = jnp.concatenate(cols, axis=-1)             # (H*W, 9*Cin) f32

  # bf16 x bf16 MXU matmul with f32 accumulation.
  acc = jnp.dot(patches.astype(jnp.bfloat16), w_ref[...],
                preferred_element_type=jnp.float32)    # (H*W, Cout) f32
  out = jnp.maximum(acc + b_ref[...], 0.0)             # bias + ReLU in f32
  return out.reshape(H, W, Cout)


def _maxpool2x2(x):
  """2x2 max pool, stride 2, on an (H, W, C) f32 value."""
  H, W, C = x.shape
  # TODO(synk): the reshape splits the sublane (W) axis (relayout); negligible
  # at these sizes; could be replaced by strided views / conv-epilogue fusion.
  return jnp.max(x.reshape(H // 2, 2, W // 2, 2, C), axis=(1, 3))


# ------------------------------ fused FT kernel ------------------------------


def ft_fused_kernel(x_ref, w0, b0, w1, b1, w2, b2, w3, b3, w4, b4, w5, b5,
                    o_ref):
  """Entire FT network for one image; activations never leave VMEM."""
  x = x_ref[...]                       # (H, W, 3) f32
  x = _conv_bn_relu(x, w0, b0)         # (H, W, 64)
  x = _conv_bn_relu(x, w1, b1)         # (H, W, 64)
  x = _maxpool2x2(x)                   # (H/2, W/2, 64)
  x = _conv_bn_relu(x, w2, b2)         # (H/2, W/2, 64)
  x = _conv_bn_relu(x, w3, b3)         # (H/2, W/2, 128)
  x = _maxpool2x2(x)                   # (H/4, W/4, 128)
  x = _conv_bn_relu(x, w4, b4)         # (H/4, W/4, 128)
  x = _conv_bn_relu(x, w5, b5)         # (H/4, W/4, 68)
  # Dropout2d(0.5): identity at inference.
  o_ref[...] = x.astype(o_ref.dtype)


# --------------------------------- wrapper -----------------------------------


@jax.jit
def ft_forward(x_nchw, params):
  """Matches FT.forward (eval semantics). x_nchw: (N, 3, H, W) float32."""
  N, C, H, W = x_nchw.shape
  assert C == 3 and H % 4 == 0 and W % 4 == 0
  x = jnp.transpose(x_nchw, (0, 2, 3, 1))              # NCHW -> NHWC
  Ho, Wo = H // 4, W // 4

  weight_args = []
  weight_specs = []
  for (w, b) in params:
    weight_args += [w, b]
    weight_specs += [
        pl.BlockSpec(w.shape, lambda n: (0, 0)),       # loaded once, resident
        pl.BlockSpec(b.shape, lambda n: (0, 0)),
    ]

  out = pl.pallas_call(
      ft_fused_kernel,
      out_shape=jax.ShapeDtypeStruct((N, Ho, Wo, 68), jnp.float32),
      grid=(N,),
      in_specs=[pl.BlockSpec((pl.Squeezed(), H, W, 3),
                             lambda n: (n, 0, 0, 0))] + weight_specs,
      out_specs=pl.BlockSpec((pl.Squeezed(), Ho, Wo, 68),
                             lambda n: (n, 0, 0, 0)),
      compiler_params=pltpu.CompilerParams(
          dimension_semantics=("parallel",)),          # one image per TC (v7x)
  )(x, *weight_args)
  return jnp.transpose(out, (0, 3, 1, 2))              # NHWC -> NCHW


# --------------------------- parameter generation ----------------------------


def init_conv_bn(key, cin, cout, eps=1e-5):
  """Synthetic Conv2d + BatchNorm2d params folded for inference.

  Returns (w_folded (9*cin, cout) bf16  [K = tap-major, channel-minor],
           b_folded (1, cout)     f32).
  """
  k1, k2, k3, k4, k5, k6 = jax.random.split(key, 6)
  w = jax.random.normal(k1, (3, 3, cin, cout), jnp.float32) / np.sqrt(9 * cin)
  b = 0.01 * jax.random.normal(k2, (cout,), jnp.float32)
  gamma = 1.0 + 0.1 * jax.random.normal(k3, (cout,), jnp.float32)
  beta = 0.1 * jax.random.normal(k4, (cout,), jnp.float32)
  run_mean = 0.1 * jax.random.normal(k5, (cout,), jnp.float32)
  run_var = 1.0 + 0.1 * jax.random.uniform(k6, (cout,), jnp.float32)

  scale = gamma / jnp.sqrt(run_var + eps)                      # (cout,)
  w_folded = (w * scale).reshape(9 * cin, cout).astype(jnp.bfloat16)
  b_folded = (beta + (b - run_mean) * scale).reshape(1, cout)  # f32
  return w_folded, b_folded


def init_ft_params(key):
  keys = jax.random.split(key, len(LAYER_SPECS))
  return [init_conv_bn(k, cin, cout) for k, (cin, cout) in zip(keys, LAYER_SPECS)]


# ----------------------------- pure-JAX reference ----------------------------


def ft_reference(x_nchw, params):
  """Reference with the same bf16-input / f32-accumulate numerics."""
  x = jnp.transpose(x_nchw, (0, 2, 3, 1))

  def block(x, w_k, b):
    K, cout = w_k.shape
    cin = K // 9
    w = w_k.astype(jnp.float32).reshape(3, 3, cin, cout)       # exact bf16 vals
    xb = x.astype(jnp.bfloat16).astype(jnp.float32)            # match kernel
    dn = jax.lax.conv_dimension_numbers(xb.shape, w.shape,
                                        ("NHWC", "HWIO", "NHWC"))
    y = jax.lax.conv_general_dilated(xb, w, (1, 1), "SAME",
                                     dimension_numbers=dn,
                                     preferred_element_type=jnp.float32)
    return jnp.maximum(y + b.reshape(1, 1, 1, cout), 0.0)

  def pool(x):
    return jax.lax.reduce_window(x, -jnp.inf, jax.lax.max,
                                 (1, 2, 2, 1), (1, 2, 2, 1), "VALID")

  x = block(x, *params[0])
  x = block(x, *params[1])
  x = pool(x)
  x = block(x, *params[2])
  x = block(x, *params[3])
  x = pool(x)
  x = block(x, *params[4])
  x = block(x, *params[5])
  return jnp.transpose(x, (0, 3, 1, 2))


# ----------------------------------- main ------------------------------------


if __name__ == "__main__":
  key = jax.random.PRNGKey(0)
  k_x, k_p = jax.random.split(key)

  N, C, H, W = 2, 3, 16, 16
  x = jax.random.normal(k_x, (N, C, H, W), jnp.float32)
  params = init_ft_params(k_p)

  out = jax.block_until_ready(ft_forward(x, params))
  assert out.shape == (N, 68, H // 4, W // 4), out.shape

  ref = jax.block_until_ready(ft_reference(x, params))
  np.testing.assert_allclose(np.asarray(out), np.asarray(ref),
                             rtol=5e-3, atol=5e-3)

  print("KERNEL_OK")
</pallas_src>

<mosaic_0001>
module attributes {stable_mosaic.version = 11 : i64} {
  func.func @ft_fused_kernel(%arg0: i32, %arg1: memref<1x16x16x3xf32, #tpu.memory_space<vmem>>, %arg2: memref<27x64xbf16, #tpu.memory_space<vmem>>, %arg3: memref<1x64xf32, #tpu.memory_space<vmem>>, %arg4: memref<576x64xbf16, #tpu.memory_space<vmem>>, %arg5: memref<1x64xf32, #tpu.memory_space<vmem>>, %arg6: memref<576x64xbf16, #tpu.memory_space<vmem>>, %arg7: memref<1x64xf32, #tpu.memory_space<vmem>>, %arg8: memref<576x128xbf16, #tpu.memory_space<vmem>>, %arg9: memref<1x128xf32, #tpu.memory_space<vmem>>, %arg10: memref<1152x128xbf16, #tpu.memory_space<vmem>>, %arg11: memref<1x128xf32, #tpu.memory_space<vmem>>, %arg12: memref<1152x68xbf16, #tpu.memory_space<vmem>>, %arg13: memref<1x68xf32, #tpu.memory_space<vmem>>, %arg14: memref<1x4x4x68xf32, #tpu.memory_space<vmem>>) attributes {dimension_semantics = [#tpu.dimension_semantics<parallel>], iteration_bounds = array<i64: 2>, scalar_prefetch = 0 : i64, scratch_operands = 0 : i64, tpu.core_type = #tpu.core_type<tc>, window_params = [{transform_indices = @transform_0, window_bounds = array<i64: 1, 16, 16, 3>}, {pipeline_mode = #tpu.pipeline_mode<synchronous>, transform_indices = @transform_1, window_bounds = array<i64: 27, 64>}, {pipeline_mode = #tpu.pipeline_mode<synchronous>, transform_indices = @transform_2, window_bounds = array<i64: 1, 64>}, {pipeline_mode = #tpu.pipeline_mode<synchronous>, transform_indices = @transform_3, window_bounds = array<i64: 576, 64>}, {pipeline_mode = #tpu.pipeline_mode<synchronous>, transform_indices = @transform_4, window_bounds = array<i64: 1, 64>}, {pipeline_mode = #tpu.pipeline_mode<synchronous>, transform_indices = @transform_5, window_bounds = array<i64: 576, 64>}, {pipeline_mode = #tpu.pipeline_mode<synchronous>, transform_indices = @transform_6, window_bounds = array<i64: 1, 64>}, {pipeline_mode = #tpu.pipeline_mode<synchronous>, transform_indices = @transform_7, window_bounds = array<i64: 576, 128>}, {pipeline_mode = #tpu.pipeline_mode<synchronous>, transform_indices = @transform_8, window_bounds = array<i64: 1, 128>}, {pipeline_mode = #tpu.pipeline_mode<synchronous>, transform_indices = @transform_9, window_bounds = array<i64: 1152, 128>}, {pipeline_mode = #tpu.pipeline_mode<synchronous>, transform_indices = @transform_10, window_bounds = array<i64: 1, 128>}, {pipeline_mode = #tpu.pipeline_mode<synchronous>, transform_indices = @transform_11, window_bounds = array<i64: 1152, 68>}, {pipeline_mode = #tpu.pipeline_mode<synchronous>, transform_indices = @transform_12, window_bounds = array<i64: 1, 68>}, {transform_indices = @transform_13, window_bounds = array<i64: 1, 4, 4, 68>}]} {
    %c0 = arith.constant 0 : index
    %c0_0 = arith.constant 0 : index
    %c0_1 = arith.constant 0 : index
    %c0_2 = arith.constant 0 : index
    %0 = vector.load %arg1[%c0, %c0_0, %c0_1, %c0_2] : memref<1x16x16x3xf32, #tpu.memory_space<vmem>>, vector<1x16x16x3xf32>
    %1 = vector.shape_cast %0 : vector<1x16x16x3xf32> to vector<16x16x3xf32>
    %cst = arith.constant 0.000000e+00 : f32
    %2 = vector.broadcast %cst : f32 to vector<16x1x3xf32>
    %3 = tpu.concatenate %2, %1, %2 in 1 : vector<16x1x3xf32>, vector<16x16x3xf32>, vector<16x1x3xf32> -> vector<16x18x3xf32>
    %cst_3 = arith.constant 0.000000e+00 : f32
    %4 = vector.broadcast %cst_3 : f32 to vector<1x18x3xf32>
    %5 = tpu.concatenate %4, %3, %4 in 0 : vector<1x18x3xf32>, vector<16x18x3xf32>, vector<1x18x3xf32> -> vector<18x18x3xf32>
    %6 = vector.extract_strided_slice %5 {offsets = [0, 0, 0], sizes = [16, 16, 3], strides = [1, 1, 1]} : vector<18x18x3xf32> to vector<16x16x3xf32>
    %7 = vector.shape_cast %6 : vector<16x16x3xf32> to vector<256x3xf32>
    %8 = vector.extract_strided_slice %5 {offsets = [0, 1, 0], sizes = [16, 16, 3], strides = [1, 1, 1]} : vector<18x18x3xf32> to vector<16x16x3xf32>
    %9 = vector.shape_cast %8 : vector<16x16x3xf32> to vector<256x3xf32>
    %10 = vector.extract_strided_slice %5 {offsets = [0, 2, 0], sizes = [16, 16, 3], strides = [1, 1, 1]} : vector<18x18x3xf32> to vector<16x16x3xf32>
    %11 = vector.shape_cast %10 : vector<16x16x3xf32> to vector<256x3xf32>
    %12 = vector.extract_strided_slice %5 {offsets = [1, 0, 0], sizes = [16, 16, 3], strides = [1, 1, 1]} : vector<18x18x3xf32> to vector<16x16x3xf32>
    %13 = vector.shape_cast %12 : vector<16x16x3xf32> to vector<256x3xf32>
    %14 = vector.extract_strided_slice %5 {offsets = [1, 1, 0], sizes = [16, 16, 3], strides = [1, 1, 1]} : vector<18x18x3xf32> to vector<16x16x3xf32>
    %15 = vector.shape_cast %14 : vector<16x16x3xf32> to vector<256x3xf32>
    %16 = vector.extract_strided_slice %5 {offsets = [1, 2, 0], sizes = [16, 16, 3], strides = [1, 1, 1]} : vector<18x18x3xf32> to vector<16x16x3xf32>
    %17 = vector.shape_cast %16 : vector<16x16x3xf32> to vector<256x3xf32>
    %18 = vector.extract_strided_slice %5 {offsets = [2, 0, 0], sizes = [16, 16, 3], strides = [1, 1, 1]} : vector<18x18x3xf32> to vector<16x16x3xf32>
    %19 = vector.shape_cast %18 : vector<16x16x3xf32> to vector<256x3xf32>
    %20 = vector.extract_strided_slice %5 {offsets = [2, 1, 0], sizes = [16, 16, 3], strides = [1, 1, 1]} : vector<18x18x3xf32> to vector<16x16x3xf32>
    %21 = vector.shape_cast %20 : vector<16x16x3xf32> to vector<256x3xf32>
    %22 = vector.extract_strided_slice %5 {offsets = [2, 2, 0], sizes = [16, 16, 3], strides = [1, 1, 1]} : vector<18x18x3xf32> to vector<16x16x3xf32>
    %23 = vector.shape_cast %22 : vector<16x16x3xf32> to vector<256x3xf32>
    %24 = tpu.concatenate %7, %9, %11, %13, %15, %17, %19, %21, %23 in 1 : vector<256x3xf32>, vector<256x3xf32>, vector<256x3xf32>, vector<256x3xf32>, vector<256x3xf32>, vector<256x3xf32>, vector<256x3xf32>, vector<256x3xf32>, vector<256x3xf32> -> vector<256x27xf32>
    %25 = arith.truncf %24 : vector<256x27xf32> to vector<256x27xbf16>
    %c0_4 = arith.constant 0 : index
    %c0_5 = arith.constant 0 : index
    %26 = vector.load %arg2[%c0_4, %c0_5] : memref<27x64xbf16, #tpu.memory_space<vmem>>, vector<27x64xbf16>
    %cst_6 = arith.constant dense<0.000000e+00> : vector<256x64xf32>
    %27 = tpu.matmul %25, %26, %cst_6 {dimension_numbers = #tpu.dot_dimension_numbers<[1], [0], [0], [1], [0, 0, 1, 1], [], []>} : vector<256x27xbf16>, vector<27x64xbf16>, vector<256x64xf32> -> vector<256x64xf32>
    %c0_7 = arith.constant 0 : index
    %c0_8 = arith.constant 0 : index
    %28 = vector.load %arg3[%c0_7, %c0_8] : memref<1x64xf32, #tpu.memory_space<vmem>>, vector<1x64xf32>
    %29 = vector.broadcast %28 : vector<1x64xf32> to vector<256x64xf32>
    %30 = arith.addf %27, %29 : vector<256x64xf32>
    %cst_9 = arith.constant 0.000000e+00 : f32
    %31 = vector.broadcast %cst_9 : f32 to vector<256x64xf32>
    %32 = arith.maximumf %30, %31 : vector<256x64xf32>
    %33 = vector.shape_cast %32 : vector<256x64xf32> to vector<16x16x64xf32>
    %cst_10 = arith.constant 0.000000e+00 : f32
    %34 = vector.broadcast %cst_10 : f32 to vector<16x1x64xf32>
    %35 = tpu.concatenate %34, %33, %34 in 1 : vector<16x1x64xf32>, vector<16x16x64xf32>, vector<16x1x64xf32> -> vector<16x18x64xf32>
    %cst_11 = arith.constant 0.000000e+00 : f32
    %36 = vector.broadcast %cst_11 : f32 to vector<1x18x64xf32>
    %37 = tpu.concatenate %36, %35, %36 in 0 : vector<1x18x64xf32>, vector<16x18x64xf32>, vector<1x18x64xf32> -> vector<18x18x64xf32>
    %38 = vector.extract_strided_slice %37 {offsets = [0, 0, 0], sizes = [16, 16, 64], strides = [1, 1, 1]} : vector<18x18x64xf32> to vector<16x16x64xf32>
    %39 = vector.shape_cast %38 : vector<16x16x64xf32> to vector<256x64xf32>
    %40 = vector.extract_strided_slice %37 {offsets = [0, 1, 0], sizes = [16, 16, 64], strides = [1, 1, 1]} : vector<18x18x64xf32> to vector<16x16x64xf32>
    %41 = vector.shape_cast %40 : vector<16x16x64xf32> to vector<256x64xf32>
    %42 = vector.extract_strided_slice %37 {offsets = [0, 2, 0], sizes = [16, 16, 64], strides = [1, 1, 1]} : vector<18x18x64xf32> to vector<16x16x64xf32>
    %43 = vector.shape_cast %42 : vector<16x16x64xf32> to vector<256x64xf32>
    %44 = vector.extract_strided_slice %37 {offsets = [1, 0, 0], sizes = [16, 16, 64], strides = [1, 1, 1]} : vector<18x18x64xf32> to vector<16x16x64xf32>
    %45 = vector.shape_cast %44 : vector<16x16x64xf32> to vector<256x64xf32>
    %46 = vector.extract_strided_slice %37 {offsets = [1, 1, 0], sizes = [16, 16, 64], strides = [1, 1, 1]} : vector<18x18x64xf32> to vector<16x16x64xf32>
    %47 = vector.shape_cast %46 : vector<16x16x64xf32> to vector<256x64xf32>
    %48 = vector.extract_strided_slice %37 {offsets = [1, 2, 0], sizes = [16, 16, 64], strides = [1, 1, 1]} : vector<18x18x64xf32> to vector<16x16x64xf32>
    %49 = vector.shape_cast %48 : vector<16x16x64xf32> to vector<256x64xf32>
    %50 = vector.extract_strided_slice %37 {offsets = [2, 0, 0], sizes = [16, 16, 64], strides = [1, 1, 1]} : vector<18x18x64xf32> to vector<16x16x64xf32>
    %51 = vector.shape_cast %50 : vector<16x16x64xf32> to vector<256x64xf32>
    %52 = vector.extract_strided_slice %37 {offsets = [2, 1, 0], sizes = [16, 16, 64], strides = [1, 1, 1]} : vector<18x18x64xf32> to vector<16x16x64xf32>
    %53 = vector.shape_cast %52 : vector<16x16x64xf32> to vector<256x64xf32>
    %54 = vector.extract_strided_slice %37 {offsets = [2, 2, 0], sizes = [16, 16, 64], strides = [1, 1, 1]} : vector<18x18x64xf32> to vector<16x16x64xf32>
    %55 = vector.shape_cast %54 : vector<16x16x64xf32> to vector<256x64xf32>
    %56 = tpu.concatenate %39, %41, %43, %45, %47, %49, %51, %53, %55 in 1 : vector<256x64xf32>, vector<256x64xf32>, vector<256x64xf32>, vector<256x64xf32>, vector<256x64xf32>, vector<256x64xf32>, vector<256x64xf32>, vector<256x64xf32>, vector<256x64xf32> -> vector<256x576xf32>
    %57 = arith.truncf %56 : vector<256x576xf32> to vector<256x576xbf16>
    %c0_12 = arith.constant 0 : index
    %c0_13 = arith.constant 0 : index
    %58 = vector.load %arg4[%c0_12, %c0_13] : memref<576x64xbf16, #tpu.memory_space<vmem>>, vector<576x64xbf16>
    %cst_14 = arith.constant dense<0.000000e+00> : vector<256x64xf32>
    %59 = tpu.matmul %57, %58, %cst_14 {dimension_numbers = #tpu.dot_dimension_numbers<[1], [0], [0], [1], [0, 0, 1, 1], [], []>} : vector<256x576xbf16>, vector<576x64xbf16>, vector<256x64xf32> -> vector<256x64xf32>
    %c0_15 = arith.constant 0 : index
    %c0_16 = arith.constant 0 : index
    %60 = vector.load %arg5[%c0_15, %c0_16] : memref<1x64xf32, #tpu.memory_space<vmem>>, vector<1x64xf32>
    %61 = vector.broadcast %60 : vector<1x64xf32> to vector<256x64xf32>
    %62 = arith.addf %59, %61 : vector<256x64xf32>
    %cst_17 = arith.constant 0.000000e+00 : f32
    %63 = vector.broadcast %cst_17 : f32 to vector<256x64xf32>
    %64 = arith.maximumf %62, %63 : vector<256x64xf32>
    %65 = vector.shape_cast %64 : vector<256x64xf32> to vector<16x16x64xf32>
    %66 = vector.shape_cast %65 : vector<16x16x64xf32> to vector<8x2x8x2x64xf32>
    %cst_18 = arith.constant dense<0xFF800000> : vector<8x8x64xf32>
    %67 = vector.multi_reduction <maximumf>, %66, %cst_18 [1, 3] : vector<8x2x8x2x64xf32> to vector<8x8x64xf32>
    %cst_19 = arith.constant 0.000000e+00 : f32
    %68 = vector.broadcast %cst_19 : f32 to vector<8x1x64xf32>
    %69 = tpu.concatenate %68, %67, %68 in 1 : vector<8x1x64xf32>, vector<8x8x64xf32>, vector<8x1x64xf32> -> vector<8x10x64xf32>
    %cst_20 = arith.constant 0.000000e+00 : f32
    %70 = vector.broadcast %cst_20 : f32 to vector<1x10x64xf32>
    %71 = tpu.concatenate %70, %69, %70 in 0 : vector<1x10x64xf32>, vector<8x10x64xf32>, vector<1x10x64xf32> -> vector<10x10x64xf32>
    %72 = vector.extract_strided_slice %71 {offsets = [0, 0, 0], sizes = [8, 8, 64], strides = [1, 1, 1]} : vector<10x10x64xf32> to vector<8x8x64xf32>
    %73 = vector.shape_cast %72 : vector<8x8x64xf32> to vector<64x64xf32>
    %74 = vector.extract_strided_slice %71 {offsets = [0, 1, 0], sizes = [8, 8, 64], strides = [1, 1, 1]} : vector<10x10x64xf32> to vector<8x8x64xf32>
    %75 = vector.shape_cast %74 : vector<8x8x64xf32> to vector<64x64xf32>
    %76 = vector.extract_strided_slice %71 {offsets = [0, 2, 0], sizes = [8, 8, 64], strides = [1, 1, 1]} : vector<10x10x64xf32> to vector<8x8x64xf32>
    %77 = vector.shape_cast %76 : vector<8x8x64xf32> to vector<64x64xf32>
    %78 = vector.extract_strided_slice %71 {offsets = [1, 0, 0], sizes = [8, 8, 64], strides = [1, 1, 1]} : vector<10x10x64xf32> to vector<8x8x64xf32>
    %79 = vector.shape_cast %78 : vector<8x8x64xf32> to vector<64x64xf32>
    %80 = vector.extract_strided_slice %71 {offsets = [1, 1, 0], sizes = [8, 8, 64], strides = [1, 1, 1]} : vector<10x10x64xf32> to vector<8x8x64xf32>
    %81 = vector.shape_cast %80 : vector<8x8x64xf32> to vector<64x64xf32>
    %82 = vector.extract_strided_slice %71 {offsets = [1, 2, 0], sizes = [8, 8, 64], strides = [1, 1, 1]} : vector<10x10x64xf32> to vector<8x8x64xf32>
    %83 = vector.shape_cast %82 : vector<8x8x64xf32> to vector<64x64xf32>
    %84 = vector.extract_strided_slice %71 {offsets = [2, 0, 0], sizes = [8, 8, 64], strides = [1, 1, 1]} : vector<10x10x64xf32> to vector<8x8x64xf32>
    %85 = vector.shape_cast %84 : vector<8x8x64xf32> to vector<64x64xf32>
    %86 = vector.extract_strided_slice %71 {offsets = [2, 1, 0], sizes = [8, 8, 64], strides = [1, 1, 1]} : vector<10x10x64xf32> to vector<8x8x64xf32>
    %87 = vector.shape_cast %86 : vector<8x8x64xf32> to vector<64x64xf32>
    %88 = vector.extract_strided_slice %71 {offsets = [2, 2, 0], sizes = [8, 8, 64], strides = [1, 1, 1]} : vector<10x10x64xf32> to vector<8x8x64xf32>
    %89 = vector.shape_cast %88 : vector<8x8x64xf32> to vector<64x64xf32>
    %90 = tpu.concatenate %73, %75, %77, %79, %81, %83, %85, %87, %89 in 1 : vector<64x64xf32>, vector<64x64xf32>, vector<64x64xf32>, vector<64x64xf32>, vector<64x64xf32>, vector<64x64xf32>, vector<64x64xf32>, vector<64x64xf32>, vector<64x64xf32> -> vector<64x576xf32>
    %91 = arith.truncf %90 : vector<64x576xf32> to vector<64x576xbf16>
    %c0_21 = arith.constant 0 : index
    %c0_22 = arith.constant 0 : index
    %92 = vector.load %arg6[%c0_21, %c0_22] : memref<576x64xbf16, #tpu.memory_space<vmem>>, vector<576x64xbf16>
    %cst_23 = arith.constant dense<0.000000e+00> : vector<64x64xf32>
    %93 = tpu.matmul %91, %92, %cst_23 {dimension_numbers = #tpu.dot_dimension_numbers<[1], [0], [0], [1], [0, 0, 1, 1], [], []>} : vector<64x576xbf16>, vector<576x64xbf16>, vector<64x64xf32> -> vector<64x64xf32>
    %c0_24 = arith.constant 0 : index
    %c0_25 = arith.constant 0 : index
    %94 = vector.load %arg7[%c0_24, %c0_25] : memref<1x64xf32, #tpu.memory_space<vmem>>, vector<1x64xf32>
    %95 = vector.broadcast %94 : vector<1x64xf32> to vector<64x64xf32>
    %96 = arith.addf %93, %95 : vector<64x64xf32>
    %cst_26 = arith.constant 0.000000e+00 : f32
    %97 = vector.broadcast %cst_26 : f32 to vector<64x64xf32>
    %98 = arith.maximumf %96, %97 : vector<64x64xf32>
    %99 = vector.shape_cast %98 : vector<64x64xf32> to vector<8x8x64xf32>
    %cst_27 = arith.constant 0.000000e+00 : f32
    %100 = vector.broadcast %cst_27 : f32 to vector<8x1x64xf32>
    %101 = tpu.concatenate %100, %99, %100 in 1 : vector<8x1x64xf32>, vector<8x8x64xf32>, vector<8x1x64xf32> -> vector<8x10x64xf32>
    %cst_28 = arith.constant 0.000000e+00 : f32
    %102 = vector.broadcast %cst_28 : f32 to vector<1x10x64xf32>
    %103 = tpu.concatenate %102, %101, %102 in 0 : vector<1x10x64xf32>, vector<8x10x64xf32>, vector<1x10x64xf32> -> vector<10x10x64xf32>
    %104 = vector.extract_strided_slice %103 {offsets = [0, 0, 0], sizes = [8, 8, 64], strides = [1, 1, 1]} : vector<10x10x64xf32> to vector<8x8x64xf32>
    %105 = vector.shape_cast %104 : vector<8x8x64xf32> to vector<64x64xf32>
    %106 = vector.extract_strided_slice %103 {offsets = [0, 1, 0], sizes = [8, 8, 64], strides = [1, 1, 1]} : vector<10x10x64xf32> to vector<8x8x64xf32>
    %107 = vector.shape_cast %106 : vector<8x8x64xf32> to vector<64x64xf32>
    %108 = vector.extract_strided_slice %103 {offsets = [0, 2, 0], sizes = [8, 8, 64], strides = [1, 1, 1]} : vector<10x10x64xf32> to vector<8x8x64xf32>
    %109 = vector.shape_cast %108 : vector<8x8x64xf32> to vector<64x64xf32>
    %110 = vector.extract_strided_slice %103 {offsets = [1, 0, 0], sizes = [8, 8, 64], strides = [1, 1, 1]} : vector<10x10x64xf32> to vector<8x8x64xf32>
    %111 = vector.shape_cast %110 : vector<8x8x64xf32> to vector<64x64xf32>
    %112 = vector.extract_strided_slice %103 {offsets = [1, 1, 0], sizes = [8, 8, 64], strides = [1, 1, 1]} : vector<10x10x64xf32> to vector<8x8x64xf32>
    %113 = vector.shape_cast %112 : vector<8x8x64xf32> to vector<64x64xf32>
    %114 = vector.extract_strided_slice %103 {offsets = [1, 2, 0], sizes = [8, 8, 64], strides = [1, 1, 1]} : vector<10x10x64xf32> to vector<8x8x64xf32>
    %115 = vector.shape_cast %114 : vector<8x8x64xf32> to vector<64x64xf32>
    %116 = vector.extract_strided_slice %103 {offsets = [2, 0, 0], sizes = [8, 8, 64], strides = [1, 1, 1]} : vector<10x10x64xf32> to vector<8x8x64xf32>
    %117 = vector.shape_cast %116 : vector<8x8x64xf32> to vector<64x64xf32>
    %118 = vector.extract_strided_slice %103 {offsets = [2, 1, 0], sizes = [8, 8, 64], strides = [1, 1, 1]} : vector<10x10x64xf32> to vector<8x8x64xf32>
    %119 = vector.shape_cast %118 : vector<8x8x64xf32> to vector<64x64xf32>
    %120 = vector.extract_strided_slice %103 {offsets = [2, 2, 0], sizes = [8, 8, 64], strides = [1, 1, 1]} : vector<10x10x64xf32> to vector<8x8x64xf32>
    %121 = vector.shape_cast %120 : vector<8x8x64xf32> to vector<64x64xf32>
    %122 = tpu.concatenate %105, %107, %109, %111, %113, %115, %117, %119, %121 in 1 : vector<64x64xf32>, vector<64x64xf32>, vector<64x64xf32>, vector<64x64xf32>, vector<64x64xf32>, vector<64x64xf32>, vector<64x64xf32>, vector<64x64xf32>, vector<64x64xf32> -> vector<64x576xf32>
    %123 = arith.truncf %122 : vector<64x576xf32> to vector<64x576xbf16>
    %c0_29 = arith.constant 0 : index
    %c0_30 = arith.constant 0 : index
    %124 = vector.load %arg8[%c0_29, %c0_30] : memref<576x128xbf16, #tpu.memory_space<vmem>>, vector<576x128xbf16>
    %cst_31 = arith.constant dense<0.000000e+00> : vector<64x128xf32>
    %125 = tpu.matmul %123, %124, %cst_31 {dimension_numbers = #tpu.dot_dimension_numbers<[1], [0], [0], [1], [0, 0, 1, 1], [], []>} : vector<64x576xbf16>, vector<576x128xbf16>, vector<64x128xf32> -> vector<64x128xf32>
    %c0_32 = arith.constant 0 : index
    %c0_33 = arith.constant 0 : index
    %126 = vector.load %arg9[%c0_32, %c0_33] : memref<1x128xf32, #tpu.memory_space<vmem>>, vector<1x128xf32>
    %127 = vector.broadcast %126 : vector<1x128xf32> to vector<64x128xf32>
    %128 = arith.addf %125, %127 : vector<64x128xf32>
    %cst_34 = arith.constant 0.000000e+00 : f32
    %129 = vector.broadcast %cst_34 : f32 to vector<64x128xf32>
    %130 = arith.maximumf %128, %129 : vector<64x128xf32>
    %131 = vector.shape_cast %130 : vector<64x128xf32> to vector<8x8x128xf32>
    %132 = vector.shape_cast %131 : vector<8x8x128xf32> to vector<4x2x4x2x128xf32>
    %cst_35 = arith.constant dense<0xFF800000> : vector<4x4x128xf32>
    %133 = vector.multi_reduction <maximumf>, %132, %cst_35 [1, 3] : vector<4x2x4x2x128xf32> to vector<4x4x128xf32>
    %cst_36 = arith.constant 0.000000e+00 : f32
    %134 = vector.broadcast %cst_36 : f32 to vector<4x1x128xf32>
    %135 = tpu.concatenate %134, %133, %134 in 1 : vector<4x1x128xf32>, vector<4x4x128xf32>, vector<4x1x128xf32> -> vector<4x6x128xf32>
    %cst_37 = arith.constant 0.000000e+00 : f32
    %136 = vector.broadcast %cst_37 : f32 to vector<1x6x128xf32>
    %137 = tpu.concatenate %136, %135, %136 in 0 : vector<1x6x128xf32>, vector<4x6x128xf32>, vector<1x6x128xf32> -> vector<6x6x128xf32>
    %138 = vector.extract_strided_slice %137 {offsets = [0, 0, 0], sizes = [4, 4, 128], strides = [1, 1, 1]} : vector<6x6x128xf32> to vector<4x4x128xf32>
    %139 = vector.shape_cast %138 : vector<4x4x128xf32> to vector<16x128xf32>
    %140 = vector.extract_strided_slice %137 {offsets = [0, 1, 0], sizes = [4, 4, 128], strides = [1, 1, 1]} : vector<6x6x128xf32> to vector<4x4x128xf32>
    %141 = vector.shape_cast %140 : vector<4x4x128xf32> to vector<16x128xf32>
    %142 = vector.extract_strided_slice %137 {offsets = [0, 2, 0], sizes = [4, 4, 128], strides = [1, 1, 1]} : vector<6x6x128xf32> to vector<4x4x128xf32>
    %143 = vector.shape_cast %142 : vector<4x4x128xf32> to vector<16x128xf32>
    %144 = vector.extract_strided_slice %137 {offsets = [1, 0, 0], sizes = [4, 4, 128], strides = [1, 1, 1]} : vector<6x6x128xf32> to vector<4x4x128xf32>
    %145 = vector.shape_cast %144 : vector<4x4x128xf32> to vector<16x128xf32>
    %146 = vector.extract_strided_slice %137 {offsets = [1, 1, 0], sizes = [4, 4, 128], strides = [1, 1, 1]} : vector<6x6x128xf32> to vector<4x4x128xf32>
    %147 = vector.shape_cast %146 : vector<4x4x128xf32> to vector<16x128xf32>
    %148 = vector.extract_strided_slice %137 {offsets = [1, 2, 0], sizes = [4, 4, 128], strides = [1, 1, 1]} : vector<6x6x128xf32> to vector<4x4x128xf32>
    %149 = vector.shape_cast %148 : vector<4x4x128xf32> to vector<16x128xf32>
    %150 = vector.extract_strided_slice %137 {offsets = [2, 0, 0], sizes = [4, 4, 128], strides = [1, 1, 1]} : vector<6x6x128xf32> to vector<4x4x128xf32>
    %151 = vector.shape_cast %150 : vector<4x4x128xf32> to vector<16x128xf32>
    %152 = vector.extract_strided_slice %137 {offsets = [2, 1, 0], sizes = [4, 4, 128], strides = [1, 1, 1]} : vector<6x6x128xf32> to vector<4x4x128xf32>
    %153 = vector.shape_cast %152 : vector<4x4x128xf32> to vector<16x128xf32>
    %154 = vector.extract_strided_slice %137 {offsets = [2, 2, 0], sizes = [4, 4, 128], strides = [1, 1, 1]} : vector<6x6x128xf32> to vector<4x4x128xf32>
    %155 = vector.shape_cast %154 : vector<4x4x128xf32> to vector<16x128xf32>
    %156 = tpu.concatenate %139, %141, %143, %145, %147, %149, %151, %153, %155 in 1 : vector<16x128xf32>, vector<16x128xf32>, vector<16x128xf32>, vector<16x128xf32>, vector<16x128xf32>, vector<16x128xf32>, vector<16x128xf32>, vector<16x128xf32>, vector<16x128xf32> -> vector<16x1152xf32>
    %157 = arith.truncf %156 : vector<16x1152xf32> to vector<16x1152xbf16>
    %c0_38 = arith.constant 0 : index
    %c0_39 = arith.constant 0 : index
    %158 = vector.load %arg10[%c0_38, %c0_39] : memref<1152x128xbf16, #tpu.memory_space<vmem>>, vector<1152x128xbf16>
    %cst_40 = arith.constant dense<0.000000e+00> : vector<16x128xf32>
    %159 = tpu.matmul %157, %158, %cst_40 {dimension_numbers = #tpu.dot_dimension_numbers<[1], [0], [0], [1], [0, 0, 1, 1], [], []>} : vector<16x1152xbf16>, vector<1152x128xbf16>, vector<16x128xf32> -> vector<16x128xf32>
    %c0_41 = arith.constant 0 : index
    %c0_42 = arith.constant 0 : index
    %160 = vector.load %arg11[%c0_41, %c0_42] : memref<1x128xf32, #tpu.memory_space<vmem>>, vector<1x128xf32>
    %161 = vector.broadcast %160 : vector<1x128xf32> to vector<16x128xf32>
    %162 = arith.addf %159, %161 : vector<16x128xf32>
    %cst_43 = arith.constant 0.000000e+00 : f32
    %163 = vector.broadcast %cst_43 : f32 to vector<16x128xf32>
    %164 = arith.maximumf %162, %163 : vector<16x128xf32>
    %165 = vector.shape_cast %164 : vector<16x128xf32> to vector<4x4x128xf32>
    %cst_44 = arith.constant 0.000000e+00 : f32
    %166 = vector.broadcast %cst_44 : f32 to vector<4x1x128xf32>
    %167 = tpu.concatenate %166, %165, %166 in 1 : vector<4x1x128xf32>, vector<4x4x128xf32>, vector<4x1x128xf32> -> vector<4x6x128xf32>
    %cst_45 = arith.constant 0.000000e+00 : f32
    %168 = vector.broadcast %cst_45 : f32 to vector<1x6x128xf32>
    %169 = tpu.concatenate %168, %167, %168 in 0 : vector<1x6x128xf32>, vector<4x6x128xf32>, vector<1x6x128xf32> -> vector<6x6x128xf32>
    %170 = vector.extract_strided_slice %169 {offsets = [0, 0, 0], sizes = [4, 4, 128], strides = [1, 1, 1]} : vector<6x6x128xf32> to vector<4x4x128xf32>
    %171 = vector.shape_cast %170 : vector<4x4x128xf32> to vector<16x128xf32>
    %172 = vector.extract_strided_slice %169 {offsets = [0, 1, 0], sizes = [4, 4, 128], strides = [1, 1, 1]} : vector<6x6x128xf32> to vector<4x4x128xf32>
    %173 = vector.shape_cast %172 : vector<4x4x128xf32> to vector<16x128xf32>
    %174 = vector.extract_strided_slice %169 {offsets = [0, 2, 0], sizes = [4, 4, 128], strides = [1, 1, 1]} : vector<6x6x128xf32> to vector<4x4x128xf32>
    %175 = vector.shape_cast %174 : vector<4x4x128xf32> to vector<16x128xf32>
    %176 = vector.extract_strided_slice %169 {offsets = [1, 0, 0], sizes = [4, 4, 128], strides = [1, 1, 1]} : vector<6x6x128xf32> to vector<4x4x128xf32>
    %177 = vector.shape_cast %176 : vector<4x4x128xf32> to vector<16x128xf32>
    %178 = vector.extract_strided_slice %169 {offsets = [1, 1, 0], sizes = [4, 4, 128], strides = [1, 1, 1]} : vector<6x6x128xf32> to vector<4x4x128xf32>
    %179 = vector.shape_cast %178 : vector<4x4x128xf32> to vector<16x128xf32>
    %180 = vector.extract_strided_slice %169 {offsets = [1, 2, 0], sizes = [4, 4, 128], strides = [1, 1, 1]} : vector<6x6x128xf32> to vector<4x4x128xf32>
    %181 = vector.shape_cast %180 : vector<4x4x128xf32> to vector<16x128xf32>
    %182 = vector.extract_strided_slice %169 {offsets = [2, 0, 0], sizes = [4, 4, 128], strides = [1, 1, 1]} : vector<6x6x128xf32> to vector<4x4x128xf32>
    %183 = vector.shape_cast %182 : vector<4x4x128xf32> to vector<16x128xf32>
    %184 = vector.extract_strided_slice %169 {offsets = [2, 1, 0], sizes = [4, 4, 128], strides = [1, 1, 1]} : vector<6x6x128xf32> to vector<4x4x128xf32>
    %185 = vector.shape_cast %184 : vector<4x4x128xf32> to vector<16x128xf32>
    %186 = vector.extract_strided_slice %169 {offsets = [2, 2, 0], sizes = [4, 4, 128], strides = [1, 1, 1]} : vector<6x6x128xf32> to vector<4x4x128xf32>
    %187 = vector.shape_cast %186 : vector<4x4x128xf32> to vector<16x128xf32>
    %188 = tpu.concatenate %171, %173, %175, %177, %179, %181, %183, %185, %187 in 1 : vector<16x128xf32>, vector<16x128xf32>, vector<16x128xf32>, vector<16x128xf32>, vector<16x128xf32>, vector<16x128xf32>, vector<16x128xf32>, vector<16x128xf32>, vector<16x128xf32> -> vector<16x1152xf32>
    %189 = arith.truncf %188 : vector<16x1152xf32> to vector<16x1152xbf16>
    %c0_46 = arith.constant 0 : index
    %c0_47 = arith.constant 0 : index
    %190 = vector.load %arg12[%c0_46, %c0_47] : memref<1152x68xbf16, #tpu.memory_space<vmem>>, vector<1152x68xbf16>
    %cst_48 = arith.constant dense<0.000000e+00> : vector<16x68xf32>
    %191 = tpu.matmul %189, %190, %cst_48 {dimension_numbers = #tpu.dot_dimension_numbers<[1], [0], [0], [1], [0, 0, 1, 1], [], []>} : vector<16x1152xbf16>, vector<1152x68xbf16>, vector<16x68xf32> -> vector<16x68xf32>
    %c0_49 = arith.constant 0 : index
    %c0_50 = arith.constant 0 : index
    %192 = vector.load %arg13[%c0_49, %c0_50] : memref<1x68xf32, #tpu.memory_space<vmem>>, vector<1x68xf32>
    %193 = vector.broadcast %192 : vector<1x68xf32> to vector<16x68xf32>
    %194 = arith.addf %191, %193 : vector<16x68xf32>
    %cst_51 = arith.constant 0.000000e+00 : f32
    %195 = vector.broadcast %cst_51 : f32 to vector<16x68xf32>
    %196 = arith.maximumf %194, %195 : vector<16x68xf32>
    %197 = vector.shape_cast %196 : vector<16x68xf32> to vector<4x4x68xf32>
    %c0_52 = arith.constant 0 : index
    %c0_53 = arith.constant 0 : index
    %c0_54 = arith.constant 0 : index
    %c0_55 = arith.constant 0 : index
    %198 = vector.load %arg14[%c0_52, %c0_53, %c0_54, %c0_55] : memref<1x4x4x68xf32, #tpu.memory_space<vmem>>, vector<1x4x4x68xf32>
    %199 = vector.shape_cast %198 : vector<1x4x4x68xf32> to vector<4x4x68xf32>
    %200 = vector.shape_cast %197 : vector<4x4x68xf32> to vector<1x4x4x68xf32>
    tpu.vector_store %arg14[%c0_52, %c0_53, %c0_54, %c0_55], %200 {strides = array<i32>} : memref<1x4x4x68xf32, #tpu.memory_space<vmem>>, vector<1x4x4x68xf32>,
    return
  }
  func.func @transform_0(%arg0: i32) -> (i32, i32, i32, i32) {
    %c0_i32 = arith.constant 0 : i32
    %c0_i32_0 = arith.constant 0 : i32
    %c0_i32_1 = arith.constant 0 : i32
    %c0_i32_2 = arith.constant 0 : i32
    return %arg0, %c0_i32, %c0_i32_0, %c0_i32_1 : i32, i32, i32, i32
  }
  func.func @transform_1(%arg0: i32) -> (i32, i32) {
    %c0_i32 = arith.constant 0 : i32
    %c0_i32_0 = arith.constant 0 : i32
    %c0_i32_1 = arith.constant 0 : i32
    return %c0_i32, %c0_i32_0 : i32, i32
  }
  func.func @transform_2(%arg0: i32) -> (i32, i32) {
    %c0_i32 = arith.constant 0 : i32
    %c0_i32_0 = arith.constant 0 : i32
    %c0_i32_1 = arith.constant 0 : i32
    return %c0_i32, %c0_i32_0 : i32, i32
  }
  func.func @transform_3(%arg0: i32) -> (i32, i32) {
    %c0_i32 = arith.constant 0 : i32
    %c0_i32_0 = arith.constant 0 : i32
    %c0_i32_1 = arith.constant 0 : i32
    return %c0_i32, %c0_i32_0 : i32, i32
  }
  func.func @transform_4(%arg0: i32) -> (i32, i32) {
    %c0_i32 = arith.constant 0 : i32
    %c0_i32_0 = arith.constant 0 : i32
    %c0_i32_1 = arith.constant 0 : i32
    return %c0_i32, %c0_i32_0 : i32, i32
  }
  func.func @transform_5(%arg0: i32) -> (i32, i32) {
    %c0_i32 = arith.constant 0 : i32
    %c0_i32_0 = arith.constant 0 : i32
    %c0_i32_1 = arith.constant 0 : i32
    return %c0_i32, %c0_i32_0 : i32, i32
  }
  func.func @transform_6(%arg0: i32) -> (i32, i32) {
    %c0_i32 = arith.constant 0 : i32
    %c0_i32_0 = arith.constant 0 : i32
    %c0_i32_1 = arith.constant 0 : i32
    return %c0_i32, %c0_i32_0 : i32, i32
  }
  func.func @transform_7(%arg0: i32) -> (i32, i32) {
    %c0_i32 = arith.constant 0 : i32
    %c0_i32_0 = arith.constant 0 : i32
    %c0_i32_1 = arith.constant 0 : i32
    return %c0_i32, %c0_i32_0 : i32, i32
  }
  func.func @transform_8(%arg0: i32) -> (i32, i32) {
    %c0_i32 = arith.constant 0 : i32
    %c0_i32_0 = arith.constant 0 : i32
    %c0_i32_1 = arith.constant 0 : i32
    return %c0_i32, %c0_i32_0 : i32, i32
  }
  func.func @transform_9(%arg0: i32) -> (i32, i32) {
    %c0_i32 = arith.constant 0 : i32
    %c0_i32_0 = arith.constant 0 : i32
    %c0_i32_1 = arith.constant 0 : i32
    return %c0_i32, %c0_i32_0 : i32, i32
  }
  func.func @transform_10(%arg0: i32) -> (i32, i32) {
    %c0_i32 = arith.constant 0 : i32
    %c0_i32_0 = arith.constant 0 : i32
    %c0_i32_1 = arith.constant 0 : i32
    return %c0_i32, %c0_i32_0 : i32, i32
  }
  func.func @transform_11(%arg0: i32) -> (i32, i32) {
    %c0_i32 = arith.constant 0 : i32
    %c0_i32_0 = arith.constant 0 : i32
    %c0_i32_1 = arith.constant 0 : i32
    return %c0_i32, %c0_i32_0 : i32, i32
  }
  func.func @transform_12(%arg0: i32) -> (i32, i32) {
    %c0_i32 = arith.constant 0 : i32
    %c0_i32_0 = arith.constant 0 : i32
    %c0_i32_1 = arith.constant 0 : i32
    return %c0_i32, %c0_i32_0 : i32, i32
  }
  func.func @transform_13(%arg0: i32) -> (i32, i32, i32, i32) {
    %c0_i32 = arith.constant 0 : i32
    %c0_i32_0 = arith.constant 0 : i32
    %c0_i32_1 = arith.constant 0 : i32
    %c0_i32_2 = arith.constant 0 : i32
    return %arg0, %c0_i32, %c0_i32_0, %c0_i32_1 : i32, i32, i32, i32
  }
}

</mosaic_0001>

<bundles_post_ra>
// kernel: ft_forward.1
= control target key start
LH: loop header
LB: loop body
LE: loop exit
PB: predicated region body
PF: predicated region fallthrough
CT: control target
= control target key end

     0   :  { %s14909_s0 = inlined_call_operand.vmem [shape: f32[2,16,16,3], index: 0, kind: input, shape index: {}]   ;;  %s14910_s1 = inlined_call_operand.vmem [shape: bf16[27,64], index: 1, kind: input, shape index: {}]   ;;  %s14911_s2 = inlined_call_operand.vmem [shape: f32[1,64], index: 2, kind: input, shape index: {}]   ;;  %s14912_s3 = inlined_call_operand.vmem [shape: bf16[576,64], index: 3, kind: input, shape index: {}]   ;;  %s14913_s4 = inlined_call_operand.vmem [shape: f32[1,64], index: 4, kind: input, shape index: {}]   ;;  %s14914_s5 = inlined_call_operand.vmem [shape: bf16[576,64], index: 5, kind: input, shape index: {}]   ;;  %s14915_s6 = inlined_call_operand.vmem [shape: f32[1,64], index: 6, kind: input, shape index: {}]   ;;  %s14916_s7 = inlined_call_operand.vmem [shape: bf16[576,128], index: 7, kind: input, shape index: {}]   ;;  %s14917_s8 = inlined_call_operand.vmem [shape: f32[1,128], index: 8, kind: input, shape index: {}]   ;;  %s14918_s9 = inlined_call_operand.vmem [shape: bf16[1152,128], index: 9, kind: input, shape index: {}]   ;;  %s14919_s10 = inlined_call_operand.vmem [shape: f32[1,128], index: 10, kind: input, shape index: {}]   ;;  %s14920_s11 = inlined_call_operand.vmem [shape: bf16[1152,68], index: 11, kind: input, shape index: {}]   ;;  %s14921_s12 = inlined_call_operand.vmem [shape: f32[1,68], index: 12, kind: input, shape index: {}]   ;;  %s14922_s13 = inlined_call_operand.hbm [shape: f32[2,4,4,68], index: 13, kind: output, shape index: {}]  }
   0x1   :  { %15005 = sst [smem:[#allocation62_spill]] %s14909_s0 }
   0x2   :  { %15006 = sst [smem:[#allocation63_spill]] %s14910_s1 }
   0x3   :  { %18 = vsyncpa [#allocation3], 0 }
   0x4   :  { %20 = vsyncpa [#allocation3 + $0x1], 0  ;;  %s10664_s25 = smov 0   ;;  %s10666_s26 = smov 0  }
   0x5   :  { %s10668_s27 = smov 0   ;;  %s10670_s28 = smov 0  }
   0x6 LB: > { %15007 = sst [smem:[#allocation5_spill]] %s10575_s27  ;;  %s10685_s29 = sadd.s32 4294967295, %s10579_s28   ;;  %s10579_s28 = sphi %s10670_s28, %s15201_s28   ;;  %s10575_s27 = sphi %s10668_s27, %s15198_s27   ;;  %s10571_s26 = sphi %s10666_s26, %s15200_s26   ;;  %s10567_s25 = sphi %s10664_s25, %s15199_s25  }
   0x7   : > { %s8123_s30 = sadd.s32 4294967294, %s10579_s28   ;;  %s10689_s14 = sadd.s32 1, %s10579_s28  }
   0x8   : > { %s311_s15 = sadd.s32 1, %s10575_s27  ;;  %s308_s16 = ssub.s32 %s10579_s28, %s10689_s14 }
   0x9   : > { %p321_p0 = scmp.ne.s32.totalorder %s10575_s27, %s10571_s26  ;;  %p309_p1 = scmp.eq.s32.totalorder %s308_s16, 0 }
   0xa   : > { %p322_p2 = scmp.eq.s32.totalorder %s10685_s29, 1  ;;  %p327_p3 = scmp.ne.s32.totalorder %s10571_s26, %s10567_s25 }
   0xb   : > { %p328_p4 = scmp.eq.s32.totalorder %s8123_s30, 1  ;;  %p8126_p7 = scmp.ge.s32.totalorder %s10579_s28, 1 }
   0xc   : > { %s10700_s17 = scalar_select %p309_p1, %s10575_s27, %s311_s15  }
   0xd   : > { %p10702_p5 = por %p322_p2, %p321_p0  ;;  %p10706_p6 = por %p328_p4, %p327_p3 }
   0xe   : > { %15008 = sst [smem:[#allocation6_spill]] %s10700_s17  ;;  %p390_p8 = scmp.lt.s32.totalorder %s10579_s28, 3 }
  0x10   : > { %p391_p9 = pnand %p8126_p7, %p390_p8 }
  0x12   : > { %394 = sbr.rel (%p391_p9) target bundleno = 2353 (0x931), region = 72 }
  0x17   : > { %p434_p10 = scmp.lt.s32.totalorder %s10685_s29, 1  ;;  %v14941_v0 = vmov 0.0   ;;  %s15011_s0 = sld [smem:[#allocation62_spill]]  ;;  %vm504_vm0 = vcmask 1040384   ;;  %vm663_vm1 = vcmask 1046528   ;;  %vm741_vm2 = vcmask 1045504  }
  0x18   : > { %6331 = vst [vmem:[#allocation1] ss:$2 sm:$0xff] %v14941_v0  ;;  %v10725_v8 = vrot.slane %v14941_v0, 1  ;;  %s14925_s30 = smov 9   ;;  %s14938_s15 = smov 18   ;;  %v10756_v27 = vrot.slane %v14941_v0, 2 }
  0x19   : > { %s435_s20 = scalar_select %p434_p10, %s10685_s29, 1  ;;  %vm1930_vm3 = vcmask 1044480   ;;  %vm1584_vm4 = vcmask 23552   ;;  %vm1616_vm5 = vcmask 48128   ;;  %vm1648_vm6 = vcmask 72704  }
  0x1a   : > { %s14927_s16 = smov 3   ;;  %15012 = vst [vmem:[#allocation7_spill] sm:$0xff] %v10756_v27  ;;  %s14931_s22 = smov 6   ;;  %vm1681_vm7 = vcmask 97280   ;;  %vm1714_vm8 = vcmask 121856   ;;  %vm1747_vm9 = vcmask 146432  }
  0x1b   : > { %s9235_s21 = sshll.u32 %s435_s20, 8  ;;  %s14935_s20 = smov 12   ;;  %vm1780_vm10 = vcmask 171008   ;;  %vm1813_vm11 = vcmask 195584   ;;  %vm1881_vm12 = vcmask 220160   ;;  %vm2765_vm13 = vcmask 523264  }
  0x1c   : > { %s14933_s23 = smov 24   ;;  %s15018_s1 = sld [smem:[#allocation63_spill]]  ;;  %vm11913_vm14 = vmneg %vm2765_vm13 }
  0x1d   : > { %s10718_s24 = scalar_lea.vmem %s15011_s0, %s9235_s21  ;;  %s14923_s21 = smov 15   ;;  %vm8300_vm15 = vmpackc.low %vm11913_vm14, %vm11913_vm14 }
  0x1e   : > { %v440_v1 = vld [vmem:[%s10718_s24] sm:$0xff]  ;;  %v441_v2 = vld [vmem:[%s10718_s24 + $0x8] sm:$0xff]  ;;  %v442_v3 = vld [vmem:[%s10718_s24 + $0x10] sm:$0xff]  ;;  %s15019_s17 = smov 24   ;;  %s14939_s0 = smov 64  }
  0x1f   : > { %v505_v4 = vrot.slane %v440_v1, 7  ;;  %v506_v5 = vrot.slane %v441_v2, 7  ;;  %v443_v6 = vld [vmem:[%s10718_s24 + $0x18] sm:$0xff]  ;;  %v508_v7 = vrot.slane %v442_v3, 7  ;;  %v444_v46 = vld [vmem:[%s10718_s24 + $0x20] sm:$0xff]  ;;  %v445_v47 = vld [vmem:[%s10718_s24 + $0x28] sm:$0xff] }
  0x20   : > { %v509_v9 = vrot.slane %v443_v6, 7  ;;  %v511_v48 = vrot.slane %v444_v46, 7  ;;  %v512_v49 = vrot.slane %v445_v47, 7  ;;  %v446_v1 = vld [vmem:[%s10718_s24 + $0x30] sm:$0xff]  ;;  %v447_v2 = vld [vmem:[%s10718_s24 + $0x38] sm:$0xff]  ;;  %s9490_s27 = sshll.u32 %s10685_s29, 4 }
  0x21   : > { %v10728_v10 = vsel %vm504_vm0, %v505_v4, %v506_v5  ;;  %v10731_v11 = vsel %vm504_vm0, 0.0, %v505_v4  ;;  %v616_v12 = vsel %vm504_vm0, %v506_v5, 0.0  ;;  %v10735_v13 = vsel %vm504_vm0, 0.0, %v508_v7 }
  0x22   : > { %v9543_v14 = vpack.i.bf16 %v10728_v10, %v10731_v11  ;;  %v666_v15 = vrot.slane %v10731_v11, 1  ;;  %v667_v16 = vrot.slane %v10728_v10, 1  ;;  %v669_v17 = vrot.slane %v616_v12, 1 }
  0x23   : > { %v10742_v18 = vsel %vm504_vm0, %v508_v7, %v509_v9  ;;  %v747_v19 = vrot.slane %v616_v12, 2  ;;  %v744_v22 = vrot.slane %v10731_v11, 2  ;;  %v745_v23 = vrot.slane %v10728_v10, 2 }
  0x24   : > { %9544 = vrot.lane.b32.xlu1 %v9543_v14, %s14925_s30  ;;  %v668_v20 = vsel %vm663_vm1, %v666_v15, %v667_v16  ;;  %v9548_v21 = vpack.i.bf16 %v10742_v18, %v10735_v13  ;;  %v670_v24 = vsel %vm663_vm1, %v667_v16, %v669_v17  ;;  %v617_v26 = vsel %vm504_vm0, %v509_v9, 0.0 }
  0x25   : > { %v9553_v25 = vpack.i.bf16 %v668_v20, %v10725_v8  ;;  %v748_v28 = vsel %vm741_vm2, %v745_v23, %v747_v19  ;;  %v9563_v29 = vpack.i.bf16 %v670_v24, %v668_v20  ;;  %v746_v30 = vsel %vm741_vm2, %v744_v22, %v745_v23 }
  0x26   : > { %9549 = vrot.lane.b32.xlu2 %v9548_v21, %s14938_s15  ;;  %v749_v31 = vrot.slane %v10735_v13, 2  ;;  %v750_v32 = vrot.slane %v10742_v18, 2  ;;  %v752_v33 = vrot.slane %v617_v26, 2  ;;  %v9568_v34 = vpack.i.bf16 %v748_v28, %v746_v30 }
  0x27   : > { %9554 = vrot.lane.b32.xlu0 %v9553_v25, %s14927_s16  ;;  %v9558_v35 = vpack.i.bf16 %v746_v30, %v10756_v27  ;;  %v671_v36 = vrot.slane %v10735_v13, 1  ;;  %v672_v37 = vrot.slane %v10742_v18, 1  ;;  %v674_v38 = vrot.slane %v617_v26, 1 }
  0x28   : > { %v751_v39 = vsel %vm741_vm2, %v749_v31, %v750_v32  ;;  %v753_v40 = vsel %vm741_vm2, %v750_v32, %v752_v33  ;;  %v618_v50 = vsel %vm504_vm0, %v512_v49, 0.0  ;;  %v10779_v51 = vsel %vm504_vm0, %v511_v48, %v512_v49  ;;  %v448_v32 = vld [vmem:[%s10718_s24 + $0x40] sm:$0xff]  ;;  %v449_v33 = vld [vmem:[%s10718_s24 + $0x48] sm:$0xff] }
  0x29   : > { %v9578_v41 = vpack.i.bf16 %v753_v40, %v751_v39  ;;  %v673_v42 = vsel %vm663_vm1, %v671_v36, %v672_v37  ;;  %v675_v43 = vsel %vm663_vm1, %v672_v37, %v674_v38  ;;  %v10782_v52 = vsel %vm504_vm0, 0.0, %v511_v48 }
  0x2a   : > { %v9583_v44 = vpack.i.bf16 %v673_v42, %v670_v24  ;;  %v9573_v45 = vpack.i.bf16 %v675_v43, %v673_v42  ;;  %v9588_v53 = vpack.i.bf16 %v751_v39, %v748_v28  ;;  %v676_v54 = vrot.slane %v10782_v52, 1 }
  0x2b   : > { %v677_v55 = vrot.slane %v10779_v51, 1  ;;  %v679_v56 = vrot.slane %v618_v50, 1  ;;  %v9608_v59 = vpack.i.bf16 %v10779_v51, %v10782_v52  ;;  %v754_v61 = vrot.slane %v10782_v52, 2 }
  0x2c   : > { %9564 = vrot.lane.b32.xlu1 %v9563_v29, %s14935_s20  ;;  %v755_v62 = vrot.slane %v10779_v51, 2  ;;  %v757_v63 = vrot.slane %v618_v50, 2  ;;  %v514_v7 = vrot.slane %v446_v1, 7  ;;  %v515_v9 = vrot.slane %v447_v2, 7 }
  0x2d   : > { %v678_v57 = vsel %vm663_vm1, %v676_v54, %v677_v55  ;;  %v680_v58 = vsel %vm663_vm1, %v677_v55, %v679_v56  ;;  %v518_v36 = vrot.slane %v449_v33, 7 }
  0x2e   : > { %9569 = vrot.lane.b32.xlu2 %v9568_v34, %s14923_s21  ;;  %s14929_s21 = smov 21   ;;  %v9613_v60 = vpack.i.bf16 %v680_v58, %v678_v57  ;;  %v9623_v3 = vpack.i.bf16 %v678_v57, %v675_v43  ;;  %v756_v4 = vsel %vm741_vm2, %v754_v61, %v755_v62  ;;  %v758_v5 = vsel %vm741_vm2, %v755_v62, %v757_v63  ;;  %v450_v57 = vld [vmem:[%s10718_s24 + $0x50] sm:$0xff] }
  0x2f   : > { %9559 = vrot.lane.b32.xlu0 %v9558_v35, %s14931_s22  ;;  %v9628_v6 = vpack.i.bf16 %v756_v4, %v753_v40  ;;  %v9618_v12 = vpack.i.bf16 %v758_v5, %v756_v4  ;;  %v10805_v14 = vsel %vm504_vm0, %v514_v7, %v515_v9  ;;  %v10808_v15 = vsel %vm504_vm0, 0.0, %v514_v7 }
  0x30   : > { %v619_v16 = vsel %vm504_vm0, %v515_v9, 0.0  ;;  %v681_v17 = vrot.slane %v10808_v15, 1  ;;  %v682_v19 = vrot.slane %v10805_v14, 1  ;;  %v760_v22 = vrot.slane %v10805_v14, 2 }
  0x31   : > { %v684_v20 = vrot.slane %v619_v16, 1  ;;  %v762_v23 = vrot.slane %v619_v16, 2  ;;  %v9648_v31 = vpack.i.bf16 %v10805_v14, %v10808_v15  ;;  %v517_v35 = vrot.slane %v448_v32, 7 }
  0x32   : > { %v683_v24 = vsel %vm663_vm1, %v681_v17, %v682_v19  ;;  %v620_v40 = vsel %vm504_vm0, %v518_v36, 0.0 }
  0x33   : > { %v685_v25 = vsel %vm663_vm1, %v682_v19, %v684_v20  ;;  %v763_v28 = vsel %vm741_vm2, %v760_v22, %v762_v23  ;;  %v9663_v37 = vpack.i.bf16 %v683_v24, %v680_v58  ;;  %v10833_v38 = vsel %vm504_vm0, %v517_v35, %v518_v36  ;;  %v451_v58 = vld [vmem:[%s10718_s24 + $0x58] sm:$0xff]  ;;  %v8136_v20 = vld [vmem:[%s15018_s1 + $0x8] sm:$0xf] }
  0x34   : > { %9579 = vrot.lane.b32.xlu1 %v9578_v41, %s14933_s23  ;;  %v9653_v29 = vpack.i.bf16 %v685_v25, %v683_v24  ;;  %v10836_v39 = vsel %vm504_vm0, 0.0, %v517_v35  ;;  %v765_v42 = vrot.slane %v10833_v38, 2  ;;  %v767_v43 = vrot.slane %v620_v40, 2 }
  0x35   : > { %v687_v46 = vrot.slane %v10833_v38, 1  ;;  %v689_v47 = vrot.slane %v620_v40, 1  ;;  %v10590_v23 = vmov 65535   ;;  %v9236_v40 = vld [vmem:[%s15018_s1] sm:$0xff] }
  0x36   : > { %9584 = vrot.lane.b32.xlu2 %v9583_v44, %s14927_s16  ;;  %v9688_v44 = vpack.i.bf16 %v10833_v38, %v10836_v39  ;;  %v768_v49 = vsel %vm741_vm2, %v765_v42, %v767_v43  ;;  %v1931_v24 = vsel %vm1930_vm3, 4294967295, %v10590_v23 }
  0x37   : > { %9574 = vrot.lane.b32.xlu0 %v9573_v45, %s14929_s21  ;;  %v690_v54 = vsel %vm663_vm1, %v687_v46, %v689_v47 }
  0x3c   : > { %9594 = vrot.lane.b32.xlu1 %v9548_v21, %s14925_s30  ;;  %s15013_s30 = smov 15   ;;  %v759_v21 = vrot.slane %v10808_v15, 2 }
  0x3e   : > { %9599 = vrot.lane.b32.xlu2 %v9573_v45, %s14935_s20  ;;  %v761_v26 = vsel %vm741_vm2, %v759_v21, %v760_v22  ;;  %v686_v45 = vrot.slane %v10836_v39, 1  ;;  %v9237_v21 = vld [vmem:[%s15018_s1 + $0x8] sm:$0x30]  ;;  %s431_s1 = sand.u32 1, %s10571_s26  }
  0x3f   : > { %9589 = vrot.lane.b32.xlu0 %v9588_v53, %s14931_s22  ;;  %v9658_v30 = vpack.i.bf16 %v763_v28, %v761_v26  ;;  %v9668_v34 = vpack.i.bf16 %v761_v26, %v758_v5  ;;  %v8137_v22 = vor.u32 %v9237_v21, %v8136_v20  ;;  %v452_v26 = vld [vmem:[%s10718_s24 + $0x60] sm:$0xff]  ;;  %s8046_s29 = scalar_lea.sflag [#allocation3], %s431_s1 }
  0x40   : > { %v688_v53 = vsel %vm663_vm1, %v686_v45, %v687_v46 }
  0x41   : > { %v9703_v55 = vpack.i.bf16 %v688_v53, %v685_v25  ;;  %v9693_v56 = vpack.i.bf16 %v690_v54, %v688_v53  ;;  %v1932_v25 = vsel %vm741_vm2, %v1931_v24, 0 }
  0x44   : > { %9609 = vrot.lane.b32.xlu1 %v9608_v59, %s14938_s15 }
  0x46   : > { %9614 = vrot.lane.b32.xlu2 %v9613_v60, %s14929_s21 }
  0x47   : > { %9604 = vrot.lane.b32.xlu0 %v9578_v41, %s15013_s30  ;;  %v764_v41 = vrot.slane %v10836_v39, 2 }
  0x49   : > { %v766_v48 = vsel %vm741_vm2, %v764_v41, %v765_v42 }
  0x4a   : > { %v9698_v50 = vpack.i.bf16 %v768_v49, %v766_v48  ;;  %v9708_v62 = vpack.i.bf16 %v766_v48, %v763_v28  ;;  %v453_v28 = vld [vmem:[%s10718_s24 + $0x68] sm:$0xff] }
  0x4b   : > { %v524_v35 = vrot.slane %v453_v28, 7 }
  0x4c   : > { %9624 = vrot.lane.b32.xlu1 %v9623_v3, %s14927_s16  ;;  %s15014_s16 = smov 9  }
  0x4d   : > { %v622_v43 = vsel %vm504_vm0, %v524_v35, 0.0 }
  0x4e   : > { %9629 = vrot.lane.b32.xlu2 %v9628_v6, %s14931_s22  ;;  %v699_v47 = vrot.slane %v622_v43, 1  ;;  %v777_v48 = vrot.slane %v622_v43, 2 }
  0x4f   : > { %9619 = vrot.lane.b32.xlu0 %v9618_v12, %s14933_s23 }
  0x54   : > { %9639 = vrot.lane.b32.xlu1 %v9613_v60, %s14935_s20  ;;  %v521_v60 = vrot.slane %v451_v58, 7 }
  0x56   : > { %9644 = vrot.lane.b32.xlu2 %v9618_v12, %s15013_s30  ;;  %v621_v61 = vsel %vm504_vm0, %v521_v60, 0.0 }
  0x57   : > { %9634 = vrot.lane.b32.xlu0 %v9608_v59, %s15014_s16  ;;  %v520_v59 = vrot.slane %v450_v57, 7  ;;  %v694_v63 = vrot.slane %v621_v61, 1  ;;  %v772_v19 = vrot.slane %v621_v61, 2 }
  0x59   : > { %v10861_v1 = vsel %vm504_vm0, %v520_v59, %v521_v60  ;;  %v10864_v2 = vsel %vm504_vm0, 0.0, %v520_v59 }
  0x5a   : > { %v691_v3 = vrot.slane %v10864_v2, 1  ;;  %v692_v4 = vrot.slane %v10861_v1, 1  ;;  %v9728_v6 = vpack.i.bf16 %v10861_v1, %v10864_v2  ;;  %v769_v16 = vrot.slane %v10864_v2, 2 }
  0x5b   : > { %v770_v17 = vrot.slane %v10861_v1, 2 }
  0x5c   : > { %9654 = vrot.lane.b32.xlu1 %v9653_v29, %s14929_s21  ;;  %s15015_s21 = smov 3   ;;  %v10871_v5 = vsel %vm663_vm1, %v692_v4, %v694_v63  ;;  %v693_v9 = vsel %vm663_vm1, %v691_v3, %v692_v4  ;;  %v454_v3 = vld [vmem:[%s10718_s24 + $0x70] sm:$0xff]  ;;  %v455_v4 = vld [vmem:[%s10718_s24 + $0x78] sm:$0xff] }
  0x5d   : > { %v9733_v12 = vpack.i.bf16 %v10871_v5, %v693_v9  ;;  %v771_v32 = vsel %vm741_vm2, %v769_v16, %v770_v17  ;;  %v773_v33 = vsel %vm741_vm2, %v770_v17, %v772_v19  ;;  %v526_v17 = vrot.slane %v454_v3, 7 }
  0x5e   : > { %9659 = vrot.lane.b32.xlu2 %v9658_v30, %s14933_s23  ;;  %v9748_v36 = vpack.i.bf16 %v771_v32, %v768_v49  ;;  %v527_v19 = vrot.slane %v455_v4, 7 }
  0x5f   : > { %9649 = vrot.lane.b32.xlu0 %v9648_v31, %s14938_s15 }
  0x64   : > { %9669 = vrot.lane.b32.xlu1 %v9668_v34, %s14931_s22  ;;  %s15016_s22 = smov 21   ;;  %v523_v34 = vrot.slane %v452_v26, 7 }
  0x66   : > { %9674 = vrot.lane.b32.xlu2 %v9648_v31, %s15014_s16  ;;  %v10903_v41 = vsel %vm504_vm0, %v523_v34, %v524_v35  ;;  %v10906_v42 = vsel %vm504_vm0, 0.0, %v523_v34  ;;  %v10960_v35 = vsel %vm504_vm0, 0.0, %v526_v17 }
  0x67   : > { %9664 = vrot.lane.b32.xlu0 %v9663_v37, %s15015_s21  ;;  %v9738_v37 = vpack.i.bf16 %v773_v33, %v771_v32  ;;  %v696_v45 = vrot.slane %v10906_v42, 1  ;;  %v697_v46 = vrot.slane %v10903_v41, 1  ;;  %v774_v53 = vrot.slane %v10906_v42, 2 }
  0x69   : > { %v698_v49 = vsel %vm663_vm1, %v696_v45, %v697_v46 }
  0x6a   : > { %v9783_v26 = vpack.i.bf16 %v698_v49, %v10871_v5 }
  0x6c   : > { %9684 = vrot.lane.b32.xlu1 %v9658_v30, %s15013_s30  ;;  %v9743_v30 = vpack.i.bf16 %v693_v9, %v690_v54  ;;  %v775_v54 = vrot.slane %v10903_v41, 2 }
  0x6e   : > { %9689 = vrot.lane.b32.xlu2 %v9688_v44, %s14938_s15  ;;  %v776_v60 = vsel %vm741_vm2, %v774_v53, %v775_v54 }
  0x6f   : > { %9679 = vrot.lane.b32.xlu0 %v9653_v29, %s14935_s20  ;;  %v1934_v29 = vand.u32 %v8137_v22, %v1932_v25  ;;  %v9788_v9 = vpack.i.bf16 %v776_v60, %v773_v33 }
  0x71   : > { %1942 = vmatpush.bf16.msra.mxu0 %v1934_v29 }
  0x74   : > { %9699 = vrot.lane.b32.xlu1 %v9698_v50, %s14933_s23  ;;  %s15017_s23 = smov 6  }
  0x75   : > { %1943 = vmatpush.bf16.msra.mxu0 %v9236_v40  ;;  %v10965_v40 = vsel %vm504_vm0, %v526_v17, %v527_v19 }
  0x76   : > { %9704 = vrot.lane.b32.xlu2 %v9703_v55, %s15015_s21 }
  0x77   : > { %9694 = vrot.lane.b32.xlu0 %v9693_v56, %s15016_s22 }
  0x7c   : > { %9714 = vrot.lane.b32.xlu1 %v9688_v44, %s15014_s16 }
  0x7e   : > { %9719 = vrot.lane.b32.xlu2 %v9693_v56, %s14935_s20  ;;  %s15020_s20 = smov 12   ;;  %v10925_v56 = vsel %vm741_vm2, %v775_v54, %v777_v48  ;;  %v779_v48 = vrot.slane %v10960_v35, 2 }
  0x7f   : > { %9709 = vrot.lane.b32.xlu0 %v9708_v62, %s15017_s23  ;;  %v9778_v61 = vpack.i.bf16 %v10925_v56, %v776_v60  ;;  %v9768_v62 = vpack.i.bf16 %v10903_v41, %v10906_v42 }
  0x80   : > { %v10875_v7 = vpop.permute.xlu2 %9549 }
  0x81   : > { %v9552_v28 = vunpack.i.h.bf16 %v10875_v7  ;;  %v9551_v43 = vunpack.i.l.bf16 %v10875_v7 }
  0x84   : > { %9729 = vrot.lane.b32.xlu1 %v9728_v6, %s14938_s15 }
  0x86   : > { %9734 = vrot.lane.b32.xlu2 %v9733_v12, %s15016_s22 }
  0x87   : > { %9724 = vrot.lane.b32.xlu0 %v9698_v50, %s15013_s30  ;;  %v10918_v50 = vsel %vm663_vm1, %v697_v46, %v699_v47 }
  0x88   : > { %v10894_v31 = vpop.permute.xlu2 %9569  ;;  %v10928_v57 = vpack.i.bf16 %v10918_v50, %v698_v49 }
  0x89   : > { %v9572_v29 = vunpack.i.h.bf16 %v10894_v31 }
  0x8c   : > { %9744 = vrot.lane.b32.xlu1 %v9743_v30, %s15015_s21  ;;  %v9571_v30 = vunpack.i.l.bf16 %v10894_v31  ;;  %v623_v31 = vsel %vm504_vm0, %v527_v19, 0.0  ;;  %v702_v19 = vrot.slane %v10965_v40, 1 }
  0x8d   : > { %v782_v60 = vrot.slane %v623_v31, 2 }
  0x8e   : > { %9749 = vrot.lane.b32.xlu2 %v9748_v36, %s15017_s23 }
  0x8f   : > { %9739 = vrot.lane.b32.xlu0 %v9738_v37, %s15019_s17 }
  0x90   : > { %v10911_v44 = vpop.permute.xlu2 %9584 }
  0x94   : > { %9759 = vrot.lane.b32.xlu1 %v9733_v12, %s15020_s20 }
  0x96   : > { %v9545_v55 = vpop.permute.xlu1 %9544  ;;  %9764 = vrot.lane.b32.xlu2 %v9738_v37, %s15013_s30 }
  0x97   : > { %9754 = vrot.lane.b32.xlu0 %v9728_v6, %s15014_s16  ;;  %v9547_v23 = vunpack.i.h.bf16 %v9545_v55  ;;  %v9546_v24 = vunpack.i.l.bf16 %v9545_v55  ;;  %v780_v55 = vrot.slane %v10965_v40, 2 }
  0x98   : > { %v10930_v58 = vpop.permute.xlu2 %9599 }
  0x99   : > { %v10932_v59 = vpop.permute.xlu0 %9554 }
  0x9a   : > { %v9556_v6 = vunpack.i.l.bf16 %v10932_v59 }
  0x9c   : > { %9774 = vrot.lane.b32.xlu1 %v10928_v57, %s15016_s22  ;;  %v1585_v25 = vsel %vm1584_vm4, 0.0, %v9556_v6  ;;  %v701_v6 = vrot.slane %v10960_v35, 1 }
  0x9e   : > { %v9565_v63 = vpop.permute.xlu1 %9564  ;;  %9779 = vrot.lane.b32.xlu2 %v9778_v61, %s15019_s17 }
  0x9f   : > { %9769 = vrot.lane.b32.xlu0 %v9768_v62, %s14938_s15  ;;  %v9567_v20 = vunpack.i.h.bf16 %v9565_v63  ;;  %v9566_v21 = vunpack.i.l.bf16 %v9565_v63  ;;  %v9808_v63 = vpack.i.bf16 %v10965_v40, %v10960_v35 }
  0xa0   : > { %v10945_v12 = vpop.permute.xlu2 %9614 }
  0xa1   : > { %v10947_v16 = vpop.permute.xlu0 %9559 }
  0xa2   : > { %v9561_v22 = vunpack.i.l.bf16 %v10947_v16 }
  0xa4   : > { %v1617_v32 = vsel %vm1616_vm5, %v1585_v25, %v9561_v22  ;;  %9789 = vrot.lane.b32.xlu1 %v9788_v9, %s15017_s23 }
  0xa5   : > { %v1649_v33 = vsel %vm1648_vm6, %v1617_v32, %v9546_v24  ;;  %v1650_v34 = vsel %vm1648_vm6, %v1617_v32, %v9547_v23  ;;  %v781_v23 = vsel %vm741_vm2, %v779_v48, %v780_v55  ;;  %v10990_v24 = vsel %vm741_vm2, %v780_v55, %v782_v60 }
  0xa6   : > { %v1682_v5 = vsel %vm1681_vm7, %v1649_v33, %v9566_v21  ;;  %v1683_v36 = vsel %vm1681_vm7, %v1650_v34, %v9567_v20  ;;  %v9580_v37 = vpop.permute.xlu1 %9579  ;;  %9794 = vrot.lane.b32.xlu2 %v9768_v62, %s15014_s16  ;;  %v704_v20 = vrot.slane %v623_v31, 1  ;;  %v9586_v32 = vunpack.i.l.bf16 %v10911_v44  ;;  %v456_v31 = vld [vmem:[%s10718_s24 + $0x80] sm:$0xff] }
  0xa7   : > { %9784 = vrot.lane.b32.xlu0 %v9783_v26, %s15015_s21  ;;  %v1715_v46 = vsel %vm1714_vm8, %v1682_v5, %v9571_v30  ;;  %v1716_v47 = vsel %vm1714_vm8, %v1683_v36, %v9572_v29  ;;  %v9582_v49 = vunpack.i.h.bf16 %v9580_v37  ;;  %v9581_v53 = vunpack.i.l.bf16 %v9580_v37 }
  0xa8   : > { %v10971_v45 = vpop.permute.xlu2 %9629  ;;  %v1748_v3 = vsel %vm1747_vm9, %v1715_v46, %v9551_v43  ;;  %v1749_v4 = vsel %vm1747_vm9, %v1716_v47, %v9552_v28  ;;  %v703_v29 = vsel %vm663_vm1, %v701_v6, %v702_v19  ;;  %v11003_v30 = vsel %vm663_vm1, %v702_v19, %v704_v20  ;;  %v457_v43 = vld [vmem:[%s10718_s24 + $0x88] sm:$0xff] }
  0xa9   : > { %v9575_v54 = vpop.permute.xlu0 %9574  ;;  %v9557_v5 = vunpack.i.h.bf16 %v10932_v59  ;;  %v9813_v36 = vpack.i.bf16 %v11003_v30, %v703_v29  ;;  %v9562_v37 = vunpack.i.h.bf16 %v10947_v16  ;;  %v1587_v46 = vsel %vm1584_vm4, %v10728_v10, %v9586_v32 }
  0xaa   : > { %v9577_v7 = vunpack.i.h.bf16 %v9575_v54  ;;  %v9576_v62 = vunpack.i.l.bf16 %v9575_v54  ;;  %v529_v59 = vrot.slane %v456_v31, 7  ;;  %v530_v16 = vrot.slane %v457_v43, 7 }
  0xab   : > { %v9602_v54 = vunpack.i.h.bf16 %v10930_v58  ;;  %v9601_v55 = vunpack.i.l.bf16 %v10930_v58 }
  0xac   : > { %9804 = vrot.lane.b32.xlu1 %v9778_v61, %s15013_s30  ;;  %v1781_v9 = vsel %vm1780_vm10, %v1748_v3, %v9576_v62  ;;  %v1782_v17 = vsel %vm1780_vm10, %v1749_v4, %v9577_v7  ;;  %v10997_v61 = vpack.i.bf16 %v10990_v24, %v781_v23  ;;  %v11037_v58 = vsel %vm504_vm0, 0.0, %v529_v59 }
  0xad   : > { %v1814_v21 = vsel %vm1813_vm11, %v1781_v9, %v9581_v53  ;;  %v1815_v22 = vsel %vm1813_vm11, %v1782_v17, %v9582_v49  ;;  %v9828_v9 = vpack.i.bf16 %v781_v23, %v10925_v56  ;;  %v11034_v17 = vsel %vm504_vm0, %v529_v59, %v530_v16 }
  0xae   : > { %v9595_v25 = vpop.permute.xlu1 %9594  ;;  %v1846_v26 = vpack.c.bf16 %v1815_v22, %v1814_v21  ;;  %9809 = vrot.lane.b32.xlu2 %v9808_v63, %s14938_s15  ;;  %v706_v56 = vrot.slane %v11037_v58, 1  ;;  %v707_v23 = vrot.slane %v11034_v17, 1 }
  0xaf   : > { %9799 = vrot.lane.b32.xlu0 %v10928_v57, %s15020_s20  ;;  %v9823_v57 = vpack.i.bf16 %v703_v29, %v10918_v50  ;;  %v9597_v47 = vunpack.i.h.bf16 %v9595_v25  ;;  %v9596_v48 = vunpack.i.l.bf16 %v9595_v25  ;;  %v1586_v50 = vsel %vm1584_vm4, %v10731_v11, %v9557_v5 }
  0xb0   : > { %8138 = vmatmul.msk.bf16.vlgmr.msra.gmra.mxu0 %vm1881_vm12, %v1846_v26  ;;  %v10999_v28 = vpop.permute.xlu2 %9644  ;;  %v1618_v10 = vsel %vm1616_vm5, %v1586_v50, %v9562_v37  ;;  %v624_v11 = vsel %vm504_vm0, %v530_v16, 0.0  ;;  %v11057_v5 = vpack.i.bf16 %v11034_v17, %v11037_v58  ;;  %v784_v50 = vrot.slane %v11037_v58, 2 }
  0xb1   : > { %v11006_v33 = vpop.permute.xlu0 %9589  ;;  %v1651_v7 = vsel %vm1648_vm6, %v1618_v10, %v9596_v48  ;;  %v709_v19 = vrot.slane %v624_v11, 1 }
  0xb2   : > { %v9591_v34 = vunpack.i.l.bf16 %v11006_v33  ;;  %v1684_v22 = vsel %vm1681_vm7, %v1651_v7, %v9601_v55  ;;  %v787_v55 = vrot.slane %v624_v11, 2 }
  0xb4   : > { %9819 = vrot.lane.b32.xlu1 %v10997_v61, %s15019_s17  ;;  %v1619_v49 = vsel %vm1616_vm5, %v1587_v46, %v9591_v34  ;;  %v9617_v34 = vunpack.i.h.bf16 %v10945_v12  ;;  %v708_v46 = vsel %vm663_vm1, %v706_v56, %v707_v23 }
  0xb5   : > { %v1652_v62 = vsel %vm1648_vm6, %v1619_v49, %v9597_v47  ;;  %v9863_v11 = vpack.i.bf16 %v708_v46, %v11003_v30 }
  0xb6   : > { %v9610_v53 = vpop.permute.xlu1 %9609  ;;  %9824 = vrot.lane.b32.xlu2 %v9823_v57, %s15015_s21  ;;  %v1685_v25 = vsel %vm1681_vm7, %v1652_v62, %v9602_v54  ;;  %v9616_v57 = vunpack.i.l.bf16 %v10945_v12  ;;  %v785_v54 = vrot.slane %v11034_v17, 2  ;;  %v458_v62 = vld [vmem:[%s10718_s24 + $0x90] sm:$0xff] }
  0xb7   : > { %9814 = vrot.lane.b32.xlu0 %v9813_v36, %s15016_s22  ;;  %v9612_v20 = vunpack.i.h.bf16 %v9610_v53  ;;  %v9611_v21 = vunpack.i.l.bf16 %v9610_v53 }
  0xb8   : > { %v11027_v60 = vpop.permute.xlu2 %9659 }
  0xb9   : > { %v9605_v3 = vpop.permute.xlu0 %9604 }
  0xba   : > { %v9607_v4 = vunpack.i.h.bf16 %v9605_v3  ;;  %v9606_v6 = vunpack.i.l.bf16 %v9605_v3  ;;  %v9587_v3 = vunpack.i.h.bf16 %v10911_v44  ;;  %v11089_v44 = vsel %vm741_vm2, %v785_v54, %v787_v55 }
  0xbc   : > { %9834 = vrot.lane.b32.xlu1 %v9808_v63, %s15014_s16  ;;  %v1717_v26 = vsel %vm1714_vm8, %v1684_v22, %v9606_v6  ;;  %v1718_v29 = vsel %vm1714_vm8, %v1685_v25, %v9607_v4  ;;  %v11053_v63 = vsel %vm663_vm1, %v707_v23, %v709_v19  ;;  %v459_v6 = vld [vmem:[%s10718_s24 + $0x98] sm:$0xff]  ;;  %v9592_v19 = vunpack.i.h.bf16 %v11006_v33 }
  0xbd   : > { %v1750_v31 = vsel %vm1747_vm9, %v1717_v26, %v9611_v21  ;;  %v1751_v43 = vsel %vm1747_vm9, %v1718_v29, %v9612_v20  ;;  %v11065_v48 = vpack.i.bf16 %v11053_v63, %v708_v46  ;;  %v786_v20 = vsel %vm741_vm2, %v784_v50, %v785_v54 }
  0xbe   : > { %v11046_v32 = vpop.permute.xlu1 %9624  ;;  %9839 = vrot.lane.b32.xlu2 %v9813_v36, %s15020_s20  ;;  %v1783_v49 = vsel %vm1780_vm10, %v1750_v31, %v9616_v57  ;;  %v1784_v53 = vsel %vm1780_vm10, %v1751_v43, %v9617_v34  ;;  %v532_v22 = vrot.slane %v458_v62, 7  ;;  %v533_v33 = vrot.slane %v459_v6, 7 }
  0xbf   : > { %9829 = vrot.lane.b32.xlu0 %v9828_v9, %s15017_s23  ;;  %v9626_v10 = vunpack.i.l.bf16 %v11046_v32  ;;  %v9631_v9 = vunpack.i.l.bf16 %v10971_v45  ;;  %v9868_v30 = vpack.i.bf16 %v786_v20, %v10990_v24  ;;  %v9858_v34 = vpack.i.bf16 %v11089_v44, %v786_v20 }
  0xc0   : > { %v11059_v37 = vpop.permute.xlu2 %9674  ;;  %v11108_v46 = vsel %vm504_vm0, %v532_v22, %v533_v33  ;;  %v625_v24 = vsel %vm504_vm0, %v533_v33, 0.0 }
  0xc1   : > { %v9620_v36 = vpop.permute.xlu0 %9619  ;;  %v1589_v25 = vsel %vm1584_vm4, %v10742_v18, %v9626_v10  ;;  %v11103_v18 = vsel %vm504_vm0, 0.0, %v532_v22  ;;  %v714_v54 = vrot.slane %v625_v24, 1  ;;  %v9662_v10 = vunpack.i.h.bf16 %v11027_v60 }
  0xc2   : > { %v9622_v12 = vunpack.i.h.bf16 %v9620_v36  ;;  %v9621_v47 = vunpack.i.l.bf16 %v9620_v36  ;;  %v1621_v43 = vsel %vm1616_vm5, %v1589_v25, %v9631_v9 }
  0xc4   : > { %9849 = vrot.lane.b32.xlu1 %v11057_v5, %s14938_s15  ;;  %v1816_v59 = vsel %vm1813_vm11, %v1783_v49, %v9621_v47  ;;  %v1817_v16 = vsel %vm1813_vm11, %v1784_v53, %v9622_v12  ;;  %v9647_v47 = vunpack.i.h.bf16 %v10999_v28  ;;  %v9646_v49 = vunpack.i.l.bf16 %v10999_v28 }
  0xc5   : > { %v1847_v7 = vpack.c.bf16 %v1817_v16, %v1816_v59  ;;  %v711_v53 = vrot.slane %v11103_v18, 1  ;;  %v712_v16 = vrot.slane %v11108_v46, 1  ;;  %v9661_v28 = vunpack.i.l.bf16 %v11027_v60 }
  0xc6   : > { %v9640_v4 = vpop.permute.xlu1 %9639  ;;  %9854 = vrot.lane.b32.xlu2 %v11065_v48, %s15016_s22 }
  0xc7   : > { %9844 = vrot.lane.b32.xlu0 %v10997_v61, %s15013_s30  ;;  %8139 = vmatmul.msk.bf16.gmra.mxu0 %vm1881_vm12, %v1847_v7  ;;  %v1588_v61 = vsel %vm1584_vm4, %v10735_v13, %v9587_v3  ;;  %v9642_v57 = vunpack.i.h.bf16 %v9640_v4  ;;  %v9641_v31 = vunpack.i.l.bf16 %v9640_v4  ;;  %v713_v25 = vsel %vm663_vm1, %v711_v53, %v712_v16 }
  0xc8   : > { %v11091_v21 = vpop.permute.xlu2 %9689  ;;  %v1620_v23 = vsel %vm1616_vm5, %v1588_v61, %v9592_v19  ;;  %v789_v61 = vrot.slane %v11103_v18, 2  ;;  %v9632_v53 = vunpack.i.h.bf16 %v10971_v45 }
  0xc9   : > { %v9635_v26 = vpop.permute.xlu0 %9634 }
  0xca   : > { %v9637_v29 = vunpack.i.h.bf16 %v9635_v26  ;;  %v9636_v56 = vunpack.i.l.bf16 %v9635_v26  ;;  %v11131_v26 = vsel %vm663_vm1, %v712_v16, %v714_v54  ;;  %v460_v54 = vld [vmem:[%s10718_s24 + $0xa0] sm:$0xff] }
  0xcc   : > { %9864 = vrot.lane.b32.xlu1 %v9863_v11, %s15015_s21  ;;  %v1654_v36 = vsel %vm1648_vm6, %v1621_v43, %v9637_v29  ;;  %v1653_v13 = vsel %vm1648_vm6, %v1620_v23, %v9636_v56  ;;  %v792_v11 = vrot.slane %v625_v24, 2  ;;  %v790_v29 = vrot.slane %v11108_v46, 2 }
  0xcd   : > { %v1687_v50 = vsel %vm1681_vm7, %v1654_v36, %v9642_v57  ;;  %v1686_v59 = vsel %vm1681_vm7, %v1653_v13, %v9641_v31  ;;  %v11148_v31 = vpack.i.bf16 %v11131_v26, %v713_v25  ;;  %v9627_v13 = vunpack.i.h.bf16 %v11046_v32 }
  0xce   : > { %v9655_v12 = vpop.permute.xlu1 %9654  ;;  %9869 = vrot.lane.b32.xlu2 %v9868_v30, %s15017_s23  ;;  %v1719_v9 = vsel %vm1714_vm8, %v1686_v59, %v9646_v49  ;;  %v1720_v19 = vsel %vm1714_vm8, %v1687_v50, %v9647_v47  ;;  %v11145_v57 = vsel %vm741_vm2, %v790_v29, %v792_v11  ;;  %v9888_v47 = vpack.i.bf16 %v11108_v46, %v11103_v18 }
  0xcf   : > { %9859 = vrot.lane.b32.xlu0 %v9858_v34, %s15019_s17  ;;  %v9657_v7 = vunpack.i.h.bf16 %v9655_v12  ;;  %v9656_v62 = vunpack.i.l.bf16 %v9655_v12  ;;  %v9677_v50 = vunpack.i.h.bf16 %v11059_v37  ;;  %v1590_v32 = vsel %vm1584_vm4, %v10782_v52, %v9627_v13 }
  0xd0   : > { %v11119_v55 = vpop.permute.xlu2 %9704  ;;  %v1622_v45 = vsel %vm1616_vm5, %v1590_v32, %v9632_v53  ;;  %v9903_v11 = vpack.i.bf16 %v713_v25, %v11053_v63 }
  0xd1   : > { %v9650_v3 = vpop.permute.xlu0 %9649 }
  0xd2   : > { %v9652_v4 = vunpack.i.h.bf16 %v9650_v3  ;;  %v9651_v6 = vunpack.i.l.bf16 %v9650_v3 }
  0xd4   : > { %v1752_v20 = vsel %vm1747_vm9, %v1719_v9, %v9651_v6  ;;  %v1753_v22 = vsel %vm1747_vm9, %v1720_v19, %v9652_v4  ;;  %9879 = vrot.lane.b32.xlu1 %v11065_v48, %s15020_s20 }
  0xd5   : > { %v1785_v60 = vsel %vm1780_vm10, %v1752_v20, %v9656_v62  ;;  %v1786_v33 = vsel %vm1780_vm10, %v1753_v22, %v9657_v7 }
  0xd6   : > { %v11137_v56 = vpop.permute.xlu1 %9669  ;;  %v1818_v30 = vsel %vm1813_vm11, %v1785_v60, %v9661_v28  ;;  %v1819_v23 = vsel %vm1813_vm11, %v1786_v33, %v9662_v10  ;;  %9884 = vrot.lane.b32.xlu2 %v9858_v34, %s15013_s30  ;;  %v791_v34 = vsel %vm741_vm2, %v789_v61, %v790_v29  ;;  %v461_v10 = vld [vmem:[%s10718_s24 + $0xa8] sm:$0xff]  ;;  %v535_v28 = vrot.slane %v460_v54, 7 }
  0xd7   : > { %9874 = vrot.lane.b32.xlu0 %v11057_v5, %s15014_s16  ;;  %v1848_v48 = vpack.c.bf16 %v1819_v23, %v1818_v30  ;;  %v9671_v5 = vunpack.i.l.bf16 %v11137_v56  ;;  %v9898_v12 = vpack.i.bf16 %v11145_v57, %v791_v34  ;;  %v9908_v7 = vpack.i.bf16 %v791_v34, %v11089_v44 }
  0xd8   : > { %v11150_v43 = vpop.permute.xlu2 %9719  ;;  %v536_v4 = vrot.slane %v461_v10, 7  ;;  %v9692_v44 = vunpack.i.h.bf16 %v11091_v21  ;;  %v11191_v61 = vsel %vm504_vm0, 0.0, %v535_v28  ;;  %v9691_v30 = vunpack.i.l.bf16 %v11091_v21 }
  0xd9   : > { %v11152_v36 = vpop.permute.xlu0 %9664  ;;  %8140 = vmatmul.msk.bf16.gmra.mxu0 %vm1881_vm12, %v1848_v48  ;;  %v794_v48 = vrot.slane %v11191_v61, 2  ;;  %v716_v54 = vrot.slane %v11191_v61, 1 }
  0xda   : > { %v9666_v24 = vunpack.i.l.bf16 %v11152_v36  ;;  %v11188_v33 = vsel %vm504_vm0, %v535_v28, %v536_v4  ;;  %v626_v25 = vsel %vm504_vm0, %v536_v4, 0.0 }
  0xdb   : > { %v795_v34 = vrot.slane %v11188_v33, 2  ;;  %v9928_v21 = vpack.i.bf16 %v11188_v33, %v11191_v61 }
  0xdc   : > { %v1591_v49 = vsel %vm1584_vm4, %v10779_v51, %v9666_v24  ;;  %9894 = vrot.lane.b32.xlu1 %v11148_v31, %s15016_s22  ;;  %v9676_v51 = vunpack.i.l.bf16 %v11059_v37 }
  0xdd   : > { %v1623_v59 = vsel %vm1616_vm5, %v1591_v49, %v9671_v5  ;;  %v796_v28 = vsel %vm741_vm2, %v794_v48, %v795_v34  ;;  %v9722_v48 = vunpack.i.h.bf16 %v11150_v43 }
  0xde   : > { %v9685_v16 = vpop.permute.xlu1 %9684  ;;  %9899 = vrot.lane.b32.xlu2 %v9898_v12, %s15019_s17  ;;  %v1656_v52 = vsel %vm1648_vm6, %v1623_v59, %v9677_v50  ;;  %v1655_v20 = vsel %vm1648_vm6, %v1622_v45, %v9676_v51  ;;  %v797_v50 = vrot.slane %v626_v25, 2  ;;  %v9706_v59 = vunpack.i.l.bf16 %v11119_v55 }
  0xdf   : > { %9889 = vrot.lane.b32.xlu0 %v9888_v47, %s14938_s15  ;;  %v9687_v6 = vunpack.i.h.bf16 %v9685_v16  ;;  %v9686_v22 = vunpack.i.l.bf16 %v9685_v16  ;;  %v719_v45 = vrot.slane %v626_v25, 1 }
  0xe0   : > { %v11177_v62 = vpop.permute.xlu2 %9734  ;;  %v11217_v4 = vsel %vm741_vm2, %v795_v34, %v797_v50 }
  0xe1   : > { %v9680_v3 = vpop.permute.xlu0 %9679 }
  0xe2   : > { %v9682_v9 = vunpack.i.h.bf16 %v9680_v3  ;;  %v9681_v19 = vunpack.i.l.bf16 %v9680_v3 }
  0xe4   : > { %v1689_v37 = vsel %vm1681_vm7, %v1656_v52, %v9682_v9  ;;  %9909 = vrot.lane.b32.xlu1 %v9908_v7, %s15017_s23  ;;  %v1688_v60 = vsel %vm1681_vm7, %v1655_v20, %v9681_v19  ;;  %v717_v7 = vrot.slane %v11188_v33, 1  ;;  %v11225_v19 = vpack.i.bf16 %v11217_v4, %v796_v28 }
  0xe5   : > { %v1722_v29 = vsel %vm1714_vm8, %v1689_v37, %v9687_v6  ;;  %v1721_v23 = vsel %vm1714_vm8, %v1688_v60, %v9686_v22 }
  0xe6   : > { %v9700_v63 = vpop.permute.xlu1 %9699  ;;  %9914 = vrot.lane.b32.xlu2 %v9888_v47, %s15014_s16  ;;  %v1755_v53 = vsel %vm1747_vm9, %v1722_v29, %v9692_v44  ;;  %v1754_v16 = vsel %vm1747_vm9, %v1721_v23, %v9691_v30  ;;  %v11229_v20 = vsel %vm663_vm1, %v717_v7, %v719_v45  ;;  %v463_v23 = vld [vmem:[%s10718_s24 + $0xb8] sm:$0xff] }
  0xe7   : > { %9904 = vrot.lane.b32.xlu0 %v9903_v11, %s15015_s21  ;;  %v9702_v5 = vunpack.i.h.bf16 %v9700_v63  ;;  %v9701_v24 = vunpack.i.l.bf16 %v9700_v63  ;;  %v718_v11 = vsel %vm663_vm1, %v716_v54, %v717_v7 }
  0xe8   : > { %v11201_v13 = vpop.permute.xlu2 %9749  ;;  %v9943_v29 = vpack.i.bf16 %v718_v11, %v11131_v26  ;;  %v9933_v25 = vpack.i.bf16 %v11229_v20, %v718_v11 }
  0xe9   : > { %v9695_v49 = vpop.permute.xlu0 %9694 }
  0xea   : > { %v9697_v32 = vunpack.i.h.bf16 %v9695_v49  ;;  %v9696_v47 = vunpack.i.l.bf16 %v9695_v49  ;;  %v9721_v49 = vunpack.i.l.bf16 %v11150_v43 }
  0xec   : > { %9924 = vrot.lane.b32.xlu1 %v9898_v12, %s15013_s30  ;;  %v1787_v10 = vsel %vm1780_vm10, %v1754_v16, %v9696_v47  ;;  %v1788_v51 = vsel %vm1780_vm10, %v1755_v53, %v9697_v32  ;;  %v9667_v12 = vunpack.i.h.bf16 %v11152_v36  ;;  %v1593_v36 = vsel %vm1584_vm4, %v10805_v14, %v9706_v59  ;;  %v462_v14 = vld [vmem:[%s10718_s24 + $0xb0] sm:$0xff] }
  0xed   : > { %v1820_v3 = vsel %vm1813_vm11, %v1787_v10, %v9701_v24  ;;  %v1821_v52 = vsel %vm1813_vm11, %v1788_v51, %v9702_v5  ;;  %v539_v24 = vrot.slane %v463_v23, 7  ;;  %v9948_v51 = vpack.i.bf16 %v796_v28, %v11145_v57 }
  0xee   : > { %v9715_v6 = vpop.permute.xlu1 %9714  ;;  %v1849_v9 = vpack.c.bf16 %v1821_v52, %v1820_v3  ;;  %9929 = vrot.lane.b32.xlu2 %v9928_v21, %s14938_s15  ;;  %v1592_v63 = vsel %vm1584_vm4, %v10808_v15, %v9667_v12  ;;  %v538_v15 = vrot.slane %v462_v14, 7 }
  0xef   : > { %9919 = vrot.lane.b32.xlu0 %v11148_v31, %s15020_s20  ;;  %v9672_v31 = vunpack.i.h.bf16 %v11137_v56  ;;  %v9717_v44 = vunpack.i.h.bf16 %v9715_v6  ;;  %v9716_v56 = vunpack.i.l.bf16 %v9715_v6  ;;  %v627_v59 = vsel %vm504_vm0, %v539_v24, 0.0 }
  0xf0   : > { %8141 = vmatmul.msk.bf16.gmra.mxu0 %vm1881_vm12, %v1849_v9  ;;  %v11231_v22 = vpop.permute.xlu2 %9764  ;;  %v11261_v7 = vsel %vm504_vm0, %v538_v15, %v539_v24  ;;  %v724_v45 = vrot.slane %v627_v59, 1  ;;  %v11267_v6 = vsel %vm504_vm0, 0.0, %v538_v15  ;;  %v9737_v9 = vunpack.i.h.bf16 %v11177_v62 }
  0xf1   : > { %v11235_v37 = vpop.permute.xlu0 %9709  ;;  %v1624_v34 = vsel %vm1616_vm5, %v1592_v63, %v9672_v31  ;;  %v721_v57 = vrot.slane %v11267_v6, 1  ;;  %v722_v28 = vrot.slane %v11261_v7, 1  ;;  %v9736_v31 = vunpack.i.l.bf16 %v11177_v62 }
  0xf2   : > { %v9711_v60 = vunpack.i.l.bf16 %v11235_v37  ;;  %v1657_v50 = vsel %vm1648_vm6, %v1624_v34, %v9716_v56  ;;  %v799_v34 = vrot.slane %v11267_v6, 2  ;;  %v800_v15 = vrot.slane %v11261_v7, 2 }
  0xf3   : > { %v1690_v43 = vsel %vm1681_vm7, %v1657_v50, %v9721_v49  ;;  %v723_v62 = vsel %vm663_vm1, %v721_v57, %v722_v28  ;;  %v802_v24 = vrot.slane %v627_v59, 2  ;;  %v464_v49 = vld [vmem:[%s10718_s24 + $0xc0] sm:$0xff]  ;;  %v465_v50 = vld [vmem:[%s10718_s24 + $0xc8] sm:$0xff] }
  0xf4   : > { %v1625_v30 = vsel %vm1616_vm5, %v1593_v36, %v9711_v60  ;;  %9939 = vrot.lane.b32.xlu1 %v11225_v19, %s15019_s17  ;;  %v541_v59 = vrot.slane %v464_v49, 7 }
  0xf5   : > { %v1658_v5 = vsel %vm1648_vm6, %v1625_v30, %v9717_v44  ;;  %v11284_v44 = vpack.i.bf16 %v11261_v7, %v11267_v6 }
  0xf6   : > { %v9730_v26 = vpop.permute.xlu1 %9729  ;;  %9944 = vrot.lane.b32.xlu2 %v9943_v29, %s15015_s21  ;;  %v1691_v47 = vsel %vm1681_vm7, %v1658_v5, %v9722_v48 }
  0xf7   : > { %9934 = vrot.lane.b32.xlu0 %v9933_v25, %s15016_s22  ;;  %v9732_v16 = vunpack.i.h.bf16 %v9730_v26  ;;  %v9731_v3 = vunpack.i.l.bf16 %v9730_v26 }
  0xf8   : > { %v11254_v53 = vpop.permute.xlu2 %9779 }
  0xf9   : > { %v9725_v32 = vpop.permute.xlu0 %9724 }
  0xfa   : > { %v9727_v54 = vunpack.i.h.bf16 %v9725_v32  ;;  %v9726_v10 = vunpack.i.l.bf16 %v9725_v32  ;;  %v9707_v32 = vunpack.i.h.bf16 %v11119_v55  ;;  %v9983_v55 = vpack.i.bf16 %v723_v62, %v11229_v20 }
  0xfc   : > { %v1724_v52 = vsel %vm1714_vm8, %v1691_v47, %v9727_v54  ;;  %9954 = vrot.lane.b32.xlu1 %v9928_v21, %s15014_s16  ;;  %v1723_v12 = vsel %vm1714_vm8, %v1690_v43, %v9726_v10  ;;  %v11280_v21 = vsel %vm663_vm1, %v722_v28, %v724_v45  ;;  %v9751_v47 = vunpack.i.l.bf16 %v11201_v13 }
  0xfd   : > { %v1757_v36 = vsel %vm1747_vm9, %v1724_v52, %v9732_v16  ;;  %v1756_v60 = vsel %vm1747_vm9, %v1723_v12, %v9731_v3  ;;  %v11293_v48 = vpack.i.bf16 %v11280_v21, %v723_v62  ;;  %v9712_v45 = vunpack.i.h.bf16 %v11235_v37 }
  0xfe   : > { %v11273_v11 = vpop.permute.xlu1 %9744  ;;  %9959 = vrot.lane.b32.xlu2 %v9933_v25, %s15020_s20  ;;  %v1790_v25 = vsel %vm1780_vm10, %v1757_v36, %v9737_v9  ;;  %v1789_v56 = vsel %vm1780_vm10, %v1756_v60, %v9736_v31  ;;  %v801_v3 = vsel %vm741_vm2, %v799_v34, %v800_v15  ;;  %v11317_v43 = vsel %vm741_vm2, %v800_v15, %v802_v24 }
  0xff   : > { %9949 = vrot.lane.b32.xlu0 %v9948_v51, %s15017_s23  ;;  %v9746_v30 = vunpack.i.l.bf16 %v11273_v11  ;;  %v542_v51 = vrot.slane %v465_v50, 7  ;;  %v1594_v52 = vsel %vm1584_vm4, %v10836_v39, %v9707_v32  ;;  %v9988_v37 = vpack.i.bf16 %v801_v3, %v11217_v4 }
 0x100   : > { %v11287_v29 = vpop.permute.xlu2 %9794  ;;  %v9978_v20 = vpack.i.bf16 %v11317_v43, %v801_v3  ;;  %v1626_v31 = vsel %vm1616_vm5, %v1594_v52, %v9712_v45  ;;  %v11333_v39 = vsel %vm504_vm0, 0.0, %v541_v59  ;;  %v9781_v15 = vunpack.i.l.bf16 %v11254_v53 }
 0x101   : > { %v9740_v63 = vpop.permute.xlu0 %9739  ;;  %v1595_v54 = vsel %vm1584_vm4, %v10833_v38, %v9746_v30  ;;  %v11327_v36 = vsel %vm504_vm0, %v541_v59, %v542_v51 }
 0x102   : > { %v9742_v14 = vunpack.i.h.bf16 %v9740_v63  ;;  %v9741_v23 = vunpack.i.l.bf16 %v9740_v63 }
 0x104   : > { %9969 = vrot.lane.b32.xlu1 %v11284_v44, %s14938_s15  ;;  %v1822_v5 = vsel %vm1813_vm11, %v1789_v56, %v9741_v23  ;;  %v1823_v26 = vsel %vm1813_vm11, %v1790_v25, %v9742_v14  ;;  %v9767_v25 = vunpack.i.h.bf16 %v11231_v22  ;;  %v9766_v14 = vunpack.i.l.bf16 %v11231_v22 }
 0x105   : > { %v1850_v16 = vpack.c.bf16 %v1823_v26, %v1822_v5  ;;  %v11343_v23 = vpack.i.bf16 %v11327_v36, %v11333_v39  ;;  %v9782_v56 = vunpack.i.h.bf16 %v11254_v53  ;;  %v726_v5 = vrot.slane %v11333_v39, 1 }
 0x106   : > { %v9760_v10 = vpop.permute.xlu1 %9759  ;;  %9974 = vrot.lane.b32.xlu2 %v11293_v48, %s15016_s22  ;;  %v727_v26 = vrot.slane %v11327_v36, 1 }
 0x107   : > { %9964 = vrot.lane.b32.xlu0 %v11225_v19, %s15013_s30  ;;  %8142 = vmatmul.msk.bf16.gmra.mxu0 %vm1881_vm12, %v1850_v16  ;;  %v1627_v19 = vsel %vm1616_vm5, %v1595_v54, %v9751_v47  ;;  %v9762_v12 = vunpack.i.h.bf16 %v9760_v10  ;;  %v9761_v60 = vunpack.i.l.bf16 %v9760_v10  ;;  %v628_v54 = vsel %vm504_vm0, %v542_v51, 0.0 }
 0x108   : > { %v11319_v38 = vpop.permute.xlu2 %9809  ;;  %v729_v59 = vrot.slane %v628_v54, 1  ;;  %v728_v52 = vsel %vm663_vm1, %v726_v5, %v727_v26 }
 0x109   : > { %v9755_v9 = vpop.permute.xlu0 %9754 }
 0x10a   : > { %v9757_v57 = vunpack.i.h.bf16 %v9755_v9  ;;  %v9756_v28 = vunpack.i.l.bf16 %v9755_v9 }
 0x10c   : > { %v1660_v63 = vsel %vm1648_vm6, %v1627_v19, %v9757_v57  ;;  %9984 = vrot.lane.b32.xlu1 %v9983_v55, %s15015_s21  ;;  %v1659_v62 = vsel %vm1648_vm6, %v1626_v31, %v9756_v28  ;;  %v11371_v57 = vsel %vm663_vm1, %v727_v26, %v729_v59  ;;  %v10023_v28 = vpack.i.bf16 %v728_v52, %v11280_v21 }
 0x10d   : > { %v1693_v4 = vsel %vm1681_vm7, %v1660_v63, %v9762_v12  ;;  %v1692_v34 = vsel %vm1681_vm7, %v1659_v62, %v9761_v60  ;;  %v805_v62 = vrot.slane %v11327_v36, 2 }
 0x10e   : > { %v9775_v30 = vpop.permute.xlu1 %9774  ;;  %9989 = vrot.lane.b32.xlu2 %v9988_v37, %s15017_s23  ;;  %v1726_v22 = vsel %vm1714_vm8, %v1693_v4, %v9767_v25  ;;  %v1725_v10 = vsel %vm1714_vm8, %v1692_v34, %v9766_v14  ;;  %v9747_v37 = vunpack.i.h.bf16 %v11273_v11  ;;  %v804_v11 = vrot.slane %v11333_v39, 2 }
 0x10f   : > { %9979 = vrot.lane.b32.xlu0 %v9978_v20, %s15019_s17  ;;  %v9777_v24 = vunpack.i.h.bf16 %v9775_v30  ;;  %v9776_v49 = vunpack.i.l.bf16 %v9775_v30  ;;  %v807_v4 = vrot.slane %v628_v54, 2  ;;  %v9797_v14 = vunpack.i.h.bf16 %v11287_v29 }
 0x110   : > { %v11351_v32 = vpop.permute.xlu2 %9824  ;;  %v1596_v30 = vsel %vm1584_vm4, %v10864_v2, %v9747_v37  ;;  %v806_v5 = vsel %vm741_vm2, %v804_v11, %v805_v62  ;;  %v11435_v11 = vld [vmem:[%s14911_s2] ss:$0 sm:$0xff] }
 0x111   : > { %v9770_v50 = vpop.permute.xlu0 %9769  ;;  %v11402_v26 = vsel %vm741_vm2, %v805_v62, %v807_v4 }
 0x112   : > { %v9772_v47 = vunpack.i.h.bf16 %v9770_v50  ;;  %v9771_v16 = vunpack.i.l.bf16 %v9770_v50 }
 0x114   : > { %v1758_v45 = vsel %vm1747_vm9, %v1725_v10, %v9771_v16  ;;  %v1759_v55 = vsel %vm1747_vm9, %v1726_v22, %v9772_v47  ;;  %10009 = vrot.lane.b32.xlu1 %v11343_v23, %s14938_s15  ;;  %v10028_v16 = vpack.i.bf16 %v806_v5, %v11317_v43 }
 0x115   : > { %v1791_v53 = vsel %vm1780_vm10, %v1758_v45, %v9776_v49  ;;  %v1792_v3 = vsel %vm1780_vm10, %v1759_v55, %v9777_v24  ;;  %v466_v24 = vld [vmem:[%s10718_s24 + $0xd0] sm:$0xff]  ;;  %v467_v49 = vld [vmem:[%s10718_s24 + $0xd8] sm:$0xff]  ;;  %v9812_v55 = vunpack.i.h.bf16 %v11319_v38 }
 0x116   : > { %v11362_v19 = vpop.permute.xlu1 %9789  ;;  %v1824_v51 = vsel %vm1813_vm11, %v1791_v53, %v9781_v15  ;;  %v1825_v9 = vsel %vm1813_vm11, %v1792_v3, %v9782_v56  ;;  %9999 = vrot.lane.b32.xlu2 %v11293_v48, %s15020_s20  ;;  %v11381_v48 = vpack.i.bf16 %v11371_v57, %v728_v52  ;;  %v544_v59 = vrot.slane %v466_v24, 7 }
 0x117   : > { %9994 = vrot.lane.b32.xlu0 %v11284_v44, %s15014_s16  ;;  %v1851_v12 = vpack.c.bf16 %v1825_v9, %v1824_v51  ;;  %v9791_v60 = vunpack.i.l.bf16 %v11362_v19  ;;  %v9752_v44 = vunpack.i.h.bf16 %v11201_v13  ;;  %v545_v45 = vrot.slane %v467_v49, 7 }
 0x118   : > { %v11384_v25 = vpop.permute.xlu2 %9839  ;;  %v9811_v51 = vunpack.i.l.bf16 %v11319_v38 }
 0x119   : > { %v11375_v31 = vpop.permute.xlu0 %9784  ;;  %8143 = vmatmul.msk.bf16.gmra.mxu0 %vm1881_vm12, %v1851_v12  ;;  %v1628_v34 = vsel %vm1616_vm5, %v1596_v30, %v9752_v44  ;;  %v11426_v12 = vsel %vm504_vm0, 0.0, %v544_v59  ;;  %v11430_v44 = vsel %vm504_vm0, %v545_v45, 0.0 }
 0x11a   : > { %v9786_v63 = vunpack.i.l.bf16 %v11375_v31  ;;  %v809_v4 = vrot.slane %v11426_v12, 2  ;;  %v9787_v49 = vunpack.i.h.bf16 %v11375_v31  ;;  %v9792_v31 = vunpack.i.h.bf16 %v11362_v19 }
 0x11c   : > { %v1597_v21 = vsel %vm1584_vm4, %v10861_v1, %v9786_v63  ;;  %10024 = vrot.lane.b32.xlu1 %v10023_v28, %s15015_s21  ;;  %v9796_v1 = vunpack.i.l.bf16 %v11287_v29 }
 0x11d   : > { %v1629_v13 = vsel %vm1616_vm5, %v1597_v21, %v9791_v60 }
 0x11e   : > { %v9805_v56 = vpop.permute.xlu1 %9804  ;;  %10014 = vrot.lane.b32.xlu2 %v11381_v48, %s15016_s22  ;;  %v1662_v15 = vsel %vm1648_vm6, %v1629_v13, %v9797_v14  ;;  %v1661_v29 = vsel %vm1648_vm6, %v1628_v34, %v9796_v1  ;;  %v9826_v1 = vunpack.i.l.bf16 %v11351_v32 }
 0x11f   : > { %10004 = vrot.lane.b32.xlu0 %v9978_v20, %s15013_s30  ;;  %v9807_v50 = vunpack.i.h.bf16 %v9805_v56  ;;  %v10018_v20 = vpack.i.bf16 %v11402_v26, %v806_v5  ;;  %v9806_v54 = vunpack.i.l.bf16 %v9805_v56  ;;  %v812_v56 = vrot.slane %v11430_v44, 2 }
 0x120   : > { %v11415_v3 = vpop.permute.xlu2 %9854 }
 0x121   : > { %v9800_v2 = vpop.permute.xlu0 %9799 }
 0x122   : > { %v9802_v22 = vunpack.i.h.bf16 %v9800_v2  ;;  %v9801_v47 = vunpack.i.l.bf16 %v9800_v2 }
 0x124   : > { %v1695_v10 = vsel %vm1681_vm7, %v1662_v15, %v9802_v22  ;;  %10034 = vrot.lane.b32.xlu1 %v11343_v23, %s15014_s16  ;;  %v1694_v53 = vsel %vm1681_vm7, %v1661_v29, %v9801_v47  ;;  %v11423_v23 = vsel %vm504_vm0, %v544_v59, %v545_v45  ;;  %v1599_v29 = vsel %vm1584_vm4, %v10903_v41, %v9826_v1 }
 0x125   : > { %v1728_v43 = vsel %vm1714_vm8, %v1695_v10, %v9807_v50  ;;  %v1727_v9 = vsel %vm1714_vm8, %v1694_v53, %v9806_v54  ;;  %v810_v13 = vrot.slane %v11423_v23, 2  ;;  %v1598_v10 = vsel %vm1584_vm4, %v10906_v42, %v9787_v49 }
 0x126   : > { %v9820_v52 = vpop.permute.xlu1 %9819  ;;  %10029 = vrot.lane.b32.xlu2 %v10028_v16, %s15017_s23  ;;  %v1761_v63 = vsel %vm1747_vm9, %v1728_v43, %v9812_v55  ;;  %v1760_v62 = vsel %vm1747_vm9, %v1727_v9, %v9811_v51  ;;  %v9842_v53 = vunpack.i.h.bf16 %v11384_v25  ;;  %v9841_v42 = vunpack.i.l.bf16 %v11384_v25 }
 0x127   : > { %10019 = vrot.lane.b32.xlu0 %v10018_v20, %s15019_s17  ;;  %v9822_v28 = vunpack.i.h.bf16 %v9820_v52  ;;  %v9821_v37 = vunpack.i.l.bf16 %v9820_v52  ;;  %v11455_v47 = vsel %vm741_vm2, %v809_v4, %v810_v13  ;;  %v11458_v16 = vsel %vm741_vm2, %v810_v13, %v812_v56 }
 0x128   : > { %v11451_v22 = vpop.permute.xlu2 %9869  ;;  %v10063_v45 = vpack.i.bf16 %v11458_v16, %v11455_v47  ;;  %v1630_v52 = vsel %vm1616_vm5, %v1598_v10, %v9792_v31 }
 0x129   : > { %v9815_v60 = vpop.permute.xlu0 %9814 }
 0x12a   : > { %v9817_v21 = vunpack.i.h.bf16 %v9815_v60  ;;  %v9816_v38 = vunpack.i.l.bf16 %v9815_v60 }
 0x12c   : > { %v1793_v30 = vsel %vm1780_vm10, %v1760_v62, %v9816_v38  ;;  %v1794_v14 = vsel %vm1780_vm10, %v1761_v63, %v9817_v21 }
 0x12d   : > { %v1945_v34 = vpop.f32.mrf.mxu0  ;;  %v1826_v5 = vsel %vm1813_vm11, %v1793_v30, %v9821_v37  ;;  %v1827_v2 = vsel %vm1813_vm11, %v1794_v14, %v9822_v28 }
 0x12e   : > { %v9835_v15 = vpop.permute.xlu1 %9834  ;;  %v1852_v24 = vpack.c.bf16 %v1827_v2, %v1826_v5  ;;  %10039 = vrot.lane.b32.xlu2 %v11381_v48, %s15020_s20  ;;  %v1946_v50 = vadd.f32 %v11435_v11, %v1945_v34  ;;  %v9857_v5 = vunpack.i.h.bf16 %v11415_v3 }
 0x12f   : > { %10044 = vrot.lane.b32.xlu0 %v10018_v20, %s15013_s30  ;;  %v9837_v54 = vunpack.i.h.bf16 %v9835_v15  ;;  %v9836_v43 = vunpack.i.l.bf16 %v9835_v15  ;;  %v731_v15 = vrot.slane %v11426_v12, 1 }
 0x130   : > { %8144 = vmatmul.msk.bf16.gmra.mxu0 %vm1881_vm12, %v1852_v24  ;;  %v2025_v59 = vmax.f32 %v1946_v50, 0.0  ;;  %v11479_v38 = vpop.permute.xlu2 %9884  ;;  %v732_v24 = vrot.slane %v11423_v23, 1 }
 0x131   : > { %v11462_v48 = vpop.permute.xlu0 %9829  ;;  %v1663_v60 = vsel %vm1648_vm6, %v1630_v52, %v9836_v43 }
 0x132   : > { %v9831_v20 = vunpack.i.l.bf16 %v11462_v48  ;;  %v2089_v28 = vrot.slane %v2025_v59, 7  ;;  %v1696_v1 = vsel %vm1681_vm7, %v1663_v60, %v9841_v42  ;;  %v11518_v52 = vsel %vm663_vm1, %v731_v15, %v732_v24 }
 0x133   : > { %v9827_v60 = vunpack.i.h.bf16 %v11351_v32  ;;  %v9832_v32 = vunpack.i.h.bf16 %v11462_v48 }
 0x134   : > { %v1631_v55 = vsel %vm1616_vm5, %v1599_v29, %v9831_v20  ;;  %v11484_v13 = vsel %vm504_vm0, 0.0, %v2089_v28  ;;  %v9856_v20 = vunpack.i.l.bf16 %v11415_v3 }
 0x135   : > { %v1947_v41 = vpop.f32.mrf.mxu0  ;;  %v1664_v19 = vsel %vm1648_vm6, %v1631_v55, %v9837_v54  ;;  %v2247_v49 = vrot.slane %v11484_v13, 1  ;;  %v734_v54 = vrot.slane %v11430_v44, 1 }
 0x136   : > { %v1948_v51 = vadd.f32 %v11435_v11, %v1947_v41  ;;  %v9850_v9 = vpop.permute.xlu1 %9849  ;;  %v1697_v21 = vsel %vm1681_vm7, %v1664_v19, %v9842_v53 }
 0x137   : > { %10064 = vrot.lane.b32.xlu0 %v10063_v45, %s15019_s17  ;;  %v9852_v4 = vunpack.i.h.bf16 %v9850_v9  ;;  %v9851_v25 = vunpack.i.l.bf16 %v9850_v9  ;;  %v11511_v55 = vsel %vm663_vm1, %v732_v24, %v734_v54 }
 0x138   : > { %v2026_v37 = vmax.f32 %v1948_v51, 0.0  ;;  %v11521_v19 = vpop.permute.xlu2 %9899  ;;  %v11526_v9 = vpack.i.bf16 %v11511_v55, %v11518_v52 }
 0x139   : > { %v9845_v63 = vpop.permute.xlu0 %9844 }
 0x13a   : > { %v11481_v62 = vrot.slane %v2026_v37, 7  ;;  %v9847_v30 = vunpack.i.h.bf16 %v9845_v63  ;;  %v9846_v14 = vunpack.i.l.bf16 %v9845_v63  ;;  %v9871_v63 = vunpack.i.l.bf16 %v11451_v22  ;;  %10059 = vrot.lane.b32.xlu2 %v11526_v9, %s15016_s22 }
 0x13c   : > { %v11488_v56 = vsel %vm504_vm0, %v2089_v28, %v11481_v62  ;;  %v1730_v34 = vsel %vm1714_vm8, %v1697_v21, %v9847_v30  ;;  %v1729_v2 = vsel %vm1714_vm8, %v1696_v1, %v9846_v14  ;;  %v1600_v1 = vsel %vm1584_vm4, %v10960_v35, %v9827_v60 }
 0x13d   : > { %v1763_v50 = vsel %vm1747_vm9, %v1730_v34, %v9852_v4  ;;  %v2248_v31 = vrot.slane %v11488_v56, 1  ;;  %v1762_v10 = vsel %vm1747_vm9, %v1729_v2, %v9851_v25  ;;  %v11540_v25 = vpack.i.bf16 %v11423_v23, %v11426_v12 }
 0x13e   : > { %v11498_v29 = vpop.permute.xlu1 %9864  ;;  %v1796_v44 = vsel %vm1780_vm10, %v1763_v50, %v9857_v5  ;;  %v1795_v51 = vsel %vm1780_vm10, %v1762_v10, %v9856_v20  ;;  %v1632_v48 = vsel %vm1616_vm5, %v1600_v1, %v9832_v32  ;;  %v11568_v60 = vsel %vm504_vm0, %v11481_v62, 0.0 }
 0x13f   : > { %10089 = vrot.lane.b32.xlu0 %v10063_v45, %s15013_s30  ;;  %v11508_v59 = vsel %vm663_vm1, %v2247_v49, %v2248_v31  ;;  %v9866_v3 = vunpack.i.l.bf16 %v11498_v29 }
 0x140   : > { %v10048_v43 = vpack.i.bf16 %v11508_v59, %v10725_v8 }
 0x141   : > { %v9860_v53 = vpop.permute.xlu0 %9859  ;;  %v1601_v30 = vsel %vm1584_vm4, %v10965_v40, %v9866_v3  ;;  %v10073_v40 = vpack.i.bf16 %v11455_v47, %v11402_v26  ;;  %v468_v26 = vld [vmem:[%s10718_s24 + $0xe0] sm:$0xff]  ;;  %v469_v47 = vld [vmem:[%s10718_s24 + $0xe8] sm:$0xff]  ;;  %v9886_v3 = vunpack.i.l.bf16 %v11479_v38 }
 0x142   : > { %v9862_v41 = vunpack.i.h.bf16 %v9860_v53  ;;  %v9861_v45 = vunpack.i.l.bf16 %v9860_v53  ;;  %10049 = vrot.lane.b32.xlu1 %v10048_v43, %s14939_s0  ;;  %v1633_v5 = vsel %vm1616_vm5, %v1601_v30, %v9871_v63  ;;  %v11554_v43 = vpop.permute.xlu2 %9914 }
 0x143   : > { %10074 = vrot.lane.b32.xlu2 %v10073_v40, %s15017_s23 }
 0x144   : > { %v1950_v28 = vpop.f32.mrf.mxu0  ;;  %v1828_v42 = vsel %vm1813_vm11, %v1795_v51, %v9861_v45  ;;  %v1829_v37 = vsel %vm1813_vm11, %v1796_v44, %v9862_v41  ;;  %v9887_v44 = vunpack.i.h.bf16 %v11479_v38  ;;  %v10068_v45 = vpack.i.bf16 %v11518_v52, %v11371_v57 }
 0x145   : > { %v1951_v21 = vadd.f32 %v11435_v11, %v1950_v28  ;;  %v1853_v4 = vpack.c.bf16 %v1829_v37, %v1828_v42  ;;  %v9902_v51 = vunpack.i.h.bf16 %v11521_v19  ;;  %v9901_v28 = vunpack.i.l.bf16 %v11521_v19 }
 0x146   : > { %v9880_v14 = vpop.permute.xlu1 %9879 }
 0x147   : > { %8145 = vmatmul.msk.bf16.gmra.mxu0 %vm1881_vm12, %v1853_v4  ;;  %v2027_v34 = vmax.f32 %v1951_v21, 0.0  ;;  %v9882_v49 = vunpack.i.h.bf16 %v9880_v14  ;;  %v9881_v50 = vunpack.i.l.bf16 %v9880_v14  ;;  %v547_v21 = vrot.slane %v468_v26, 7 }
 0x148   : > { %v548_v4 = vrot.slane %v469_v47, 7 }
 0x149   : > { %v9875_v2 = vpop.permute.xlu0 %9874  ;;  %v2092_v20 = vrot.slane %v2027_v34, 7  ;;  %v2250_v34 = vrot.slane %v11568_v60, 1 }
 0x14a   : > { %v9877_v15 = vunpack.i.h.bf16 %v9875_v2  ;;  %v9876_v24 = vunpack.i.l.bf16 %v9875_v2  ;;  %10054 = vrot.lane.b32.xlu1 %v11540_v25, %s14938_s15  ;;  %v11586_v40 = vsel %vm504_vm0, %v547_v21, %v548_v4 }
 0x14b   : > { %v11572_v38 = vsel %vm504_vm0, 0.0, %v2092_v20  ;;  %10084 = vrot.lane.b32.xlu2 %v11526_v9, %s15020_s20  ;;  %v737_v47 = vrot.slane %v11586_v40, 1 }
 0x14c   : > { %v1666_v35 = vsel %vm1648_vm6, %v1633_v5, %v9877_v15  ;;  %v1952_v54 = vpop.f32.mrf.mxu0  ;;  %v1665_v10 = vsel %vm1648_vm6, %v1632_v48, %v9876_v24  ;;  %v11589_v15 = vsel %vm504_vm0, 0.0, %v547_v21  ;;  %v630_v24 = vsel %vm504_vm0, %v548_v4, 0.0 }
 0x14d   : > { %v1953_v53 = vadd.f32 %v11435_v11, %v1952_v54  ;;  %v1699_v42 = vsel %vm1681_vm7, %v1666_v35, %v9882_v49  ;;  %v1698_v63 = vsel %vm1681_vm7, %v1665_v10, %v9881_v50  ;;  %v2252_v49 = vrot.slane %v11572_v38, 1 }
 0x14e   : > { %v9895_v41 = vpop.permute.xlu1 %9894  ;;  %v1732_v1 = vsel %vm1714_vm8, %v1699_v42, %v9887_v44  ;;  %v1731_v5 = vsel %vm1714_vm8, %v1698_v63, %v9886_v3  ;;  %v736_v26 = vrot.slane %v11589_v15, 1  ;;  %v11604_v44 = vpop.permute.xlu2 %9929  ;;  %v814_v9 = vrot.slane %v11589_v15, 2 }
 0x14f   : > { %v2028_v37 = vmax.f32 %v1953_v53, 0.0  ;;  %v9896_v57 = vunpack.i.l.bf16 %v9895_v41  ;;  %v9897_v14 = vunpack.i.h.bf16 %v9895_v41  ;;  %v11610_v41 = vsel %vm663_vm1, %v2248_v31, %v2250_v34 }
 0x150   : > { %v817_v63 = vrot.slane %v630_v24, 2 }
 0x151   : > { %v11574_v30 = vrot.slane %v2028_v37, 7  ;;  %v9890_v52 = vpop.permute.xlu0 %9889 }
 0x152   : > { %v9892_v19 = vunpack.i.h.bf16 %v9890_v52  ;;  %v9891_v32 = vunpack.i.l.bf16 %v9890_v52  ;;  %10069 = vrot.lane.b32.xlu1 %v10068_v45, %s15015_s21  ;;  %v815_v45 = vrot.slane %v11586_v40, 2  ;;  %v738_v52 = vsel %vm663_vm1, %v736_v26, %v737_v47 }
 0x153   : > { %v11580_v62 = vsel %vm504_vm0, %v2092_v20, %v11574_v30  ;;  %v11657_v26 = vsel %vm504_vm0, %v11574_v30, 0.0 }
 0x154   : > { %v1764_v2 = vsel %vm1747_vm9, %v1731_v5, %v9891_v32  ;;  %v1765_v48 = vsel %vm1747_vm9, %v1732_v1, %v9892_v19  ;;  %v2253_v35 = vrot.slane %v11580_v62, 1  ;;  %v9872_v19 = vunpack.i.h.bf16 %v11451_v22 }
 0x155   : > { %v1797_v50 = vsel %vm1780_vm10, %v1764_v2, %v9896_v57  ;;  %v1798_v10 = vsel %vm1780_vm10, %v1765_v48, %v9897_v14  ;;  %v739_v14 = vrot.slane %v630_v24, 1  ;;  %v818_v34 = vsel %vm741_vm2, %v815_v45, %v817_v63 }
 0x156   : > { %v11598_v54 = vpop.permute.xlu1 %9909  ;;  %v1955_v20 = vpop.f32.mrf.mxu0  ;;  %v1830_v53 = vsel %vm1813_vm11, %v1797_v50, %v9901_v28  ;;  %v1831_v3 = vsel %vm1813_vm11, %v1798_v10, %v9902_v51  ;;  %v11618_v37 = vsel %vm663_vm1, %v2252_v49, %v2253_v35  ;;  %v9867_v51 = vunpack.i.h.bf16 %v11498_v29 }
 0x157   : > { %v1956_v42 = vadd.f32 %v11435_v11, %v1955_v20  ;;  %v1854_v28 = vpack.c.bf16 %v1831_v3, %v1830_v53  ;;  %v10103_v31 = vpack.i.bf16 %v11618_v37, %v11610_v41  ;;  %v9911_v4 = vunpack.i.l.bf16 %v11598_v54 }
 0x158   : > { %v816_v29 = vsel %vm741_vm2, %v814_v9, %v815_v45  ;;  %v740_v5 = vsel %vm663_vm1, %v737_v47, %v739_v14  ;;  %v1602_v2 = vsel %vm1584_vm4, %v11037_v58, %v9867_v51  ;;  %v9917_v22 = vunpack.i.h.bf16 %v11554_v43 }
 0x159   : > { %v11621_v21 = vpop.permute.xlu0 %9904  ;;  %8146 = vmatmul.msk.bf16.gmra.mxu0 %vm1881_vm12, %v1854_v28  ;;  %10104 = vrot.lane.b32.xlu0 %v10103_v31, %s14939_s0  ;;  %v2029_v32 = vmax.f32 %v1956_v42, 0.0  ;;  %v11641_v24 = vpack.i.bf16 %v740_v5, %v738_v52  ;;  %v9916_v50 = vunpack.i.l.bf16 %v11554_v43  ;;  %v11650_v10 = vpack.i.bf16 %v818_v34, %v816_v29  ;;  %v11659_v43 = vpop.permute.xlu2 %9944  ;;  %v470_v29 = vld [vmem:[%s10718_s24 + $0xf0] sm:$0xff] }
 0x15a   : > { %v9906_v57 = vunpack.i.l.bf16 %v11621_v21  ;;  %10079 = vrot.lane.b32.xlu1 %v11540_v25, %s15014_s16  ;;  %v1634_v58 = vsel %vm1616_vm5, %v1602_v2, %v9872_v19  ;;  %v2255_v30 = vrot.slane %v11657_v26, 1  ;;  %v9932_v52 = vunpack.i.h.bf16 %v11604_v44 }
 0x15b   : > { %10099 = vrot.lane.b32.xlu2 %v11641_v24, %s15016_s22  ;;  %v2095_v53 = vrot.slane %v2029_v32, 7  ;;  %v1667_v63 = vsel %vm1648_vm6, %v1634_v58, %v9916_v50  ;;  %v471_v32 = vld [vmem:[%s10718_s24 + $0xf8] sm:$0xff]  ;;  %v9931_v2 = vunpack.i.l.bf16 %v11604_v44  ;;  %s15028_s24 = smov 64  }
 0x15c   : > { %v1603_v1 = vsel %vm1584_vm4, %v11034_v17, %v9906_v57  ;;  %v11648_v17 = vpack.i.bf16 %v11586_v40, %v11589_v15  ;;  %v551_v50 = vrot.slane %v471_v32, 7 }
 0x15d   : > { %v1635_v49 = vsel %vm1616_vm5, %v1603_v1, %v9911_v4  ;;  %v11669_v31 = vsel %vm504_vm0, 0.0, %v2095_v53 }
 0x15e   : > { %v9925_v25 = vpop.permute.xlu1 %9924  ;;  %v1957_v48 = vpop.f32.mrf.mxu0  ;;  %v1668_v9 = vsel %vm1648_vm6, %v1635_v49, %v9917_v22  ;;  %v2257_v5 = vrot.slane %v11669_v31, 1 }
 0x15f   : > { %v1958_v20 = vadd.f32 %v11435_v11, %v1957_v48  ;;  %v9927_v45 = vunpack.i.h.bf16 %v9925_v25  ;;  %v9926_v4 = vunpack.i.l.bf16 %v9925_v25  ;;  %v11689_v25 = vsel %vm663_vm1, %v2253_v35, %v2255_v30 }
 0x160   : > { %15021 = vst [vmem:[#allocation8_spill] sm:$0xff] %v11689_v25  ;;  %v550_v48 = vrot.slane %v470_v29, 7 }
 0x161   : > { %v2030_v47 = vmax.f32 %v1958_v20, 0.0  ;;  %v9920_v3 = vpop.permute.xlu0 %9919  ;;  %10109 = vrot.lane.b32.xlu0 %v11650_v10, %s15019_s17 }
 0x162   : > { %v9922_v42 = vunpack.i.h.bf16 %v9920_v3  ;;  %v9921_v28 = vunpack.i.l.bf16 %v9920_v3  ;;  %10094 = vrot.lane.b32.xlu1 %v11648_v17, %s14938_s15  ;;  %v11713_v29 = vsel %vm504_vm0, %v550_v48, %v551_v50 }
 0x163   : > { %v2096_v51 = vrot.slane %v2030_v47, 7  ;;  %980 = vrot.lane.b32.xlu2 %v11458_v16, %s15017_s23 }
 0x164   : > { %v1701_v57 = vsel %vm1681_vm7, %v1668_v9, %v9922_v42  ;;  %v1700_v19 = vsel %vm1681_vm7, %v1667_v63, %v9921_v28  ;;  %v11698_v42 = vpop.permute.xlu2 %9959  ;;  %v9907_v28 = vunpack.i.h.bf16 %v11621_v21 }
 0x165   : > { %v11674_v14 = vsel %vm504_vm0, %v2095_v53, %v2096_v51  ;;  %v1734_v1 = vsel %vm1714_vm8, %v1701_v57, %v9927_v45  ;;  %v1733_v49 = vsel %vm1714_vm8, %v1700_v19, %v9926_v4  ;;  %v9946_v45 = vunpack.i.l.bf16 %v11659_v43 }
 0x166   : > { %v9940_v34 = vpop.permute.xlu1 %9939  ;;  %v2258_v22 = vrot.slane %v11674_v14, 1  ;;  %v1767_v47 = vsel %vm1747_vm9, %v1734_v1, %v9932_v52  ;;  %v1766_v35 = vsel %vm1747_vm9, %v1733_v49, %v9931_v2  ;;  %v11705_v63 = vsel %vm504_vm0, %v2096_v51, 0.0 }
 0x167   : > { %v9942_v20 = vunpack.i.h.bf16 %v9940_v34  ;;  %v9941_v58 = vunpack.i.l.bf16 %v9940_v34  ;;  %v631_v51 = vsel %vm504_vm0, %v551_v50, 0.0  ;;  %v822_v1 = vrot.slane %v11713_v29, 1 }
 0x168   : > { %v11693_v44 = vsel %vm663_vm1, %v2257_v5, %v2258_v22  ;;  %v2260_v34 = vrot.slane %v11705_v63, 1  ;;  %v824_v49 = vrot.slane %v631_v51, 1  ;;  %v1605_v50 = vsel %vm1584_vm4, %v11108_v46, %v9946_v45 }
 0x169   : > { %v9935_v53 = vpop.permute.xlu0 %9934  ;;  %15022 = vst [vmem:[#allocation9_spill] sm:$0xff] %v11693_v44  ;;  %v10113_v16 = vpack.i.bf16 %v11693_v44, %v11689_v25 }
 0x16a   : > { %v9937_v3 = vunpack.i.h.bf16 %v9935_v53  ;;  %v9936_v9 = vunpack.i.l.bf16 %v9935_v53  ;;  %887 = vrot.lane.b32.xlu1 %v11511_v55, %s15015_s21  ;;  %v11716_v55 = vsel %vm504_vm0, 0.0, %v550_v48  ;;  %v825_v53 = vsel %vm663_vm1, %v822_v1, %v824_v49 }
 0x16b   : > { %10114 = vrot.lane.b32.xlu0 %v10113_v16, %s14939_s0  ;;  %v821_v32 = vrot.slane %v11716_v55, 1  ;;  %10124 = vrot.lane.b32.xlu2 %v11641_v24, %s15020_s20  ;;  %v827_v49 = vrot.slane %v11713_v29, 2 }
 0x16c   : > { %v1799_v30 = vsel %vm1780_vm10, %v1766_v35, %v9936_v9  ;;  %v1800_v4 = vsel %vm1780_vm10, %v1767_v47, %v9937_v3  ;;  %v1604_v47 = vsel %vm1584_vm4, %v11103_v18, %v9907_v28  ;;  %v11739_v35 = vsel %vm663_vm1, %v2258_v22, %v2260_v34 }
 0x16d   : > { %v1960_v57 = vpop.f32.mrf.mxu0  ;;  %v1832_v52 = vsel %vm1813_vm11, %v1799_v30, %v9941_v58  ;;  %v1833_v19 = vsel %vm1813_vm11, %v1800_v4, %v9942_v20  ;;  %v823_v48 = vsel %vm663_vm1, %v821_v32, %v822_v1  ;;  %v9912_v20 = vunpack.i.h.bf16 %v11598_v54  ;;  %15023 = vst [vmem:[#allocation10_spill] sm:$0xff] %v11739_v35  ;;  %v9975_v30 = vpop.permute.xlu2 %9974 }
 0x16e   : > { %v1855_v21 = vpack.c.bf16 %v1833_v19, %v1832_v52  ;;  %v1961_v5 = vadd.f32 %v11435_v11, %v1960_v57  ;;  %v9955_v2 = vpop.permute.xlu1 %9954  ;;  %v11741_v54 = vpack.i.bf16 %v825_v53, %v823_v48  ;;  %v9962_v18 = vunpack.i.h.bf16 %v11698_v42 }
 0x16f   : > { %v9957_v3 = vunpack.i.h.bf16 %v9955_v2  ;;  %v9956_v46 = vunpack.i.l.bf16 %v9955_v2  ;;  %v1636_v28 = vsel %vm1616_vm5, %v1604_v47, %v9912_v20  ;;  %v9961_v22 = vunpack.i.l.bf16 %v11698_v42  ;;  %v9245_v47 = vld [vmem:[%s14912_s3 + $0x38] sm:$0xff] }
 0x170   : > { %8147 = vmatmul.msk.bf16.gmra.mxu0 %vm1881_vm12, %v1855_v21  ;;  %v2031_v16 = vmax.f32 %v1961_v5, 0.0  ;;  %v11753_v19 = vpack.i.bf16 %v11713_v29, %v11716_v55  ;;  %v826_v2 = vrot.slane %v11716_v55, 2  ;;  %v829_v42 = vrot.slane %v631_v51, 2  ;;  %3268 = vmatpush.bf16.msra.mxu1 %v9245_v47 }
 0x171   : > { %v11730_v58 = vpop.permute.xlu0 %9949  ;;  %v1669_v21 = vsel %vm1648_vm6, %v1636_v28, %v9956_v46 }
 0x172   : > { %v9951_v9 = vunpack.i.l.bf16 %v11730_v58  ;;  %10119 = vrot.lane.b32.xlu1 %v11648_v17, %s15014_s16  ;;  %v2098_v52 = vrot.slane %v2031_v16, 7  ;;  %v1702_v16 = vsel %vm1681_vm7, %v1669_v21, %v9961_v22  ;;  %v828_v28 = vsel %vm741_vm2, %v826_v2, %v827_v49 }
 0x173   : > { %2486 = vrot.lane.b32.xlu0 %v11739_v35, %s14939_s0  ;;  %10139 = vrot.lane.b32.xlu2 %v11741_v54, %s15016_s22  ;;  %v9976_v21 = vunpack.i.l.bf16 %v9975_v30 }
 0x174   : > { %v1637_v45 = vsel %vm1616_vm5, %v1605_v50, %v9951_v9  ;;  %v9977_v9 = vunpack.i.h.bf16 %v9975_v30 }
 0x175   : > { %v1962_v4 = vpop.f32.mrf.mxu0  ;;  %v1670_v57 = vsel %vm1648_vm6, %v1637_v45, %v9957_v3  ;;  %v11765_v3 = vsel %vm504_vm0, 0.0, %v2098_v52 }
 0x176   : > { %v1963_v17 = vadd.f32 %v11435_v11, %v1962_v4  ;;  %v9970_v1 = vpop.permute.xlu1 %9969  ;;  %v1703_v5 = vsel %vm1681_vm7, %v1670_v57, %v9962_v18  ;;  %v830_v4 = vsel %vm741_vm2, %v827_v49, %v829_v42  ;;  %v2262_v57 = vrot.slane %v11765_v3, 1 }
 0x177   : > { %v9972_v20 = vunpack.i.h.bf16 %v9970_v1  ;;  %v9971_v51 = vunpack.i.l.bf16 %v9970_v1  ;;  %v11798_v2 = vpack.i.bf16 %v830_v4, %v828_v28  ;;  %v9242_v28 = vld [vmem:[%s14912_s3 + $0x20] sm:$0xff] }
 0x178   : > { %v2032_v32 = vmax.f32 %v1963_v17, 0.0 }
 0x179   : > { %v9965_v34 = vpop.permute.xlu0 %9964 }
 0x17a   : > { %v2099_v48 = vrot.slane %v2032_v32, 7  ;;  %v9967_v50 = vunpack.i.h.bf16 %v9965_v34  ;;  %v9966_v53 = vunpack.i.l.bf16 %v9965_v34  ;;  %10134 = vrot.lane.b32.xlu1 %v11753_v19, %s14938_s15  ;;  %v11789_v32 = vpop.permute.xlu2 %9989 }
 0x17b   : > { %10129 = vrot.lane.b32.xlu0 %v11650_v10, %s15013_s30  ;;  %v9991_v4 = vunpack.i.l.bf16 %v11789_v32 }
 0x17c   : > { %v11771_v29 = vsel %vm504_vm0, %v2098_v52, %v2099_v48  ;;  %v11774_v55 = vsel %vm504_vm0, %v2099_v48, 0.0  ;;  %v1736_v46 = vsel %vm1714_vm8, %v1703_v5, %v9967_v50  ;;  %v1735_v18 = vsel %vm1714_vm8, %v1702_v16, %v9966_v53  ;;  %v9244_v52 = vld [vmem:[%s14912_s3 + $0x30] sm:$0xff]  ;;  %v9243_v50 = vld [vmem:[%s14912_s3 + $0x28] sm:$0xff] }
 0x17d   : > { %v2265_v45 = vrot.slane %v11774_v55, 1  ;;  %v1769_v17 = vsel %vm1747_vm9, %v1736_v46, %v9972_v20  ;;  %v2263_v22 = vrot.slane %v11771_v29, 1  ;;  %v1768_v1 = vsel %vm1747_vm9, %v1735_v18, %v9971_v51  ;;  %3269 = vmatpush.bf16.msra.mxu1 %v9244_v52 }
 0x17e   : > { %v1802_v48 = vsel %vm1780_vm10, %v1769_v17, %v9977_v9  ;;  %v1801_v53 = vsel %vm1780_vm10, %v1768_v1, %v9976_v21  ;;  %v11808_v47 = vpop.permute.xlu1 %9984  ;;  %v9947_v17 = vunpack.i.h.bf16 %v11659_v43 }
 0x17f   : > { %v11793_v34 = vsel %vm663_vm1, %v2262_v57, %v2263_v22  ;;  %v11796_v5 = vsel %vm663_vm1, %v2263_v22, %v2265_v45  ;;  %v9986_v46 = vunpack.i.l.bf16 %v11808_v47  ;;  %v9241_v57 = vld [vmem:[%s14912_s3 + $0x18] sm:$0xff] }
 0x180   : > { %15024 = vst [vmem:[#allocation11_spill] sm:$0xff] %v11793_v34  ;;  %v10148_v42 = vpack.i.bf16 %v11796_v5, %v11793_v34 }
 0x181   : > { %15025 = vst [vmem:[#allocation12_spill] sm:$0xff] %v11796_v5  ;;  %v9980_v49 = vpop.permute.xlu0 %9979  ;;  %3270 = vmatpush.bf16.msra.mxu1 %v9243_v50  ;;  %v1607_v22 = vsel %vm1584_vm4, %v11188_v33, %v9986_v46  ;;  %v9240_v33 = vld [vmem:[%s14912_s3 + $0x10] sm:$0xff] }
 0x182   : > { %v9982_v30 = vunpack.i.h.bf16 %v9980_v49  ;;  %v9981_v20 = vunpack.i.l.bf16 %v9980_v49  ;;  %10149 = vrot.lane.b32.xlu1 %v10148_v42, %s14939_s0  ;;  %v10000_v52 = vpop.permute.xlu2 %9999  ;;  %v9952_v42 = vunpack.i.h.bf16 %v11730_v58  ;;  %s8127_s0 = sshll.u32 %s431_s1, 4 }
 0x183   : > { %10144 = vrot.lane.b32.xlu0 %v11798_v2, %s15019_s17  ;;  %v10002_v43 = vunpack.i.h.bf16 %v10000_v52  ;;  %v10001_v46 = vunpack.i.l.bf16 %v10000_v52  ;;  %s433_s15 = scalar_lea.vmem [#allocation2], %s8127_s0 }
 0x184   : > { %v1965_v16 = vpop.f32.mrf.mxu0  ;;  %v1834_v51 = vsel %vm1813_vm11, %v1801_v53, %v9981_v20  ;;  %v1835_v9 = vsel %vm1813_vm11, %v1802_v48, %v9982_v30  ;;  %v1639_v48 = vsel %vm1616_vm5, %v1607_v22, %v9991_v4  ;;  %v1606_v20 = vsel %vm1584_vm4, %v11191_v61, %v9947_v17 }
 0x185   : > { %v1856_v45 = vpack.c.bf16 %v1835_v9, %v1834_v51  ;;  %v1966_v18 = vadd.f32 %v11435_v11, %v1965_v16  ;;  %3271 = vmatpush.bf16.msra.mxu1 %v9242_v28  ;;  %v1638_v58 = vsel %vm1616_vm5, %v1606_v20, %v9952_v42 }
 0x187   : > { %8148 = vmatmul.msk.bf16.gmra.mxu0 %vm1881_vm12, %v1856_v45  ;;  %v2033_v1 = vmax.f32 %v1966_v18, 0.0  ;;  %v10010_v45 = vpop.permute.xlu1 %10009 }
 0x188   : > { %v10012_v18 = vunpack.i.h.bf16 %v10010_v45 }
 0x189   : > { %v9995_v21 = vpop.permute.xlu0 %9994  ;;  %3272 = vmatpush.bf16.msra.mxu1 %v9241_v57  ;;  %v2101_v16 = vrot.slane %v2033_v1, 7  ;;  %v9239_v1 = vld [vmem:[%s14912_s3 + $0x8] sm:$0xff] }
 0x18a   : > { %v9997_v49 = vunpack.i.h.bf16 %v9995_v21  ;;  %v9996_v50 = vunpack.i.l.bf16 %v9995_v21 }
 0x18b   : > { %v11839_v57 = vsel %vm504_vm0, 0.0, %v2101_v16 }
 0x18c   : > { %v1967_v30 = vpop.f32.mrf.mxu0  ;;  %v1672_v51 = vsel %vm1648_vm6, %v1639_v48, %v9997_v49  ;;  %v1671_v61 = vsel %vm1648_vm6, %v1638_v58, %v9996_v50  ;;  %v10015_v49 = vpop.permute.xlu2 %10014  ;;  %v10011_v48 = vunpack.i.l.bf16 %v10010_v45  ;;  %v9238_v58 = vld [vmem:[%s14912_s3] sm:$0xff] }
 0x18d   : > { %v1968_v53 = vadd.f32 %v11435_v11, %v1967_v30  ;;  %3273 = vmatpush.bf16.msra.mxu1 %v9240_v33  ;;  %v1705_v21 = vsel %vm1681_vm7, %v1672_v51, %v10002_v43  ;;  %v10017_v30 = vunpack.i.h.bf16 %v10015_v49  ;;  %v1704_v50 = vsel %vm1681_vm7, %v1671_v61, %v10001_v46 }
 0x18e   : > { %v10016_v45 = vunpack.i.l.bf16 %v10015_v49 }
 0x18f   : > { %v2034_v9 = vmax.f32 %v1968_v53, 0.0  ;;  %v2267_v53 = vrot.slane %v11839_v57, 1 }
 0x191   : > { %v2102_v28 = vrot.slane %v2034_v9, 7  ;;  %v10005_v4 = vpop.permute.xlu0 %10004  ;;  %3274 = vmatpush.bf16.msra.mxu1 %v9239_v1 }
 0x192   : > { %v10007_v17 = vunpack.i.h.bf16 %v10005_v4  ;;  %v10006_v22 = vunpack.i.l.bf16 %v10005_v4 }
 0x193   : > { %v11846_v52 = vsel %vm504_vm0, %v2101_v16, %v2102_v28  ;;  %v11849_v42 = vsel %vm504_vm0, %v2102_v28, 0.0 }
 0x194   : > { %v2270_v20 = vrot.slane %v11849_v42, 1  ;;  %v1737_v43 = vsel %vm1714_vm8, %v1704_v50, %v10006_v22  ;;  %v1738_v33 = vsel %vm1714_vm8, %v1705_v21, %v10007_v17  ;;  %v2268_v51 = vrot.slane %v11846_v52, 1 }
 0x195   : > { %v1771_v16 = vsel %vm1747_vm9, %v1738_v33, %v10012_v18  ;;  %v1770_v61 = vsel %vm1747_vm9, %v1737_v43, %v10011_v48  ;;  %3275 = vmatpush.bf16.msra.mxu1 %v9238_v58 }
 0x196   : > { %v1970_v9 = vpop.f32.mrf.mxu0  ;;  %v11863_v46 = vsel %vm663_vm1, %v2267_v53, %v2268_v51  ;;  %v11867_v4 = vsel %vm663_vm1, %v2268_v51, %v2270_v20  ;;  %v1804_v22 = vsel %vm1780_vm10, %v1771_v16, %v10017_v30  ;;  %v1803_v50 = vsel %vm1780_vm10, %v1770_v61, %v10016_v45  ;;  %v11878_v30 = vpop.permute.xlu1 %10024 }
 0x197   : > { %v1971_v28 = vadd.f32 %v11435_v11, %v1970_v9  ;;  %15026 = vst [vmem:[#allocation13_spill] sm:$0xff] %v11863_v46  ;;  %v10153_v18 = vpack.i.bf16 %v11867_v4, %v11863_v46 }
 0x198   : > { %15027 = vst [vmem:[#allocation14_spill] sm:$0xff] %v11867_v4 }
 0x199   : > { %v10020_v17 = vpop.permute.xlu0 %10019  ;;  %v2035_v49 = vmax.f32 %v1971_v28, 0.0  ;;  %10154 = vrot.lane.b32.xlu2 %v10153_v18, %s15028_s24  ;;  %v11883_v28 = vpop.permute.xlu2 %10029 }
 0x19a   : > { %v10022_v21 = vunpack.i.h.bf16 %v10020_v17  ;;  %v10021_v1 = vunpack.i.l.bf16 %v10020_v17 }
 0x19b   : > { %v2104_v33 = vrot.slane %v2035_v49, 7 }
 0x19c   : > { %v1836_v53 = vsel %vm1813_vm11, %v1803_v50, %v10021_v1  ;;  %v1837_v48 = vsel %vm1813_vm11, %v1804_v22, %v10022_v21 }
 0x19d   : > { %v1857_v20 = vpack.c.bf16 %v1837_v48, %v1836_v53  ;;  %v11881_v16 = vsel %vm504_vm0, 0.0, %v2104_v33  ;;  %v9987_v48 = vunpack.i.h.bf16 %v11808_v47  ;;  %v15031_v47 = vmov 0 }
 0x19e   : > { %v1972_v43 = vpop.f32.mrf.mxu0  ;;  %v2272_v17 = vrot.slane %v11881_v16, 1  ;;  %v10035_v50 = vpop.permute.xlu1 %10034  ;;  %v15032_v47 = vsel %vm11913_vm14, 4294967295, %v15031_v47 }
 0x19f   : > { %v1973_v51 = vadd.f32 %v11435_v11, %v1972_v43  ;;  %8149 = vmatmul.msk.bf16.gmra.mxu0 %vm1881_vm12, %v1857_v20  ;;  %15033 = vst [vmem:[#allocation17_spill] sm:$0xff] %v15032_v47 }
 0x1a1   : > { %v2036_v9 = vmax.f32 %v1973_v51, 0.0  ;;  %v10040_v20 = vpop.permute.xlu2 %10039  ;;  %v9992_v51 = vunpack.i.h.bf16 %v11789_v32 }
 0x1a3   : > { %v2105_v58 = vrot.slane %v2036_v9, 7  ;;  %v10045_v9 = vpop.permute.xlu0 %10044 }
 0x1a5   : > { %v11886_v45 = vsel %vm504_vm0, %v2104_v33, %v2105_v58  ;;  %v11889_v61 = vsel %vm504_vm0, %v2105_v58, 0.0  ;;  %v10026_v33 = vunpack.i.l.bf16 %v11878_v30  ;;  %v1608_v58 = vsel %vm1584_vm4, %v11267_v6, %v9987_v48 }
 0x1a6   : > { %v2275_v18 = vrot.slane %v11889_v61, 1  ;;  %v2273_v22 = vrot.slane %v11886_v45, 1  ;;  %v1640_v32 = vsel %vm1616_vm5, %v1608_v58, %v9992_v51  ;;  %v10042_v51 = vunpack.i.h.bf16 %v10040_v20 }
 0x1a8   : > { %v11895_v21 = vsel %vm663_vm1, %v2272_v17, %v2273_v22  ;;  %v11898_v1 = vsel %vm663_vm1, %v2273_v22, %v2275_v18  ;;  %v10031_v17 = vunpack.i.l.bf16 %v11883_v28  ;;  %v1609_v22 = vsel %vm1584_vm4, %v11261_v7, %v10026_v33 }
 0x1a9   : > { %15029 = vst [vmem:[#allocation15_spill] sm:$0xff] %v11895_v21  ;;  %v10158_v49 = vpack.i.bf16 %v11898_v1, %v11895_v21  ;;  %v10060_v33 = vpop.permute.xlu2 %10059  ;;  %v10041_v21 = vunpack.i.l.bf16 %v10040_v20 }
 0x1aa   : > { %15030 = vst [vmem:[#allocation16_spill] sm:$0xff] %v11898_v1  ;;  %v1641_v6 = vsel %vm1616_vm5, %v1609_v22, %v10031_v17  ;;  %v10061_v47 = vunpack.i.l.bf16 %v10060_v33 }
 0x1ab   : > { %10159 = vrot.lane.b32.xlu0 %v10158_v49, %s15028_s24  ;;  %v10036_v49 = vunpack.i.l.bf16 %v10035_v50 }
 0x1ad   : > { %v1975_v53 = vpop.f32.mrf.mxu0 }
 0x1ae   : > { %v1976_v43 = vadd.f32 %v11435_v11, %v1975_v53  ;;  %v10037_v53 = vunpack.i.h.bf16 %v10035_v50  ;;  %v1673_v50 = vsel %vm1648_vm6, %v1640_v32, %v10036_v49  ;;  %v10047_v49 = vunpack.i.h.bf16 %v10045_v9 }
 0x1af   : > { %v1706_v20 = vsel %vm1681_vm7, %v1673_v50, %v10041_v21  ;;  %v10046_v32 = vunpack.i.l.bf16 %v10045_v9 }
 0x1b0   : > { %v2037_v18 = vmax.f32 %v1976_v43, 0.0  ;;  %v1674_v17 = vsel %vm1648_vm6, %v1641_v6, %v10037_v53 }
 0x1b2   : > { %v2107_v48 = vrot.slane %v2037_v18, 7  ;;  %v10065_v18 = vpop.permute.xlu0 %10064 }
 0x1b3   : > { %v10067_v21 = vunpack.i.h.bf16 %v10065_v18  ;;  %v10066_v50 = vunpack.i.l.bf16 %v10065_v18  ;;  %v11966_v18 = vpop.permute.xlu2 %10074 }
 0x1b4   : > { %v11918_v0 = vpop.permute.xlu1 %10049  ;;  %v11935_v22 = vsel %vm504_vm0, 0.0, %v2107_v48 }
 0x1b5   : > { %v1977_v1 = vpop.f32.mrf.mxu0  ;;  %v11922_v43 = vunpack.i.l.bf16 %v11918_v0 }
 0x1b6   : > { %v1978_v7 = vadd.f32 %v11435_v11, %v1977_v1 }
 0x1b7   : > { %15034 = vst [vmem:[#allocation18_spill] sm:$0xff] %v11922_v43  ;;  %v11931_v4 = vpack.c.bf16 %v11922_v43, %v11922_v43  ;;  %v2277_v43 = vrot.slane %v11935_v22, 1 }
 0x1b8   : > { %v2038_v58 = vmax.f32 %v1978_v7, 0.0  ;;  %v1707_v7 = vsel %vm1681_vm7, %v1674_v17, %v10042_v51 }
 0x1b9   : > { %15035 = vst [vmem:[#allocation19_spill] sm:$0xff] %v11931_v4  ;;  %8302 = vmatmul.msk.bf16.vlgmr.msra.gmra.mxu1 %vm8300_vm15, %v11931_v4  ;;  %v1740_v51 = vsel %vm1714_vm8, %v1707_v7, %v10047_v49 }
 0x1ba   : > { %v2108_v1 = vrot.slane %v2038_v58, 7  ;;  %v10062_v58 = vunpack.i.h.bf16 %v10060_v33 }
 0x1bc   : > { %v11946_v53 = vsel %vm504_vm0, %v2107_v48, %v2108_v1  ;;  %v11949_v6 = vsel %vm504_vm0, %v2108_v1, 0.0  ;;  %v10055_v5 = vpop.permute.xlu1 %10054  ;;  %v1739_v48 = vsel %vm1714_vm8, %v1706_v20, %v10046_v32 }
 0x1bd   : > { %v2280_v46 = vrot.slane %v11949_v6, 1  ;;  %v2278_v4 = vrot.slane %v11946_v53, 1  ;;  %v10057_v9 = vunpack.i.h.bf16 %v10055_v5  ;;  %v10056_v34 = vunpack.i.l.bf16 %v10055_v5 }
 0x1bf   : > { %v11957_v17 = vsel %vm663_vm1, %v2277_v43, %v2278_v4  ;;  %v11960_v1 = vsel %vm663_vm1, %v2278_v4, %v2280_v46  ;;  %v1773_v35 = vsel %vm1747_vm9, %v1740_v51, %v10057_v9  ;;  %v1772_v33 = vsel %vm1747_vm9, %v1739_v48, %v10056_v34  ;;  %v10090_v4 = vpop.permute.xlu0 %10089 }
 0x1c0   : > { %15036 = vst [vmem:[#allocation20_spill] sm:$0xff] %v11957_v17  ;;  %v10163_v44 = vpack.i.bf16 %v11960_v1, %v11957_v17  ;;  %v1806_v5 = vsel %vm1780_vm10, %v1773_v35, %v10062_v58  ;;  %v1805_v49 = vsel %vm1780_vm10, %v1772_v33, %v10061_v47  ;;  %v10027_v35 = vunpack.i.h.bf16 %v11878_v30  ;;  %v10085_v58 = vpop.permute.xlu2 %10084 }
 0x1c1   : > { %15037 = vst [vmem:[#allocation21_spill] sm:$0xff] %v11960_v1  ;;  %v1838_v43 = vsel %vm1813_vm11, %v1805_v49, %v10066_v50  ;;  %v1839_v46 = vsel %vm1813_vm11, %v1806_v5, %v10067_v21  ;;  %v10032_v50 = vunpack.i.h.bf16 %v11883_v28  ;;  %v10052_v48 = vunpack.i.h.bf16 %v11918_v0 }
 0x1c2   : > { %10164 = vrot.lane.b32.xlu1 %v10163_v44, %s15028_s24  ;;  %v1858_v20 = vpack.c.bf16 %v1839_v46, %v1838_v43  ;;  %v10076_v44 = vunpack.i.l.bf16 %v11966_v18  ;;  %v1610_v51 = vsel %vm1584_vm4, %v11333_v39, %v10027_v35  ;;  %v10086_v39 = vunpack.i.l.bf16 %v10085_v58 }
 0x1c3   : > { %v2767_v0 = vsel %vm2765_vm13, %v11484_v13, %v10052_v48 }
 0x1c4   : > { %v1980_v32 = vpop.f32.mrf.mxu0  ;;  %v11974_v7 = vpop.permute.xlu1 %10069  ;;  %8150 = vmatmul.msk.bf16.gmra.mxu0 %vm1881_vm12, %v1858_v20 }
 0x1c5   : > { %v1981_v34 = vadd.f32 %v11435_v11, %v1980_v32  ;;  %v10071_v9 = vunpack.i.l.bf16 %v11974_v7 }
 0x1c7   : > { %v2039_v47 = vmax.f32 %v1981_v34, 0.0  ;;  %v1611_v21 = vsel %vm1584_vm4, %v11327_v36, %v10071_v9  ;;  %v1642_v36 = vsel %vm1616_vm5, %v1610_v51, %v10032_v50  ;;  %v10087_v9 = vunpack.i.h.bf16 %v10085_v58 }
 0x1c8   : > { %v1643_v28 = vsel %vm1616_vm5, %v1611_v21, %v10076_v44  ;;  %v10092_v44 = vunpack.i.h.bf16 %v10090_v4 }
 0x1c9   : > { %v2110_v5 = vrot.slane %v2039_v47, 7 }
 0x1cb   : > { %v11986_v49 = vpop.permute.xlu0 %10104 }
 0x1cc   : > { %v1982_v33 = vpop.f32.mrf.mxu0  ;;  %v10080_v43 = vpop.permute.xlu1 %10079  ;;  %v10106_v46 = vunpack.i.l.bf16 %v11986_v49 }
 0x1cd   : > { %v1983_v30 = vadd.f32 %v11435_v11, %v1982_v33  ;;  %v10082_v20 = vunpack.i.h.bf16 %v10080_v43  ;;  %v10081_v32 = vunpack.i.l.bf16 %v10080_v43  ;;  %v11999_v43 = vsel %vm504_vm0, 0.0, %v2110_v5 }
 0x1ce   : > { %v2768_v35 = vsel %vm2765_vm13, %v11488_v56, %v10106_v46 }
 0x1cf   : > { %v2040_v34 = vmax.f32 %v1983_v30, 0.0  ;;  %v1675_v11 = vsel %vm1648_vm6, %v1642_v36, %v10081_v32  ;;  %v1676_v33 = vsel %vm1648_vm6, %v1643_v28, %v10082_v20  ;;  %v2868_v1 = vpack.c.bf16 %v2768_v35, %v2767_v0  ;;  %v10100_v30 = vpop.permute.xlu2 %10099 }
 0x1d0   : > { %v1708_v51 = vsel %vm1681_vm7, %v1675_v11, %v10086_v39  ;;  %v1709_v48 = vsel %vm1681_vm7, %v1676_v33, %v10087_v9  ;;  %v10091_v20 = vunpack.i.l.bf16 %v10090_v4  ;;  %v2282_v32 = vrot.slane %v11999_v43, 1 }
 0x1d1   : > { %v2111_v47 = vrot.slane %v2040_v34, 7  ;;  %3281 = vmatmul.bf16.gmra.mxu1 %v2868_v1  ;;  %v10102_v28 = vunpack.i.h.bf16 %v10100_v30  ;;  %v10101_v36 = vunpack.i.l.bf16 %v10100_v30  ;;  %v1742_v39 = vsel %vm1714_vm8, %v1709_v48, %v10092_v44  ;;  %v12029_v44 = vld [vmem:[%s14911_s2] ss:$0 sm:$0xff] }
 0x1d2   : > { %v1741_v17 = vsel %vm1714_vm8, %v1708_v51, %v10091_v20 }
 0x1d3   : > { %v12002_v50 = vsel %vm504_vm0, %v2110_v5, %v2111_v47  ;;  %v12005_v58 = vsel %vm504_vm0, %v2111_v47, 0.0  ;;  %v10110_v34 = vpop.permute.xlu0 %10109 }
 0x1d4   : > { %v2285_v21 = vrot.slane %v12005_v58, 1  ;;  %v2283_v46 = vrot.slane %v12002_v50, 1  ;;  %v10095_v5 = vpop.permute.xlu1 %10094  ;;  %v10112_v47 = vunpack.i.h.bf16 %v10110_v34  ;;  %v10111_v1 = vunpack.i.l.bf16 %v10110_v34 }
 0x1d5   : > { %v10097_v0 = vunpack.i.h.bf16 %v10095_v5  ;;  %v10096_v35 = vunpack.i.l.bf16 %v10095_v5 }
 0x1d6   : > { %v1985_v11 = vpop.f32.mrf.mxu0  ;;  %v12015_v9 = vsel %vm663_vm1, %v2282_v32, %v2283_v46  ;;  %v12018_v4 = vsel %vm663_vm1, %v2283_v46, %v2285_v21 }
 0x1d7   : > { %15038 = vst [vmem:[#allocation22_spill] sm:$0xff] %v12015_v9  ;;  %v1774_v33 = vsel %vm1747_vm9, %v1741_v17, %v10096_v35  ;;  %v1775_v30 = vsel %vm1747_vm9, %v1742_v39, %v10097_v0  ;;  %v10168_v5 = vpack.i.bf16 %v12018_v4, %v12015_v9  ;;  %v1986_v48 = vadd.f32 %v12029_v44, %v1985_v11  ;;  %v9269_v0 = vld [vmem:[%s14912_s3 + $0xf8] sm:$0xff] }
 0x1d8   : > { %15039 = vst [vmem:[#allocation23_spill] sm:$0xff] %v12018_v4  ;;  %v1807_v34 = vsel %vm1780_vm10, %v1774_v33, %v10101_v36  ;;  %v1808_v51 = vsel %vm1780_vm10, %v1775_v30, %v10102_v28  ;;  %v10107_v28 = vunpack.i.h.bf16 %v11986_v49  ;;  %v9273_v35 = vld [vmem:[%s14912_s3 + $0x118] sm:$0xff]  ;;  %3535 = vmatpush.bf16.msrb.mxu0 %v9269_v0 }
 0x1d9   : > { %v1840_v21 = vsel %vm1813_vm11, %v1807_v34, %v10111_v1  ;;  %v1841_v17 = vsel %vm1813_vm11, %v1808_v51, %v10112_v47  ;;  %10169 = vrot.lane.b32.xlu2 %v10168_v5, %s15028_s24  ;;  %v2041_v20 = vmax.f32 %v1986_v48, 0.0  ;;  %v981_v1 = vpop.permute.xlu2 %980  ;;  %3628 = vmatpush.bf16.msrb.mxu1 %v9273_v35  ;;  %v10072_v48 = vunpack.i.h.bf16 %v11974_v7 }
 0x1da   : > { %v1859_v46 = vpack.c.bf16 %v1841_v17, %v1840_v21  ;;  %v2769_v49 = vsel %vm2765_vm13, %v11572_v38, %v10107_v28 }
 0x1db   : > { %v2113_v33 = vrot.slane %v2041_v20, 7 }
 0x1dc   : > { %v888_v32 = vpop.permute.xlu1 %887  ;;  %8151 = vmatmul.msk.bf16.gmra.mxu0 %vm1881_vm12, %v1859_v46 }
 0x1dd   : > { %v10115_v36 = vpop.permute.xlu0 %10114  ;;  %v12052_v21 = vsel %vm504_vm0, 0.0, %v2113_v33  ;;  %v1613_v7 = vsel %vm1584_vm4, %v11423_v23, %v888_v32 }
 0x1de   : > { %v1987_v47 = vpop.f32.mrf.mxu0  ;;  %v10116_v39 = vunpack.i.l.bf16 %v10115_v36  ;;  %v2287_v35 = vrot.slane %v12052_v21, 1  ;;  %v1645_v4 = vsel %vm1616_vm5, %v1613_v7, %v981_v1 }
 0x1df   : > { %v1988_v11 = vadd.f32 %v12029_v44, %v1987_v47 }
 0x1e0   : > { %v2770_v5 = vsel %vm2765_vm13, %v11580_v62, %v10116_v39  ;;  %v10077_v39 = vunpack.i.h.bf16 %v11966_v18 }
 0x1e1   : > { %v2042_v30 = vmax.f32 %v1988_v11, 0.0  ;;  %v12048_v34 = vpack.c.bf16 %v2770_v5, %v2769_v49  ;;  %v1612_v11 = vsel %vm1584_vm4, %v11426_v12, %v10072_v48  ;;  %v10117_v48 = vunpack.i.h.bf16 %v10115_v36 }
 0x1e2   : > { %v1644_v18 = vsel %vm1616_vm5, %v1612_v11, %v10077_v39 }
 0x1e3   : > { %v2114_v51 = vrot.slane %v2042_v30, 7  ;;  %3286 = vmatmul.bf16.gmra.mxu1 %v12048_v34 }
 0x1e4   : > { %v10120_v17 = vpop.permute.xlu1 %10119 }
 0x1e5   : > { %v12056_v46 = vsel %vm504_vm0, %v2113_v33, %v2114_v51  ;;  %v12059_v20 = vsel %vm504_vm0, %v2114_v51, 0.0  ;;  %v2487_v28 = vpop.permute.xlu0 %2486  ;;  %v10125_v33 = vpop.permute.xlu2 %10124  ;;  %v10122_v30 = vunpack.i.h.bf16 %v10120_v17  ;;  %v10121_v49 = vunpack.i.l.bf16 %v10120_v17 }
 0x1e6   : > { %v2290_v0 = vrot.slane %v12059_v20, 1  ;;  %v2288_v47 = vrot.slane %v12056_v46, 1  ;;  %v10127_v32 = vunpack.i.h.bf16 %v10125_v33  ;;  %v10126_v9 = vunpack.i.l.bf16 %v10125_v33 }
 0x1e7   : > { %v1678_v17 = vsel %vm1648_vm6, %v1645_v4, %v10122_v30  ;;  %v2771_v30 = vsel %vm2765_vm13, %v11669_v31, %v10117_v48 }
 0x1e8   : > { %v12070_v5 = vsel %vm663_vm1, %v2287_v35, %v2288_v47  ;;  %v12073_v51 = vsel %vm663_vm1, %v2288_v47, %v2290_v0  ;;  %v1677_v35 = vsel %vm1648_vm6, %v1644_v18, %v10121_v49  ;;  %v1711_v11 = vsel %vm1681_vm7, %v1678_v17, %v10127_v32 }
 0x1e9   : > { %15040 = vst [vmem:[#allocation24_spill] sm:$0xff] %v12070_v5  ;;  %v10173_v23 = vpack.i.bf16 %v12073_v51, %v12070_v5  ;;  %v1710_v39 = vsel %vm1681_vm7, %v1677_v35, %v10126_v9 }
 0x1ea   : > { %15041 = vst [vmem:[#allocation25_spill] sm:$0xff] %v12073_v51  ;;  %v2772_v51 = vsel %vm2765_vm13, %v11674_v14, %v2487_v28 }
 0x1eb   : > { %10174 = vrot.lane.b32.xlu0 %v10173_v23, %s15028_s24  ;;  %v12091_v18 = vpack.c.bf16 %v2772_v51, %v2771_v30 }
 0x1ec   : > { %v10135_v0 = vpop.permute.xlu1 %10134 }
 0x1ed   : > { %v1990_v12 = vpop.f32.mrf.mxu0  ;;  %v10130_v25 = vpop.permute.xlu0 %10129  ;;  %v10137_v33 = vunpack.i.h.bf16 %v10135_v0  ;;  %v10136_v5 = vunpack.i.l.bf16 %v10135_v0  ;;  %15042 = vst [vmem:[#allocation26_spill] sm:$0xff] %v12091_v18 }
 0x1ee   : > { %v1991_v47 = vadd.f32 %v12029_v44, %v1990_v12  ;;  %v10132_v1 = vunpack.i.h.bf16 %v10130_v25  ;;  %v10131_v7 = vunpack.i.l.bf16 %v10130_v25  ;;  %v10140_v49 = vpop.permute.xlu2 %10139 }
 0x1ef   : > { %v10142_v25 = vunpack.i.h.bf16 %v10140_v49  ;;  %v10141_v12 = vunpack.i.l.bf16 %v10140_v49 }
 0x1f0   : > { %v1743_v36 = vsel %vm1714_vm8, %v1710_v39, %v10131_v7  ;;  %v1744_v4 = vsel %vm1714_vm8, %v1711_v11, %v10132_v1  ;;  %v2043_v23 = vmax.f32 %v1991_v47, 0.0 }
 0x1f1   : > { %v1776_v28 = vsel %vm1747_vm9, %v1743_v36, %v10136_v5  ;;  %v1777_v0 = vsel %vm1747_vm9, %v1744_v4, %v10137_v33 }
 0x1f2   : > { %v2116_v17 = vrot.slane %v2043_v23, 7  ;;  %v1809_v48 = vsel %vm1780_vm10, %v1776_v28, %v10141_v12  ;;  %v1810_v51 = vsel %vm1780_vm10, %v1777_v0, %v10142_v25 }
 0x1f3   : > { %3291 = vmatmul.bf16.gmra.mxu1 %v12091_v18 }
 0x1f4   : > { %v10150_v47 = vpop.permute.xlu1 %10149  ;;  %v12102_v36 = vsel %vm504_vm0, 0.0, %v2116_v17 }
 0x1f5   : > { %v1992_v9 = vpop.f32.mrf.mxu0  ;;  %v10145_v32 = vpop.permute.xlu0 %10144  ;;  %v10152_v30 = vunpack.i.h.bf16 %v10150_v47  ;;  %v10151_v49 = vunpack.i.l.bf16 %v10150_v47  ;;  %v2292_v12 = vrot.slane %v12102_v36, 1 }
 0x1f6   : > { %v1993_v35 = vadd.f32 %v12029_v44, %v1992_v9  ;;  %v10147_v1 = vunpack.i.h.bf16 %v10145_v32  ;;  %v10146_v7 = vunpack.i.l.bf16 %v10145_v32 }
 0x1f8   : > { %v2044_v39 = vmax.f32 %v1993_v35, 0.0  ;;  %v1842_v11 = vsel %vm1813_vm11, %v1809_v48, %v10146_v7  ;;  %v1843_v5 = vsel %vm1813_vm11, %v1810_v51, %v10147_v1  ;;  %v2773_v35 = vsel %vm2765_vm13, %v11765_v3, %v10151_v49  ;;  %v9268_v51 = vld [vmem:[%s14912_s3 + $0xf0] sm:$0xff] }
 0x1f9   : > { %v1860_v33 = vpack.c.bf16 %v1843_v5, %v1842_v11  ;;  %3536 = vmatpush.bf16.msrb.mxu0 %v9268_v51 }
 0x1fa   : > { %v2117_v4 = vrot.slane %v2044_v39, 7  ;;  %v10155_v39 = vpop.permute.xlu2 %10154 }
 0x1fb   : > { %8152 = vmatmul.msk.bf16.gmra.mxu0 %vm1881_vm12, %v1860_v33  ;;  %v10157_v5 = vunpack.i.h.bf16 %v10155_v39  ;;  %v10156_v33 = vunpack.i.l.bf16 %v10155_v39 }
 0x1fc   : > { %v12106_v23 = vsel %vm504_vm0, %v2116_v17, %v2117_v4  ;;  %v12109_v25 = vsel %vm504_vm0, %v2117_v4, 0.0  ;;  %v2774_v17 = vsel %vm2765_vm13, %v11771_v29, %v10152_v30 }
 0x1fd   : > { %v2295_v28 = vrot.slane %v12109_v25, 1  ;;  %v2293_v0 = vrot.slane %v12106_v23, 1  ;;  %v12127_v7 = vpack.c.bf16 %v2774_v17, %v2773_v35 }
 0x1ff   : > { %v12115_v9 = vsel %vm663_vm1, %v2292_v12, %v2293_v0  ;;  %v12118_v32 = vsel %vm663_vm1, %v2293_v0, %v2295_v28  ;;  %15045 = vst [vmem:[#allocation29_spill] sm:$0xff] %v12127_v7  ;;  %v2775_v28 = vsel %vm2765_vm13, %v11839_v57, %v10156_v33  ;;  %v2776_v0 = vsel %vm2765_vm13, %v11846_v52, %v10157_v5 }
 0x200   : > { %15043 = vst [vmem:[#allocation27_spill] sm:$0xff] %v12115_v9  ;;  %v10178_v1 = vpack.i.bf16 %v12118_v32, %v12115_v9  ;;  %v12148_v51 = vpack.c.bf16 %v2776_v0, %v2775_v28 }
 0x201   : > { %15044 = vst [vmem:[#allocation28_spill] sm:$0xff] %v12118_v32 }
 0x202   : > { %10179 = vrot.lane.b32.xlu1 %v10178_v1, %s15028_s24  ;;  %15046 = vst [vmem:[#allocation30_spill] sm:$0xff] %v12148_v51 }
 0x203   : > { %3296 = vmatmul.bf16.gmra.mxu1 %v12127_v7 }
 0x204   : > { %v1995_v48 = vpop.f32.mrf.mxu0 }
 0x205   : > { %v1996_v47 = vadd.f32 %v12029_v44, %v1995_v48 }
 0x207   : > { %v2045_v11 = vmax.f32 %v1996_v47, 0.0 }
 0x209   : > { %v2119_v30 = vrot.slane %v2045_v11, 7 }
 0x20b   : > { %v12140_v35 = vsel %vm504_vm0, 0.0, %v2119_v30 }
 0x20c   : > { %v1997_v4 = vpop.f32.mrf.mxu0  ;;  %v2297_v47 = vrot.slane %v12140_v35, 1 }
 0x20d   : > { %v1998_v49 = vadd.f32 %v12029_v44, %v1997_v4 }
 0x20f   : > { %v2046_v12 = vmax.f32 %v1998_v49, 0.0 }
 0x211   : > { %v2120_v17 = vrot.slane %v2046_v12, 7 }
 0x213   : > { %v12143_v1 = vsel %vm504_vm0, %v2119_v30, %v2120_v17  ;;  %v12146_v48 = vsel %vm504_vm0, %v2120_v17, 0.0  ;;  %3301 = vmatmul.bf16.gmra.mxu1 %v12148_v51  ;;  %v9267_v30 = vld [vmem:[%s14912_s3 + $0xe8] sm:$0xff] }
 0x214   : > { %v2300_v39 = vrot.slane %v12146_v48, 1  ;;  %v2298_v11 = vrot.slane %v12143_v1, 1  ;;  %3537 = vmatpush.bf16.msrb.mxu0 %v9267_v30 }
 0x216   : > { %v12155_v5 = vsel %vm663_vm1, %v2297_v47, %v2298_v11  ;;  %v12158_v33 = vsel %vm663_vm1, %v2298_v11, %v2300_v39  ;;  %v9272_v11 = vld [vmem:[%s14912_s3 + $0x110] sm:$0xff] }
 0x217   : > { %15047 = vst [vmem:[#allocation31_spill] sm:$0xff] %v12155_v5  ;;  %v10183_v4 = vpack.i.bf16 %v12158_v33, %v12155_v5  ;;  %3629 = vmatpush.bf16.msrb.mxu1 %v9272_v11 }
 0x218   : > { %15048 = vst [vmem:[#allocation32_spill] sm:$0xff] %v12158_v33 }
 0x219   : > { %10184 = vrot.lane.b32.xlu2 %v10183_v4, %s15028_s24 }
 0x21c   : > { %v2000_v49 = vpop.f32.mrf.mxu0 }
 0x21d   : > { %v2001_v12 = vadd.f32 %v12029_v44, %v2000_v49  ;;  %v10160_v28 = vpop.permute.xlu0 %10159 }
 0x21e   : > { %v10162_v0 = vunpack.i.h.bf16 %v10160_v28  ;;  %v10161_v17 = vunpack.i.l.bf16 %v10160_v28 }
 0x21f   : > { %v2047_v4 = vmax.f32 %v2001_v12, 0.0 }
 0x220   : > { %v2777_v47 = vsel %vm2765_vm13, %v11881_v16, %v10161_v17  ;;  %v2778_v39 = vsel %vm2765_vm13, %v11886_v45, %v10162_v0 }
 0x221   : > { %v12174_v33 = vpack.c.bf16 %v2778_v39, %v2777_v47  ;;  %v2122_v5 = vrot.slane %v2047_v4, 7  ;;  %10209 = vrot.lane.b32.xlu2 %v11753_v19, %s15014_s16  ;;  %v2327_v19 = vrot.slane %v11572_v38, 2  ;;  %s10537_s16 = scalar_lea.hbm %s14922_s13, 32 }
 0x223   : > { %15049 = vst [vmem:[#allocation33_spill] sm:$0xff] %v12174_v33  ;;  %3306 = vmatmul.bf16.gmra.mxu1 %v12174_v33  ;;  %v12179_v17 = vsel %vm504_vm0, 0.0, %v2122_v5 }
 0x224   : > { %v2002_v30 = vpop.f32.mrf.mxu0  ;;  %v2302_v12 = vrot.slane %v12179_v17, 1 }
 0x225   : > { %v2003_v49 = vadd.f32 %v12029_v44, %v2002_v30 }
 0x227   : > { %v2048_v28 = vmax.f32 %v2003_v49, 0.0 }
 0x229   : > { %v2123_v32 = vrot.slane %v2048_v28, 7 }
 0x22b   : > { %v12182_v0 = vsel %vm504_vm0, %v2122_v5, %v2123_v32  ;;  %v12185_v9 = vsel %vm504_vm0, %v2123_v32, 0.0 }
 0x22c   : > { %v2305_v47 = vrot.slane %v12185_v9, 1  ;;  %v2303_v39 = vrot.slane %v12182_v0, 1 }
 0x22e   : > { %v12191_v11 = vsel %vm663_vm1, %v2302_v12, %v2303_v39  ;;  %v12194_v4 = vsel %vm663_vm1, %v2303_v39, %v2305_v47 }
 0x22f   : > { %15050 = vst [vmem:[#allocation34_spill] sm:$0xff] %v12191_v11  ;;  %v10188_v30 = vpack.i.bf16 %v12194_v4, %v12191_v11 }
 0x230   : > { %15051 = vst [vmem:[#allocation35_spill] sm:$0xff] %v12194_v4 }
 0x231   : > { %10189 = vrot.lane.b32.xlu0 %v10188_v30, %s15028_s24 }
 0x233   : > { %v10170_v12 = vpop.permute.xlu2 %10169 }
 0x234   : > { %v10165_v5 = vpop.permute.xlu1 %10164  ;;  %v10172_v47 = vunpack.i.h.bf16 %v10170_v12  ;;  %v10171_v39 = vunpack.i.l.bf16 %v10170_v12 }
 0x235   : > { %v10167_v32 = vunpack.i.h.bf16 %v10165_v5  ;;  %v10166_v49 = vunpack.i.l.bf16 %v10165_v5  ;;  %v9266_v5 = vld [vmem:[%s14912_s3 + $0xe0] sm:$0xff] }
 0x236   : > { %3538 = vmatpush.bf16.msrb.mxu0 %v9266_v5  ;;  %v10233_v5 = vpack.i.bf16 %v11488_v56, %v11484_v13  ;;  %v12258_v11 = vpop.f32.mrf.mxu1 }
 0x237   : > { %v2779_v28 = vsel %vm2765_vm13, %v11935_v22, %v10166_v49  ;;  %v2780_v33 = vsel %vm2765_vm13, %v11946_v53, %v10167_v32  ;;  %15057 = vst [vmem:[#allocation41_spill] sm:$0xff] %v12258_v11 }
 0x238   : > { %v12203_v51 = vpack.c.bf16 %v2780_v33, %v2779_v28  ;;  %v2781_v33 = vsel %vm2765_vm13, %v11999_v43, %v10171_v39 }
 0x239   : > { %10199 = vrot.lane.b32.xlu0 %v11641_v24, %s15015_s21  ;;  %v2782_v24 = vsel %vm2765_vm13, %v12002_v50, %v10172_v47 }
 0x23a   : > { %15052 = vst [vmem:[#allocation36_spill] sm:$0xff] %v12203_v51  ;;  %3311 = vmatmul.bf16.gmra.mxu1 %v12203_v51  ;;  %v12218_v28 = vpack.c.bf16 %v2782_v24, %v2781_v33 }
 0x23c   : > { %15053 = vst [vmem:[#allocation37_spill] sm:$0xff] %v12218_v28 }
 0x241   : > { %10214 = vrot.lane.b32.xlu0 %v11741_v54, %s15020_s20  ;;  %v2005_v30 = vpop.f32.mrf.mxu0  ;;  %s8058_s20 = sshll.u32 %s433_s15, 4  ;;  %s8059_s20 = int_to_ptr.vmem [resolvable:$true] %s8058_s20 }
 0x242   : > { %v2006_v32 = vadd.f32 %v12029_v44, %v2005_v30 }
 0x244   : > { %v2049_v49 = vmax.f32 %v2006_v32, 0.0  ;;  %v2328_v32 = vrot.slane %v11580_v62, 2 }
 0x246   : > { %v2125_v12 = vrot.slane %v2049_v49, 7 }
 0x248   : > { %v12227_v39 = vsel %vm504_vm0, 0.0, %v2125_v12 }
 0x249   : > { %1458 = vrot.lane.b32.xlu0 %v10725_v8, %s15016_s22  ;;  %v2007_v54 = vpop.f32.mrf.mxu0  ;;  %v2330_v8 = vrot.slane %v11657_v26, 2  ;;  %s8057_s22 = scalar_lea.hbm %s14922_s13, %s9490_s27 }
 0x24a   : > { %3316 = vmatmul.bf16.gmra.mxu1 %v12218_v28  ;;  %v2008_v4 = vadd.f32 %v12029_v44, %v2007_v54 }
 0x24c   : > { %v2050_v30 = vmax.f32 %v2008_v4, 0.0  ;;  %v2307_v4 = vrot.slane %v12227_v39, 1 }
 0x24e   : > { %v2126_v47 = vrot.slane %v2050_v30, 7 }
 0x250   : > { %v12234_v33 = vsel %vm504_vm0, %v2125_v12, %v2126_v47  ;;  %v12237_v24 = vsel %vm504_vm0, %v2126_v47, 0.0  ;;  %v12251_v12 = vsel %vm741_vm2, %v2327_v19, %v2328_v32  ;;  %v12254_v47 = vsel %vm741_vm2, %v2328_v32, %v2330_v8 }
 0x251   : > { %10234 = vrot.lane.b32.xlu0 %v10233_v5, %s15028_s24  ;;  %v2310_v49 = vrot.slane %v12237_v24, 1  ;;  %v2308_v54 = vrot.slane %v12234_v33, 1  ;;  %15056 = vst [vmem:[#allocation40_spill] sm:$0xff] %v12254_v47  ;;  %v10263_v32 = vpack.i.bf16 %v11771_v29, %v11765_v3  ;;  %v2343_v8 = vrot.slane %v11846_v52, 2 }
 0x253   : > { %v12245_v30 = vsel %vm663_vm1, %v2307_v4, %v2308_v54  ;;  %v12248_v26 = vsel %vm663_vm1, %v2308_v54, %v2310_v49  ;;  %v10248_v4 = vpack.i.bf16 %v12254_v47, %v12251_v12 }
 0x254   : > { %15054 = vst [vmem:[#allocation38_spill] sm:$0xff] %v12245_v30  ;;  %v10193_v5 = vpack.i.bf16 %v12248_v26, %v12245_v30 }
 0x255   : > { %15055 = vst [vmem:[#allocation39_spill] sm:$0xff] %v12248_v26  ;;  %v12271_v26 = vpop.f32.mrf.mxu1 }
 0x256   : > { %10194 = vrot.lane.b32.xlu1 %v10193_v5, %s15028_s24  ;;  %v2345_v5 = vrot.slane %v11849_v42, 2  ;;  %15058 = vst [vmem:[#allocation42_spill] sm:$0xff] %v12271_v26 }
 0x258   : > { %v12292_v18 = vsel %vm741_vm2, %v2343_v8, %v2345_v5 }
 0x259   : > { %10249 = vrot.lane.b32.xlu0 %v10248_v4, %s15028_s24  ;;  %v2010_v49 = vpop.f32.mrf.mxu0  ;;  %v9265_v4 = vld [vmem:[%s14912_s3 + $0xd8] sm:$0xff]  ;;  %15060 = vst [vmem:[#allocation44_spill] sm:$0xff] %v12292_v18 }
 0x25a   : > { %v2011_v54 = vadd.f32 %v12029_v44, %v2010_v49  ;;  %v2342_v49 = vrot.slane %v11839_v57, 2  ;;  %3539 = vmatpush.bf16.msrb.mxu0 %v9265_v4 }
 0x25c   : > { %v2051_v19 = vmax.f32 %v2011_v54, 0.0  ;;  %v12289_v7 = vsel %vm741_vm2, %v2342_v49, %v2343_v8 }
 0x25d   : > { %v10175_v28 = vpop.permute.xlu0 %10174 }
 0x25e   : > { %10204 = vrot.lane.b32.xlu1 %v11650_v10, %s15017_s23  ;;  %v10177_v30 = vunpack.i.h.bf16 %v10175_v28  ;;  %v10176_v11 = vunpack.i.l.bf16 %v10175_v28  ;;  %v9271_v10 = vld [vmem:[%s14912_s3 + $0x108] sm:$0xff]  ;;  %v2128_v28 = vrot.slane %v2051_v19, 7  ;;  %v12302_v19 = vpop.f32.mrf.mxu1 }
 0x25f   : > { %3630 = vmatpush.bf16.msrb.mxu1 %v9271_v10  ;;  %15061 = vst [vmem:[#allocation45_spill] sm:$0xff] %v12302_v19  ;;  %v2375_v19 = vrot.slane %v12146_v48, 2 }
 0x260   : > { %v2783_v42 = vsel %vm2765_vm13, %v12052_v21, %v10176_v11  ;;  %v2784_v26 = vsel %vm2765_vm13, %v12056_v46, %v10177_v30  ;;  %v12296_v11 = vsel %vm504_vm0, 0.0, %v2128_v28 }
 0x261   : > { %10264 = vrot.lane.b32.xlu0 %v10263_v32, %s15028_s24  ;;  %v2012_v54 = vpop.f32.mrf.mxu0  ;;  %v12286_v51 = vpack.c.bf16 %v2784_v26, %v2783_v42  ;;  %v10278_v26 = vpack.i.bf16 %v12292_v18, %v12289_v7  ;;  %v2312_v5 = vrot.slane %v12296_v11, 1  ;;  %v2325_v42 = vrot.slane %v11568_v60, 2 }
 0x262   : > { %v2013_v32 = vadd.f32 %v12029_v44, %v2012_v54  ;;  %v2357_v60 = vrot.slane %v11999_v43, 2 }
 0x263   : > { %15059 = vst [vmem:[#allocation43_spill] sm:$0xff] %v12286_v51  ;;  %3321 = vmatmul.bf16.gmra.mxu1 %v12286_v51 }
 0x264   : > { %v2052_v47 = vmax.f32 %v2013_v32, 0.0  ;;  %v10293_v32 = vpack.i.bf16 %v11946_v53, %v11935_v22 }
 0x266   : > { %v2129_v30 = vrot.slane %v2052_v47, 7  ;;  %10219 = vrot.lane.b32.xlu1 %v11798_v2, %s15013_s30  ;;  %s15067_s30 = smov 18  }
 0x268   : > { %v12305_v4 = vsel %vm504_vm0, %v2128_v28, %v2129_v30  ;;  %v12308_v8 = vsel %vm504_vm0, %v2129_v30, 0.0  ;;  %v2323_v28 = vrot.slane %v11488_v56, 2  ;;  %v2322_v30 = vrot.slane %v11484_v13, 2 }
 0x269   : > { %10279 = vrot.lane.b32.xlu0 %v10278_v26, %s15028_s24  ;;  %v2315_v47 = vrot.slane %v12308_v8, 1  ;;  %v2313_v10 = vrot.slane %v12305_v4, 1  ;;  %v2358_v26 = vrot.slane %v12002_v50, 2 }
 0x26a   : > { %v12337_v56 = vsel %vm741_vm2, %v2322_v30, %v2323_v28 }
 0x26b   : > { %v12315_v2 = vsel %vm663_vm1, %v2312_v5, %v2313_v10  ;;  %v12318_v49 = vsel %vm663_vm1, %v2313_v10, %v2315_v47  ;;  %v2360_v5 = vrot.slane %v12005_v58, 2  ;;  %v12334_v47 = vpop.f32.mrf.mxu1  ;;  %v12340_v10 = vsel %vm741_vm2, %v2323_v28, %v2325_v42 }
 0x26c   : > { %15062 = vst [vmem:[#allocation46_spill] sm:$0xff] %v12315_v2  ;;  %v10223_v54 = vpack.i.bf16 %v12318_v49, %v12315_v2  ;;  %v10238_v58 = vpack.i.bf16 %v12340_v10, %v12337_v56  ;;  %v15068_v42 = vmov 0.0  }
 0x26d   : > { %15063 = vst [vmem:[#allocation47_spill] sm:$0xff] %v12318_v49  ;;  %v12346_v13 = vsel %vm741_vm2, %v2358_v26, %v2360_v5 }
 0x26e   : > { %10224 = vrot.lane.b32.xlu2 %v10223_v54, %s15028_s24  ;;  %1551 = vrot.lane.b32.xlu1 %v10756_v27, %s15019_s17  ;;  %15064 = vst [vmem:[#allocation48_spill] sm:$0xff] %v12334_v47  ;;  %v12343_v54 = vsel %vm741_vm2, %v2357_v60, %v2358_v26  ;;  %v2340_v47 = vrot.slane %v11774_v55, 2 }
 0x26f   : > { %15065 = vst [vmem:[#allocation49_spill] sm:$0xff] %v12343_v54  ;;  %v10308_v30 = vpack.i.bf16 %v12346_v13, %v12343_v54 }
 0x270   : > { %15066 = vst [vmem:[#allocation50_spill] sm:$0xff] %v12346_v13 }
 0x271   : > { %10294 = vrot.lane.b32.xlu0 %v10293_v32, %s15028_s24 }
 0x274   : > { %v10180_v49 = vpop.permute.xlu1 %10179 }
 0x275   : > { %v10182_v32 = vunpack.i.h.bf16 %v10180_v49  ;;  %v10181_v2 = vunpack.i.l.bf16 %v10180_v49  ;;  %v12362_v49 = vpop.f32.mrf.mxu1 }
 0x276   : > { %10239 = vrot.lane.b32.xlu1 %v10238_v58, %s15028_s24  ;;  %1365 = vrot.lane.b32.xlu2 %v15068_v42, %s15067_s30  ;;  %15070 = vst [vmem:[#allocation52_spill] sm:$0xff] %v12362_v49  ;;  %v9264_v42 = vld [vmem:[%s14912_s3 + $0xd0] sm:$0xff]  ;;  %v2373_v49 = vrot.slane %v12143_v1, 2  ;;  %s8060_s30 = sshll.u32 %s8057_s22, 4  ;;  %s8061_s30 = int_to_ptr.hbm [resolvable:$true] %s8060_s30 }
 0x277   : > { %v2785_v28 = vsel %vm2765_vm13, %v12102_v36, %v10181_v2  ;;  %v2786_v26 = vsel %vm2765_vm13, %v12106_v23, %v10182_v32  ;;  %v2338_v2 = vrot.slane %v11771_v29, 2  ;;  %v10253_v32 = vpack.i.bf16 %v11674_v14, %v11669_v31  ;;  %3540 = vmatpush.bf16.msrb.mxu0 %v9264_v42  ;;  %s10531_s23 = sshra.s32 %s8061_s30, 4  ;;  %s10532_s23 = int_to_ptr.hbm [resolvable:$true] %s10531_s23 }
 0x278   : > { %v2015_v5 = vpop.f32.mrf.mxu0  ;;  %v12360_v60 = vpack.c.bf16 %v2786_v26, %v2785_v28  ;;  %v2337_v28 = vrot.slane %v11765_v3, 2  ;;  %v10185_v26 = vpop.permute.xlu2 %10184  ;;  %v2372_v29 = vrot.slane %v12140_v35, 2  ;;  %v12394_v18 = vsel %vm741_vm2, %v2373_v49, %v2375_v19  ;;  %s10533_s17 = scalar_lea.hbm %s10532_s23, 16  ;;  %p10538_p0 = scmp.lt.s32.totalorder %s10532_s23, %s14922_s13 }
 0x279   : > { %10309 = vrot.lane.b32.xlu0 %v10308_v30, %s15028_s24  ;;  %v2016_v58 = vadd.f32 %v12029_v44, %v2015_v5  ;;  %v10323_v5 = vpack.i.bf16 %v12106_v23, %v12102_v36  ;;  %v12385_v3 = vsel %vm741_vm2, %v2338_v2, %v2340_v47  ;;  %p10534_p11 = scmp.ne.s32.totalorder %s10532_s23, %s10533_s17  ;;  %p10539_p1 = scmp.lt.s32.totalorder %s10537_s16, %s10533_s17 }
 0x27a   : > { %15069 = vst [vmem:[#allocation51_spill] sm:$0xff] %v12360_v60  ;;  %3326 = vmatmul.bf16.gmra.mxu1 %v12360_v60  ;;  %v12382_v42 = vsel %vm741_vm2, %v2337_v28, %v2338_v2  ;;  %v12391_v48 = vsel %vm741_vm2, %v2372_v29, %v2373_v49 }
 0x27b   : > { %v2053_v30 = vmax.f32 %v2016_v58, 0.0  ;;  %v10187_v58 = vunpack.i.h.bf16 %v10185_v26  ;;  %v10268_v28 = vpack.i.bf16 %v12385_v3, %v12382_v42  ;;  %p10535_p12 = pnand %p10534_p11, %p10702_p5  ;;  %p10540_p2 = por %p10539_p1, %p10538_p0 }
 0x27d   : > { %v2131_v60 = vrot.slane %v2053_v30, 7  ;;  %v12388_v13 = vpop.f32.mrf.mxu1  ;;  %p10536_p13 = pneg %p10535_p12 }
 0x27e   : > { %10254 = vrot.lane.b32.xlu1 %v10253_v32, %s15028_s24  ;;  %v10186_v32 = vunpack.i.l.bf16 %v10185_v26 }
 0x27f   : > { %v12399_v47 = vsel %vm504_vm0, 0.0, %v2131_v60  ;;  %p10541_p3 = pnand %p10540_p2, %p10536_p13 }
 0x280   : > { %v2017_v55 = vpop.f32.mrf.mxu0  ;;  %v2787_v30 = vsel %vm2765_vm13, %v12140_v35, %v10186_v32  ;;  %v2317_v26 = vrot.slane %v12399_v47, 1 }
 0x281   : > { %10324 = vrot.lane.b32.xlu0 %v10323_v5, %s15028_s24  ;;  %v2018_v51 = vadd.f32 %v12029_v44, %v2017_v55  ;;  %v2788_v44 = vsel %vm2765_vm13, %v12143_v1, %v10187_v58  ;;  %v9253_v58 = vld [vmem:[%s14912_s3 + $0x78] sm:$0xff] }
 0x282   : > { %v12417_v5 = vpack.c.bf16 %v2788_v44, %v2787_v30  ;;  %3357 = vmatpush.bf16.msra.mxu2 %v9253_v58  ;;  %v2355_v30 = vrot.slane %v11949_v6, 2  ;;  %v9251_v6 = vld [vmem:[%s14912_s3 + $0x68] sm:$0xff]  ;;  %v2387_v58 = vrot.slane %v12296_v11, 2 }
 0x283   : > { %v2054_v54 = vmax.f32 %v2018_v51, 0.0  ;;  %v10338_v51 = vpack.i.bf16 %v12394_v18, %v12391_v48 }
 0x285   : > { %v2132_v2 = vrot.slane %v2054_v54, 7  ;;  %v12436_v44 = vpop.f32.mrf.mxu1 }
 0x286   : > { %10269 = vrot.lane.b32.xlu1 %v10268_v28, %s15028_s24  ;;  %v10283_v28 = vpack.i.bf16 %v11886_v45, %v11881_v16 }
 0x287   : > { %v12409_v19 = vsel %vm504_vm0, %v2131_v60, %v2132_v2  ;;  %v12412_v49 = vsel %vm504_vm0, %v2132_v2, 0.0  ;;  %v2353_v2 = vrot.slane %v11946_v53, 2  ;;  %v2390_v53 = vrot.slane %v12308_v8, 2 }
 0x288   : > { %v2320_v54 = vrot.slane %v12412_v49, 1  ;;  %v2318_v29 = vrot.slane %v12409_v19, 1 }
 0x289   : > { %10339 = vrot.lane.b32.xlu0 %v10338_v51, %s15028_s24  ;;  %v9252_v51 = vld [vmem:[%s14912_s3 + $0x70] sm:$0xff] }
 0x28a   : > { %3331 = vmatmul.bf16.gmra.mxu1 %v12417_v5  ;;  %v12422_v55 = vsel %vm663_vm1, %v2317_v26, %v2318_v29  ;;  %v12425_v60 = vsel %vm663_vm1, %v2318_v29, %v2320_v54  ;;  %v10353_v26 = vpack.i.bf16 %v12234_v33, %v12227_v39  ;;  %v2352_v54 = vrot.slane %v11935_v22, 2  ;;  %3358 = vmatpush.bf16.msra.mxu2 %v9252_v51 }
 0x28b   : > { %15071 = vst [vmem:[#allocation53_spill] sm:$0xff] %v12422_v55  ;;  %v10228_v32 = vpack.i.bf16 %v12425_v60, %v12422_v55  ;;  %v2388_v29 = vrot.slane %v12305_v4, 2  ;;  %v10243_v22 = vpack.i.bf16 %v11580_v62, %v11572_v38  ;;  %v9250_v38 = vld [vmem:[%s14912_s3 + $0x60] sm:$0xff]  ;;  %v2332_v62 = vrot.slane %v11669_v31, 2  ;;  %v9249_v31 = vld [vmem:[%s14912_s3 + $0x58] sm:$0xff] }
 0x28c   : > { %15072 = vst [vmem:[#allocation54_spill] sm:$0xff] %v12425_v60  ;;  %v2335_v60 = vrot.slane %v11705_v63, 2 }
 0x28d   : > { %10229 = vrot.lane.b32.xlu2 %v10228_v32, %s15028_s24  ;;  %v12454_v32 = vsel %vm741_vm2, %v2352_v54, %v2353_v2  ;;  %v12462_v8 = vsel %vm741_vm2, %v2387_v58, %v2388_v29  ;;  %v12465_v51 = vsel %vm741_vm2, %v2388_v29, %v2390_v53  ;;  %v9263_v29 = vld [vmem:[%s14912_s3 + $0xc8] sm:$0xff]  ;;  %v2370_v58 = vrot.slane %v12109_v25, 2 }
 0x28e   : > { %10284 = vrot.lane.b32.xlu1 %v10283_v28, %s15028_s24  ;;  %v12457_v28 = vsel %vm741_vm2, %v2353_v2, %v2355_v30  ;;  %3359 = vmatpush.bf16.msra.mxu2 %v9251_v6  ;;  %v10368_v2 = vpack.i.bf16 %v12465_v51, %v12462_v8  ;;  %v10313_v6 = vpack.i.bf16 %v12056_v46, %v12052_v21 }
 0x28f   : > { %v10298_v54 = vpack.i.bf16 %v12457_v28, %v12454_v32  ;;  %3541 = vmatpush.bf16.msrb.mxu0 %v9263_v29 }
 0x291   : > { %10354 = vrot.lane.b32.xlu0 %v10353_v26, %s15028_s24  ;;  %v2333_v26 = vrot.slane %v11674_v14, 2  ;;  %v12479_v14 = vpop.f32.mrf.mxu1 }
 0x292   : > { %3360 = vmatpush.bf16.msra.mxu2 %v9250_v38 }
 0x293   : > { %v12483_v63 = vsel %vm741_vm2, %v2332_v62, %v2333_v26  ;;  %v12486_v30 = vsel %vm741_vm2, %v2333_v26, %v2335_v60  ;;  %v2368_v60 = vrot.slane %v12106_v23, 2  ;;  %v9270_v26 = vld [vmem:[%s14912_s3 + $0x100] sm:$0xff]  ;;  %v9247_v23 = vld [vmem:[%s14912_s3 + $0x48] sm:$0xff] }
 0x294   : > { %v10258_v53 = vpack.i.bf16 %v12486_v30, %v12483_v63  ;;  %3631 = vmatpush.bf16.msrb.mxu1 %v9270_v26 }
 0x295   : > { %10244 = vrot.lane.b32.xlu2 %v10243_v22, %s15028_s24  ;;  %v9248_v22 = vld [vmem:[%s14912_s3 + $0x50] sm:$0xff]  ;;  %v12518_v62 = vsel %vm741_vm2, %v2368_v60, %v2370_v58 }
 0x296   : > { %10299 = vrot.lane.b32.xlu1 %v10298_v54, %s15028_s24  ;;  %3361 = vmatpush.bf16.msra.mxu2 %v9249_v31  ;;  %v2367_v54 = vrot.slane %v12102_v36, 2  ;;  %v10273_v36 = vpack.i.bf16 %v11846_v52, %v11839_v57  ;;  %v9246_v57 = vld [vmem:[%s14912_s3 + $0x40] sm:$0xff]  ;;  %v2347_v52 = vrot.slane %v11881_v16, 2 }
 0x298   : > { %v12515_v38 = vsel %vm741_vm2, %v2367_v54, %v2368_v60 }
 0x299   : > { %10369 = vrot.lane.b32.xlu0 %v10368_v2, %s15028_s24  ;;  %v12512_v25 = vpop.f32.mrf.mxu1 }
 0x29a   : > { %3362 = vmatpush.bf16.msra.mxu2 %v9248_v22  ;;  %v10328_v22 = vpack.i.bf16 %v12518_v62, %v12515_v38 }
 0x29d   : > { %10259 = vrot.lane.b32.xlu2 %v10258_v53, %s15028_s24  ;;  %v2348_v53 = vrot.slane %v11886_v45, 2 }
 0x29e   : > { %10314 = vrot.lane.b32.xlu1 %v10313_v6, %s15028_s24  ;;  %v2350_v6 = vrot.slane %v11889_v61, 2  ;;  %3363 = vmatpush.bf16.msra.mxu2 %v9247_v23 }
 0x29f   : > { %v12540_v61 = vsel %vm741_vm2, %v2347_v52, %v2348_v53  ;;  %v2365_v52 = vrot.slane %v12059_v20, 2 }
 0x2a0   : > { %v12543_v26 = vsel %vm741_vm2, %v2348_v53, %v2350_v6  ;;  %v9261_v53 = vld [vmem:[%s14912_s3 + $0xb8] sm:$0xff] }
 0x2a1   : > { %v12547_v23 = vpop.f32.mrf.mxu1  ;;  %v10288_v16 = vpack.i.bf16 %v12543_v26, %v12540_v61  ;;  %3446 = vmatpush.bf16.msra.mxu3 %v9261_v53  ;;  %v9262_v53 = vld [vmem:[%s14912_s3 + $0xc0] sm:$0xff] }
 0x2a2   : > { %3364 = vmatpush.bf16.msra.mxu2 %v9246_v57  ;;  %v2363_v57 = vrot.slane %v12056_v46, 2  ;;  %3542 = vmatpush.bf16.msrb.mxu0 %v9262_v53 }
 0x2a3   : > { %v10190_v2 = vpop.permute.xlu0 %10189 }
 0x2a4   : > { %v10192_v31 = vunpack.i.h.bf16 %v10190_v2  ;;  %v10191_v29 = vunpack.i.l.bf16 %v10190_v2  ;;  %v10343_v2 = vpack.i.bf16 %v12182_v0, %v12179_v17  ;;  %v12590_v20 = vsel %vm741_vm2, %v2363_v57, %v2365_v52  ;;  %v9256_v52 = vld [vmem:[%s14912_s3 + $0x90] sm:$0xff] }
 0x2a5   : > { %10274 = vrot.lane.b32.xlu2 %v10273_v36, %s15028_s24  ;;  %v2382_v36 = vrot.slane %v12227_v39, 2 }
 0x2a6   : > { %v2789_v60 = vsel %vm2765_vm13, %v12179_v17, %v10191_v29  ;;  %v2790_v58 = vsel %vm2765_vm13, %v12182_v0, %v10192_v31  ;;  %10329 = vrot.lane.b32.xlu1 %v10328_v22, %s15028_s24  ;;  %v2383_v31 = vrot.slane %v12234_v33, 2  ;;  %v2385_v29 = vrot.slane %v12237_v24, 2 }
 0x2a7   : > { %v12536_v45 = vpack.c.bf16 %v2790_v58, %v2789_v60  ;;  %v10303_v24 = vpack.i.bf16 %v12002_v50, %v11999_v43  ;;  %v9260_v58 = vld [vmem:[%s14912_s3 + $0xb0] sm:$0xff]  ;;  %v9259_v43 = vld [vmem:[%s14912_s3 + $0xa8] sm:$0xff]  ;;  %v2362_v50 = vrot.slane %v12052_v21, 2  ;;  %v10373_v21 = vpack.i.bf16 %v12409_v19, %v12399_v47 }
 0x2a8   : > { %v12562_v6 = vsel %vm741_vm2, %v2382_v36, %v2383_v31  ;;  %v12565_v22 = vsel %vm741_vm2, %v2383_v31, %v2385_v29  ;;  %3447 = vmatpush.bf16.msra.mxu3 %v9260_v58  ;;  %v9258_v31 = vld [vmem:[%s14912_s3 + $0xa0] sm:$0xff] }
 0x2a9   : > { %15073 = vst [vmem:[#allocation55_spill] sm:$0xff] %v12536_v45  ;;  %3336 = vmatmul.bf16.gmra.mxu1 %v12536_v45  ;;  %v12587_v46 = vsel %vm741_vm2, %v2362_v50, %v2363_v57  ;;  %v10333_v50 = vpack.i.bf16 %v12143_v1, %v12140_v35  ;;  %v10210_v1 = vpop.permute.xlu2 %10209 }
 0x2aa   : > { %v10318_v36 = vpack.i.bf16 %v12590_v20, %v12587_v46 }
 0x2ab   : > { %v12545_v54 = vpop.permute.xlu0 %10199 }
 0x2ac   : > { %3448 = vmatpush.bf16.msra.mxu3 %v9259_v43 }
 0x2ad   : > { %10289 = vrot.lane.b32.xlu2 %v10288_v16, %s15028_s24  ;;  %v10358_v16 = vpack.i.bf16 %v12565_v22, %v12562_v6 }
 0x2ae   : > { %10344 = vrot.lane.b32.xlu1 %v10343_v2, %s15028_s24  ;;  %v12578_v2 = vpop.f32.mrf.mxu1 }
 0x2b0   : > { %3449 = vmatpush.bf16.msra.mxu3 %v9258_v31  ;;  %v2378_v31 = vrot.slane %v12182_v0, 2 }
 0x2b3   : > { %v12567_v60 = vpop.permute.xlu0 %10214 }
 0x2b5   : > { %10304 = vrot.lane.b32.xlu2 %v10303_v24, %s15028_s24  ;;  %v9257_v24 = vld [vmem:[%s14912_s3 + $0x98] sm:$0xff] }
 0x2b6   : > { %10359 = vrot.lane.b32.xlu1 %v10358_v16, %s15028_s24  ;;  %v12609_v58 = vpop.f32.mrf.mxu1  ;;  %3450 = vmatpush.bf16.msra.mxu3 %v9257_v24  ;;  %v9255_v24 = vld [vmem:[%s14912_s3 + $0x88] sm:$0xff] }
 0x2ba   : > { %3451 = vmatpush.bf16.msra.mxu3 %v9256_v52 }
 0x2bb   : > { %v12595_v29 = vpop.permute.xlu0 %1458 }
 0x2bd   : > { %10319 = vrot.lane.b32.xlu2 %v10318_v36, %s15028_s24  ;;  %v2380_v36 = vrot.slane %v12185_v9, 2 }
 0x2be   : > { %10374 = vrot.lane.b32.xlu1 %v10373_v21, %s15028_s24  ;;  %3452 = vmatpush.bf16.msra.mxu3 %v9255_v24 }
 0x2c3   : > { %v10235_v57 = vpop.permute.xlu0 %10234 }
 0x2c4   : > { %v10237_v16 = vunpack.i.h.bf16 %v10235_v57  ;;  %v10236_v43 = vunpack.i.l.bf16 %v10235_v57  ;;  %v2377_v57 = vrot.slane %v12179_v17, 2 }
 0x2c5   : > { %10334 = vrot.lane.b32.xlu2 %v10333_v50, %s15028_s24  ;;  %v12631_v50 = vsel %vm741_vm2, %v2378_v31, %v2380_v36  ;;  %v10202_v36 = vunpack.i.h.bf16 %v12545_v54 }
 0x2c6   : > { %v2797_v21 = vsel %vm2765_vm13, %v10756_v27, %v10236_v43  ;;  %v2798_v53 = vsel %vm2765_vm13, %v10756_v27, %v10237_v16  ;;  %v12628_v9 = vsel %vm741_vm2, %v2377_v57, %v2378_v31  ;;  %v12633_v43 = vpop.f32.mrf.mxu1  ;;  %v9254_v27 = vld [vmem:[%s14912_s3 + $0x80] sm:$0xff]  ;;  %v10201_v57 = vunpack.i.l.bf16 %v12545_v54 }
 0x2c7   : > { %v2864_v35 = vpack.c.bf16 %v2798_v53, %v2797_v21  ;;  %v10348_v17 = vpack.i.bf16 %v12631_v50, %v12628_v9  ;;  %3453 = vmatpush.bf16.msra.mxu3 %v9254_v27  ;;  %v10363_v54 = vpack.i.bf16 %v12305_v4, %v12296_v11  ;;  %v2393_v27 = vrot.slane %v12409_v19, 2 }
 0x2c8   : > { %v10195_v0 = vpop.permute.xlu1 %10194 }
 0x2c9   : > { %3365 = vmatmul.bf16.vlgmr.msra.gmra.mxu2 %v2864_v35  ;;  %v10197_v16 = vunpack.i.h.bf16 %v10195_v0  ;;  %v10196_v52 = vunpack.i.l.bf16 %v10195_v0  ;;  %v1615_v35 = vsel %vm1584_vm4, %v11586_v40, %v10202_v36 }
 0x2cb   : > { %v2791_v21 = vsel %vm2765_vm13, %v12227_v39, %v10196_v52  ;;  %v2792_v53 = vsel %vm2765_vm13, %v12234_v33, %v10197_v16  ;;  %v1614_v39 = vsel %vm1584_vm4, %v11589_v15, %v10201_v57  ;;  %v10225_v16 = vpop.permute.xlu2 %10224  ;;  %v2392_v57 = vrot.slane %v12399_v47, 2 }
 0x2cc   : > { %v12644_v31 = vpack.c.bf16 %v2792_v53, %v2791_v21  ;;  %v10212_v21 = vunpack.i.h.bf16 %v10210_v1  ;;  %v10211_v53 = vunpack.i.l.bf16 %v10210_v1  ;;  %v10227_v36 = vunpack.i.h.bf16 %v10225_v16 }
 0x2cd   : > { %10349 = vrot.lane.b32.xlu2 %v10348_v17, %s15028_s24  ;;  %v2395_v17 = vrot.slane %v12412_v49, 2  ;;  %v10226_v15 = vunpack.i.l.bf16 %v10225_v16  ;;  %v10216_v1 = vunpack.i.l.bf16 %v12567_v60  ;;  %v12669_v49 = vsel %vm741_vm2, %v2392_v57, %v2393_v27 }
 0x2ce   : > { %15074 = vst [vmem:[#allocation56_spill] sm:$0xff] %v12644_v31  ;;  %3341 = vmatmul.bf16.gmra.mxu1 %v12644_v31  ;;  %v12654_v52 = vpop.f32.mrf.mxu1  ;;  %v2794_v16 = vsel %vm2765_vm13, %v12305_v4, %v10227_v36  ;;  %vm3969_vm4 = vcmask 517120  }
 0x2cf   : > { %15075 = vst [vmem:[#allocation57_spill] sm:$0xff] %v12654_v52 }
 0x2d0   : > { %v10205_v24 = vpop.permute.xlu1 %10204  ;;  %15076 = vst [vmem:[#allocation58_spill] sm:$0xff] %v12669_v49 }
 0x2d1   : > { %v10207_v0 = vunpack.i.h.bf16 %v10205_v24  ;;  %v10206_v33 = vunpack.i.l.bf16 %v10205_v24  ;;  %v10217_v24 = vunpack.i.h.bf16 %v12567_v60 }
 0x2d3   : > { %v1647_v55 = vsel %vm1616_vm5, %v1615_v35, %v10207_v0  ;;  %v1646_v40 = vsel %vm1616_vm5, %v1614_v39, %v10206_v33  ;;  %v12672_v35 = vsel %vm741_vm2, %v2393_v27, %v2395_v17  ;;  %v2793_v33 = vsel %vm2765_vm13, %v12296_v11, %v10226_v15  ;;  %v1366_v60 = vpop.permute.xlu2 %1365 }
 0x2d4   : > { %v1679_v52 = vsel %vm1648_vm6, %v1646_v40, %v10211_v53  ;;  %v1680_v31 = vsel %vm1648_vm6, %v1647_v55, %v10212_v21  ;;  %15077 = vst [vmem:[#allocation59_spill] sm:$0xff] %v12672_v35  ;;  %v12686_v17 = vpack.c.bf16 %v2794_v16, %v2793_v33  ;;  %vm4610_vm5 = vcmask 1042434  }
 0x2d5   : > { %10364 = vrot.lane.b32.xlu2 %v10363_v54, %s15028_s24  ;;  %v1712_v53 = vsel %vm1681_vm7, %v1679_v52, %v10216_v1  ;;  %v1713_v55 = vsel %vm1681_vm7, %v1680_v31, %v10217_v24  ;;  %vm4612_vm6 = vcmask 1043459   ;;  %vm4614_vm7 = vcmask 1044484  }
 0x2d6   : > { %v12680_v21 = vpop.f32.mrf.mxu1 }
 0x2d8   : > { %v10220_v45 = vpop.permute.xlu1 %10219 }
 0x2d9   : > { %v10222_v39 = vunpack.i.h.bf16 %v10220_v45  ;;  %v10221_v0 = vunpack.i.l.bf16 %v10220_v45  ;;  %v10378_v45 = vpack.i.bf16 %v12672_v35, %v12669_v49 }
 0x2db   : > { %v1745_v54 = vsel %vm1714_vm8, %v1712_v53, %v10221_v0  ;;  %v1746_v27 = vsel %vm1714_vm8, %v1713_v55, %v10222_v39  ;;  %vm4616_vm8 = vcmask 1045509  }
 0x2dc   : > { %v1778_v11 = vsel %vm1747_vm9, %v1745_v54, %v1366_v60  ;;  %v1779_v4 = vsel %vm1747_vm9, %v1746_v27, %v1366_v60  ;;  %vm4618_vm9 = vcmask 1046534  }
 0x2dd   : > { %10379 = vrot.lane.b32.xlu2 %v10378_v45, %s15028_s24  ;;  %v1811_v52 = vsel %vm1780_vm10, %v1778_v11, %v12595_v29  ;;  %v1812_v40 = vsel %vm1780_vm10, %v1779_v4, %v12595_v29  ;;  %vm4620_vm10 = vcmask 1047559  }
 0x2de   : > { %3346 = vmatmul.bf16.gmra.mxu1 %v12686_v17  ;;  %v12699_v24 = vpop.f32.mrf.mxu1 }
 0x2e0   : > { %v1552_v31 = vpop.permute.xlu1 %1551 }
 0x2e1   : > { %v1844_v36 = vsel %vm1813_vm11, %v1811_v52, %v1552_v31  ;;  %v1845_v15 = vsel %vm1813_vm11, %v1812_v40, %v1552_v31  ;;  %v10250_v40 = vpop.permute.xlu0 %10249  ;;  %vm10592_vm11 = vmmov 1  }
 0x2e2   : > { %v1861_v57 = vpack.c.bf16 %v1845_v15, %v1844_v36  ;;  %v10251_v36 = vunpack.i.l.bf16 %v10250_v40 }
 0x2e4   : > { %8153 = vmatmul.msk.bf16.gmra.mxu0 %vm1881_vm12, %v1861_v57  ;;  %vm13419_vm12 = vmpackc.low %vm10592_vm11, %vm11913_vm14 }
 0x2e6   : > { %v12712_v11 = vpop.f32.mrf.mxu1 }
 0x2e7   : > { %v10230_v1 = vpop.permute.xlu2 %10229  ;;  %15078 = vst [vmem:[#allocation60_spill] sm:$0xff] %v12712_v11 }
 0x2e8   : > { %v10232_v39 = vunpack.i.h.bf16 %v10230_v1  ;;  %v10231_v0 = vunpack.i.l.bf16 %v10230_v1  ;;  %v10240_v33 = vpop.permute.xlu1 %10239  ;;  %v2831_v1 = vsel %vm2765_vm13, %v11618_v37, %v10251_v36  ;;  %v2872_v36 = vpack.c.bf16 %v12486_v30, %v12483_v63 }
 0x2e9   : > { %v10242_v16 = vunpack.i.h.bf16 %v10240_v33  ;;  %v10241_v60 = vunpack.i.l.bf16 %v10240_v33 }
 0x2ea   : > { %v2795_v53 = vsel %vm2765_vm13, %v12399_v47, %v10231_v0  ;;  %v2796_v29 = vsel %vm2765_vm13, %v12409_v19, %v10232_v39  ;;  %v15080_v39 = vld [vmem:[#allocation8_spill] sm:$0xff] }
 0x2eb   : > { %v12705_v55 = vpack.c.bf16 %v2796_v29, %v2795_v53  ;;  %v2829_v54 = vsel %vm2765_vm13, %v11508_v59, %v10241_v60  ;;  %v2830_v27 = vsel %vm2765_vm13, %v11610_v41, %v10242_v16  ;;  %v10252_v41 = vunpack.i.h.bf16 %v10250_v40 }
 0x2ec   : > { %v2865_v45 = vpack.c.bf16 %v2830_v27, %v2829_v54  ;;  %v15083_v27 = vld [vmem:[#allocation26_spill] sm:$0xff] }
 0x2ed   : > { %v2832_v0 = vsel %vm2765_vm13, %v15080_v39, %v10252_v41 }
 0x2ee   : > { %3351 = vmatmul.bf16.gmra.mxu1 %v12705_v55  ;;  %3454 = vmatmul.bf16.vlgmr.msra.gmra.mxu3 %v2865_v45  ;;  %v12719_v15 = vpop.f32.mrf.mxu1  ;;  %v2870_v60 = vpack.c.bf16 %v2832_v0, %v2831_v1 }
 0x2ef   : > { %v10245_v4 = vpop.permute.xlu2 %10244  ;;  %15079 = vst [vmem:[#allocation61_spill] sm:$0xff] %v12719_v15 }
 0x2f0   : > { %v10247_v31 = vunpack.i.h.bf16 %v10245_v4  ;;  %v10246_v47 = vunpack.i.l.bf16 %v10245_v4  ;;  %v10255_v57 = vpop.permute.xlu1 %10254 }
 0x2f1   : > { %v10256_v33 = vunpack.i.l.bf16 %v10255_v57 }
 0x2f2   : > { %v2799_v19 = vsel %vm2765_vm13, %v12337_v56, %v10246_v47  ;;  %v2800_v52 = vsel %vm2765_vm13, %v12340_v10, %v10247_v31  ;;  %v10257_v56 = vunpack.i.h.bf16 %v10255_v57  ;;  %v15081_v10 = vld [vmem:[#allocation40_spill] sm:$0xff]  ;;  %v10265_v31 = vpop.permute.xlu0 %10264  ;;  %v15084_v47 = vld [vmem:[#allocation9_spill] sm:$0xff] }
 0x2f3   : > { %v2869_v59 = vpack.c.bf16 %v2800_v52, %v2799_v19  ;;  %v2867_v16 = vpack.c.bf16 %v15081_v10, %v12251_v12  ;;  %v15085_v52 = vld [vmem:[#allocation10_spill] sm:$0xff]  ;;  %v10266_v41 = vunpack.i.l.bf16 %v10265_v31 }
 0x2f4   : > { %3543 = vmatmul.bf16.vlgmr.msrb.gmra.mxu0 %v12048_v34  ;;  %v2801_v34 = vsel %vm2765_vm13, %v12251_v12, %v10256_v33  ;;  %v2802_v53 = vsel %vm2765_vm13, %v15081_v10, %v10257_v56  ;;  %v15088_v10 = vld [vmem:[#allocation29_spill] sm:$0xff] }
 0x2f5   : > { %3370 = vmatmul.bf16.gmra.mxu2 %v2869_v59  ;;  %v2873_v54 = vpack.c.bf16 %v2802_v53, %v2801_v34  ;;  %v10267_v59 = vunpack.i.h.bf16 %v10265_v31  ;;  %v2803_v1 = vsel %vm2765_vm13, %v12483_v63, %v10266_v41  ;;  %v15089_v53 = vld [vmem:[#allocation11_spill] sm:$0xff] }
 0x2f6   : > { %v12732_v29 = vpop.f32.mrf.mxu1 }
 0x2f7   : > { %15082 = vst [vmem:[#allocation8_spill] sm:$0xff] %v12732_v29  ;;  %v10260_v37 = vpop.permute.xlu2 %10259  ;;  %v2804_v39 = vsel %vm2765_vm13, %v12486_v30, %v10267_v59  ;;  %v2876_v30 = vpack.c.bf16 %v12385_v3, %v12382_v42  ;;  %v15092_v59 = vld [vmem:[#allocation30_spill] sm:$0xff] }
 0x2f8   : > { %v10262_v45 = vunpack.i.h.bf16 %v10260_v37  ;;  %v10261_v4 = vunpack.i.l.bf16 %v10260_v37  ;;  %v10270_v56 = vpop.permute.xlu1 %10269  ;;  %v2877_v33 = vpack.c.bf16 %v2804_v39, %v2803_v1  ;;  %v15094_v39 = vld [vmem:[#allocation13_spill] sm:$0xff] }
 0x2fa   : > { %v2833_v19 = vsel %vm2765_vm13, %v15084_v47, %v10261_v4  ;;  %v2834_v40 = vsel %vm2765_vm13, %v15085_v52, %v10262_v45  ;;  %v10280_v52 = vpop.permute.xlu0 %10279 }
 0x2fb   : > { %v2874_v57 = vpack.c.bf16 %v2834_v40, %v2833_v19  ;;  %v10282_v41 = vunpack.i.h.bf16 %v10280_v52 }
 0x2fe   : > { %8308 = vmatmul.msk.bf16.vlgmr.msrb.gmra.mxu1 %vm2765_vm13, %v2867_v16  ;;  %3459 = vmatmul.bf16.gmra.mxu3 %v2870_v60  ;;  %v12739_v12 = vpop.f32.mrf.mxu1  ;;  %v10272_v16 = vunpack.i.h.bf16 %v10270_v56  ;;  %v10271_v60 = vunpack.i.l.bf16 %v10270_v56 }
 0x2ff   : > { %15086 = vst [vmem:[#allocation40_spill] sm:$0xff] %v12739_v12  ;;  %v10275_v34 = vpop.permute.xlu2 %10274 }
 0x300   : > { %v2835_v37 = vsel %vm2765_vm13, %v15089_v53, %v10271_v60  ;;  %v10277_v63 = vunpack.i.h.bf16 %v10275_v34  ;;  %v10276_v45 = vunpack.i.l.bf16 %v10275_v34  ;;  %v10285_v1 = vpop.permute.xlu1 %10284 }
 0x302   : > { %v2805_v47 = vsel %vm2765_vm13, %v12382_v42, %v10276_v45  ;;  %v2806_v19 = vsel %vm2765_vm13, %v12385_v3, %v10277_v63  ;;  %v10287_v42 = vunpack.i.h.bf16 %v10285_v1  ;;  %v15096_v3 = vld [vmem:[#allocation44_spill] sm:$0xff]  ;;  %v15098_v45 = vld [vmem:[#allocation33_spill] sm:$0xff] }
 0x303   : > { %v2881_v40 = vpack.c.bf16 %v2806_v19, %v2805_v47  ;;  %v2880_v60 = vpack.c.bf16 %v15096_v3, %v12289_v7  ;;  %v10295_v47 = vpop.permute.xlu0 %10294 }
 0x304   : > { %3548 = vmatmul.bf16.gmra.mxu0 %v15083_v27 }
 0x305   : > { %3375 = vmatmul.bf16.gmra.mxu2 %v2873_v54  ;;  %v15090_v54 = vld [vmem:[#allocation12_spill] sm:$0xff] }
 0x306   : > { %v12748_v0 = vpop.f32.mrf.mxu1  ;;  %v2836_v27 = vsel %vm2765_vm13, %v15090_v54, %v10272_v16  ;;  %v10286_v16 = vunpack.i.l.bf16 %v10285_v1  ;;  %v2884_v1 = vpack.c.bf16 %v12543_v26, %v12540_v61 }
 0x307   : > { %15087 = vst [vmem:[#allocation26_spill] sm:$0xff] %v12748_v0  ;;  %v2878_v31 = vpack.c.bf16 %v2836_v27, %v2835_v37  ;;  %v2808_v37 = vsel %vm2765_vm13, %v15096_v3, %v10287_v42  ;;  %v10290_v27 = vpop.permute.xlu2 %10289  ;;  %v15103_v3 = vld [vmem:[#allocation36_spill] sm:$0xff] }
 0x308   : > { %v2807_v53 = vsel %vm2765_vm13, %v12289_v7, %v10286_v16 }
 0x309   : > { %v2885_v63 = vpack.c.bf16 %v2808_v37, %v2807_v53  ;;  %v15104_v37 = vld [vmem:[#allocation20_spill] sm:$0xff] }
 0x30e   : > { %8309 = vmatmul.msk.bf16.gmra.mxu1 %vm2765_vm13, %v2872_v36  ;;  %3464 = vmatmul.bf16.gmra.mxu3 %v2874_v57  ;;  %v12757_v4 = vpop.f32.mrf.mxu1  ;;  %v10281_v36 = vunpack.i.l.bf16 %v10280_v52  ;;  %v15100_v52 = vld [vmem:[#allocation15_spill] sm:$0xff] }
 0x30f   : > { %15091 = vst [vmem:[#allocation9_spill] sm:$0xff] %v12757_v4  ;;  %v10305_v53 = vpop.permute.xlu2 %10304 }
 0x310   : > { %v2837_v56 = vsel %vm2765_vm13, %v15094_v39, %v10281_v36  ;;  %v10296_v36 = vunpack.i.l.bf16 %v10295_v47 }
 0x314   : > { %3553 = vmatmul.bf16.gmra.mxu0 %v15088_v10 }
 0x315   : > { %3380 = vmatmul.bf16.gmra.mxu2 %v2877_v33  ;;  %v15095_v33 = vld [vmem:[#allocation14_spill] sm:$0xff] }
 0x316   : > { %v12765_v57 = vpop.f32.mrf.mxu1  ;;  %v2838_v10 = vsel %vm2765_vm13, %v15095_v33, %v10282_v41  ;;  %v10297_v41 = vunpack.i.h.bf16 %v10295_v47 }
 0x317   : > { %15093 = vst [vmem:[#allocation10_spill] sm:$0xff] %v12765_v57  ;;  %v2882_v34 = vpack.c.bf16 %v2838_v10, %v2837_v56  ;;  %v2809_v56 = vsel %vm2765_vm13, %v12540_v61, %v10296_v36  ;;  %v10300_v10 = vpop.permute.xlu1 %10299  ;;  %v15108_v36 = vld [vmem:[#allocation37_spill] sm:$0xff] }
 0x318   : > { %v2810_v33 = vsel %vm2765_vm13, %v12543_v26, %v10297_v41  ;;  %v10306_v26 = vunpack.i.l.bf16 %v10305_v53 }
 0x319   : > { %v2889_v16 = vpack.c.bf16 %v2810_v33, %v2809_v56  ;;  %v15109_v33 = vld [vmem:[#allocation22_spill] sm:$0xff] }
 0x31e   : > { %8310 = vmatmul.msk.bf16.gmra.mxu1 %vm2765_vm13, %v2876_v30  ;;  %3469 = vmatmul.bf16.gmra.mxu3 %v2878_v31  ;;  %v12778_v54 = vpop.f32.mrf.mxu1  ;;  %v10292_v30 = vunpack.i.h.bf16 %v10290_v27  ;;  %v10291_v31 = vunpack.i.l.bf16 %v10290_v27 }
 0x31f   : > { %15097 = vst [vmem:[#allocation29_spill] sm:$0xff] %v12778_v54  ;;  %v10315_v56 = vpop.permute.xlu1 %10314  ;;  %v15130_v54 = vld [vmem:[#allocation42_spill] sm:$0xff] }
 0x324   : > { %3558 = vmatmul.bf16.gmra.mxu0 %v15092_v59  ;;  %v15101_v59 = vld [vmem:[#allocation16_spill] sm:$0xff] }
 0x325   : > { %3385 = vmatmul.bf16.gmra.mxu2 %v2881_v40  ;;  %v2839_v40 = vsel %vm2765_vm13, %v15100_v52, %v10291_v31  ;;  %v2840_v7 = vsel %vm2765_vm13, %v15101_v59, %v10292_v30  ;;  %v10307_v30 = vunpack.i.h.bf16 %v10305_v53  ;;  %v2888_v31 = vpack.c.bf16 %v12457_v28, %v12454_v32  ;;  %v10310_v59 = vpop.permute.xlu0 %10309  ;;  %v15113_v53 = vld [vmem:[#allocation50_spill] sm:$0xff] }
 0x326   : > { %v12781_v19 = vpop.f32.mrf.mxu1  ;;  %v2886_v39 = vpack.c.bf16 %v2840_v7, %v2839_v40  ;;  %v2811_v52 = vsel %vm2765_vm13, %v12454_v32, %v10306_v26 }
 0x327   : > { %15099 = vst [vmem:[#allocation11_spill] sm:$0xff] %v12781_v19  ;;  %v2812_v40 = vsel %vm2765_vm13, %v12457_v28, %v10307_v30  ;;  %v10316_v28 = vunpack.i.l.bf16 %v10315_v56 }
 0x328   : > { %v2893_v41 = vpack.c.bf16 %v2812_v40, %v2811_v52  ;;  %v10320_v52 = vpop.permute.xlu2 %10319 }
 0x32d   : > { %v10325_v26 = vpop.permute.xlu0 %10324 }
 0x32e   : > { %8311 = vmatmul.msk.bf16.gmra.mxu1 %vm2765_vm13, %v2880_v60  ;;  %3474 = vmatmul.bf16.gmra.mxu3 %v2882_v34  ;;  %v12794_v42 = vpop.f32.mrf.mxu1  ;;  %v10302_v60 = vunpack.i.h.bf16 %v10300_v10  ;;  %v10301_v34 = vunpack.i.l.bf16 %v10300_v10 }
 0x32f   : > { %15102 = vst [vmem:[#allocation12_spill] sm:$0xff] %v12794_v42 }
 0x330   : > { %v2841_v27 = vsel %vm2765_vm13, %v15104_v37, %v10301_v34  ;;  %v15112_v34 = vld [vmem:[#allocation49_spill] sm:$0xff] }
 0x331   : > { %v2892_v37 = vpack.c.bf16 %v15113_v53, %v15112_v34 }
 0x334   : > { %3563 = vmatmul.bf16.gmra.mxu0 %v15098_v45 }
 0x335   : > { %3390 = vmatmul.bf16.gmra.mxu2 %v2885_v63  ;;  %v15105_v63 = vld [vmem:[#allocation21_spill] sm:$0xff] }
 0x336   : > { %v2842_v45 = vsel %vm2765_vm13, %v15105_v63, %v10302_v60  ;;  %v10317_v60 = vunpack.i.h.bf16 %v10315_v56  ;;  %v2813_v63 = vsel %vm2765_vm13, %v15112_v34, %v10316_v28  ;;  %v15117_v28 = vld [vmem:[#allocation25_spill] sm:$0xff] }
 0x337   : > { %v2890_v47 = vpack.c.bf16 %v2842_v45, %v2841_v27 }
 0x338   : > { %v2814_v45 = vsel %vm2765_vm13, %v15113_v53, %v10317_v60  ;;  %v10327_v53 = vunpack.i.h.bf16 %v10325_v26 }
 0x33e   : > { %8312 = vmatmul.msk.bf16.gmra.mxu1 %vm2765_vm13, %v2884_v1  ;;  %3479 = vmatmul.bf16.gmra.mxu3 %v2886_v39  ;;  %v10312_v1 = vunpack.i.h.bf16 %v10310_v59  ;;  %v10311_v39 = vunpack.i.l.bf16 %v10310_v59  ;;  %v2897_v59 = vpack.c.bf16 %v2814_v45, %v2813_v63  ;;  %v12838_v63 = vpop.permute.xlu0 %10339 }
 0x340   : > { %v2843_v10 = vsel %vm2765_vm13, %v15109_v33, %v10311_v39  ;;  %v10321_v39 = vunpack.i.l.bf16 %v10320_v52 }
 0x344   : > { %3568 = vmatmul.bf16.gmra.mxu0 %v15103_v3 }
 0x345   : > { %3395 = vmatmul.bf16.gmra.mxu2 %v2889_v16  ;;  %v15110_v16 = vld [vmem:[#allocation23_spill] sm:$0xff] }
 0x346   : > { %v2844_v3 = vsel %vm2765_vm13, %v15110_v16, %v10312_v1  ;;  %v10322_v1 = vunpack.i.h.bf16 %v10320_v52 }
 0x347   : > { %v2894_v27 = vpack.c.bf16 %v2844_v3, %v2843_v10  ;;  %v15116_v3 = vld [vmem:[#allocation24_spill] sm:$0xff] }
 0x348   : > { %v2845_v60 = vsel %vm2765_vm13, %v15116_v3, %v10321_v39  ;;  %v2846_v34 = vsel %vm2765_vm13, %v15117_v28, %v10322_v1 }
 0x34b   : > { %v12801_v61 = vpop.f32.mrf.mxu1 }
 0x34c   : > { %15106 = vst [vmem:[#allocation30_spill] sm:$0xff] %v12801_v61  ;;  %v3366_v56 = vpop.f32.mrf.mxu2 }
 0x34e   : > { %8313 = vmatmul.msk.bf16.gmra.mxu1 %vm2765_vm13, %v2888_v31  ;;  %3484 = vmatmul.bf16.gmra.mxu3 %v2890_v47  ;;  %v10515_v31 = vld [vmem:[%s14911_s2] ss:$0 sm:$0xff] }
 0x353   : > { %v12810_v7 = vpop.f32.mrf.mxu1 }
 0x354   : > { %15107 = vst [vmem:[#allocation13_spill] sm:$0xff] %v12810_v7  ;;  %3573 = vmatmul.bf16.gmra.mxu0 %v15108_v36  ;;  %v15129_v7 = vld [vmem:[#allocation28_spill] sm:$0xff] }
 0x355   : > { %3400 = vmatmul.bf16.gmra.mxu2 %v2893_v41  ;;  %v15115_v41 = vld [vmem:[#allocation43_spill] sm:$0xff] }
 0x35b   : > { %v12817_v32 = vpop.f32.mrf.mxu1 }
 0x35c   : > { %15111 = vst [vmem:[#allocation14_spill] sm:$0xff] %v12817_v32 }
 0x35e   : > { %8314 = vmatmul.msk.bf16.gmra.mxu1 %vm2765_vm13, %v2892_v37  ;;  %3489 = vmatmul.bf16.gmra.mxu3 %v2894_v27  ;;  %v10326_v37 = vunpack.i.l.bf16 %v10325_v26  ;;  %v2816_v26 = vsel %vm2765_vm13, %v12590_v20, %v10327_v53 }
 0x361   : > { %v2020_v30 = vpop.f32.mrf.mxu0 }
 0x362   : > { %v2021_v47 = vadd.f32 %v10515_v31, %v2020_v30  ;;  %v2896_v30 = vpack.c.bf16 %v12590_v20, %v12587_v46 }
 0x363   : > { %v12829_v40 = vpop.f32.mrf.mxu1 }
 0x364   : > { %15114 = vst [vmem:[#allocation44_spill] sm:$0xff] %v12829_v40  ;;  %3578 = vmatmul.bf16.gmra.mxu0 %v15115_v41  ;;  %v2055_v36 = vmax.f32 %v2021_v47, 0.0  ;;  %v3368_v41 = vpop.f32.mrf.mxu2  ;;  %v15128_v40 = vld [vmem:[#allocation27_spill] sm:$0xff] }
 0x365   : > { %3405 = vmatmul.bf16.gmra.mxu2 %v2897_v59  ;;  %v2815_v59 = vsel %vm2765_vm13, %v12587_v46, %v10326_v37 }
 0x366   : > { %v2134_v33 = vrot.slane %v2055_v36, 7 }
 0x368   : > { %v12843_v47 = vsel %vm504_vm0, 0.0, %v2134_v33 }
 0x369   : > { %v2022_v10 = vpop.f32.mrf.mxu0  ;;  %15119 = vst [vmem:[#allocation15_spill] sm:$0xff] %v12843_v47  ;;  %v2430_v36 = vrot.slane %v12843_v47, 1  ;;  %v2467_v1 = vrot.slane %v12843_v47, 2 }
 0x36a   : > { %v2023_v16 = vadd.f32 %v10515_v31, %v2022_v10  ;;  %v2898_v31 = vpack.c.bf16 %v2846_v34, %v2845_v60  ;;  %v10330_v34 = vpop.permute.xlu1 %10329 }
 0x36b   : > { %v12836_v27 = vpop.f32.mrf.mxu1 }
 0x36c   : > { %15118 = vst [vmem:[#allocation33_spill] sm:$0xff] %v12836_v27  ;;  %v2056_v45 = vmax.f32 %v2023_v16, 0.0 }
 0x36e   : > { %v2135_v52 = vrot.slane %v2056_v45, 7  ;;  %8315 = vmatmul.msk.bf16.gmra.mxu1 %vm2765_vm13, %v2896_v30  ;;  %3494 = vmatmul.bf16.gmra.mxu3 %v2898_v31  ;;  %v2901_v45 = vpack.c.bf16 %v2816_v26, %v2815_v59  ;;  %v12881_v59 = vld [vmem:[%s14913_s4] ss:$0 sm:$0xff] }
 0x370   : > { %v12853_v39 = vsel %vm504_vm0, %v2134_v33, %v2135_v52  ;;  %v2216_v10 = vsel %vm504_vm0, %v2135_v52, 0.0  ;;  %v15125_v52 = vld [vmem:[#allocation51_spill] sm:$0xff] }
 0x371   : > { %15120 = vst [vmem:[#allocation16_spill] sm:$0xff] %v12853_v39  ;;  %v2431_v16 = vrot.slane %v12853_v39, 1  ;;  %v2433_v3 = vrot.slane %v2216_v10, 1  ;;  %v2468_v60 = vrot.slane %v12853_v39, 2  ;;  %v2470_v28 = vrot.slane %v2216_v10, 2  ;;  %v3544_v46 = vpop.f32.mrf.mxu0  ;;  %v3455_v37 = vpop.f32.mrf.mxu3 }
 0x372   : > { %v10388_v20 = vpack.i.bf16 %v12853_v39, %v12843_v47  ;;  %v15135_v39 = vld [vmem:[#allocation32_spill] sm:$0xff] }
 0x373   : > { %v12860_v53 = vpop.f32.mrf.mxu1  ;;  %v12863_v33 = vsel %vm741_vm2, %v2467_v1, %v2468_v60  ;;  %v12866_v30 = vsel %vm741_vm2, %v2468_v60, %v2470_v28  ;;  %v12869_v31 = vsel %vm663_vm1, %v2430_v36, %v2431_v16  ;;  %v12876_v27 = vsel %vm663_vm1, %v2431_v16, %v2433_v3  ;;  %v12887_v1 = vpop.permute.xlu0 %10354 }
 0x374   : > { %15121 = vst [vmem:[#allocation36_spill] sm:$0xff] %v12860_v53  ;;  %10389 = vrot.lane.b32.xlu1 %v10388_v20, %s15028_s24  ;;  %3583 = vmatmul.bf16.gmra.mxu0 %v15125_v52  ;;  %v10393_v10 = vpack.i.bf16 %v12866_v30, %v12863_v33  ;;  %v10383_v26 = vpack.i.bf16 %v12876_v27, %v12869_v31  ;;  %v10332_v60 = vunpack.i.h.bf16 %v10330_v34  ;;  %v10331_v28 = vunpack.i.l.bf16 %v10330_v34  ;;  %v10335_v16 = vpop.permute.xlu2 %10334  ;;  %v15127_v20 = vld [vmem:[#allocation41_spill] sm:$0xff] }
 0x375   : > { %15122 = vst [vmem:[#allocation20_spill] sm:$0xff] %v12863_v33  ;;  %3410 = vmatmul.bf16.gmra.mxu2 %v2901_v45  ;;  %v3278_v52 = vadd.f32 %v12881_v59, %v15127_v20  ;;  %v10337_v34 = vunpack.i.h.bf16 %v10335_v16  ;;  %v10336_v19 = vunpack.i.l.bf16 %v10335_v16  ;;  %v3280_v20 = vadd.f32 %v12881_v59, %v15130_v54 }
 0x376   : > { %15123 = vst [vmem:[#allocation21_spill] sm:$0xff] %v12866_v30  ;;  %10394 = vrot.lane.b32.xlu2 %v10393_v10, %s15028_s24  ;;  %10384 = vrot.lane.b32.xlu0 %v10383_v26, %s15028_s24  ;;  %v2847_v32 = vsel %vm2765_vm13, %v15128_v40, %v10331_v28  ;;  %v2848_v36 = vsel %vm2765_vm13, %v15129_v7, %v10332_v60  ;;  %v12897_v10 = vpop.permute.xlu1 %10344  ;;  %v15131_v28 = vld [vmem:[#allocation45_spill] sm:$0xff] }
 0x377   : > { %15124 = vst [vmem:[#allocation37_spill] sm:$0xff] %v12869_v31  ;;  %v3367_v61 = vadd.f32 %v3366_v56, %v3278_v52  ;;  %v2900_v26 = vpack.c.bf16 %v12518_v62, %v12515_v38  ;;  %v2902_v4 = vpack.c.bf16 %v2848_v36, %v2847_v32  ;;  %v3283_v7 = vadd.f32 %v12881_v59, %v15131_v28  ;;  %v15132_v56 = vld [vmem:[#allocation48_spill] sm:$0xff] }
 0x378   : > { %15126 = vst [vmem:[#allocation22_spill] sm:$0xff] %v12876_v27  ;;  %v3371_v3 = vpop.f32.mrf.mxu2  ;;  %v12909_v60 = vadd.f32 %v12881_v59, %v15132_v56  ;;  %v3369_v36 = vadd.f32 %v3368_v41, %v3280_v20  ;;  %v10341_v28 = vunpack.i.l.bf16 %v12838_v63  ;;  %v10342_v41 = vunpack.i.h.bf16 %v12838_v63 }
 0x379   : > { %v3546_v45 = vpop.f32.mrf.mxu0  ;;  %v3457_v53 = vpop.f32.mrf.mxu3  ;;  %v3456_v57 = vadd.f32 %v3455_v37, %v3367_v61  ;;  %v15133_v61 = vld [vmem:[#allocation52_spill] sm:$0xff]  ;;  %v12922_v37 = vadd.f32 %v12881_v59, %v12388_v13  ;;  %v2818_v13 = vsel %vm2765_vm13, %v12518_v62, %v10337_v34  ;;  %v12942_v40 = vadd.f32 %v12881_v59, %v12512_v25 }
 0x37a   : > { %v12918_v32 = vadd.f32 %v12881_v59, %v15133_v61  ;;  %v2817_v61 = vsel %vm2765_vm13, %v12515_v38, %v10336_v19  ;;  %v12946_v38 = vadd.f32 %v12881_v59, %v12547_v23  ;;  %v12950_v62 = vadd.f32 %v12881_v59, %v12578_v2  ;;  %v15134_v23 = vld [vmem:[#allocation31_spill] sm:$0xff] }
 0x37b   : > { %v3633_v42 = vpop.f32.mrf.mxu1  ;;  %v10370_v56 = vpop.permute.xlu0 %10369  ;;  %v3545_v52 = vadd.f32 %v3544_v46, %v3456_v57  ;;  %v10357_v57 = vunpack.i.h.bf16 %v12887_v1  ;;  %v10356_v63 = vunpack.i.l.bf16 %v12887_v1  ;;  %v2905_v25 = vpack.c.bf16 %v2818_v13, %v2817_v61  ;;  %v15137_v13 = vld [vmem:[#allocation46_spill] sm:$0xff] }
 0x37c   : > { %v10350_v20 = vpop.permute.xlu2 %10349  ;;  %v10372_v34 = vunpack.i.h.bf16 %v10370_v56  ;;  %v3372_v0 = vadd.f32 %v3371_v3, %v3283_v7  ;;  %v2849_v2 = vsel %vm2765_vm13, %v15134_v23, %v10341_v28  ;;  %v10347_v12 = vunpack.i.h.bf16 %v12897_v10 }
 0x37d   : > { %v3634_v46 = vadd.f32 %v3633_v42, %v3545_v52  ;;  %v10346_v47 = vunpack.i.l.bf16 %v12897_v10  ;;  %v2850_v1 = vsel %vm2765_vm13, %v15135_v39, %v10342_v41  ;;  %v12965_v42 = vadd.f32 %v12881_v59, %v12609_v58 }
 0x37e   : > { %8316 = vmatmul.msk.bf16.gmra.mxu1 %vm2765_vm13, %v2900_v26  ;;  %3499 = vmatmul.bf16.gmra.mxu3 %v2902_v4  ;;  %v12928_v26 = vadd.f32 %v12881_v59, %v12436_v44  ;;  %v12937_v4 = vadd.f32 %v12881_v59, %v12479_v14  ;;  %v3458_v44 = vadd.f32 %v3457_v53, %v3369_v36  ;;  %v10371_v36 = vunpack.i.l.bf16 %v10370_v56  ;;  %v10360_v7 = vpop.permute.xlu1 %10359 }
 0x37f   : > { %v10352_v52 = vunpack.i.h.bf16 %v10350_v20  ;;  %v10351_v3 = vunpack.i.l.bf16 %v10350_v20  ;;  %v3713_v56 = vmax.f32 %v3634_v46, 0.0  ;;  %v12969_v28 = vsel %vm2765_vm13, %v12628_v9, %v10356_v63 }
 0x380   : > { %v3373_v54 = vpop.f32.mrf.mxu2  ;;  %v3547_v19 = vadd.f32 %v3546_v45, %v3458_v44  ;;  %v12973_v45 = vsel %vm2765_vm13, %v12631_v50, %v10357_v57  ;;  %v12977_v39 = vadd.f32 %v12881_v59, %v12633_v43  ;;  %v2906_v10 = vpack.c.bf16 %v2850_v1, %v2849_v2 }
 0x381   : > { %v3549_v16 = vpop.f32.mrf.mxu0  ;;  %v3460_v14 = vpop.f32.mrf.mxu3  ;;  %v12981_v41 = vsel %vm2765_vm13, %v15137_v13, %v10371_v36  ;;  %v10362_v44 = vunpack.i.h.bf16 %v10360_v7  ;;  %v2819_v57 = vsel %vm2765_vm13, %v12391_v48, %v10346_v47  ;;  %v2820_v43 = vsel %vm2765_vm13, %v12394_v18, %v10347_v12  ;;  %v15140_v36 = vld [vmem:[#allocation35_spill] sm:$0xff] }
 0x382   : > { %15136 = vst [vmem:[#allocation23_spill] sm:$0xff] %v12977_v39  ;;  %v12997_v23 = vsel %vm2765_vm13, %v15140_v36, %v10352_v52  ;;  %v3777_v1 = vrot.slane %v3713_v56, 2  ;;  %v3778_v47 = vrot.slane %v3713_v56, 4 }
 0x383   : > { %v3635_v53 = vpop.f32.mrf.mxu1 }
 0x384   : > { %3588 = vmatmul.bf16.gmra.mxu0 %v12417_v5  ;;  %v3461_v5 = vadd.f32 %v3460_v14, %v3372_v0  ;;  %v3636_v61 = vadd.f32 %v3635_v53, %v3547_v19  ;;  %v15138_v0 = vld [vmem:[#allocation47_spill] sm:$0xff]  ;;  %v10361_v14 = vunpack.i.l.bf16 %v10360_v7  ;;  %v15139_v53 = vld [vmem:[#allocation34_spill] sm:$0xff]  ;;  %v13001_v2 = vpop.permute.xlu2 %10364 }
 0x385   : > { %3415 = vmatmul.bf16.gmra.mxu2 %v2905_v25  ;;  %v12985_v20 = vsel %vm2765_vm13, %v15138_v0, %v10372_v34  ;;  %v12993_v25 = vsel %vm2765_vm13, %v15139_v53, %v10351_v3  ;;  %v3779_v0 = vrot.slane %v3713_v56, 6  ;;  %v15141_v53 = vld [vmem:[#allocation38_spill] sm:$0xff]  ;;  %v15142_v34 = vld [vmem:[#allocation39_spill] sm:$0xff] }
 0x386   : > { %v3550_v63 = vadd.f32 %v3549_v16, %v3461_v5  ;;  %v3714_v7 = vmax.f32 %v3636_v61, 0.0  ;;  %v3374_v16 = vadd.f32 %v3373_v54, %v12909_v60  ;;  %v2909_v5 = vpack.c.bf16 %v2820_v43, %v2819_v57 }
 0x387   : > { %v13010_v36 = vsel %vm2765_vm13, %v15141_v53, %v10361_v14  ;;  %v13014_v61 = vsel %vm2765_vm13, %v15142_v34, %v10362_v44  ;;  %v15143_v54 = vpack.c.bf16 %v12394_v18, %v12391_v48  ;;  %v3970_v57 = vsel %vm3969_vm4, %v3713_v56, -inf }
 0x388   : > { %v3376_v58 = vpop.f32.mrf.mxu2  ;;  %v3979_v14 = vsel %vm3969_vm4, %v3777_v1, -inf  ;;  %v3988_v43 = vsel %vm3969_vm4, %v3778_v47, -inf  ;;  %v3782_v18 = vrot.slane %v3714_v7, 6 }
 0x389   : > { %v3551_v19 = vpop.f32.mrf.mxu0  ;;  %v3462_v46 = vpop.f32.mrf.mxu3 }
 0x38a   : > { %v3463_v30 = vadd.f32 %v3462_v46, %v3374_v16  ;;  %v3997_v16 = vsel %vm3969_vm4, %v3779_v0, -inf  ;;  %v4006_v0 = vsel %vm3969_vm4, %v3714_v7, -inf }
 0x38b   : > { %v3638_v13 = vpop.f32.mrf.mxu1 }
 0x38c   : > { %v3639_v3 = vadd.f32 %v3638_v13, %v3550_v63  ;;  %v3780_v63 = vrot.slane %v3714_v7, 2  ;;  %v3552_v56 = vadd.f32 %v3551_v19, %v3463_v30  ;;  %v15144_v30 = vld [vmem:[#allocation55_spill] sm:$0xff] }
 0x38e   : > { %v3715_v60 = vmax.f32 %v3639_v3, 0.0  ;;  %8317 = vmatmul.msk.bf16.gmra.mxu1 %vm2765_vm13, %v15143_v54  ;;  %3504 = vmatmul.bf16.gmra.mxu3 %v2906_v10  ;;  %v3781_v3 = vrot.slane %v3714_v7, 4  ;;  %v4015_v39 = vsel %vm3969_vm4, %v3780_v63, -inf }
 0x390   : > { %v3783_v44 = vrot.slane %v3715_v60, 2  ;;  %v3784_v34 = vrot.slane %v3715_v60, 4  ;;  %v3785_v13 = vrot.slane %v3715_v60, 6  ;;  %v3971_v53 = vsel %vm3969_vm4, %v3715_v60, -inf  ;;  %v3378_v46 = vpop.f32.mrf.mxu2 }
 0x391   : > { %v3972_v48 = vmax.f32 %v3970_v57, %v3971_v53  ;;  %v13027_v54 = vpop.f32.mrf.mxu0  ;;  %v3465_v33 = vpop.f32.mrf.mxu3  ;;  %v3377_v57 = vadd.f32 %v3376_v58, %v12918_v32 }
 0x392   : > { %v3980_v1 = vsel %vm3969_vm4, %v3783_v44, -inf  ;;  %v3989_v47 = vsel %vm3969_vm4, %v3784_v34, -inf  ;;  %v3998_v10 = vsel %vm3969_vm4, %v3785_v13, -inf  ;;  %v4024_v13 = vsel %vm3969_vm4, %v3781_v3, -inf }
 0x393   : > { %v3973_v12 = vrot.slane %v3972_v48, 4  ;;  %v3981_v52 = vmax.f32 %v3979_v14, %v3980_v1  ;;  %v3990_v27 = vmax.f32 %v3988_v43, %v3989_v47  ;;  %v3999_v60 = vmax.f32 %v3997_v16, %v3998_v10  ;;  %v3640_v31 = vpop.f32.mrf.mxu1 }
 0x394   : > { %v3641_v53 = vadd.f32 %v3640_v31, %v3552_v56  ;;  %3593 = vmatmul.bf16.gmra.mxu0 %v15144_v30  ;;  %v4033_v14 = vsel %vm3969_vm4, %v3782_v18, -inf  ;;  %v3466_v43 = vadd.f32 %v3465_v33, %v3377_v57 }
 0x395   : > { %v3974_v19 = vmax.f32 %v3972_v48, %v3973_v12  ;;  %v3982_v44 = vrot.slane %v3981_v52, 4  ;;  %v3991_v34 = vrot.slane %v3990_v27, 4  ;;  %v4000_v49 = vrot.slane %v3999_v60, 4  ;;  %3420 = vmatmul.bf16.gmra.mxu2 %v2909_v5 }
 0x396   : > { %v3716_v16 = vmax.f32 %v3641_v53, 0.0 }
 0x397   : > { %v3975_v7 = vrot.slane %v3974_v19, 2  ;;  %v3983_v1 = vmax.f32 %v3981_v52, %v3982_v44  ;;  %v3992_v63 = vmax.f32 %v3990_v27, %v3991_v34  ;;  %v4001_v47 = vmax.f32 %v3999_v60, %v4000_v49 }
 0x398   : > { %v3786_v32 = vrot.slane %v3716_v16, 2  ;;  %v3787_v31 = vrot.slane %v3716_v16, 4  ;;  %v3788_v58 = vrot.slane %v3716_v16, 6  ;;  %v4007_v12 = vsel %vm3969_vm4, %v3716_v16, -inf  ;;  %v3381_v48 = vpop.f32.mrf.mxu2 }
 0x399   : > { %v3976_v56 = vmax.f32 %v3974_v19, %v3975_v7  ;;  %v3984_v10 = vrot.slane %v3983_v1, 2  ;;  %v3993_v5 = vrot.slane %v3992_v63, 2  ;;  %v4002_v30 = vrot.slane %v4001_v47, 2  ;;  %v3556_v3 = vpop.f32.mrf.mxu0  ;;  %v3467_v27 = vpop.f32.mrf.mxu3 }
 0x39a   : > { %v4008_v35 = vmax.f32 %v4006_v0, %v4007_v12  ;;  %v4016_v18 = vsel %vm3969_vm4, %v3786_v32, -inf  ;;  %v4025_v33 = vsel %vm3969_vm4, %v3787_v31, -inf  ;;  %v4034_v52 = vsel %vm3969_vm4, %v3788_v58, -inf }
 0x39b   : > { %v3977_v49 = vrot.slane %v3976_v56, 1  ;;  %v3985_v60 = vmax.f32 %v3983_v1, %v3984_v10  ;;  %v3994_v57 = vmax.f32 %v3992_v63, %v3993_v5  ;;  %v4003_v53 = vmax.f32 %v4001_v47, %v4002_v30  ;;  %v3643_v44 = vpop.f32.mrf.mxu1 }
 0x39c   : > { %v4009_v34 = vrot.slane %v4008_v35, 4  ;;  %v4017_v16 = vmax.f32 %v4015_v39, %v4016_v18  ;;  %v4026_v19 = vmax.f32 %v4024_v13, %v4025_v33  ;;  %v4035_v7 = vmax.f32 %v4033_v14, %v4034_v52 }
 0x39d   : > { %v3986_v29 = vrot.slane %v3985_v60, 1  ;;  %v3995_v15 = vrot.slane %v3994_v57, 1  ;;  %v3379_v0 = vadd.f32 %v3378_v46, %v12922_v37  ;;  %v15145_v58 = vpack.c.bf16 %v12631_v50, %v12628_v9 }
 0x39e   : > { %v4010_v32 = vmax.f32 %v4008_v35, %v4009_v34  ;;  %v4018_v12 = vrot.slane %v4017_v16, 4  ;;  %v4027_v31 = vrot.slane %v4026_v19, 4  ;;  %v4036_v11 = vrot.slane %v4035_v7, 4 }
 0x39f   : > { %8318 = vmatmul.msk.bf16.gmra.mxu1 %vm2765_vm13, %v15145_v58  ;;  %v3978_v1 = vmax.f32 %v3976_v56, %v3977_v49  ;;  %v3987_v63 = vmax.f32 %v3985_v60, %v3986_v29  ;;  %v3996_v47 = vmax.f32 %v3994_v57, %v3995_v15  ;;  %v3555_v39 = vadd.f32 %v13027_v54, %v3466_v43  ;;  %v10375_v60 = vpop.permute.xlu1 %10374 }
 0x3a0   : > { %v15146_v13 = vpack.c.bf16 %v12997_v23, %v12993_v25  ;;  %v4004_v37 = vrot.slane %v4003_v53, 1  ;;  %v4011_v46 = vrot.slane %v4010_v32, 2  ;;  %v4019_v35 = vmax.f32 %v4017_v16, %v4018_v12  ;;  %v3383_v10 = vpop.f32.mrf.mxu2 }
 0x3a1   : > { %v4028_v14 = vmax.f32 %v4026_v19, %v4027_v31  ;;  %v4611_v5 = vsel %vm4610_vm5, %v3987_v63, %v3978_v1  ;;  %v3468_v30 = vadd.f32 %v3467_v27, %v3379_v0  ;;  %v3644_v9 = vadd.f32 %v3643_v44, %v3555_v39  ;;  %v3559_v50 = vpop.f32.mrf.mxu0  ;;  %v3470_v33 = vpop.f32.mrf.mxu3 }
 0x3a2   : > { %3509 = vmatmul.bf16.gmra.mxu3 %v15146_v13  ;;  %v4037_v18 = vmax.f32 %v4035_v7, %v4036_v11  ;;  %v4012_v56 = vmax.f32 %v4010_v32, %v4011_v46  ;;  %v4020_v29 = vrot.slane %v4019_v35, 2  ;;  %v2914_v54 = vpack.c.bf16 %v13014_v61, %v13010_v36 }
 0x3a3   : > { %v4029_v15 = vrot.slane %v4028_v14, 2  ;;  %v3382_v25 = vadd.f32 %v3381_v48, %v12928_v26  ;;  %v3645_v23 = vpop.f32.mrf.mxu1  ;;  %v4613_v43 = vsel %vm4612_vm6, %v3996_v47, %v4611_v5  ;;  %v15147_v52 = vunpack.i.l.bf16 %v13001_v2  ;;  %v15149_v26 = vld [vmem:[#allocation56_spill] sm:$0xff] }
 0x3a4   : > { %v15148_v11 = vunpack.i.h.bf16 %v13001_v2  ;;  %v4013_v57 = vrot.slane %v4012_v56, 1  ;;  %v4021_v36 = vmax.f32 %v4019_v35, %v4020_v29  ;;  %3598 = vmatmul.bf16.gmra.mxu0 %v15149_v26  ;;  %v4038_v48 = vrot.slane %v4037_v18, 2 }
 0x3a5   : > { %v13060_v27 = vsel %vm2765_vm13, %v12562_v6, %v15147_v52  ;;  %v4030_v61 = vmax.f32 %v4028_v14, %v4029_v15  ;;  %v4005_v44 = vmax.f32 %v4003_v53, %v4004_v37  ;;  %v3557_v34 = vadd.f32 %v3556_v3, %v3468_v30 }
 0x3a6   : > { %v13066_v49 = vsel %vm2765_vm13, %v12565_v22, %v15148_v11  ;;  %v3717_v16 = vmax.f32 %v3644_v9, 0.0  ;;  %v15150_v19 = vpack.c.bf16 %v12973_v45, %v12969_v28  ;;  %v4014_v2 = vmax.f32 %v4012_v56, %v4013_v57  ;;  %v9281_v28 = vld [vmem:[%s14914_s5 + $0x38] sm:$0xff] }
 0x3a7   : > { %v4022_v7 = vrot.slane %v4021_v36, 1  ;;  %v4031_v0 = vrot.slane %v4030_v61, 1  ;;  %v3471_v32 = vadd.f32 %v3470_v33, %v3382_v25  ;;  %v10377_v12 = vunpack.i.h.bf16 %v10375_v60  ;;  %5193 = vmatpush.bf16.msrb.mxu2 %v9281_v28 }
 0x3a8   : > { %3425 = vmatmul.bf16.gmra.mxu2 %v15150_v19  ;;  %v10376_v31 = vunpack.i.l.bf16 %v10375_v60  ;;  %v3646_v58 = vadd.f32 %v3645_v23, %v3557_v34  ;;  %v3386_v63 = vpop.f32.mrf.mxu2  ;;  %v4039_v47 = vmax.f32 %v4037_v18, %v4038_v48  ;;  %v4615_v53 = vsel %vm4614_vm7, %v4005_v44, %v4613_v43 }
 0x3a9   : > { %v4023_v1 = vmax.f32 %v4021_v36, %v4022_v7  ;;  %v2917_v3 = vpack.c.bf16 %v13066_v49, %v13060_v27  ;;  %v3789_v45 = vrot.slane %v3717_v16, 2  ;;  %v3790_v39 = vrot.slane %v3717_v16, 4  ;;  %v3561_v13 = vpop.f32.mrf.mxu0  ;;  %v3472_v35 = vpop.f32.mrf.mxu3 }
 0x3aa   : > { %v4032_v37 = vmax.f32 %v4030_v61, %v4031_v0  ;;  %v3560_v46 = vadd.f32 %v3559_v50, %v3471_v32  ;;  %v4040_v14 = vrot.slane %v4039_v47, 1  ;;  %v4617_v5 = vsel %vm4616_vm8, %v4014_v2, %v4615_v53 }
 0x3ab   : > { %v3791_v30 = vrot.slane %v3717_v16, 6  ;;  %v3718_v9 = vmax.f32 %v3646_v58, 0.0  ;;  %v3648_v18 = vpop.f32.mrf.mxu1  ;;  %v13081_v56 = vsel %vm2765_vm13, %v12462_v8, %v10376_v31  ;;  %v13085_v29 = vsel %vm2765_vm13, %v12465_v51, %v10377_v12 }
 0x3ac   : > { %v3384_v15 = vadd.f32 %v3383_v10, %v12937_v4  ;;  %v3649_v50 = vadd.f32 %v3648_v18, %v3560_v46  ;;  %v4041_v33 = vmax.f32 %v4039_v47, %v4040_v14  ;;  %v4619_v25 = vsel %vm4618_vm9, %v4023_v1, %v4617_v5 }
 0x3ad   : > { %v4042_v23 = vsel %vm3969_vm4, %v3717_v16, -inf  ;;  %v4051_v43 = vsel %vm3969_vm4, %v3789_v45, -inf  ;;  %v4060_v52 = vsel %vm3969_vm4, %v3790_v39, -inf  ;;  %v4621_v11 = vsel %vm4620_vm10, %v4032_v37, %v4619_v25 }
 0x3ae   : > { %v3473_v60 = vadd.f32 %v3472_v35, %v3384_v15  ;;  %v3719_v57 = vmax.f32 %v3649_v50, 0.0  ;;  %v15151_v36 = vpack.c.bf16 %v12565_v22, %v12562_v6  ;;  %v13098_v4 = vsel %vm504_vm0, 0.0, %v4621_v11 }
 0x3af   : > { %v13101_v10 = vsel %vm504_vm0, %v4041_v33, 0.0  ;;  %v4069_v61 = vsel %vm3969_vm4, %v3791_v30, -inf  ;;  %v3792_v26 = vrot.slane %v3718_v9, 2  ;;  %v4710_v48 = vrot.slane %v13098_v4, 1 }
 0x3b0   : > { %8319 = vmatmul.msk.bf16.gmra.mxu1 %vm2765_vm13, %v15151_v36  ;;  %v4711_v44 = vrot.slane %v13101_v10, 1  ;;  %v3795_v34 = vrot.slane %v3719_v57, 2  ;;  %v3796_v16 = vrot.slane %v3719_v57, 4  ;;  %v3797_v19 = vrot.slane %v3719_v57, 6  ;;  %v3388_v22 = vpop.f32.mrf.mxu2 }
 0x3b1   : > { %v4043_v6 = vsel %vm3969_vm4, %v3719_v57, -inf  ;;  %v3793_v2 = vrot.slane %v3718_v9, 4  ;;  %v3794_v7 = vrot.slane %v3718_v9, 6  ;;  %v13110_v12 = vpop.f32.mrf.mxu0  ;;  %v3562_v31 = vadd.f32 %v3561_v13, %v3473_v60  ;;  %v3475_v47 = vpop.f32.mrf.mxu3 }
 0x3b2   : > { %3514 = vmatmul.bf16.gmra.mxu3 %v2914_v54  ;;  %v4044_v0 = vmax.f32 %v4042_v23, %v4043_v6  ;;  %v13108_v32 = vsel %vm663_vm1, %v4710_v48, %v4711_v44  ;;  %v4052_v54 = vsel %vm3969_vm4, %v3795_v34, -inf  ;;  %v4061_v58 = vsel %vm3969_vm4, %v3796_v16, -inf }
 0x3b3   : > { %v4070_v1 = vsel %vm3969_vm4, %v3797_v19, -inf  ;;  %4776 = vrot.lane.b32.xlu0 %v13108_v32, %s15028_s24  ;;  %v4053_v28 = vmax.f32 %v4051_v43, %v4052_v54  ;;  %v4062_v45 = vmax.f32 %v4060_v52, %v4061_v58  ;;  %v3650_v37 = vpop.f32.mrf.mxu1  ;;  %v4078_v46 = vsel %vm3969_vm4, %v3718_v9, -inf }
 0x3b4   : > { %v4045_v53 = vrot.slane %v4044_v0, 4  ;;  %v4071_v39 = vmax.f32 %v4069_v61, %v4070_v1  ;;  %v4087_v35 = vsel %vm3969_vm4, %v3792_v26, -inf  ;;  %v3387_v13 = vadd.f32 %v3386_v63, %v12942_v40  ;;  %3603 = vmatmul.bf16.gmra.mxu0 %v12686_v17 }
 0x3b5   : > { %v3651_v14 = vadd.f32 %v3650_v37, %v3562_v31  ;;  %v4054_v30 = vrot.slane %v4053_v28, 4  ;;  %v4063_v18 = vrot.slane %v4062_v45, 4  ;;  %v4096_v50 = vsel %vm3969_vm4, %v3793_v2, -inf }
 0x3b6   : > { %v4046_v5 = vmax.f32 %v4044_v0, %v4045_v53  ;;  %v4072_v15 = vrot.slane %v4071_v39, 4  ;;  %v4105_v33 = vsel %vm3969_vm4, %v3794_v7, -inf  ;;  %v3476_v9 = vadd.f32 %v3475_v47, %v3387_v13 }
 0x3b7   : > { %v3720_v25 = vmax.f32 %v3651_v14, 0.0  ;;  %v4055_v43 = vmax.f32 %v4053_v28, %v4054_v30  ;;  %v4064_v40 = vmax.f32 %v4062_v45, %v4063_v18  ;;  %v3389_v45 = vadd.f32 %v3388_v22, %v12946_v38 }
 0x3b8   : > { %3430 = vmatmul.bf16.gmra.mxu2 %v2917_v3  ;;  %v4047_v23 = vrot.slane %v4046_v5, 2  ;;  %v4073_v63 = vmax.f32 %v4071_v39, %v4072_v15  ;;  %v3391_v57 = vpop.f32.mrf.mxu2  ;;  %v15152_v14 = vpack.c.bf16 %v12465_v51, %v12462_v8  ;;  %v15153_v15 = vpack.c.bf16 %v12985_v20, %v12981_v41 }
 0x3b9   : > { %v3798_v52 = vrot.slane %v3720_v25, 2  ;;  %v3799_v17 = vrot.slane %v3720_v25, 4  ;;  %v3800_v11 = vrot.slane %v3720_v25, 6  ;;  %v4079_v60 = vsel %vm3969_vm4, %v3720_v25, -inf  ;;  %v13127_v3 = vpop.f32.mrf.mxu0  ;;  %v3477_v16 = vpop.f32.mrf.mxu3 }
 0x3ba   : > { %v4048_v36 = vmax.f32 %v4046_v5, %v4047_v23  ;;  %v4056_v61 = vrot.slane %v4055_v43, 2  ;;  %v4065_v27 = vrot.slane %v4064_v40, 2  ;;  %v4074_v49 = vrot.slane %v4073_v63, 2 }
 0x3bb   : > { %v4080_v26 = vmax.f32 %v4078_v46, %v4079_v60  ;;  %v4088_v48 = vsel %vm3969_vm4, %v3798_v52, -inf  ;;  %v4097_v44 = vsel %vm3969_vm4, %v3799_v17, -inf  ;;  %v4106_v34 = vsel %vm3969_vm4, %v3800_v11, -inf  ;;  %v3653_v0 = vpop.f32.mrf.mxu1 }
 0x3bc   : > { %v4049_v19 = vrot.slane %v4048_v36, 1  ;;  %v4057_v6 = vmax.f32 %v4055_v43, %v4056_v61  ;;  %v4066_v2 = vmax.f32 %v4064_v40, %v4065_v27  ;;  %v4075_v7 = vmax.f32 %v4073_v63, %v4074_v49 }
 0x3bd   : > { %v4081_v31 = vrot.slane %v4080_v26, 4  ;;  %v4089_v54 = vmax.f32 %v4087_v35, %v4088_v48  ;;  %v4098_v58 = vmax.f32 %v4096_v50, %v4097_v44  ;;  %v4107_v1 = vmax.f32 %v4105_v33, %v4106_v34  ;;  %v10380_v50 = vpop.permute.xlu2 %10379  ;;  %v15154_v44 = vld [vmem:[#allocation57_spill] sm:$0xff] }
 0x3be   : > { %v4058_v47 = vrot.slane %v4057_v6, 1  ;;  %v4067_v53 = vrot.slane %v4066_v2, 1  ;;  %v4076_v28 = vrot.slane %v4075_v7, 1  ;;  %v4050_v5 = vmax.f32 %v4048_v36, %v4049_v19 }
 0x3bf   : > { %v4082_v39 = vmax.f32 %v4080_v26, %v4081_v31  ;;  %v4090_v37 = vrot.slane %v4089_v54, 4  ;;  %v4099_v46 = vrot.slane %v4098_v58, 4  ;;  %v4108_v13 = vrot.slane %v4107_v1, 4 }
 0x3c0   : > { %8320 = vmatmul.msk.bf16.gmra.mxu1 %vm2765_vm13, %v15152_v14  ;;  %v4059_v30 = vmax.f32 %v4057_v6, %v4058_v47  ;;  %v4068_v18 = vmax.f32 %v4066_v2, %v4067_v53  ;;  %v3565_v35 = vadd.f32 %v13110_v12, %v3476_v9  ;;  %v3393_v23 = vpop.f32.mrf.mxu2  ;;  %v4077_v43 = vmax.f32 %v4075_v7, %v4076_v28  ;;  %v15156_v53 = vld [vmem:[#allocation54_spill] sm:$0xff] }
 0x3c1   : > { %v4083_v38 = vrot.slane %v4082_v39, 2  ;;  %v4091_v22 = vmax.f32 %v4089_v54, %v4090_v37  ;;  %v4100_v33 = vmax.f32 %v4098_v58, %v4099_v46  ;;  %v4109_v25 = vmax.f32 %v4107_v1, %v4108_v13  ;;  %v3569_v63 = vpop.f32.mrf.mxu0  ;;  %v3480_v11 = vpop.f32.mrf.mxu3  ;;  %v15155_v54 = vld [vmem:[#allocation53_spill] sm:$0xff] }
 0x3c2   : > { %3519 = vmatmul.bf16.gmra.mxu3 %v15153_v15  ;;  %v4622_v8 = vsel %vm4610_vm5, %v4059_v30, %v4050_v5  ;;  %v3478_v51 = vadd.f32 %v3477_v16, %v3389_v45  ;;  %v3654_v40 = vadd.f32 %v3653_v0, %v3565_v35  ;;  %v10381_v41 = vunpack.i.l.bf16 %v10380_v50  ;;  %v15158_v15 = vld [vmem:[#allocation61_spill] sm:$0xff] }
 0x3c3   : > { %v4623_v52 = vsel %vm4612_vm6, %v4068_v18, %v4622_v8  ;;  %v4084_v17 = vmax.f32 %v4082_v39, %v4083_v38  ;;  %v4092_v12 = vrot.slane %v4091_v22, 2  ;;  %v4101_v9 = vrot.slane %v4100_v33, 2  ;;  %v3655_v36 = vpop.f32.mrf.mxu1  ;;  %v15157_v18 = vld [vmem:[#allocation60_spill] sm:$0xff] }
 0x3c4   : > { %v4624_v20 = vsel %vm4614_vm7, %v4077_v43, %v4623_v52  ;;  %v4110_v60 = vrot.slane %v4109_v25, 2  ;;  %v2921_v61 = vpack.c.bf16 %v13085_v29, %v13081_v56  ;;  %v10382_v27 = vunpack.i.h.bf16 %v10380_v50  ;;  %3608 = vmatmul.bf16.gmra.mxu0 %v12705_v55 }
 0x3c5   : > { %v4085_v49 = vrot.slane %v4084_v17, 1  ;;  %v4093_v26 = vmax.f32 %v4091_v22, %v4092_v12  ;;  %v4102_v48 = vmax.f32 %v4100_v33, %v4101_v9  ;;  %v13149_v34 = vadd.f32 %v12881_v59, %v15154_v44  ;;  %v15159_v33 = vld [vmem:[#allocation8_spill] sm:$0xff] }
 0x3c6   : > { %v4111_v16 = vmax.f32 %v4109_v25, %v4110_v60  ;;  %v3392_v19 = vadd.f32 %v3391_v57, %v12950_v62  ;;  %v3721_v6 = vmax.f32 %v3654_v40, 0.0  ;;  %v3567_v56 = vadd.f32 %v13127_v3, %v3478_v51 }
 0x3c7   : > { %v4086_v2 = vmax.f32 %v4084_v17, %v4085_v49  ;;  %v4094_v7 = vrot.slane %v4093_v26, 1  ;;  %v4103_v0 = vrot.slane %v4102_v48, 1  ;;  %v13155_v29 = vadd.f32 %v12881_v59, %v12680_v21 }
 0x3c8   : > { %3435 = vmatmul.bf16.gmra.mxu2 %v2921_v61  ;;  %v13159_v55 = vadd.f32 %v12881_v59, %v12699_v24  ;;  %v3481_v31 = vadd.f32 %v3480_v11, %v3392_v19  ;;  %v2857_v58 = vsel %vm2765_vm13, %v15155_v54, %v10381_v41  ;;  %v3656_v1 = vadd.f32 %v3655_v36, %v3567_v56  ;;  %v3396_v47 = vpop.f32.mrf.mxu2  ;;  %v9280_v24 = vld [vmem:[%s14914_s5 + $0x30] sm:$0xff]  ;;  %v15160_v41 = vld [vmem:[#allocation59_spill] sm:$0xff] }
 0x3c9   : > { %v4095_v62 = vmax.f32 %v4093_v26, %v4094_v7  ;;  %v4625_v57 = vsel %vm4616_vm8, %v4086_v2, %v4624_v20  ;;  %v2858_v3 = vsel %vm2765_vm13, %v15156_v53, %v10382_v27  ;;  %v4104_v28 = vmax.f32 %v4102_v48, %v4103_v0  ;;  %v3571_v39 = vpop.f32.mrf.mxu0  ;;  %v3482_v5 = vpop.f32.mrf.mxu3  ;;  %5194 = vmatpush.bf16.msrb.mxu2 %v9280_v24  ;;  %v15161_v20 = vld [vmem:[#allocation58_spill] sm:$0xff]  ;;  %v15163_v36 = vld [vmem:[#allocation23_spill] sm:$0xff] }
 0x3ca   : > { %v3801_v45 = vrot.slane %v3721_v6, 2  ;;  %v3394_v21 = vadd.f32 %v3393_v23, %v12965_v42  ;;  %v4112_v37 = vrot.slane %v4111_v16, 1  ;;  %v3802_v46 = vrot.slane %v3721_v6, 4 }
 0x3cb   : > { %v3803_v13 = vrot.slane %v3721_v6, 6  ;;  %v3722_v14 = vmax.f32 %v3656_v1, 0.0  ;;  %v4626_v30 = vsel %vm4618_vm9, %v4095_v62, %v4625_v57  ;;  %v13173_v35 = vadd.f32 %v12881_v59, %v15157_v18  ;;  %v3658_v22 = vpop.f32.mrf.mxu1 }
 0x3cc   : > { %v13177_v50 = vadd.f32 %v12881_v59, %v15158_v15  ;;  %v3570_v42 = vadd.f32 %v3569_v63, %v3481_v31  ;;  %v3483_v38 = vadd.f32 %v3482_v5, %v3394_v21  ;;  %v13181_v25 = vadd.f32 %v12881_v59, %v15159_v33  ;;  %v15165_v5 = vld [vmem:[#allocation22_spill] sm:$0xff] }
 0x3cd   : > { %v3804_v23 = vrot.slane %v3722_v14, 2  ;;  %v3805_v43 = vrot.slane %v3722_v14, 4  ;;  %v4113_v8 = vmax.f32 %v4111_v16, %v4112_v37  ;;  %v4114_v51 = vsel %vm3969_vm4, %v3721_v6, -inf }
 0x3ce   : > { %v3659_v40 = vadd.f32 %v3658_v22, %v3570_v42  ;;  %v2922_v52 = vpack.c.bf16 %v2858_v3, %v2857_v58  ;;  %v4627_v17 = vsel %vm4620_vm10, %v4104_v28, %v4626_v30  ;;  %v4123_v12 = vsel %vm3969_vm4, %v3801_v45, -inf }
 0x3cf   : > { %v4132_v63 = vsel %vm3969_vm4, %v3802_v46, -inf  ;;  %v4141_v9 = vsel %vm3969_vm4, %v3803_v13, -inf  ;;  %v3806_v11 = vrot.slane %v3722_v14, 6  ;;  %v15162_v59 = vpack.c.bf16 %v15160_v41, %v15161_v20  ;;  %v15164_v13 = vld [vmem:[#allocation37_spill] sm:$0xff] }
 0x3d0   : > { %v4150_v60 = vsel %vm3969_vm4, %v3722_v14, -inf  ;;  %v3397_v61 = vadd.f32 %v3396_v47, %v15163_v36  ;;  %v3572_v27 = vadd.f32 %v3571_v39, %v3483_v38  ;;  %v3723_v49 = vmax.f32 %v3659_v40, 0.0  ;;  %v3398_v44 = vpop.f32.mrf.mxu2  ;;  %v10395_v16 = vpop.permute.xlu2 %10394 }
 0x3d1   : > { %8321 = vmatmul.msk.bf16.gmra.mxu1 %vm2765_vm13, %v15162_v59  ;;  %v4159_v26 = vsel %vm3969_vm4, %v3804_v23, -inf  ;;  %v4168_v48 = vsel %vm3969_vm4, %v3805_v43, -inf  ;;  %v13197_v19 = vsel %vm504_vm0, 0.0, %v4627_v17  ;;  %v13200_v6 = vsel %vm504_vm0, %v4113_v8, 0.0  ;;  %v3574_v31 = vpop.f32.mrf.mxu0  ;;  %v3485_v1 = vpop.f32.mrf.mxu3 }
 0x3d2   : > { %3524 = vmatmul.bf16.gmra.mxu3 %v2922_v52  ;;  %v3807_v2 = vrot.slane %v3723_v49, 2  ;;  %v3808_v7 = vrot.slane %v3723_v49, 4  ;;  %v3809_v0 = vrot.slane %v3723_v49, 6  ;;  %v4115_v56 = vsel %vm3969_vm4, %v3723_v49, -inf }
 0x3d3   : > { %v4177_v54 = vsel %vm3969_vm4, %v3806_v11, -inf  ;;  %v4116_v58 = vmax.f32 %v4114_v51, %v4115_v56  ;;  %v10397_v62 = vunpack.i.h.bf16 %v10395_v16  ;;  %v10396_v57 = vunpack.i.l.bf16 %v10395_v16  ;;  %v3660_v28 = vpop.f32.mrf.mxu1 }
 0x3d4   : > { %v4124_v47 = vsel %vm3969_vm4, %v3807_v2, -inf  ;;  %v4133_v53 = vsel %vm3969_vm4, %v3808_v7, -inf  ;;  %v4142_v3 = vsel %vm3969_vm4, %v3809_v0, -inf  ;;  %v4713_v45 = vrot.slane %v13197_v19, 1 }
 0x3d5   : > { %v4117_v21 = vrot.slane %v4116_v58, 4  ;;  %v4125_v39 = vmax.f32 %v4123_v12, %v4124_v47  ;;  %v4134_v24 = vmax.f32 %v4132_v63, %v4133_v53  ;;  %v4143_v37 = vmax.f32 %v4141_v9, %v4142_v3 }
 0x3d6   : > { %v3661_v46 = vadd.f32 %v3660_v28, %v3572_v27  ;;  %v2859_v14 = vsel %vm2765_vm13, %v15164_v13, %v10396_v57  ;;  %v2860_v30 = vsel %vm2765_vm13, %v15165_v5, %v10397_v62  ;;  %v4714_v18 = vrot.slane %v13200_v6, 1 }
 0x3d7   : > { %v4118_v15 = vmax.f32 %v4116_v58, %v4117_v21  ;;  %v4126_v42 = vrot.slane %v4125_v39, 4  ;;  %v4135_v38 = vrot.slane %v4134_v24, 4  ;;  %v4144_v22 = vrot.slane %v4143_v37, 4 }
 0x3d8   : > { %v3399_v33 = vadd.f32 %v3398_v44, %v13149_v34  ;;  %v3486_v23 = vadd.f32 %v3485_v1, %v3397_v61  ;;  %v3724_v43 = vmax.f32 %v3661_v46, 0.0  ;;  %v2926_v8 = vpack.c.bf16 %v2860_v30, %v2859_v14  ;;  %v3401_v12 = vpop.f32.mrf.mxu2  ;;  %v15167_v46 = vld [vmem:[#allocation20_spill] sm:$0xff] }
 0x3d9   : > { %v4119_v51 = vrot.slane %v4118_v15, 2  ;;  %v4127_v40 = vmax.f32 %v4125_v39, %v4126_v42  ;;  %v4136_v52 = vmax.f32 %v4134_v24, %v4135_v38  ;;  %v4145_v17 = vmax.f32 %v4143_v37, %v4144_v22  ;;  %v13215_v36 = vpop.f32.mrf.mxu0  ;;  %v3487_v34 = vpop.f32.mrf.mxu3 }
 0x3da   : > { %v3810_v63 = vrot.slane %v3724_v43, 2  ;;  %v3811_v9 = vrot.slane %v3724_v43, 4  ;;  %v3812_v11 = vrot.slane %v3724_v43, 6  ;;  %v4151_v59 = vsel %vm3969_vm4, %v3724_v43, -inf }
 0x3db   : > { %v4120_v27 = vmax.f32 %v4118_v15, %v4119_v51  ;;  %v4128_v49 = vrot.slane %v4127_v40, 2  ;;  %v4137_v16 = vrot.slane %v4136_v52, 2  ;;  %v4146_v2 = vrot.slane %v4145_v17, 2  ;;  %v3663_v56 = vpop.f32.mrf.mxu1 }
 0x3dc   : > { %v4152_v61 = vmax.f32 %v4150_v60, %v4151_v59  ;;  %v4160_v44 = vsel %vm3969_vm4, %v3810_v63, -inf  ;;  %v4169_v7 = vsel %vm3969_vm4, %v3811_v9, -inf  ;;  %v4178_v0 = vsel %vm3969_vm4, %v3812_v11, -inf  ;;  %v15166_v60 = vld [vmem:[#allocation21_spill] sm:$0xff] }
 0x3dd   : > { %v4121_v58 = vrot.slane %v4120_v27, 1  ;;  %v4129_v62 = vmax.f32 %v4127_v40, %v4128_v49  ;;  %v4138_v57 = vmax.f32 %v4136_v52, %v4137_v16  ;;  %v4147_v1 = vmax.f32 %v4145_v17, %v4146_v2 }
 0x3de   : > { %v4153_v47 = vrot.slane %v4152_v61, 4  ;;  %v4161_v53 = vmax.f32 %v4159_v26, %v4160_v44  ;;  %v4170_v3 = vmax.f32 %v4168_v48, %v4169_v7  ;;  %v4179_v28 = vmax.f32 %v4177_v54, %v4178_v0 }
 0x3df   : > { %v4130_v21 = vrot.slane %v4129_v62, 1  ;;  %v4139_v39 = vrot.slane %v4138_v57, 1  ;;  %v4148_v24 = vrot.slane %v4147_v1, 1  ;;  %v3575_v37 = vadd.f32 %v3574_v31, %v3486_v23 }
 0x3e0   : > { %v15168_v13 = vpack.c.bf16 %v15166_v60, %v15167_v46  ;;  %v4154_v14 = vmax.f32 %v4152_v61, %v4153_v47  ;;  %v4162_v5 = vrot.slane %v4161_v53, 4  ;;  %v4171_v30 = vrot.slane %v4170_v3, 4  ;;  %v3403_v48 = vpop.f32.mrf.mxu2 }
 0x3e1   : > { %v4180_v15 = vrot.slane %v4179_v28, 4  ;;  %v4122_v42 = vmax.f32 %v4120_v27, %v4121_v58  ;;  %v4131_v38 = vmax.f32 %v4129_v62, %v4130_v21  ;;  %v4140_v22 = vmax.f32 %v4138_v57, %v4139_v39  ;;  %v3579_v31 = vpop.f32.mrf.mxu0  ;;  %v3490_v9 = vpop.f32.mrf.mxu3 }
 0x3e2   : > { %8322 = vmatmul.msk.bf16.gmra.mxu1 %vm2765_vm13, %v15168_v13  ;;  %3529 = vmatmul.bf16.gmra.mxu3 %v2926_v8  ;;  %v4149_v26 = vmax.f32 %v4147_v1, %v4148_v24  ;;  %v4155_v54 = vrot.slane %v4154_v14, 2  ;;  %v4163_v43 = vmax.f32 %v4161_v53, %v4162_v5  ;;  %v4172_v51 = vmax.f32 %v4170_v3, %v4171_v30 }
 0x3e3   : > { %v4181_v40 = vmax.f32 %v4179_v28, %v4180_v15  ;;  %v4628_v23 = vsel %vm4610_vm5, %v4131_v38, %v4122_v42  ;;  %v3402_v52 = vadd.f32 %v3401_v12, %v13155_v29  ;;  %v3488_v17 = vadd.f32 %v3487_v34, %v3399_v33  ;;  %v3665_v49 = vpop.f32.mrf.mxu1  ;;  %v9289_v15 = vld [vmem:[%s14914_s5 + $0x78] sm:$0xff]  ;;  %v9279_v42 = vld [vmem:[%s14914_s5 + $0x28] sm:$0xff] }
 0x3e4   : > { %v3664_v63 = vadd.f32 %v3663_v56, %v3575_v37  ;;  %v4629_v11 = vsel %vm4612_vm6, %v4140_v22, %v4628_v23  ;;  %v4156_v8 = vmax.f32 %v4154_v14, %v4155_v54  ;;  %v4164_v59 = vrot.slane %v4163_v43, 2  ;;  %5222 = vmatpush.bf16.msrb.mxu3 %v9289_v15  ;;  %5195 = vmatpush.bf16.msrb.mxu2 %v9279_v42 }
 0x3e5   : > { %v4173_v27 = vrot.slane %v4172_v51, 2  ;;  %v4630_v16 = vsel %vm4614_vm7, %v4149_v26, %v4629_v11  ;;  %v4182_v2 = vrot.slane %v4181_v40, 2  ;;  %v10413_v44 = vpack.i.bf16 %v13197_v19, %v13098_v4 }
 0x3e6   : > { %v3725_v61 = vmax.f32 %v3664_v63, 0.0  ;;  %v4157_v7 = vrot.slane %v4156_v8, 1  ;;  %v4165_v0 = vmax.f32 %v4163_v43, %v4164_v59  ;;  %v3491_v29 = vadd.f32 %v3490_v9, %v3402_v52  ;;  %v10390_v53 = vpop.permute.xlu1 %10389  ;;  %v15170_v59 = vld [vmem:[#allocation15_spill] sm:$0xff] }
 0x3e7   : > { %v4174_v58 = vmax.f32 %v4172_v51, %v4173_v27  ;;  %v13235_v56 = vsel %vm663_vm1, %v4713_v45, %v4714_v18  ;;  %v3577_v1 = vadd.f32 %v13215_v36, %v3488_v17  ;;  %v3404_v47 = vadd.f32 %v3403_v48, %v13159_v55 }
 0x3e8   : > { %v3813_v33 = vrot.slane %v3725_v61, 2  ;;  %v3814_v12 = vrot.slane %v3725_v61, 4  ;;  %v3815_v34 = vrot.slane %v3725_v61, 6  ;;  %v4166_v62 = vrot.slane %v4165_v0, 1  ;;  %v3406_v24 = vpop.f32.mrf.mxu2  ;;  %v10385_v46 = vpop.permute.xlu0 %10384 }
 0x3e9   : > { %v4175_v57 = vrot.slane %v4174_v58, 1  ;;  %v4158_v3 = vmax.f32 %v4156_v8, %v4157_v7  ;;  %v4183_v28 = vmax.f32 %v4181_v40, %v4182_v2  ;;  %v4186_v21 = vsel %vm3969_vm4, %v3725_v61, -inf  ;;  %v3581_v13 = vpop.f32.mrf.mxu0  ;;  %v3492_v30 = vpop.f32.mrf.mxu3 }
 0x3ea   : > { %v4195_v39 = vsel %vm3969_vm4, %v3813_v33, -inf  ;;  %v4204_v37 = vsel %vm3969_vm4, %v3814_v12, -inf  ;;  %v4213_v60 = vsel %vm3969_vm4, %v3815_v34, -inf  ;;  %v3580_v45 = vadd.f32 %v3579_v31, %v3491_v29  ;;  %v15169_v31 = vld [vmem:[#allocation16_spill] sm:$0xff] }
 0x3eb   : > { %v3666_v18 = vadd.f32 %v3665_v49, %v3577_v1  ;;  %v4167_v14 = vmax.f32 %v4165_v0, %v4166_v62  ;;  %v10392_v36 = vunpack.i.h.bf16 %v10390_v53  ;;  %v10391_v5 = vunpack.i.l.bf16 %v10390_v53  ;;  %v3668_v54 = vpop.f32.mrf.mxu1 }
 0x3ec   : > { %v10387_v55 = vunpack.i.h.bf16 %v10385_v46  ;;  %v4176_v38 = vmax.f32 %v4174_v58, %v4175_v57  ;;  %v10386_v26 = vunpack.i.l.bf16 %v10385_v46  ;;  %v3493_v48 = vadd.f32 %v3492_v30, %v3404_v47 }
 0x3ed   : > { %v13249_v22 = vmax.f32 %v3666_v18, 0.0  ;;  %v2827_v43 = vsel %vm2765_vm13, %v15161_v20, %v10391_v5  ;;  %v2828_v51 = vsel %vm2765_vm13, %v15160_v41, %v10392_v36  ;;  %v3669_v40 = vadd.f32 %v3668_v54, %v3580_v45 }
 0x3ee   : > { %v2862_v23 = vsel %vm2765_vm13, %v15169_v31, %v10387_v55  ;;  %v4631_v52 = vsel %vm4616_vm8, %v4158_v3, %v4630_v16  ;;  %v3407_v63 = vadd.f32 %v3406_v24, %v13173_v35  ;;  %v4184_v9 = vrot.slane %v4183_v28, 1 }
 0x3ef   : > { %v3816_v17 = vrot.slane %v13249_v22, 2  ;;  %v3817_v11 = vrot.slane %v13249_v22, 4  ;;  %v2925_v8 = vpack.c.bf16 %v2828_v51, %v2827_v43  ;;  %v3727_v20 = vmax.f32 %v3669_v40, 0.0 }
 0x3f0   : > { %v2861_v41 = vsel %vm2765_vm13, %v15170_v59, %v10386_v26  ;;  %v3818_v27 = vrot.slane %v13249_v22, 6  ;;  %v4222_v49 = vsel %vm3969_vm4, %v13249_v22, -inf  ;;  %v3582_v2 = vadd.f32 %v3581_v13, %v3493_v48  ;;  %v13267_v58 = vpop.f32.mrf.mxu2 }
 0x3f1   : > { %v2923_v16 = vpack.c.bf16 %v2862_v23, %v2861_v41  ;;  %3440 = vmatmul.bf16.gmra.mxu2 %v2925_v8  ;;  %v3819_v61 = vrot.slane %v3727_v20, 2  ;;  %v3820_v7 = vrot.slane %v3727_v20, 4  ;;  %v3821_v35 = vrot.slane %v3727_v20, 6  ;;  %v13270_v12 = vpop.f32.mrf.mxu0  ;;  %v3495_v53 = vpop.f32.mrf.mxu3 }
 0x3f2   : > { %v4187_v0 = vsel %vm3969_vm4, %v3727_v20, -inf  ;;  %v4231_v29 = vsel %vm3969_vm4, %v3816_v17, -inf  ;;  %v4185_v34 = vmax.f32 %v4183_v28, %v4184_v9  ;;  %v4632_v62 = vsel %vm4618_vm9, %v4167_v14, %v4631_v52 }
 0x3f3   : > { %v4188_v33 = vmax.f32 %v4186_v21, %v4187_v0  ;;  %3613 = vmatmul.bf16.gmra.mxu0 %v2923_v16  ;;  %v4196_v57 = vsel %vm3969_vm4, %v3819_v61, -inf  ;;  %v4205_v1 = vsel %vm3969_vm4, %v3820_v7, -inf  ;;  %v4214_v47 = vsel %vm3969_vm4, %v3821_v35, -inf  ;;  %v3670_v21 = vpop.f32.mrf.mxu1 }
 0x3f4   : > { %v4633_v3 = vsel %vm4620_vm10, %v4176_v38, %v4632_v62  ;;  %v4197_v45 = vmax.f32 %v4195_v39, %v4196_v57  ;;  %v4206_v18 = vmax.f32 %v4204_v37, %v4205_v1  ;;  %v4215_v46 = vmax.f32 %v4213_v60, %v4214_v47 }
 0x3f5   : > { %v4189_v24 = vrot.slane %v4188_v33, 4  ;;  %v4240_v13 = vsel %vm3969_vm4, %v3817_v11, -inf  ;;  %v13279_v28 = vsel %vm504_vm0, 0.0, %v4633_v3  ;;  %v13282_v14 = vsel %vm504_vm0, %v4185_v34, 0.0 }
 0x3f6   : > { %v3671_v36 = vadd.f32 %v3670_v21, %v3582_v2  ;;  %v4198_v55 = vrot.slane %v4197_v45, 4  ;;  %v4207_v30 = vrot.slane %v4206_v18, 4  ;;  %v4216_v15 = vrot.slane %v4215_v46, 4 }
 0x3f7   : > { %v4190_v5 = vmax.f32 %v4188_v33, %v4189_v24  ;;  %v3496_v42 = vadd.f32 %v3495_v53, %v3407_v63  ;;  %v4716_v38 = vrot.slane %v13279_v28, 1  ;;  %v4717_v39 = vrot.slane %v13282_v14, 1 }
 0x3f8   : > { %v3728_v37 = vmax.f32 %v3671_v36, 0.0  ;;  %v4199_v26 = vmax.f32 %v4197_v45, %v4198_v55  ;;  %v4208_v48 = vmax.f32 %v4206_v18, %v4207_v30  ;;  %v4217_v54 = vmax.f32 %v4215_v46, %v4216_v15  ;;  %v13289_v23 = vpop.f32.mrf.mxu2 }
 0x3f9   : > { %v4191_v60 = vrot.slane %v4190_v5, 2  ;;  %v13287_v43 = vsel %vm663_vm1, %v4716_v38, %v4717_v39  ;;  %v13291_v11 = vpop.f32.mrf.mxu0  ;;  %v3497_v2 = vpop.f32.mrf.mxu3  ;;  %v4249_v1 = vsel %vm3969_vm4, %v3818_v27, -inf  ;;  %v3409_v38 = vadd.f32 %v13267_v58, %v13177_v50 }
 0x3fa   : > { %v3822_v51 = vrot.slane %v3728_v37, 2  ;;  %v3823_v40 = vrot.slane %v3728_v37, 4  ;;  %v3824_v31 = vrot.slane %v3728_v37, 6  ;;  %v4200_v17 = vrot.slane %v4199_v26, 2 }
 0x3fb   : > { %v4192_v52 = vmax.f32 %v4190_v5, %v4191_v60  ;;  %v4209_v63 = vrot.slane %v4208_v48, 2  ;;  %v4218_v9 = vrot.slane %v4217_v54, 2  ;;  %v10398_v8 = vpack.i.bf16 %v13287_v43, %v13235_v56  ;;  %v3673_v0 = vpop.f32.mrf.mxu1 }
 0x3fc   : > { %v4223_v20 = vsel %vm3969_vm4, %v3728_v37, -inf  ;;  %v4232_v59 = vsel %vm3969_vm4, %v3822_v51, -inf  ;;  %v4241_v41 = vsel %vm3969_vm4, %v3823_v40, -inf  ;;  %v4201_v61 = vmax.f32 %v4199_v26, %v4200_v17  ;;  %v15171_v37 = vld [vmem:[#allocation19_spill] sm:$0xff]  ;;  %v9278_v17 = vld [vmem:[%s14914_s5 + $0x20] sm:$0xff] }
 0x3fd   : > { %v4193_v16 = vrot.slane %v4192_v52, 1  ;;  %v4210_v7 = vmax.f32 %v4208_v48, %v4209_v63  ;;  %v4219_v35 = vmax.f32 %v4217_v54, %v4218_v9  ;;  %10399 = vrot.lane.b32.xlu1 %v10398_v8, %s15028_s24  ;;  %v4224_v33 = vmax.f32 %v4222_v49, %v4223_v20  ;;  %v15173_v20 = vld [vmem:[#allocation7_spill] sm:$0xff]  ;;  %5196 = vmatpush.bf16.msrb.mxu2 %v9278_v17 }
 0x3fe   : > { %v4233_v34 = vmax.f32 %v4231_v29, %v4232_v59  ;;  %v4242_v62 = vmax.f32 %v4240_v13, %v4241_v41  ;;  %v4250_v57 = vsel %vm3969_vm4, %v3824_v31, -inf  ;;  %v4202_v47 = vrot.slane %v4201_v61, 1 }
 0x3ff   : > { %v4211_v53 = vrot.slane %v4210_v7, 1  ;;  %v4220_v3 = vrot.slane %v4219_v35, 1  ;;  %v4225_v24 = vrot.slane %v4224_v33, 4  ;;  %v4251_v46 = vmax.f32 %v4249_v1, %v4250_v57 }
 0x400   : > { %v4234_v45 = vrot.slane %v4233_v34, 4  ;;  %v4243_v18 = vrot.slane %v4242_v62, 4  ;;  %v4194_v21 = vmax.f32 %v4192_v52, %v4193_v16  ;;  %v4203_v36 = vmax.f32 %v4201_v61, %v4202_v47  ;;  %v3413_v15 = vpop.f32.mrf.mxu2 }
 0x401   : > { %v4212_v5 = vmax.f32 %v4210_v7, %v4211_v53  ;;  %v3585_v49 = vadd.f32 %v13270_v12, %v3496_v42  ;;  %v4226_v29 = vmax.f32 %v4224_v33, %v4225_v24  ;;  %v4252_v30 = vrot.slane %v4251_v46, 4  ;;  %v3589_v12 = vpop.f32.mrf.mxu0  ;;  %v3500_v51 = vpop.f32.mrf.mxu3 }
 0x402   : > { %v4235_v13 = vmax.f32 %v4233_v34, %v4234_v45  ;;  %v4244_v55 = vmax.f32 %v4242_v62, %v4243_v18  ;;  %v4221_v22 = vmax.f32 %v4219_v35, %v4220_v3  ;;  %v4634_v27 = vsel %vm4610_vm5, %v4203_v36, %v4194_v21  ;;  %v13330_v35 = vld [vmem:[%s14913_s4] ss:$0 sm:$0xff] }
 0x403   : > { %v3674_v39 = vadd.f32 %v3673_v0, %v3585_v49  ;;  %8307 = vmatmul.msk.bf16.gmra.mxu0 %vm8300_vm15, %v15171_v37  ;;  %v4635_v42 = vsel %vm4612_vm6, %v4212_v5, %v4634_v27  ;;  %v4227_v26 = vrot.slane %v4226_v29, 2  ;;  %v4253_v31 = vmax.f32 %v4251_v46, %v4252_v30  ;;  %v3675_v58 = vpop.f32.mrf.mxu1  ;;  %v15174_v0 = vld [vmem:[#allocation40_spill] sm:$0xff]  ;;  %vm13769_vm15 = vmpackc.low %vm11913_vm14, %vm10592_vm11 }
 0x404   : > { %v4236_v48 = vrot.slane %v4235_v13, 2  ;;  %v4245_v54 = vrot.slane %v4244_v55, 2  ;;  %v4636_v40 = vsel %vm4614_vm7, %v4221_v22, %v4635_v42  ;;  %v3498_v52 = vadd.f32 %v3497_v2, %v3409_v38 }
 0x405   : > { %v3729_v50 = vmax.f32 %v3674_v39, 0.0  ;;  %v4228_v63 = vmax.f32 %v4226_v29, %v4227_v26  ;;  %10414 = vrot.lane.b32.xlu1 %v10413_v44, %s15028_s24  ;;  %v2927_v59 = vpack.c.bf16 %v15173_v20, %v15173_v20  ;;  %v4254_v41 = vrot.slane %v4253_v31, 2 }
 0x406   : > { %v4237_v9 = vmax.f32 %v4235_v13, %v4236_v48  ;;  %v4246_v8 = vmax.f32 %v4244_v55, %v4245_v54  ;;  %v3412_v7 = vadd.f32 %v13289_v23, %v13181_v25  ;;  %v3325_v44 = vadd.f32 %v13330_v35, %v15174_v0  ;;  %v9277_v25 = vld [vmem:[%s14914_s5 + $0x18] sm:$0xff]  ;;  %v9288_v23 = vld [vmem:[%s14914_s5 + $0x70] sm:$0xff] }
 0x407   : > { %v4229_v2 = vrot.slane %v4228_v63, 1  ;;  %8323 = vmatmul.msk.bf16.gmra.mxu1 %vm2765_vm13, %v2927_v59  ;;  %v4255_v33 = vmax.f32 %v4253_v31, %v4254_v41  ;;  %v3587_v34 = vadd.f32 %v13291_v11, %v3498_v52  ;;  %v3825_v62 = vrot.slane %v3729_v50, 2  ;;  %v15175_v11 = vld [vmem:[#allocation26_spill] sm:$0xff]  ;;  %5197 = vmatpush.bf16.msrb.mxu2 %v9277_v25  ;;  %v9276_v55 = vld [vmem:[%s14914_s5 + $0x10] sm:$0xff] }
 0x408   : > { %v4238_v16 = vrot.slane %v4237_v9, 1  ;;  %v4247_v61 = vrot.slane %v4246_v8, 1  ;;  %v3501_v53 = vadd.f32 %v3500_v51, %v3412_v7  ;;  %v3416_v3 = vpop.f32.mrf.mxu2  ;;  %v3826_v24 = vrot.slane %v3729_v50, 4  ;;  %5223 = vmatpush.bf16.msrb.mxu3 %v9288_v23 }
 0x409   : > { %v4230_v57 = vmax.f32 %v4228_v63, %v4229_v2  ;;  %v3827_v45 = vrot.slane %v3729_v50, 6  ;;  %v3676_v18 = vadd.f32 %v3675_v58, %v3587_v34  ;;  %v3591_v46 = vpop.f32.mrf.mxu0  ;;  %v4256_v21 = vrot.slane %v4255_v33, 1  ;;  %v3502_v29 = vpop.f32.mrf.mxu3 }
 0x40a   : > { %v4239_v1 = vmax.f32 %v4237_v9, %v4238_v16  ;;  %v4248_v47 = vmax.f32 %v4246_v8, %v4247_v61  ;;  %v3328_v36 = vadd.f32 %v13330_v35, %v15175_v11  ;;  %v3590_v49 = vadd.f32 %v3589_v12, %v3501_v53  ;;  %v9274_v53 = vld [vmem:[%s14914_s5] sm:$0xff] }
 0x40b   : > { %v4637_v5 = vsel %vm4616_vm8, %v4230_v57, %v4636_v40  ;;  %v4737_v13 = vrot.slane %v13279_v28, 2  ;;  %v3414_v30 = vadd.f32 %v3413_v15, %v3325_v44  ;;  %v3730_v22 = vmax.f32 %v3676_v18, 0.0  ;;  %v3678_v27 = vpop.f32.mrf.mxu1  ;;  %5198 = vmatpush.bf16.msrb.mxu2 %v9276_v55 }
 0x40c   : > { %v4257_v38 = vmax.f32 %v4255_v33, %v4256_v21  ;;  %v4638_v39 = vsel %vm4618_vm9, %v4239_v1, %v4637_v5  ;;  %v4258_v37 = vsel %vm3969_vm4, %v3729_v50, -inf  ;;  %v3679_v42 = vadd.f32 %v3678_v27, %v3590_v49 }
 0x40d   : > { %v4639_v12 = vsel %vm4620_vm10, %v4248_v47, %v4638_v39  ;;  %v4738_v26 = vrot.slane %v13282_v14, 2  ;;  %v4267_v48 = vsel %vm3969_vm4, %v3825_v62, -inf  ;;  %v4276_v54 = vsel %vm3969_vm4, %v3826_v24, -inf  ;;  %v9275_v14 = vld [vmem:[%s14914_s5 + $0x8] sm:$0xff] }
 0x40e   : > { %v4285_v51 = vsel %vm3969_vm4, %v3827_v45, -inf  ;;  %v3503_v40 = vadd.f32 %v3502_v29, %v3414_v30  ;;  %v3417_v15 = vadd.f32 %v3416_v3, %v3328_v36  ;;  %v3731_v31 = vmax.f32 %v3679_v42, 0.0 }
 0x40f   : > { %v13356_v52 = vsel %vm504_vm0, 0.0, %v4639_v12  ;;  %v13359_v58 = vsel %vm741_vm2, %v4737_v13, %v4738_v26  ;;  %v3828_v50 = vrot.slane %v3730_v22, 2  ;;  %v3829_v17 = vrot.slane %v3730_v22, 4  ;;  %5199 = vmatpush.bf16.msrb.mxu2 %v9275_v14 }
 0x410   : > { %v13365_v63 = vsel %vm504_vm0, %v4257_v38, 0.0  ;;  %v4740_v9 = vrot.slane %v13356_v52, 2  ;;  %v3831_v8 = vrot.slane %v3731_v31, 2  ;;  %v3832_v59 = vrot.slane %v3731_v31, 4  ;;  %v13369_v16 = vpop.f32.mrf.mxu2 }
 0x411   : > { %v3833_v41 = vrot.slane %v3731_v31, 6  ;;  %v4259_v2 = vsel %vm3969_vm4, %v3731_v31, -inf  ;;  %v3830_v61 = vrot.slane %v3730_v22, 6  ;;  %v4294_v7 = vsel %vm3969_vm4, %v3730_v22, -inf  ;;  %v13372_v33 = vpop.f32.mrf.mxu0  ;;  %v3505_v1 = vpop.f32.mrf.mxu3 }
 0x412   : > { %v3592_v0 = vadd.f32 %v3591_v46, %v3503_v40  ;;  %v4260_v44 = vmax.f32 %v4258_v37, %v4259_v2  ;;  %v4268_v34 = vsel %vm3969_vm4, %v3831_v8, -inf  ;;  %v4277_v62 = vsel %vm3969_vm4, %v3832_v59, -inf }
 0x413   : > { %v4286_v57 = vsel %vm3969_vm4, %v3833_v41, -inf  ;;  %v4741_v47 = vrot.slane %v13365_v63, 2  ;;  %v4269_v25 = vmax.f32 %v4267_v48, %v4268_v34  ;;  %v4278_v23 = vmax.f32 %v4276_v54, %v4277_v62  ;;  %v3680_v45 = vpop.f32.mrf.mxu1  ;;  %5200 = vmatpush.bf16.msrb.mxu2 %v9274_v53 }
 0x414   : > { %v4261_v3 = vrot.slane %v4260_v44, 4  ;;  %v4287_v24 = vmax.f32 %v4285_v51, %v4286_v57  ;;  %v4303_v18 = vsel %vm3969_vm4, %v3828_v50, -inf  ;;  %v4312_v46 = vsel %vm3969_vm4, %v3829_v17, -inf }
 0x415   : > { %v13384_v21 = vsel %vm741_vm2, %v4740_v9, %v4741_v47  ;;  %v3681_v11 = vadd.f32 %v3680_v45, %v3592_v0  ;;  %v4270_v5 = vrot.slane %v4269_v25, 4  ;;  %v4279_v49 = vrot.slane %v4278_v23, 4  ;;  %v15176_v47 = vld [vmem:[#allocation9_spill] sm:$0xff] }
 0x416   : > { %v4262_v36 = vmax.f32 %v4260_v44, %v4261_v3  ;;  %v4288_v29 = vrot.slane %v4287_v24, 4  ;;  %v4321_v13 = vsel %vm3969_vm4, %v3830_v61, -inf  ;;  %v3506_v55 = vadd.f32 %v3505_v1, %v3417_v15 }
 0x417   : > { %v10428_v30 = vpack.i.bf16 %v13384_v21, %v13359_v58  ;;  %v3732_v22 = vmax.f32 %v3681_v11, 0.0  ;;  %v4271_v38 = vmax.f32 %v4269_v25, %v4270_v5  ;;  %v4280_v39 = vmax.f32 %v4278_v23, %v4279_v49 }
 0x418   : > { %v4263_v27 = vrot.slane %v4262_v36, 2  ;;  %v4289_v37 = vmax.f32 %v4287_v24, %v4288_v29  ;;  %v3421_v54 = vpop.f32.mrf.mxu2  ;;  %v3330_v53 = vadd.f32 %v13330_v35, %v15176_v47  ;;  %v3595_v29 = vadd.f32 %v13372_v33, %v3506_v55  ;;  %v9287_v47 = vld [vmem:[%s14914_s5 + $0x68] sm:$0xff] }
 0x419   : > { %10429 = vrot.lane.b32.xlu1 %v10428_v30, %s15028_s24  ;;  %v3834_v42 = vrot.slane %v3732_v22, 2  ;;  %v3835_v12 = vrot.slane %v3732_v22, 4  ;;  %v3836_v26 = vrot.slane %v3732_v22, 6  ;;  %v4295_v48 = vsel %vm3969_vm4, %v3732_v22, -inf  ;;  %v13391_v14 = vpop.f32.mrf.mxu0  ;;  %v3507_v59 = vpop.f32.mrf.mxu3  ;;  %5224 = vmatpush.bf16.msrb.mxu3 %v9287_v47 }
 0x41a   : > { %v4264_v51 = vmax.f32 %v4262_v36, %v4263_v27  ;;  %v4272_v40 = vrot.slane %v4271_v38, 2  ;;  %v4281_v15 = vrot.slane %v4280_v39, 2  ;;  %v4290_v31 = vrot.slane %v4289_v37, 2 }
 0x41b   : > { %v4296_v50 = vmax.f32 %v4294_v7, %v4295_v48  ;;  %v4304_v17 = vsel %vm3969_vm4, %v3834_v42, -inf  ;;  %v4313_v9 = vsel %vm3969_vm4, %v3835_v12, -inf  ;;  %v4322_v8 = vsel %vm3969_vm4, %v3836_v26, -inf }
 0x41c   : > { %v4265_v41 = vrot.slane %v4264_v51, 1  ;;  %v4273_v2 = vmax.f32 %v4271_v38, %v4272_v40  ;;  %v4282_v61 = vmax.f32 %v4280_v39, %v4281_v15  ;;  %v4291_v0 = vmax.f32 %v4289_v37, %v4290_v31  ;;  %v3683_v44 = vpop.f32.mrf.mxu1 }
 0x41d   : > { %v4297_v34 = vrot.slane %v4296_v50, 4  ;;  %v4305_v62 = vmax.f32 %v4303_v18, %v4304_v17  ;;  %v4314_v57 = vmax.f32 %v4312_v46, %v4313_v9  ;;  %v4323_v1 = vmax.f32 %v4321_v13, %v4322_v8  ;;  %v15177_v13 = vld [vmem:[#allocation10_spill] sm:$0xff] }
 0x41e   : > { %v4274_v7 = vrot.slane %v4273_v2, 1  ;;  %v4283_v3 = vrot.slane %v4282_v61, 1  ;;  %v4292_v25 = vrot.slane %v4291_v0, 1  ;;  %v4266_v36 = vmax.f32 %v4264_v51, %v4265_v41 }
 0x41f   : > { %v4298_v23 = vmax.f32 %v4296_v50, %v4297_v34  ;;  %v4306_v24 = vrot.slane %v4305_v62, 4  ;;  %v4315_v45 = vrot.slane %v4314_v57, 4  ;;  %v4324_v11 = vrot.slane %v4323_v1, 4 }
 0x420   : > { %v4275_v5 = vmax.f32 %v4273_v2, %v4274_v7  ;;  %v4284_v49 = vmax.f32 %v4282_v61, %v4283_v3  ;;  %v3333_v27 = vadd.f32 %v13330_v35, %v15177_v13  ;;  %v4293_v38 = vmax.f32 %v4291_v0, %v4292_v25  ;;  %v3423_v42 = vpop.f32.mrf.mxu2  ;;  %v15178_v7 = vld [vmem:[#allocation29_spill] sm:$0xff] }
 0x421   : > { %v4299_v30 = vrot.slane %v4298_v23, 2  ;;  %v4307_v22 = vmax.f32 %v4305_v62, %v4306_v24  ;;  %v4316_v18 = vmax.f32 %v4314_v57, %v4315_v45  ;;  %v4325_v46 = vmax.f32 %v4323_v1, %v4324_v11  ;;  %v3599_v12 = vpop.f32.mrf.mxu0  ;;  %v9326_v45 = vld [vmem:[%s14916_s7 + $0x80] sm:$0xff] }
 0x422   : > { %v4640_v39 = vsel %vm4610_vm5, %v4275_v5, %v4266_v36  ;;  %v3684_v37 = vadd.f32 %v3683_v44, %v3595_v29  ;;  %v3419_v55 = vadd.f32 %v13369_v16, %v3330_v53  ;;  %v3422_v41 = vadd.f32 %v3421_v54, %v3333_v27  ;;  %v15181_v36 = vld [vmem:[#allocation18_spill] sm:$0xff] }
 0x423   : > { %v4641_v26 = vsel %vm4612_vm6, %v4284_v49, %v4640_v39  ;;  %v4300_v48 = vmax.f32 %v4298_v23, %v4299_v30  ;;  %v4308_v51 = vrot.slane %v4307_v22, 2  ;;  %v4317_v40 = vrot.slane %v4316_v18, 2 }
 0x424   : > { %v4642_v33 = vsel %vm4614_vm7, %v4293_v38, %v4641_v26  ;;  %v4326_v31 = vrot.slane %v4325_v46, 2  ;;  %v3685_v50 = vpop.f32.mrf.mxu1  ;;  %v3508_v61 = vadd.f32 %v3507_v59, %v3419_v55  ;;  %v3733_v0 = vmax.f32 %v3684_v37, 0.0 }
 0x425   : > { %v3510_v15 = vpop.f32.mrf.mxu3  ;;  %v4301_v17 = vrot.slane %v4300_v48, 1  ;;  %v4309_v9 = vmax.f32 %v4307_v22, %v4308_v51  ;;  %v4318_v8 = vmax.f32 %v4316_v18, %v4317_v40  ;;  %v4777_v44 = vpop.permute.xlu0 %4776  ;;  %v3335_v16 = vadd.f32 %v13330_v35, %v15178_v7 }
 0x426   : > { %v4327_v2 = vmax.f32 %v4325_v46, %v4326_v31  ;;  %v3511_v1 = vadd.f32 %v3510_v15, %v3422_v41  ;;  %v4719_v53 = vrot.slane %v13356_v52, 1  ;;  %v4734_v3 = vrot.slane %v13197_v19, 2 }
 0x427   : > { %v4302_v34 = vmax.f32 %v4300_v48, %v4301_v17  ;;  %v4310_v62 = vrot.slane %v4309_v9, 1  ;;  %v4319_v57 = vrot.slane %v4318_v8, 1  ;;  %v4735_v54 = vrot.slane %v13200_v6, 2 }
 0x428   : > { %v4848_v24 = vsel %vm2765_vm13, %v13098_v4, %v4777_v44  ;;  %v3597_v11 = vadd.f32 %v13391_v14, %v3508_v61  ;;  %v4328_v49 = vrot.slane %v4327_v2, 1  ;;  %v4720_v29 = vrot.slane %v13365_v63, 1 }
 0x429   : > { %v4311_v59 = vmax.f32 %v4309_v9, %v4310_v62  ;;  %v4320_v25 = vmax.f32 %v4318_v8, %v4319_v57  ;;  %v4643_v23 = vsel %vm4616_vm8, %v4302_v34, %v4642_v33  ;;  %v8470_v6 = vpack.c.bf16 %v4848_v24, %v15181_v36  ;;  %v3601_v5 = vpop.f32.mrf.mxu0 }
 0x42a   : > { %v3837_v30 = vrot.slane %v3733_v0, 2  ;;  %v3424_v22 = vadd.f32 %v3423_v42, %v3335_v16  ;;  %v3600_v18 = vadd.f32 %v3599_v12, %v3511_v1  ;;  %v3838_v27 = vrot.slane %v3733_v0, 4 }
 0x42b   : > { %v4644_v13 = vsel %vm4618_vm9, %v4311_v59, %v4643_v23  ;;  %v3686_v38 = vadd.f32 %v3685_v50, %v3597_v11  ;;  %8471 = vmatmul.msk.bf16.vlgmr.msrb.gmra.mxu2 %vm13419_vm12, %v8470_v6  ;;  %v3426_v39 = vpop.f32.mrf.mxu2  ;;  %v4329_v14 = vmax.f32 %v4327_v2, %v4328_v49  ;;  %v4732_v48 = vrot.slane %v13101_v10, 2  ;;  %v15182_v11 = vld [vmem:[#allocation11_spill] sm:$0xff] }
 0x42c   : > { %v4645_v26 = vsel %vm4620_vm10, %v4320_v25, %v4644_v13  ;;  %v4731_v42 = vrot.slane %v13098_v4, 2  ;;  %v3839_v12 = vrot.slane %v3733_v0, 6  ;;  %v13436_v15 = vsel %vm663_vm1, %v4719_v53, %v4720_v29 }
 0x42d   : > { %v3512_v46 = vpop.f32.mrf.mxu3  ;;  %v3688_v37 = vpop.f32.mrf.mxu1  ;;  %v13432_v63 = vsel %vm504_vm0, 0.0, %v4645_v26  ;;  %v13439_v33 = vsel %vm741_vm2, %v4734_v3, %v4735_v54  ;;  %v4330_v55 = vsel %vm3969_vm4, %v3733_v0, -inf  ;;  %v13443_v50 = vsel %vm504_vm0, %v4329_v14, 0.0 }
 0x42e   : > { %v3689_v51 = vadd.f32 %v3688_v37, %v3600_v18  ;;  %v3513_v40 = vadd.f32 %v3512_v46, %v3424_v22  ;;  %v4722_v10 = vrot.slane %v13432_v63, 1  ;;  %v4339_v17 = vsel %vm3969_vm4, %v3837_v30, -inf }
 0x42f   : > { %v4348_v4 = vsel %vm3969_vm4, %v3838_v27, -inf  ;;  %v13448_v9 = vmax.f32 %v3686_v38, 0.0  ;;  %v4723_v8 = vrot.slane %v13443_v50, 1  ;;  %v4357_v0 = vsel %vm3969_vm4, %v3839_v12, -inf }
 0x430   : > { %v3735_v31 = vmax.f32 %v3689_v51, 0.0  ;;  %v3602_v34 = vadd.f32 %v3601_v5, %v3513_v40  ;;  %v3338_v6 = vadd.f32 %v13330_v35, %v15182_v11  ;;  %v13468_v29 = vsel %vm741_vm2, %v4731_v42, %v4732_v48 }
 0x431   : > { %v13454_v57 = vsel %vm663_vm1, %v4722_v10, %v4723_v8  ;;  %v13461_v23 = vpop.f32.mrf.mxu0  ;;  %v3840_v5 = vrot.slane %v13448_v9, 2  ;;  %v3841_v27 = vrot.slane %v13448_v9, 4  ;;  %v10418_v14 = vpack.i.bf16 %v13439_v33, %v13468_v29 }
 0x432   : > { %v3843_v41 = vrot.slane %v3735_v31, 2  ;;  %v3844_v2 = vrot.slane %v3735_v31, 4  ;;  %v3845_v61 = vrot.slane %v3735_v31, 6  ;;  %v4331_v44 = vsel %vm3969_vm4, %v3735_v31, -inf }
 0x433   : > { %v4332_v62 = vmax.f32 %v4330_v55, %v4331_v44  ;;  %v10403_v53 = vpack.i.bf16 %v13454_v57, %v13436_v15  ;;  %v3428_v13 = vpop.f32.mrf.mxu2  ;;  %v3427_v38 = vadd.f32 %v3426_v39, %v3338_v6  ;;  %v4366_v48 = vsel %vm3969_vm4, %v13448_v9, -inf }
 0x434   : > { %v4340_v1 = vsel %vm3969_vm4, %v3843_v41, -inf  ;;  %v4349_v47 = vsel %vm3969_vm4, %v3844_v2, -inf  ;;  %v4358_v7 = vsel %vm3969_vm4, %v3845_v61, -inf  ;;  %v4375_v10 = vsel %vm3969_vm4, %v3840_v5, -inf }
 0x435   : > { %v3515_v16 = vpop.f32.mrf.mxu3  ;;  %v4333_v3 = vrot.slane %v4332_v62, 4  ;;  %v4341_v54 = vmax.f32 %v4339_v17, %v4340_v1  ;;  %v4350_v59 = vmax.f32 %v4348_v4, %v4349_v47  ;;  %v4359_v25 = vmax.f32 %v4357_v0, %v4358_v7  ;;  %v3690_v24 = vpop.f32.mrf.mxu1  ;;  %10404 = vrot.lane.b32.xlu2 %v10403_v53, %s15028_s24  ;;  %v15183_v7 = vld [vmem:[#allocation12_spill] sm:$0xff] }
 0x436   : > { %v3691_v49 = vadd.f32 %v3690_v24, %v3602_v34  ;;  %v4384_v0 = vsel %vm3969_vm4, %v3841_v27, -inf  ;;  %v3340_v53 = vadd.f32 %v13330_v35, %v15183_v7  ;;  %v3516_v11 = vadd.f32 %v3515_v16, %v3427_v38 }
 0x437   : > { %v4334_v30 = vmax.f32 %v4332_v62, %v4333_v3  ;;  %v4342_v22 = vrot.slane %v4341_v54, 4  ;;  %v4351_v18 = vrot.slane %v4350_v59, 4  ;;  %v4360_v46 = vrot.slane %v4359_v25, 4 }
 0x438   : > { %v3736_v37 = vmax.f32 %v3691_v49, 0.0  ;;  %v3429_v38 = vadd.f32 %v3428_v13, %v3340_v53 }
 0x439   : > { %v4335_v26 = vrot.slane %v4334_v30, 2  ;;  %v4343_v51 = vmax.f32 %v4341_v54, %v4342_v22  ;;  %v4352_v12 = vmax.f32 %v4350_v59, %v4351_v18  ;;  %v4361_v40 = vmax.f32 %v4359_v25, %v4360_v46  ;;  %v3606_v5 = vpop.f32.mrf.mxu0 }
 0x43a   : > { %v3846_v42 = vrot.slane %v3736_v37, 2  ;;  %v3847_v55 = vrot.slane %v3736_v37, 4  ;;  %v4367_v31 = vsel %vm3969_vm4, %v3736_v37, -inf  ;;  %v3848_v6 = vrot.slane %v3736_v37, 6 }
 0x43b   : > { %v4336_v17 = vmax.f32 %v4334_v30, %v4335_v26  ;;  %v4344_v4 = vrot.slane %v4343_v51, 2  ;;  %v4353_v39 = vrot.slane %v4352_v12, 2  ;;  %v4362_v8 = vrot.slane %v4361_v40, 2 }
 0x43c   : > { %v4368_v41 = vmax.f32 %v4366_v48, %v4367_v31  ;;  %v4376_v2 = vsel %vm3969_vm4, %v3846_v42, -inf  ;;  %v4385_v61 = vsel %vm3969_vm4, %v3847_v55, -inf  ;;  %v3842_v46 = vrot.slane %v13448_v9, 6  ;;  %v15184_v48 = vld [vmem:[#allocation30_spill] sm:$0xff] }
 0x43d   : > { %v3517_v44 = vpop.f32.mrf.mxu3  ;;  %v4337_v34 = vrot.slane %v4336_v17, 1  ;;  %v4345_v62 = vmax.f32 %v4343_v51, %v4344_v4  ;;  %v4354_v1 = vmax.f32 %v4352_v12, %v4353_v39  ;;  %v3693_v47 = vpop.f32.mrf.mxu1  ;;  %v4377_v54 = vmax.f32 %v4375_v10, %v4376_v2  ;;  %10419 = vrot.lane.b32.xlu2 %v10418_v14, %s15028_s24 }
 0x43e   : > { %v4369_v3 = vrot.slane %v4368_v41, 4  ;;  %v4386_v59 = vmax.f32 %v4384_v0, %v4385_v61  ;;  %v4363_v49 = vmax.f32 %v4361_v40, %v4362_v8  ;;  %v3431_v12 = vpop.f32.mrf.mxu2  ;;  %v3343_v42 = vadd.f32 %v13330_v35, %v15184_v48 }
 0x43f   : > { %v4346_v25 = vrot.slane %v4345_v62, 1  ;;  %v4355_v24 = vrot.slane %v4354_v1, 1  ;;  %v4378_v22 = vrot.slane %v4377_v54, 4  ;;  %v4338_v27 = vmax.f32 %v4336_v17, %v4337_v34 }
 0x440   : > { %v4370_v30 = vmax.f32 %v4368_v41, %v4369_v3  ;;  %v4387_v18 = vrot.slane %v4386_v59, 4  ;;  %v3605_v37 = vadd.f32 %v13461_v23, %v3516_v11  ;;  %v4394_v40 = vsel %vm3969_vm4, %v3848_v6, -inf }
 0x441   : > { %v4347_v26 = vmax.f32 %v4345_v62, %v4346_v25  ;;  %v4356_v51 = vmax.f32 %v4354_v1, %v4355_v24  ;;  %v4379_v14 = vmax.f32 %v4377_v54, %v4378_v22  ;;  %v4364_v10 = vrot.slane %v4363_v49, 1  ;;  %v3609_v24 = vpop.f32.mrf.mxu0 }
 0x442   : > { %v4371_v55 = vrot.slane %v4370_v30, 2  ;;  %v4388_v31 = vmax.f32 %v4386_v59, %v4387_v18  ;;  %v4393_v8 = vsel %vm3969_vm4, %v3842_v46, -inf  ;;  %v3518_v41 = vadd.f32 %v3517_v44, %v3429_v38 }
 0x443   : > { %v4646_v16 = vsel %vm4610_vm5, %v4347_v26, %v4338_v27  ;;  %v4380_v9 = vrot.slane %v4379_v14, 2  ;;  %v3694_v2 = vadd.f32 %v3693_v47, %v3605_v37  ;;  %v3432_v13 = vadd.f32 %v3431_v12, %v3343_v42  ;;  %v9286_v47 = vld [vmem:[%s14914_s5 + $0x60] sm:$0xff]  ;;  %v15185_v27 = vld [vmem:[#allocation13_spill] sm:$0xff] }
 0x444   : > { %v4372_v4 = vmax.f32 %v4370_v30, %v4371_v55  ;;  %v4389_v17 = vrot.slane %v4388_v31, 2  ;;  %v4647_v0 = vsel %vm4612_vm6, %v4356_v51, %v4646_v16  ;;  %v4395_v7 = vmax.f32 %v4393_v8, %v4394_v40  ;;  %5225 = vmatpush.bf16.msrb.mxu3 %v9286_v47  ;;  %v9285_v51 = vld [vmem:[%s14914_s5 + $0x58] sm:$0xff] }
 0x445   : > { %v3520_v39 = vpop.f32.mrf.mxu3  ;;  %v3695_v61 = vpop.f32.mrf.mxu1  ;;  %v4381_v62 = vmax.f32 %v4379_v14, %v4380_v9  ;;  %v4365_v23 = vmax.f32 %v4363_v49, %v4364_v10  ;;  %v3607_v59 = vadd.f32 %v3606_v5, %v3518_v41  ;;  %v3737_v25 = vmax.f32 %v3694_v2, 0.0 }
 0x446   : > { %v4373_v34 = vrot.slane %v4372_v4, 1  ;;  %v4390_v1 = vmax.f32 %v4388_v31, %v4389_v17  ;;  %v3521_v54 = vadd.f32 %v3520_v39, %v3432_v13  ;;  %v4396_v30 = vrot.slane %v4395_v7, 4  ;;  %v3433_v22 = vpop.f32.mrf.mxu2 }
 0x447   : > { %v4382_v3 = vrot.slane %v4381_v62, 1  ;;  %v4648_v44 = vsel %vm4614_vm7, %v4365_v23, %v4647_v0  ;;  %v3696_v18 = vadd.f32 %v3695_v61, %v3607_v59  ;;  %v3345_v26 = vadd.f32 %v13330_v35, %v15185_v27  ;;  %v9284_v0 = vld [vmem:[%s14914_s5 + $0x50] sm:$0xff]  ;;  %v9283_v27 = vld [vmem:[%s14914_s5 + $0x48] sm:$0xff] }
 0x448   : > { %v4374_v53 = vmax.f32 %v4372_v4, %v4373_v34  ;;  %v4391_v11 = vrot.slane %v4390_v1, 1  ;;  %v3610_v5 = vadd.f32 %v3609_v24, %v3521_v54  ;;  %v3849_v12 = vrot.slane %v3737_v25, 2  ;;  %5226 = vmatpush.bf16.msrb.mxu3 %v9285_v51 }
 0x449   : > { %v4383_v6 = vmax.f32 %v4381_v62, %v4382_v3  ;;  %v3850_v48 = vrot.slane %v3737_v25, 4  ;;  %v3851_v42 = vrot.slane %v3737_v25, 6  ;;  %v3434_v16 = vadd.f32 %v3433_v22, %v3345_v26  ;;  %v3611_v3 = vpop.f32.mrf.mxu0 }
 0x44a   : > { %v4392_v46 = vmax.f32 %v4390_v1, %v4391_v11  ;;  %v4649_v49 = vsel %vm4616_vm8, %v4374_v53, %v4648_v44  ;;  %v13502_v37 = vmax.f32 %v4395_v7, %v4396_v30  ;;  %v3738_v40 = vmax.f32 %v3696_v18, 0.0 }
 0x44b   : > { %v4650_v31 = vsel %vm4618_vm9, %v4383_v6, %v4649_v49  ;;  %v4402_v4 = vsel %vm3969_vm4, %v3737_v25, -inf  ;;  %v4411_v8 = vsel %vm3969_vm4, %v3849_v12, -inf  ;;  %v4420_v41 = vsel %vm3969_vm4, %v3850_v48, -inf }
 0x44c   : > { %v4651_v10 = vsel %vm4620_vm10, %v4392_v46, %v4650_v31  ;;  %v4429_v2 = vsel %vm3969_vm4, %v3851_v42, -inf  ;;  %v3852_v7 = vrot.slane %v3738_v40, 2  ;;  %v3853_v23 = vrot.slane %v3738_v40, 4  ;;  %5227 = vmatpush.bf16.msrb.mxu3 %v9284_v0 }
 0x44d   : > { %v3522_v55 = vpop.f32.mrf.mxu3  ;;  %v13507_v39 = vsel %vm504_vm0, 0.0, %v4651_v10  ;;  %v3854_v53 = vrot.slane %v3738_v40, 6  ;;  %v4398_v18 = vrot.slane %v13502_v37, 2  ;;  %v4438_v46 = vsel %vm3969_vm4, %v3738_v40, -inf }
 0x44e   : > { %v3698_v14 = vpop.f32.mrf.mxu1  ;;  %v3523_v9 = vadd.f32 %v3522_v55, %v3434_v16  ;;  %v10433_v61 = vpack.i.bf16 %v13507_v39, %v13432_v63  ;;  %v4447_v48 = vsel %vm3969_vm4, %v3852_v7, -inf  ;;  %v4456_v42 = vsel %vm3969_vm4, %v3853_v23, -inf }
 0x44f   : > { %v3699_v38 = vadd.f32 %v3698_v14, %v3610_v5  ;;  %v4465_v55 = vsel %vm3969_vm4, %v3854_v53, -inf }
 0x450   : > { %10434 = vrot.lane.b32.xlu2 %v10433_v61, %s15028_s24  ;;  %v3612_v59 = vadd.f32 %v3611_v3, %v3523_v9  ;;  %5228 = vmatpush.bf16.msrb.mxu3 %v9283_v27 }
 0x451   : > { %v3739_v17 = vmax.f32 %v3699_v38, 0.0 }
 0x453   : > { %v3855_v34 = vrot.slane %v3739_v17, 2  ;;  %v3856_v62 = vrot.slane %v3739_v17, 4  ;;  %v3857_v1 = vrot.slane %v3739_v17, 6  ;;  %v4403_v13 = vsel %vm3969_vm4, %v3739_v17, -inf }
 0x454   : > { %v4404_v54 = vmax.f32 %v4402_v4, %v4403_v13  ;;  %v9282_v13 = vld [vmem:[%s14914_s5 + $0x40] sm:$0xff] }
 0x455   : > { %v4412_v25 = vsel %vm3969_vm4, %v3855_v34, -inf  ;;  %v4421_v24 = vsel %vm3969_vm4, %v3856_v62, -inf  ;;  %v4430_v11 = vsel %vm3969_vm4, %v3857_v1, -inf  ;;  %5229 = vmatpush.bf16.msrb.mxu3 %v9282_v13 }
 0x456   : > { %v4405_v6 = vrot.slane %v4404_v54, 4  ;;  %v4413_v44 = vmax.f32 %v4411_v8, %v4412_v25  ;;  %v4422_v47 = vmax.f32 %v4420_v41, %v4421_v24  ;;  %v4431_v30 = vmax.f32 %v4429_v2, %v4430_v11  ;;  %v3700_v22 = vpop.f32.mrf.mxu1 }
 0x457   : > { %v3701_v49 = vadd.f32 %v3700_v22, %v3612_v59  ;;  %v4399_v11 = vmax.f32 %v13502_v37, %v4398_v18 }
 0x458   : > { %v4406_v26 = vmax.f32 %v4404_v54, %v4405_v6  ;;  %v4414_v5 = vrot.slane %v4413_v44, 4  ;;  %v4423_v51 = vrot.slane %v4422_v47, 4  ;;  %v4432_v12 = vrot.slane %v4431_v30, 4 }
 0x459   : > { %v3740_v14 = vmax.f32 %v3701_v49, 0.0 }
 0x45a   : > { %v4407_v31 = vrot.slane %v4406_v26, 2  ;;  %v4415_v16 = vmax.f32 %v4413_v44, %v4414_v5  ;;  %v4424_v38 = vmax.f32 %v4422_v47, %v4423_v51  ;;  %v4433_v40 = vmax.f32 %v4431_v30, %v4432_v12 }
 0x45b   : > { %v3858_v10 = vrot.slane %v3740_v14, 2  ;;  %v3859_v4 = vrot.slane %v3740_v14, 4  ;;  %v3860_v9 = vrot.slane %v3740_v14, 6  ;;  %v4439_v17 = vsel %vm3969_vm4, %v3740_v14, -inf }
 0x45c   : > { %v4408_v8 = vmax.f32 %v4406_v26, %v4407_v31  ;;  %v4416_v41 = vrot.slane %v4415_v16, 2  ;;  %v4425_v2 = vrot.slane %v4424_v38, 2  ;;  %v4434_v61 = vrot.slane %v4433_v40, 2 }
 0x45d   : > { %v4440_v0 = vmax.f32 %v4438_v46, %v4439_v17  ;;  %v4448_v34 = vsel %vm3969_vm4, %v3858_v10, -inf  ;;  %v4457_v62 = vsel %vm3969_vm4, %v3859_v4, -inf  ;;  %v4466_v1 = vsel %vm3969_vm4, %v3860_v9, -inf }
 0x45e   : > { %v4409_v7 = vrot.slane %v4408_v8, 1  ;;  %v4417_v23 = vmax.f32 %v4415_v16, %v4416_v41  ;;  %v4426_v53 = vmax.f32 %v4424_v38, %v4425_v2  ;;  %v4435_v3 = vmax.f32 %v4433_v40, %v4434_v61  ;;  %v3436_v16 = vpop.f32.mrf.mxu2  ;;  %v3525_v2 = vpop.f32.mrf.mxu3 }
 0x45f   : > { %v4441_v54 = vrot.slane %v4440_v0, 4  ;;  %v4449_v59 = vmax.f32 %v4447_v48, %v4448_v34  ;;  %v4458_v25 = vmax.f32 %v4456_v42, %v4457_v62  ;;  %v4467_v24 = vmax.f32 %v4465_v55, %v4466_v1 }
 0x460   : > { %v4418_v6 = vrot.slane %v4417_v23, 1  ;;  %v4427_v44 = vrot.slane %v4426_v53, 1  ;;  %v4436_v47 = vrot.slane %v4435_v3, 1  ;;  %v4410_v27 = vmax.f32 %v4408_v8, %v4409_v7 }
 0x461   : > { %v4442_v30 = vmax.f32 %v4440_v0, %v4441_v54  ;;  %v4450_v22 = vrot.slane %v4449_v59, 4  ;;  %v4459_v46 = vrot.slane %v4458_v25, 4  ;;  %v4468_v49 = vrot.slane %v4467_v24, 4 }
 0x462   : > { %v4419_v26 = vmax.f32 %v4417_v23, %v4418_v6  ;;  %v4428_v5 = vmax.f32 %v4426_v53, %v4427_v44  ;;  %v4437_v48 = vmax.f32 %v4435_v3, %v4436_v47  ;;  %v4400_v55 = vrot.slane %v4399_v11, 1 }
 0x463   : > { %v4443_v51 = vrot.slane %v4442_v30, 2  ;;  %v4451_v12 = vmax.f32 %v4449_v59, %v4450_v22  ;;  %v4460_v14 = vmax.f32 %v4458_v25, %v4459_v46  ;;  %v4469_v31 = vmax.f32 %v4467_v24, %v4468_v49 }
 0x464   : > { %v4652_v42 = vsel %vm4610_vm5, %v4419_v26, %v4410_v27  ;;  %v4401_v62 = vmax.f32 %v4399_v11, %v4400_v55  ;;  %v4725_v24 = vrot.slane %v13507_v39, 1 }
 0x465   : > { %v4653_v37 = vsel %vm4612_vm6, %v4428_v5, %v4652_v42  ;;  %v4444_v18 = vmax.f32 %v4442_v30, %v4443_v51  ;;  %v4452_v38 = vrot.slane %v4451_v12, 2  ;;  %v4461_v40 = vrot.slane %v4460_v14, 2 }
 0x466   : > { %v4654_v10 = vsel %vm4614_vm7, %v4437_v48, %v4653_v37  ;;  %v4470_v4 = vrot.slane %v4469_v31, 2  ;;  %v4693_v54 = vsel %vm504_vm0, %v4401_v62, 0.0  ;;  %v3438_v6 = vpop.f32.mrf.mxu2  ;;  %v3527_v51 = vpop.f32.mrf.mxu3 }
 0x467   : > { %v4445_v9 = vrot.slane %v4444_v18, 1  ;;  %v4453_v17 = vmax.f32 %v4451_v12, %v4452_v38  ;;  %v4462_v8 = vmax.f32 %v4460_v14, %v4461_v40  ;;  %v4726_v44 = vrot.slane %v4693_v54, 1  ;;  %v15186_v14 = vld [vmem:[#allocation14_spill] sm:$0xff]  ;;  %v3703_v48 = vpop.f32.mrf.mxu1 }
 0x468   : > { %v4471_v41 = vmax.f32 %v4469_v31, %v4470_v4  ;;  %v3348_v31 = vadd.f32 %v13330_v35, %v15186_v14 }
 0x469   : > { %v4446_v61 = vmax.f32 %v4444_v18, %v4445_v9  ;;  %v4454_v0 = vrot.slane %v4453_v17, 1  ;;  %v4463_v34 = vrot.slane %v4462_v8, 1  ;;  %v13555_v26 = vsel %vm663_vm1, %v4725_v24, %v4726_v44  ;;  %v15187_v9 = vld [vmem:[#allocation44_spill] sm:$0xff] }
 0x46a   : > { %v4472_v1 = vrot.slane %v4471_v41, 1  ;;  %v3437_v18 = vadd.f32 %v3436_v16, %v3348_v31  ;;  %v4743_v24 = vrot.slane %v13432_v63, 2  ;;  %v4744_v44 = vrot.slane %v13443_v50, 2 }
 0x46b   : > { %v4455_v13 = vmax.f32 %v4453_v17, %v4454_v0  ;;  %v4464_v7 = vmax.f32 %v4462_v8, %v4463_v34  ;;  %v4655_v23 = vsel %vm4616_vm8, %v4446_v61, %v4654_v10  ;;  %v3350_v17 = vadd.f32 %v13330_v35, %v15187_v9  ;;  %v15188_v61 = vld [vmem:[#allocation33_spill] sm:$0xff] }
 0x46c   : > { %v4473_v53 = vmax.f32 %v4471_v41, %v4472_v1  ;;  %v3526_v40 = vadd.f32 %v3525_v2, %v3437_v18  ;;  %v3353_v0 = vadd.f32 %v13330_v35, %v15188_v61  ;;  %v10423_v34 = vpack.i.bf16 %v13356_v52, %v13279_v28 }
 0x46d   : > { %v4656_v3 = vsel %vm4618_vm9, %v4455_v13, %v4655_v23  ;;  %v3439_v62 = vadd.f32 %v3438_v6, %v3350_v17  ;;  %v4746_v1 = vrot.slane %v13507_v39, 2 }
 0x46e   : > { %v4657_v59 = vsel %vm4620_vm10, %v4464_v7, %v4656_v3  ;;  %v13546_v25 = vsel %vm504_vm0, %v4473_v53, 0.0  ;;  %v3530_v13 = vpop.f32.mrf.mxu3 }
 0x46f   : > { %v13550_v11 = vsel %vm504_vm0, 0.0, %v4657_v59  ;;  %v4729_v30 = vrot.slane %v13546_v25, 1  ;;  %v10400_v22 = vpop.permute.xlu1 %10399  ;;  %v3528_v53 = vadd.f32 %v3527_v51, %v3439_v62  ;;  %v3705_v3 = vpop.f32.mrf.mxu1  ;;  %v13592_v51 = vsel %vm741_vm2, %v4743_v24, %v4744_v44 }
 0x470   : > { %v4728_v47 = vrot.slane %v13550_v11, 1  ;;  %v3614_v46 = vpop.f32.mrf.mxu0  ;;  %v10402_v49 = vunpack.i.h.bf16 %v10400_v22  ;;  %v10401_v27 = vunpack.i.l.bf16 %v10400_v22 }
 0x471   : > { %v3615_v8 = vadd.f32 %v3614_v46, %v3526_v40  ;;  %v15189_v46 = vld [vmem:[#allocation36_spill] sm:$0xff] }
 0x472   : > { %v13558_v5 = vsel %vm663_vm1, %v4728_v47, %v4729_v30  ;;  %v4849_v42 = vsel %vm2765_vm13, %v13197_v19, %v10401_v27  ;;  %v4850_v55 = vsel %vm2765_vm13, %v13279_v28, %v10402_v49  ;;  %v4747_v28 = vrot.slane %v4693_v54, 2 }
 0x473   : > { %v10408_v12 = vpack.i.bf16 %v13558_v5, %v13555_v26  ;;  %v13568_v37 = vpack.c.bf16 %v4850_v55, %v4849_v42  ;;  %v3704_v59 = vadd.f32 %v3703_v48, %v3615_v8  ;;  %v3355_v49 = vadd.f32 %v13330_v35, %v15189_v46 }
 0x474   : > { %v3441_v38 = vpop.f32.mrf.mxu2  ;;  %v13587_v47 = vsel %vm741_vm2, %v4746_v1, %v4747_v28 }
 0x475   : > { %10409 = vrot.lane.b32.xlu0 %v10408_v12, %s15028_s24  ;;  %5206 = vmatmul.bf16.gmra.mxu2 %v13568_v37  ;;  %v3442_v23 = vadd.f32 %v3441_v38, %v3353_v0  ;;  %v3741_v27 = vmax.f32 %v3704_v59, 0.0  ;;  %v10438_v54 = vpack.i.bf16 %v13587_v47, %v13592_v51 }
 0x476   : > { %v3532_v55 = vpop.f32.mrf.mxu3 }
 0x477   : > { %v10415_v10 = vpop.permute.xlu1 %10414  ;;  %v3531_v30 = vadd.f32 %v3530_v13, %v3442_v23  ;;  %v3861_v50 = vrot.slane %v3741_v27, 2  ;;  %v3862_v48 = vrot.slane %v3741_v27, 4  ;;  %v3863_v38 = vrot.slane %v3741_v27, 6 }
 0x478   : > { %v3616_v4 = vpop.f32.mrf.mxu0  ;;  %v10417_v41 = vunpack.i.h.bf16 %v10415_v10  ;;  %v10416_v19 = vunpack.i.l.bf16 %v10415_v10  ;;  %v4474_v9 = vsel %vm3969_vm4, %v3741_v27, -inf }
 0x479   : > { %v3617_v6 = vadd.f32 %v3616_v4, %v3528_v53  ;;  %v4483_v17 = vsel %vm3969_vm4, %v3861_v50, -inf  ;;  %v4492_v8 = vsel %vm3969_vm4, %v3862_v48, -inf  ;;  %v4501_v1 = vsel %vm3969_vm4, %v3863_v38, -inf }
 0x47a   : > { %v4855_v16 = vsel %vm2765_vm13, %v15173_v20, %v10416_v19  ;;  %v4856_v2 = vsel %vm2765_vm13, %v13468_v29, %v10417_v41 }
 0x47b   : > { %v4873_v7 = vpack.c.bf16 %v4856_v2, %v4855_v16  ;;  %v3706_v14 = vadd.f32 %v3705_v3, %v3617_v6 }
 0x47c   : > { %v3443_v29 = vpop.f32.mrf.mxu2 }
 0x47d   : > { %10424 = vrot.lane.b32.xlu0 %v10423_v34, %s15028_s24  ;;  %5230 = vmatmul.bf16.vlgmr.msrb.gmra.mxu3 %v4873_v7  ;;  %v3444_v31 = vadd.f32 %v3443_v29, %v3355_v49  ;;  %v3742_v40 = vmax.f32 %v3706_v14, 0.0 }
 0x47f   : > { %v3533_v35 = vadd.f32 %v3532_v55, %v3444_v31  ;;  %v3864_v62 = vrot.slane %v3742_v40, 2  ;;  %v3865_v16 = vrot.slane %v3742_v40, 4  ;;  %v3866_v13 = vrot.slane %v3742_v40, 6 }
 0x480   : > { %v3619_v22 = vpop.f32.mrf.mxu0  ;;  %v4510_v29 = vsel %vm3969_vm4, %v3742_v40, -inf }
 0x481   : > { %v3620_v12 = vadd.f32 %v3619_v22, %v3531_v30  ;;  %v4537_v14 = vsel %vm3969_vm4, %v3866_v13, -inf }
 0x484   : > { %v3708_v42 = vpop.f32.mrf.mxu1 }
 0x485   : > { %10439 = vrot.lane.b32.xlu0 %v10438_v54, %s15028_s24  ;;  %v3709_v18 = vadd.f32 %v3708_v42, %v3620_v12  ;;  %v4519_v12 = vsel %vm3969_vm4, %v3864_v62, -inf  ;;  %v4528_v54 = vsel %vm3969_vm4, %v3865_v16, -inf }
 0x487   : > { %v3743_v10 = vmax.f32 %v3709_v18, 0.0 }
 0x488   : > { %v3621_v4 = vpop.f32.mrf.mxu0 }
 0x489   : > { %v3622_v41 = vadd.f32 %v3621_v4, %v3533_v35  ;;  %v3867_v19 = vrot.slane %v3743_v10, 2  ;;  %v3868_v61 = vrot.slane %v3743_v10, 4  ;;  %v3869_v0 = vrot.slane %v3743_v10, 6 }
 0x48a   : > { %v4475_v34 = vsel %vm3969_vm4, %v3743_v10, -inf }
 0x48b   : > { %v4476_v2 = vmax.f32 %v4474_v9, %v4475_v34  ;;  %v4484_v7 = vsel %vm3969_vm4, %v3867_v19, -inf  ;;  %v4493_v23 = vsel %vm3969_vm4, %v3868_v61, -inf  ;;  %v4502_v53 = vsel %vm3969_vm4, %v3869_v0, -inf }
 0x48c   : > { %v4485_v59 = vmax.f32 %v4483_v17, %v4484_v7  ;;  %v4494_v24 = vmax.f32 %v4492_v8, %v4493_v23  ;;  %v4503_v28 = vmax.f32 %v4501_v1, %v4502_v53  ;;  %v3710_v6 = vpop.f32.mrf.mxu1 }
 0x48d   : > { %v4477_v3 = vrot.slane %v4476_v2, 4  ;;  %v3711_v44 = vadd.f32 %v3710_v6, %v3622_v41 }
 0x48e   : > { %v4486_v22 = vrot.slane %v4485_v59, 4  ;;  %v4495_v46 = vrot.slane %v4494_v24, 4  ;;  %v4504_v49 = vrot.slane %v4503_v28, 4 }
 0x48f   : > { %v4478_v30 = vmax.f32 %v4476_v2, %v4477_v3  ;;  %v3744_v27 = vmax.f32 %v3711_v44, 0.0  ;;  %v10405_v7 = vpop.permute.xlu2 %10404 }
 0x490   : > { %v4487_v50 = vmax.f32 %v4485_v59, %v4486_v22  ;;  %v4496_v48 = vmax.f32 %v4494_v24, %v4495_v46  ;;  %v4505_v42 = vmax.f32 %v4503_v28, %v4504_v49  ;;  %v10407_v22 = vunpack.i.h.bf16 %v10405_v7  ;;  %v9297_v46 = vld [vmem:[%s14914_s5 + $0xb8] sm:$0xff] }
 0x491   : > { %v4479_v31 = vrot.slane %v4478_v30, 2  ;;  %v3870_v55 = vrot.slane %v3744_v27, 2  ;;  %v3871_v18 = vrot.slane %v3744_v27, 4  ;;  %v3872_v38 = vrot.slane %v3744_v27, 6  ;;  %5251 = vmatpush.bf16.msra.mxu2 %v9297_v46 }
 0x492   : > { %v4511_v40 = vsel %vm3969_vm4, %v3744_v27, -inf  ;;  %v4488_v10 = vrot.slane %v4487_v50, 2  ;;  %v4497_v4 = vrot.slane %v4496_v48, 2  ;;  %v4506_v9 = vrot.slane %v4505_v42, 2 }
 0x493   : > { %v4480_v35 = vmax.f32 %v4478_v30, %v4479_v31  ;;  %v4512_v17 = vmax.f32 %v4510_v29, %v4511_v40  ;;  %v4520_v8 = vsel %vm3969_vm4, %v3870_v55, -inf  ;;  %v4529_v41 = vsel %vm3969_vm4, %v3871_v18, -inf }
 0x494   : > { %v4538_v19 = vsel %vm3969_vm4, %v3872_v38, -inf  ;;  %v4489_v0 = vmax.f32 %v4487_v50, %v4488_v10  ;;  %v4498_v34 = vmax.f32 %v4496_v48, %v4497_v4  ;;  %v4507_v62 = vmax.f32 %v4505_v42, %v4506_v9  ;;  %v9296_v48 = vld [vmem:[%s14914_s5 + $0xb0] sm:$0xff] }
 0x495   : > { %v4481_v61 = vrot.slane %v4480_v35, 1  ;;  %v4513_v16 = vrot.slane %v4512_v17, 4  ;;  %v4521_v2 = vmax.f32 %v4519_v12, %v4520_v8  ;;  %v4530_v1 = vmax.f32 %v4528_v54, %v4529_v41  ;;  %5252 = vmatpush.bf16.msra.mxu2 %v9296_v48 }
 0x496   : > { %v4539_v13 = vmax.f32 %v4537_v14, %v4538_v19  ;;  %v4490_v53 = vrot.slane %v4489_v0, 1  ;;  %v4499_v3 = vrot.slane %v4498_v34, 1  ;;  %v4508_v30 = vrot.slane %v4507_v62, 1  ;;  %v9295_v19 = vld [vmem:[%s14914_s5 + $0xa8] sm:$0xff] }
 0x497   : > { %v4482_v23 = vmax.f32 %v4480_v35, %v4481_v61  ;;  %v4514_v59 = vmax.f32 %v4512_v17, %v4513_v16  ;;  %v4522_v24 = vrot.slane %v4521_v2, 4  ;;  %v4531_v28 = vrot.slane %v4530_v1, 4 }
 0x498   : > { %v4540_v6 = vrot.slane %v4539_v13, 4  ;;  %v4491_v44 = vmax.f32 %v4489_v0, %v4490_v53  ;;  %v4500_v29 = vmax.f32 %v4498_v34, %v4499_v3  ;;  %v10406_v31 = vunpack.i.l.bf16 %v10405_v7 }
 0x499   : > { %v4515_v49 = vrot.slane %v4514_v59, 2  ;;  %v4523_v27 = vmax.f32 %v4521_v2, %v4522_v24  ;;  %v4532_v12 = vmax.f32 %v4530_v1, %v4531_v28  ;;  %v4852_v50 = vsel %vm2765_vm13, %v13432_v63, %v10407_v22  ;;  %5253 = vmatpush.bf16.msra.mxu2 %v9295_v19  ;;  %v9293_v22 = vld [vmem:[%s14914_s5 + $0x98] sm:$0xff]  ;;  %v9302_v19 = vld [vmem:[%s14914_s5 + $0xe0] sm:$0xff] }
 0x49a   : > { %v4541_v54 = vmax.f32 %v4539_v13, %v4540_v6  ;;  %v4658_v14 = vsel %vm4610_vm5, %v4491_v44, %v4482_v23  ;;  %v4509_v38 = vmax.f32 %v4507_v62, %v4508_v30  ;;  %v4851_v40 = vsel %vm2765_vm13, %v13356_v52, %v10406_v31  ;;  %v9294_v13 = vld [vmem:[%s14914_s5 + $0xa0] sm:$0xff]  ;;  %v9305_v31 = vld [vmem:[%s14914_s5 + $0xf8] sm:$0xff] }
 0x49b   : > { %v4516_v42 = vmax.f32 %v4514_v59, %v4515_v49  ;;  %v4524_v55 = vrot.slane %v4523_v27, 2  ;;  %v4533_v18 = vrot.slane %v4532_v12, 2  ;;  %v4659_v35 = vsel %vm4612_vm6, %v4500_v29, %v4658_v14  ;;  %v9290_v14 = vld [vmem:[%s14914_s5 + $0x80] sm:$0xff]  ;;  %5280 = vmatpush.bf16.msra.mxu3 %v9305_v31 }
 0x49c   : > { %v4542_v10 = vrot.slane %v4541_v54, 2  ;;  %v13625_v8 = vpack.c.bf16 %v4852_v50, %v4851_v40  ;;  %v4660_v63 = vsel %vm4614_vm7, %v4509_v38, %v4659_v35  ;;  %v4749_v3 = vrot.slane %v13550_v11, 2  ;;  %v9309_v50 = vld [vmem:[%s14914_s5 + $0x118] sm:$0xff]  ;;  %v9304_v35 = vld [vmem:[%s14914_s5 + $0xf0] sm:$0xff] }
 0x49d   : > { %v4517_v4 = vrot.slane %v4516_v42, 1  ;;  %v4525_v9 = vmax.f32 %v4523_v27, %v4524_v55  ;;  %v4534_v17 = vmax.f32 %v4532_v12, %v4533_v18  ;;  %v4750_v28 = vrot.slane %v13546_v25, 2  ;;  %5254 = vmatpush.bf16.msra.mxu2 %v9294_v13  ;;  %v9292_v12 = vld [vmem:[%s14914_s5 + $0x90] sm:$0xff] }
 0x49e   : > { %v4543_v41 = vmax.f32 %v4541_v54, %v4542_v10  ;;  %5211 = vmatmul.bf16.gmra.mxu2 %v13625_v8  ;;  %v9291_v54 = vld [vmem:[%s14914_s5 + $0x88] sm:$0xff]  ;;  %vm6303_vm4 = vcmask 1045508  }
 0x49f   : > { %v4518_v61 = vmax.f32 %v4516_v42, %v4517_v4  ;;  %v4526_v0 = vrot.slane %v4525_v9, 1  ;;  %v4535_v34 = vrot.slane %v4534_v17, 1  ;;  %v13656_v25 = vsel %vm741_vm2, %v4749_v3, %v4750_v28  ;;  %5281 = vmatpush.bf16.msra.mxu3 %v9304_v35  ;;  %v9303_v10 = vld [vmem:[%s14914_s5 + $0xe8] sm:$0xff] }
 0x4a0   : > { %v4544_v52 = vrot.slane %v4543_v41, 1 }
 0x4a1   : > { %v4527_v62 = vmax.f32 %v4525_v9, %v4526_v0  ;;  %v4536_v16 = vmax.f32 %v4534_v17, %v4535_v34  ;;  %v4661_v2 = vsel %vm4616_vm8, %v4518_v61, %v4660_v63  ;;  %5255 = vmatpush.bf16.msra.mxu2 %v9293_v22  ;;  %v10420_v17 = vpop.permute.xlu2 %10419  ;;  %v9299_v22 = vld [vmem:[%s14914_s5 + $0xc8] sm:$0xff] }
 0x4a2   : > { %v4545_v1 = vmax.f32 %v4543_v41, %v4544_v52  ;;  %v10422_v0 = vunpack.i.h.bf16 %v10420_v17  ;;  %v10421_v34 = vunpack.i.l.bf16 %v10420_v17  ;;  %v4876_v17 = vpack.c.bf16 %v13359_v58, %v13439_v33 }
 0x4a3   : > { %v4662_v7 = vsel %vm4618_vm9, %v4527_v62, %v4661_v2  ;;  %5282 = vmatpush.bf16.msra.mxu3 %v9303_v10 }
 0x4a4   : > { %v4663_v23 = vsel %vm4620_vm10, %v4536_v16, %v4662_v7  ;;  %v4695_v53 = vsel %vm504_vm0, %v4545_v1, 0.0  ;;  %v4864_v52 = vsel %vm2765_vm13, %v13235_v56, %v10422_v0  ;;  %v4863_v62 = vsel %vm2765_vm13, %v13108_v32, %v10421_v34  ;;  %v9301_v32 = vld [vmem:[%s14914_s5 + $0xd8] sm:$0xff]  ;;  %v9307_v56 = vld [vmem:[%s14914_s5 + $0x108] sm:$0xff] }
 0x4a5   : > { %v13641_v59 = vsel %vm504_vm0, 0.0, %v4663_v23  ;;  %v4762_v24 = vrot.slane %v4695_v53, 1  ;;  %v4773_v29 = vrot.slane %v4695_v53, 2  ;;  %5256 = vmatpush.bf16.msra.mxu2 %v9292_v12  ;;  %v4874_v2 = vpack.c.bf16 %v4864_v52, %v4863_v62  ;;  %v10430_v53 = vpop.permute.xlu1 %10429  ;;  %v9306_v12 = vld [vmem:[%s14914_s5 + $0x100] sm:$0xff] }
 0x4a6   : > { %v10443_v6 = vpack.i.bf16 %v13641_v59, %v13550_v11  ;;  %v4761_v44 = vrot.slane %v13641_v59, 1  ;;  %v4772_v30 = vrot.slane %v13641_v59, 2  ;;  %v10431_v28 = vunpack.i.l.bf16 %v10430_v53 }
 0x4a7   : > { %5283 = vmatpush.bf16.msra.mxu3 %v9302_v19 }
 0x4a8   : > { %10444 = vrot.lane.b32.xlu1 %v10443_v6, %s15028_s24  ;;  %v13653_v46 = vsel %vm663_vm1, %v4761_v44, %v4762_v24  ;;  %v13659_v49 = vsel %vm741_vm2, %v4772_v30, %v4773_v29  ;;  %v10432_v24 = vunpack.i.h.bf16 %v10430_v53  ;;  %v4865_v6 = vsel %vm2765_vm13, %v13287_v43, %v10431_v28  ;;  %v9300_v30 = vld [vmem:[%s14914_s5 + $0xd0] sm:$0xff]  ;;  %v9298_v43 = vld [vmem:[%s14914_s5 + $0xc0] sm:$0xff] }
 0x4a9   : > { %4845 = vrot.lane.b32.xlu0 %v13653_v46, %s15028_s24  ;;  %v10448_v27 = vpack.i.bf16 %v13659_v49, %v13656_v25  ;;  %5257 = vmatpush.bf16.msra.mxu2 %v9291_v54  ;;  %v4888_v60 = vpack.c.bf16 %v15173_v20, %v13659_v49 }
 0x4aa   : > { %v10435_v16 = vpop.permute.xlu2 %10434  ;;  %v4866_v44 = vsel %vm2765_vm13, %v13436_v15, %v10432_v24 }
 0x4ab   : > { %10449 = vrot.lane.b32.xlu2 %v10448_v27, %s15028_s24  ;;  %v10437_v1 = vunpack.i.h.bf16 %v10435_v16  ;;  %v10436_v13 = vunpack.i.l.bf16 %v10435_v16  ;;  %5284 = vmatpush.bf16.msra.mxu3 %v9301_v32  ;;  %v4878_v29 = vpack.c.bf16 %v4866_v44, %v4865_v6  ;;  %v9339_v32 = vld [vmem:[%s14916_s7 + $0xe8] sm:$0xff]  ;;  %v9344_v44 = vld [vmem:[%s14916_s7 + $0x110] sm:$0xff] }
 0x4ad   : > { %5258 = vmatpush.bf16.msra.mxu2 %v9290_v14  ;;  %v4859_v7 = vsel %vm2765_vm13, %v13384_v21, %v10436_v13  ;;  %v4860_v23 = vsel %vm2765_vm13, %v13592_v51, %v10437_v1 }
 0x4ae   : > { %v4881_v3 = vpack.c.bf16 %v4860_v23, %v4859_v7 }
 0x4af   : > { %5285 = vmatpush.bf16.msra.mxu3 %v9300_v30 }
 0x4b1   : > { %5313 = vmatpush.bf16.msrb.mxu2 %v9309_v50 }
 0x4b3   : > { %5286 = vmatpush.bf16.msra.mxu3 %v9299_v22 }
 0x4b7   : > { %5287 = vmatpush.bf16.msra.mxu3 %v9298_v43 }
 0x4e7   : > { %v10410_v48 = vpop.permute.xlu0 %10409 }
 0x4e8   : > { %v10412_v42 = vunpack.i.h.bf16 %v10410_v48  ;;  %v10411_v55 = vunpack.i.l.bf16 %v10410_v48 }
 0x4ea   : > { %v4853_v18 = vsel %vm2765_vm13, %v13507_v39, %v10411_v55  ;;  %v4854_v38 = vsel %vm2765_vm13, %v13550_v11, %v10412_v42  ;;  %v9308_v39 = vld [vmem:[%s14914_s5 + $0x110] sm:$0xff] }
 0x4eb   : > { %v13685_v40 = vpack.c.bf16 %v4854_v38, %v4853_v18  ;;  %5314 = vmatpush.bf16.msrb.mxu2 %v9308_v39 }
 0x4ed   : > { %5216 = vmatmul.bf16.gmra.mxu2 %v13685_v40 }
 0x4ef   : > { %v10425_v4 = vpop.permute.xlu0 %10424  ;;  %5315 = vmatpush.bf16.msrb.mxu2 %v9307_v56  ;;  %v13814_v56 = vld [vmem:[%s14915_s6] ss:$0 sm:$0xff] }
 0x4f0   : > { %v10427_v11 = vunpack.i.h.bf16 %v10425_v4  ;;  %v10426_v9 = vunpack.i.l.bf16 %v10425_v4 }
 0x4f2   : > { %v4857_v63 = vsel %vm2765_vm13, %v13439_v33, %v10426_v9  ;;  %v4858_v41 = vsel %vm2765_vm13, %v13359_v58, %v10427_v11  ;;  %v5202_v9 = vpop.f32.mrf.mxu2  ;;  %v4884_v58 = vpack.c.bf16 %v13656_v25, %v13587_v47 }
 0x4f3   : > { %v4877_v61 = vpack.c.bf16 %v4858_v41, %v4857_v63  ;;  %5316 = vmatpush.bf16.msrb.mxu2 %v9306_v12  ;;  %v4880_v41 = vpack.c.bf16 %v13592_v51, %v13384_v21  ;;  %v5203_v30 = vadd.f32 %v13814_v56, %v5202_v9 }
 0x4f5   : > { %5235 = vmatmul.bf16.gmra.mxu3 %v4877_v61 }
 0x4f7   : > { %v10440_v27 = vpop.permute.xlu0 %10439 }
 0x4f8   : > { %v10442_v15 = vunpack.i.h.bf16 %v10440_v27  ;;  %v10441_v54 = vunpack.i.l.bf16 %v10440_v27  ;;  %v9343_v27 = vld [vmem:[%s14916_s7 + $0x108] sm:$0xff] }
 0x4fa   : > { %v4867_v14 = vsel %vm2765_vm13, %v13454_v57, %v10441_v54  ;;  %v4868_v31 = vsel %vm2765_vm13, %v13555_v26, %v10442_v15  ;;  %v5204_v63 = vpop.f32.mrf.mxu2 }
 0x4fb   : > { %v4882_v50 = vpack.c.bf16 %v4868_v31, %v4867_v14  ;;  %v5205_v14 = vadd.f32 %v13814_v56, %v5204_v63 }
 0x4fd   : > { %5259 = vmatmul.bf16.vlgmr.msra.gmra.mxu2 %v4874_v2  ;;  %v9340_v2 = vld [vmem:[%s14916_s7 + $0xf0] sm:$0xff] }
 0x505   : > { %5240 = vmatmul.bf16.gmra.mxu3 %v4881_v3  ;;  %v10450_v10 = vpop.permute.xlu2 %10449 }
 0x506   : > { %v10452_v39 = vunpack.i.h.bf16 %v10450_v10  ;;  %v10451_v4 = vunpack.i.l.bf16 %v10450_v10 }
 0x508   : > { %v4869_v57 = vsel %vm2765_vm13, %v13558_v5, %v10451_v4  ;;  %v4870_v26 = vsel %vm2765_vm13, %v13653_v46, %v10452_v39  ;;  %v13753_v5 = vpop.f32.mrf.mxu2 }
 0x509   : > { %v4886_v11 = vpack.c.bf16 %v4870_v26, %v4869_v57 }
 0x50d   : > { %5264 = vmatmul.bf16.gmra.mxu2 %v4878_v29 }
 0x510   : > { %v13757_v46 = vpop.f32.mrf.mxu2 }
 0x51a   : > { %v10445_v48 = vpop.permute.xlu1 %10444 }
 0x51b   : > { %v10447_v42 = vunpack.i.h.bf16 %v10445_v48  ;;  %v10446_v55 = vunpack.i.l.bf16 %v10445_v48 }
 0x51d   : > { %5269 = vmatmul.bf16.gmra.mxu2 %v4882_v50  ;;  %v4861_v18 = vsel %vm2765_vm13, %v13587_v47, %v10446_v55  ;;  %v4862_v38 = vsel %vm2765_vm13, %v13656_v25, %v10447_v42  ;;  %v9345_v25 = vld [vmem:[%s14916_s7 + $0x118] sm:$0xff]  ;;  %v9342_v50 = vld [vmem:[%s14916_s7 + $0x100] sm:$0xff] }
 0x51e   : > { %v4885_v35 = vpack.c.bf16 %v4862_v38, %v4861_v18  ;;  %6003 = vmatpush.bf16.msra.mxu1 %v9345_v25  ;;  %v5210_v25 = vadd.f32 %v13814_v56, %v13757_v46 }
 0x520   : > { %5245 = vmatmul.bf16.gmra.mxu3 %v4885_v35 }
 0x522   : > { %6004 = vmatpush.bf16.msra.mxu1 %v9344_v44 }
 0x526   : > { %6005 = vmatpush.bf16.msra.mxu1 %v9343_v27 }
 0x52a   : > { %6006 = vmatpush.bf16.msra.mxu1 %v9342_v50 }
 0x52d   : > { %5274 = vmatmul.bf16.gmra.mxu2 %v4886_v11  ;;  %v5208_v11 = vadd.f32 %v13814_v56, %v13753_v5  ;;  %v9338_v5 = vld [vmem:[%s14916_s7 + $0xe0] sm:$0xff] }
 0x530   : > { %5288 = vmatmul.bf16.vlgmr.msra.gmra.mxu3 %v13568_v37  ;;  %v4846_v37 = vpop.permute.xlu0 %4845 }
 0x531   : > { %v4871_v33 = vsel %vm2765_vm13, %v13641_v59, %v4846_v37  ;;  %v9341_v59 = vld [vmem:[%s14916_s7 + $0xf8] sm:$0xff] }
 0x532   : > { %v8474_v51 = vpack.c.bf16 %v15181_v36, %v4871_v33  ;;  %5970 = vmatpush.bf16.msra.mxu0 %v9341_v59 }
 0x536   : > { %5971 = vmatpush.bf16.msra.mxu0 %v9340_v2 }
 0x53a   : > { %5972 = vmatpush.bf16.msra.mxu0 %v9339_v32 }
 0x53d   : > { %8476 = vmatmul.msk.bf16.vlgmr.msrb.gmra.mxu2 %vm2765_vm13, %v4876_v17 }
 0x53e   : > { %5973 = vmatpush.bf16.msra.mxu0 %v9338_v5  ;;  %v9316_v5 = vld [vmem:[%s14916_s7 + $0x30] sm:$0xff] }
 0x540   : > { %5293 = vmatmul.bf16.gmra.mxu3 %v13625_v8  ;;  %v13764_v8 = vpop.f32.mrf.mxu2 }
 0x548   : > { %v13776_v47 = vpop.f32.mrf.mxu2 }
 0x54d   : > { %8477 = vmatmul.msk.bf16.gmra.mxu2 %vm2765_vm13, %v4880_v41 }
 0x550   : > { %5298 = vmatmul.bf16.gmra.mxu3 %v13685_v40  ;;  %v5231_v40 = vpop.f32.mrf.mxu3 }
 0x551   : > { %v5232_v22 = vadd.f32 %v5231_v40, %v5203_v30 }
 0x558   : > { %v5233_v61 = vpop.f32.mrf.mxu3 }
 0x559   : > { %v5234_v48 = vadd.f32 %v5233_v61, %v5205_v14 }
 0x55d   : > { %8478 = vmatmul.msk.bf16.gmra.mxu2 %vm2765_vm13, %v4884_v58 }
 0x560   : > { %8475 = vmatmul.msk.bf16.gmra.mxu3 %vm13769_vm15, %v8474_v51 }
 0x56d   : > { %8479 = vmatmul.msk.bf16.gmra.mxu2 %vm2765_vm13, %v4888_v60 }
 0x570   : > { %v13787_v19 = vpop.f32.mrf.mxu2 }
 0x578   : > { %v13789_v0 = vpop.f32.mrf.mxu2  ;;  %v5236_v34 = vpop.f32.mrf.mxu3 }
 0x579   : > { %v5237_v63 = vadd.f32 %v5236_v34, %v5208_v11 }
 0x580   : > { %v5260_v52 = vpop.f32.mrf.mxu2  ;;  %v5238_v16 = vpop.f32.mrf.mxu3 }
 0x581   : > { %v5261_v12 = vadd.f32 %v5260_v52, %v5232_v22  ;;  %v5239_v40 = vadd.f32 %v5238_v16, %v5210_v25 }
 0x588   : > { %v5262_v62 = vpop.f32.mrf.mxu2  ;;  %v13794_v49 = vpop.f32.mrf.mxu3 }
 0x589   : > { %v5263_v55 = vadd.f32 %v5262_v62, %v5234_v48 }
 0x590   : > { %v5265_v1 = vpop.f32.mrf.mxu2  ;;  %v13796_v7 = vpop.f32.mrf.mxu3 }
 0x591   : > { %v5266_v37 = vadd.f32 %v5265_v1, %v5237_v63 }
 0x598   : > { %v5267_v13 = vpop.f32.mrf.mxu2 }
 0x599   : > { %v5268_v62 = vadd.f32 %v5267_v13, %v5239_v40  ;;  %v9337_v40 = vld [vmem:[%s14916_s7 + $0xd8] sm:$0xff] }
 0x59a   : > { %5974 = vmatpush.bf16.msra.mxu0 %v9337_v40 }
 0x5a0   : > { %v13798_v23 = vpop.f32.mrf.mxu2 }
 0x5a3   : > { %v13800_v53 = vpop.f32.mrf.mxu3 }
 0x5a8   : > { %v13802_v3 = vpop.f32.mrf.mxu2 }
 0x5ab   : > { %v13804_v24 = vpop.f32.mrf.mxu3 }
 0x5b0   : > { %v13806_v28 = vpop.f32.mrf.mxu2 }
 0x5b3   : > { %v5289_v6 = vpop.f32.mrf.mxu3 }
 0x5b4   : > { %v5290_v15 = vadd.f32 %v5289_v6, %v5261_v12 }
 0x5b8   : > { %v13819_v29 = vpop.f32.mrf.mxu2 }
 0x5bb   : > { %v5291_v43 = vpop.f32.mrf.mxu3 }
 0x5bc   : > { %v5292_v35 = vadd.f32 %v5291_v43, %v5263_v55 }
 0x5c0   : > { %v5318_v54 = vpop.f32.mrf.mxu2 }
 0x5c1   : > { %v5319_v31 = vadd.f32 %v5318_v54, %v5290_v15  ;;  %v5213_v54 = vadd.f32 %v13814_v56, %v13764_v8 }
 0x5c3   : > { %v5338_v42 = vmax.f32 %v5319_v31, 0.0  ;;  %v5294_v18 = vpop.f32.mrf.mxu3  ;;  %v5242_v55 = vadd.f32 %v13794_v49, %v5213_v54  ;;  %v5215_v49 = vadd.f32 %v13814_v56, %v13776_v47 }
 0x5c4   : > { %v5295_v33 = vadd.f32 %v5294_v18, %v5266_v37 }
 0x5c5   : > { %v5354_v38 = vrot.slane %v5338_v42, 7  ;;  %v5244_v37 = vadd.f32 %v13796_v7, %v5215_v49 }
 0x5c7   : > { %v13830_v10 = vsel %vm504_vm0, 0.0, %v5354_v38  ;;  %v13833_v39 = vsel %vm504_vm0, %v5354_v38, 0.0 }
 0x5c8   : > { %v5400_v4 = vrot.slane %v13830_v10, 1  ;;  %v5401_v57 = vrot.slane %v13833_v39, 1  ;;  %v5320_v26 = vpop.f32.mrf.mxu2 }
 0x5c9   : > { %v5321_v9 = vadd.f32 %v5320_v26, %v5292_v35  ;;  %v5271_v35 = vadd.f32 %v13798_v23, %v5242_v55 }
 0x5ca   : > { %v13840_v17 = vsel %vm663_vm1, %v5400_v4, %v5401_v57 }
 0x5cb   : > { %v5339_v41 = vmax.f32 %v5321_v9, 0.0  ;;  %5466 = vrot.lane.b32.xlu1 %v13840_v17, %s15028_s24  ;;  %v5296_v58 = vpop.f32.mrf.mxu3 }
 0x5cc   : > { %v5297_v30 = vadd.f32 %v5296_v58, %v5268_v62 }
 0x5cd   : > { %v5355_v51 = vrot.slane %v5339_v41, 7 }
 0x5cf   : > { %v13850_v61 = vsel %vm504_vm0, 0.0, %v5355_v51  ;;  %v5379_v34 = vsel %vm504_vm0, %v5355_v51, 0.0  ;;  %v5273_v51 = vadd.f32 %v13802_v3, %v5244_v37 }
 0x5d0   : > { %v5323_v59 = vpop.f32.mrf.mxu2  ;;  %v5403_v1 = vrot.slane %v13850_v61, 1  ;;  %v5404_v32 = vrot.slane %v5379_v34, 1  ;;  %v5424_v46 = vrot.slane %v13850_v61, 2  ;;  %v5425_v6 = vrot.slane %v5379_v34, 2 }
 0x5d1   : > { %v5324_v60 = vadd.f32 %v5323_v59, %v5295_v33  ;;  %v10468_v58 = vpack.i.bf16 %v13850_v61, %v13830_v10  ;;  %v9317_v33 = vld [vmem:[%s14916_s7 + $0x38] sm:$0xff] }
 0x5d2   : > { %v13864_v31 = vsel %vm741_vm2, %v5424_v46, %v5425_v6  ;;  %v13870_v48 = vsel %vm663_vm1, %v5403_v1, %v5404_v32  ;;  %5883 = vmatpush.bf16.msrb.mxu3 %v9317_v33  ;;  %v5218_v6 = vadd.f32 %v13814_v56, %v13787_v19 }
 0x5d3   : > { %v5340_v52 = vmax.f32 %v5324_v60, 0.0  ;;  %v5299_v44 = vpop.f32.mrf.mxu3 }
 0x5d4   : > { %v5300_v57 = vadd.f32 %v5299_v44, %v5271_v35 }
 0x5d5   : > { %v5356_v2 = vrot.slane %v5340_v52, 7 }
 0x5d6   : > { %5884 = vmatpush.bf16.msrb.mxu3 %v9316_v5 }
 0x5d7   : > { %v13856_v22 = vsel %vm504_vm0, 0.0, %v5356_v2  ;;  %v5380_v16 = vsel %vm504_vm0, %v5356_v2, 0.0 }
 0x5d8   : > { %v5406_v27 = vrot.slane %v13856_v22, 1  ;;  %v5407_v12 = vrot.slane %v5380_v16, 1  ;;  %v5427_v43 = vrot.slane %v13856_v22, 2  ;;  %v5428_v13 = vrot.slane %v5380_v16, 2  ;;  %v5325_v15 = vpop.f32.mrf.mxu2 }
 0x5d9   : > { %v5326_v14 = vadd.f32 %v5325_v15, %v5297_v30 }
 0x5da   : > { %v13867_v50 = vsel %vm741_vm2, %v5427_v43, %v5428_v13  ;;  %v13873_v42 = vsel %vm663_vm1, %v5406_v27, %v5407_v12  ;;  %v5247_v13 = vadd.f32 %v13800_v53, %v5218_v6  ;;  %v5422_v53 = vrot.slane %v13833_v39, 2 }
 0x5db   : > { %v5566_v18 = vpack.c.bf16 %v13867_v50, %v13864_v31  ;;  %v5341_v38 = vmax.f32 %v5326_v14, 0.0  ;;  %v10453_v8 = vpack.i.bf16 %v13873_v42, %v13870_v48  ;;  %v5301_v26 = vpop.f32.mrf.mxu3 }
 0x5dc   : > { %v5302_v34 = vadd.f32 %v5301_v26, %v5273_v51  ;;  %v5276_v55 = vadd.f32 %v13806_v28, %v5247_v13  ;;  %v9314_v51 = vld [vmem:[%s14916_s7 + $0x20] sm:$0xff] }
 0x5dd   : > { %8632 = vmatmul.msk.bf16.vlgmr.msra.gmra.mxu1 %vm2765_vm13, %v5566_v18  ;;  %10454 = vrot.lane.b32.xlu2 %v10453_v8, %s15028_s24  ;;  %v5357_v4 = vrot.slane %v5341_v38, 7  ;;  %v5421_v18 = vrot.slane %v13830_v10, 2  ;;  %v9315_v38 = vld [vmem:[%s14916_s7 + $0x28] sm:$0xff] }
 0x5de   : > { %5885 = vmatpush.bf16.msrb.mxu3 %v9315_v38 }
 0x5df   : > { %v13886_v63 = vsel %vm504_vm0, 0.0, %v5357_v4  ;;  %v5381_v41 = vsel %vm504_vm0, %v5357_v4, 0.0  ;;  %v5220_v4 = vadd.f32 %v13814_v56, %v13789_v0 }
 0x5e0   : > { %v5328_v11 = vpop.f32.mrf.mxu2  ;;  %v5430_v47 = vrot.slane %v13886_v63, 2  ;;  %v5431_v59 = vrot.slane %v5381_v41, 2  ;;  %v5409_v60 = vrot.slane %v13886_v63, 1  ;;  %v5410_v7 = vrot.slane %v5381_v41, 1 }
 0x5e1   : > { %v5329_v9 = vadd.f32 %v5328_v11, %v5300_v57  ;;  %v5249_v26 = vadd.f32 %v13804_v24, %v5220_v4  ;;  %v13945_v11 = vsel %vm741_vm2, %v5421_v18, %v5422_v53  ;;  %v9322_v4 = vld [vmem:[%s14916_s7 + $0x60] sm:$0xff] }
 0x5e2   : > { %v13914_v44 = vsel %vm741_vm2, %v5430_v47, %v5431_v59  ;;  %v13920_v12 = vsel %vm663_vm1, %v5409_v60, %v5410_v7  ;;  %v10473_v41 = vpack.i.bf16 %v13864_v31, %v13945_v11  ;;  %v9325_v47 = vld [vmem:[%s14916_s7 + $0x78] sm:$0xff]  ;;  %v9336_v60 = vld [vmem:[%s14916_s7 + $0xd0] sm:$0xff]  ;;  %5886 = vmatpush.bf16.msrb.mxu3 %v9314_v51  ;;  %v9310_v51 = vld [vmem:[%s14916_s7] sm:$0xff] }
 0x5e3   : > { %v5342_v23 = vmax.f32 %v5329_v9, 0.0  ;;  %v5304_v16 = vpop.f32.mrf.mxu3  ;;  %v10483_v14 = vpack.i.bf16 %v13914_v44, %v13867_v50  ;;  %v5278_v0 = vadd.f32 %v13819_v29, %v5249_v26  ;;  %5912 = vmatpush.bf16.msra.mxu2 %v9325_v47  ;;  %5975 = vmatpush.bf16.msra.mxu0 %v9336_v60  ;;  %v9319_v47 = vld [vmem:[%s14916_s7 + $0x48] sm:$0xff]  ;;  %v9332_v60 = vld [vmem:[%s14916_s7 + $0xb0] sm:$0xff] }
 0x5e4   : > { %v5305_v8 = vadd.f32 %v5304_v16, %v5276_v55  ;;  %v9335_v16 = vld [vmem:[%s14916_s7 + $0xc8] sm:$0xff] }
 0x5e5   : > { %v5358_v25 = vrot.slane %v5342_v23, 7  ;;  %10469 = vrot.lane.b32.xlu2 %v10468_v58, %s15028_s24  ;;  %v9323_v55 = vld [vmem:[%s14916_s7 + $0x68] sm:$0xff] }
 0x5e7   : > { %v13906_v3 = vsel %vm504_vm0, 0.0, %v5358_v25  ;;  %v5382_v52 = vsel %vm504_vm0, %v5358_v25, 0.0  ;;  %5976 = vmatpush.bf16.msra.mxu0 %v9335_v16 }
 0x5e8   : > { %v5412_v62 = vrot.slane %v13906_v3, 1  ;;  %v5413_v2 = vrot.slane %v5382_v52, 1  ;;  %v5433_v1 = vrot.slane %v13906_v3, 2  ;;  %v5434_v32 = vrot.slane %v5382_v52, 2  ;;  %v5330_v46 = vpop.f32.mrf.mxu2 }
 0x5e9   : > { %v5331_v30 = vadd.f32 %v5330_v46, %v5302_v34 }
 0x5ea   : > { %v13917_v27 = vsel %vm741_vm2, %v5433_v1, %v5434_v32  ;;  %v13923_v43 = vsel %vm663_vm1, %v5412_v62, %v5413_v2  ;;  %v9313_v62 = vld [vmem:[%s14916_s7 + $0x18] sm:$0xff]  ;;  %v9324_v2 = vld [vmem:[%s14916_s7 + $0x70] sm:$0xff] }
 0x5eb   : > { %v5343_v15 = vmax.f32 %v5331_v30, 0.0  ;;  %v10458_v19 = vpack.i.bf16 %v13923_v43, %v13920_v12  ;;  %v5570_v54 = vpack.c.bf16 %v13917_v27, %v13914_v44  ;;  %v5306_v37 = vpop.f32.mrf.mxu3  ;;  %5887 = vmatpush.bf16.msrb.mxu3 %v9313_v62  ;;  %5913 = vmatpush.bf16.msra.mxu2 %v9324_v2 }
 0x5ec   : > { %v5307_v59 = vadd.f32 %v5306_v37, %v5278_v0 }
 0x5ed   : > { %10459 = vrot.lane.b32.xlu0 %v10458_v19, %s15028_s24  ;;  %8633 = vmatmul.msk.bf16.gmra.mxu1 %vm2765_vm13, %v5570_v54  ;;  %v5359_v35 = vrot.slane %v5343_v15, 7 }
 0x5ee   : > { %10484 = vrot.lane.b32.xlu2 %v10483_v14, %s15028_s24  ;;  %v9312_v14 = vld [vmem:[%s14916_s7 + $0x10] sm:$0xff] }
 0x5ef   : > { %v13948_v39 = vsel %vm504_vm0, 0.0, %v5359_v35  ;;  %v5383_v49 = vsel %vm504_vm0, %v5359_v35, 0.0  ;;  %5888 = vmatpush.bf16.msrb.mxu3 %v9312_v14  ;;  %5914 = vmatpush.bf16.msra.mxu2 %v9323_v55  ;;  %v9329_v55 = vld [vmem:[%s14916_s7 + $0x98] sm:$0xff] }
 0x5f0   : > { %v5333_v28 = vpop.f32.mrf.mxu2  ;;  %v5415_v24 = vrot.slane %v13948_v39, 1  ;;  %v5416_v23 = vrot.slane %v5383_v49, 1  ;;  %v5436_v58 = vrot.slane %v13948_v39, 2  ;;  %v5437_v33 = vrot.slane %v5383_v49, 2 }
 0x5f1   : > { %v5334_v57 = vadd.f32 %v5333_v28, %v5305_v8  ;;  %v10488_v19 = vpack.i.bf16 %v13948_v39, %v13906_v3  ;;  %v9311_v28 = vld [vmem:[%s14916_s7 + $0x8] sm:$0xff] }
 0x5f2   : > { %v13979_v32 = vsel %vm741_vm2, %v5436_v58, %v5437_v33  ;;  %v13985_v6 = vsel %vm663_vm1, %v5415_v24, %v5416_v23  ;;  %v9320_v58 = vld [vmem:[%s14916_s7 + $0x50] sm:$0xff]  ;;  %v9334_v33 = vld [vmem:[%s14916_s7 + $0xc0] sm:$0xff] }
 0x5f3   : > { %v5344_v9 = vmax.f32 %v5334_v57, 0.0  ;;  %5915 = vmatpush.bf16.msra.mxu2 %v9322_v4  ;;  %5889 = vmatpush.bf16.msrb.mxu3 %v9311_v28  ;;  %v10493_v0 = vpack.i.bf16 %v13979_v32, %v13917_v27 }
 0x5f4   : > { %5977 = vmatpush.bf16.msra.mxu0 %v9334_v33 }
 0x5f5   : > { %v5360_v56 = vrot.slane %v5344_v9, 7  ;;  %10474 = vrot.lane.b32.xlu0 %v10473_v41, %s15028_s24  ;;  %v10478_v9 = vpack.i.bf16 %v13886_v63, %v13856_v22  ;;  %v9321_v41 = vld [vmem:[%s14916_s7 + $0x58] sm:$0xff] }
 0x5f7   : > { %v13964_v29 = vsel %vm504_vm0, 0.0, %v5360_v56  ;;  %v5384_v25 = vsel %vm504_vm0, %v5360_v56, 0.0  ;;  %5916 = vmatpush.bf16.msra.mxu2 %v9321_v41  ;;  %5890 = vmatpush.bf16.msrb.mxu3 %v9310_v51 }
 0x5f8   : > { %v5418_v7 = vrot.slane %v13964_v29, 1  ;;  %v5419_v5 = vrot.slane %v5384_v25, 1  ;;  %v5439_v40 = vrot.slane %v13964_v29, 2  ;;  %v5440_v34 = vrot.slane %v5384_v25, 2  ;;  %v5335_v52 = vpop.f32.mrf.mxu2  ;;  %v9333_v25 = vld [vmem:[%s14916_s7 + $0xb8] sm:$0xff] }
 0x5f9   : > { %v5336_v1 = vadd.f32 %v5335_v52, %v5307_v59  ;;  %v9318_v59 = vld [vmem:[%s14916_s7 + $0x40] sm:$0xff] }
 0x5fa   : > { %v13982_v46 = vsel %vm741_vm2, %v5439_v40, %v5440_v34  ;;  %v13988_v30 = vsel %vm663_vm1, %v5418_v7, %v5419_v5  ;;  %v9331_v7 = vld [vmem:[%s14916_s7 + $0xa8] sm:$0xff] }
 0x5fb   : > { %v5345_v13 = vmax.f32 %v5336_v1, 0.0  ;;  %v5574_v15 = vpack.c.bf16 %v13982_v46, %v13979_v32  ;;  %v10463_v54 = vpack.i.bf16 %v13988_v30, %v13985_v6  ;;  %5917 = vmatpush.bf16.msra.mxu2 %v9320_v58  ;;  %5941 = vmatpush.bf16.msra.mxu3 %v9333_v25 }
 0x5fd   : > { %v5361_v18 = vrot.slane %v5345_v13, 7  ;;  %8634 = vmatmul.msk.bf16.gmra.mxu1 %vm2765_vm13, %v5574_v15  ;;  %10489 = vrot.lane.b32.xlu0 %v10488_v19, %s15028_s24  ;;  %v9330_v13 = vld [vmem:[%s14916_s7 + $0xa0] sm:$0xff] }
 0x5fe   : > { %10464 = vrot.lane.b32.xlu1 %v10463_v54, %s15028_s24 }
 0x5ff   : > { %v14009_v53 = vsel %vm504_vm0, 0.0, %v5361_v18  ;;  %v5385_v38 = vsel %vm504_vm0, %v5361_v18, 0.0  ;;  %5918 = vmatpush.bf16.msra.mxu2 %v9319_v47  ;;  %5942 = vmatpush.bf16.msra.mxu3 %v9332_v60  ;;  %v9328_v18 = vld [vmem:[%s14916_s7 + $0x90] sm:$0xff] }
 0x600   : > { %v5462_v8 = vrot.slane %v14009_v53, 2  ;;  %v5463_v35 = vrot.slane %v5385_v38, 2  ;;  %v10498_v57 = vpack.i.bf16 %v14009_v53, %v13964_v29  ;;  %v5451_v56 = vrot.slane %v14009_v53, 1 }
 0x601   : > { %v5452_v24 = vrot.slane %v5385_v38, 1 }
 0x602   : > { %v5464_v26 = vsel %vm741_vm2, %v5462_v8, %v5463_v35  ;;  %10499 = vrot.lane.b32.xlu2 %v10498_v57, %s15028_s24  ;;  %vm6284_vm2 = vcmask 1042432  }
 0x603   : > { %v10503_v49 = vpack.i.bf16 %v5464_v26, %v13982_v46  ;;  %v5578_v37 = vpack.c.bf16 %v15173_v20, %v5464_v26  ;;  %v14038_v23 = vsel %vm663_vm1, %v5451_v56, %v5452_v24  ;;  %5919 = vmatpush.bf16.msra.mxu2 %v9318_v59  ;;  %5943 = vmatpush.bf16.msra.mxu3 %v9331_v7  ;;  %vm6092_vm1 = vcmask 1041408  }
 0x604   : > { %vm14198_vm8 = vmor %vm6092_vm1, %vm6303_vm4 }
 0x605   : > { %10504 = vrot.lane.b32.xlu0 %v10503_v49, %s15028_s24 }
 0x606   : > { %10479 = vrot.lane.b32.xlu1 %v10478_v9, %s15028_s24 }
 0x607   : > { %5944 = vmatpush.bf16.msra.mxu3 %v9330_v13 }
 0x60b   : > { %5945 = vmatpush.bf16.msra.mxu3 %v9329_v55 }
 0x60d   : > { %8635 = vmatmul.msk.bf16.gmra.mxu1 %vm2765_vm13, %v5578_v37 }
 0x60e   : > { %10494 = vrot.lane.b32.xlu1 %v10493_v0, %s15028_s24 }
 0x60f   : > { %5946 = vmatpush.bf16.msra.mxu3 %v9328_v18 }
 0x616   : > { %5535 = vrot.lane.b32.xlu1 %v14038_v23, %s15028_s24 }
 0x637   : > { %v10455_v5 = vpop.permute.xlu2 %10454 }
 0x638   : > { %v10457_v40 = vunpack.i.h.bf16 %v10455_v5  ;;  %v10456_v34 = vunpack.i.l.bf16 %v10455_v5 }
 0x63a   : > { %v5540_v52 = vsel %vm2765_vm13, %v13856_v22, %v10457_v40  ;;  %v5539_v62 = vsel %vm2765_vm13, %v13850_v61, %v10456_v34 }
 0x63b   : > { %v5565_v2 = vpack.c.bf16 %v5540_v52, %v5539_v62 }
 0x63d   : > { %5978 = vmatmul.bf16.vlgmr.msra.gmra.mxu0 %v5565_v2  ;;  %v5467_v1 = vpop.permute.xlu1 %5466 }
 0x63e   : > { %v5538_v16 = vsel %vm2765_vm13, %v13830_v10, %v5467_v1 }
 0x63f   : > { %v8626_v15 = vpack.c.bf16 %v5538_v16, %v15181_v36  ;;  %v10470_v19 = vpop.permute.xlu2 %10469 }
 0x640   : > { %v10472_v54 = vunpack.i.h.bf16 %v10470_v19  ;;  %v10471_v14 = vunpack.i.l.bf16 %v10470_v19 }
 0x641   : > { %8627 = vmatmul.msk.bf16.vlgmr.msrb.gmra.mxu3 %vm13419_vm12, %v8626_v15 }
 0x642   : > { %v5545_v61 = vsel %vm2765_vm13, %v15173_v20, %v10471_v14  ;;  %v5546_v22 = vsel %vm2765_vm13, %v13945_v11, %v10472_v54  ;;  %v9327_v20 = vld [vmem:[%s14916_s7 + $0x88] sm:$0xff] }
 0x643   : > { %v5563_v10 = vpack.c.bf16 %v5546_v22, %v5545_v61  ;;  %5947 = vmatpush.bf16.msra.mxu3 %v9327_v20 }
 0x645   : > { %5920 = vmatmul.bf16.vlgmr.msra.gmra.mxu2 %v5563_v10 }
 0x647   : > { %5948 = vmatpush.bf16.msra.mxu3 %v9326_v45 }
 0x648   : > { %v10485_v52 = vpop.permute.xlu2 %10484 }
 0x649   : > { %v10487_v62 = vunpack.i.h.bf16 %v10485_v52 }
 0x651   : > { %5896 = vmatmul.bf16.gmra.mxu3 %v5565_v2  ;;  %v10486_v2 = vunpack.i.l.bf16 %v10485_v52 }
 0x653   : > { %v5555_v1 = vsel %vm2765_vm13, %v13873_v42, %v10486_v2 }
 0x65f   : > { %v10460_v11 = vpop.permute.xlu0 %10459 }
 0x660   : > { %v10462_v38 = vunpack.i.h.bf16 %v10460_v11  ;;  %v10461_v8 = vunpack.i.l.bf16 %v10460_v11 }
 0x662   : > { %v5541_v35 = vsel %vm2765_vm13, %v13886_v63, %v10461_v8  ;;  %v5542_v4 = vsel %vm2765_vm13, %v13906_v3, %v10462_v38  ;;  %v14146_v38 = vld [vmem:[%s14917_s8] ss:$0 sm:$0xff] }
 0x663   : > { %v5569_v28 = vpack.c.bf16 %v5542_v4, %v5541_v35 }
 0x665   : > { %5901 = vmatmul.bf16.gmra.mxu3 %v5569_v28  ;;  %5983 = vmatmul.bf16.gmra.mxu0 %v5569_v28 }
 0x667   : > { %v10475_v0 = vpop.permute.xlu0 %10474 }
 0x668   : > { %v10477_v51 = vunpack.i.h.bf16 %v10475_v0  ;;  %v10476_v47 = vunpack.i.l.bf16 %v10475_v0 }
 0x66a   : > { %v5553_v59 = vsel %vm2765_vm13, %v13840_v17, %v10476_v47 }
 0x66f   : > { %v10490_v25 = vpop.permute.xlu0 %10489 }
 0x670   : > { %v10465_v57 = vpop.permute.xlu1 %10464  ;;  %v10492_v7 = vunpack.i.h.bf16 %v10490_v25  ;;  %v10491_v5 = vunpack.i.l.bf16 %v10490_v25 }
 0x671   : > { %v10467_v26 = vunpack.i.h.bf16 %v10465_v57  ;;  %v10466_v49 = vunpack.i.l.bf16 %v10465_v57 }
 0x672   : > { %v5549_v40 = vsel %vm2765_vm13, %v13914_v44, %v10491_v5  ;;  %v5550_v34 = vsel %vm2765_vm13, %v13917_v27, %v10492_v7  ;;  %v10500_v44 = vpop.permute.xlu2 %10499 }
 0x673   : > { %v5543_v9 = vsel %vm2765_vm13, %v13948_v39, %v10466_v49  ;;  %v5544_v41 = vsel %vm2765_vm13, %v13964_v29, %v10467_v26  ;;  %v5554_v29 = vsel %vm2765_vm13, %v13870_v48, %v10477_v51  ;;  %v5571_v17 = vpack.c.bf16 %v5550_v34, %v5549_v40 }
 0x674   : > { %v5573_v37 = vpack.c.bf16 %v5544_v41, %v5543_v9  ;;  %v5564_v60 = vpack.c.bf16 %v5554_v29, %v5553_v59  ;;  %v10502_v13 = vunpack.i.h.bf16 %v10500_v44  ;;  %v10501_v27 = vunpack.i.l.bf16 %v10500_v44  ;;  %v6008_v41 = vpop.f32.mrf.mxu1 }
 0x676   : > { %5906 = vmatmul.bf16.gmra.mxu3 %v5573_v37  ;;  %5988 = vmatmul.bf16.gmra.mxu0 %v5573_v37  ;;  %v5552_v21 = vsel %vm2765_vm13, %v13982_v46, %v10502_v13 }
 0x677   : > { %v10505_v61 = vpop.permute.xlu0 %10504 }
 0x678   : > { %v10480_v63 = vpop.permute.xlu1 %10479  ;;  %v10507_v22 = vunpack.i.h.bf16 %v10505_v61  ;;  %v10506_v10 = vunpack.i.l.bf16 %v10505_v61 }
 0x679   : > { %v10482_v56 = vunpack.i.h.bf16 %v10480_v63  ;;  %v10481_v24 = vunpack.i.l.bf16 %v10480_v63 }
 0x67a   : > { %v5560_v46 = vsel %vm2765_vm13, %v14038_v23, %v10507_v22 }
 0x67b   : > { %v5547_v3 = vsel %vm2765_vm13, %v13864_v31, %v10481_v24  ;;  %v5548_v58 = vsel %vm2765_vm13, %v13867_v50, %v10482_v56 }
 0x67c   : > { %v5567_v33 = vpack.c.bf16 %v5548_v58, %v5547_v3 }
 0x67e   : > { %5925 = vmatmul.bf16.gmra.mxu2 %v5567_v33 }
 0x680   : > { %v10495_v39 = vpop.permute.xlu1 %10494 }
 0x681   : > { %v10497_v19 = vunpack.i.h.bf16 %v10495_v39  ;;  %v10496_v54 = vunpack.i.l.bf16 %v10495_v39  ;;  %v6010_v39 = vpop.f32.mrf.mxu1 }
 0x683   : > { %v5557_v42 = vsel %vm2765_vm13, %v13923_v43, %v10496_v54 }
 0x686   : > { %5949 = vmatmul.bf16.vlgmr.msra.gmra.mxu3 %v5564_v60 }
 0x688   : > { %v5536_v31 = vpop.permute.xlu1 %5535 }
 0x689   : > { %v5561_v50 = vsel %vm2765_vm13, %v14009_v53, %v5536_v31  ;;  %v5556_v53 = vsel %vm2765_vm13, %v13920_v12, %v10487_v62  ;;  %v5558_v12 = vsel %vm2765_vm13, %v13985_v6, %v10497_v19 }
 0x68a   : > { %v8630_v48 = vpack.c.bf16 %v15181_v36, %v5561_v50  ;;  %v5568_v16 = vpack.c.bf16 %v5556_v53, %v5555_v1  ;;  %v5551_v36 = vsel %vm2765_vm13, %v13979_v32, %v10501_v27  ;;  %v5572_v14 = vpack.c.bf16 %v5558_v12, %v5557_v42 }
 0x68b   : > { %v5575_v15 = vpack.c.bf16 %v5552_v21, %v5551_v36  ;;  %v5559_v32 = vsel %vm2765_vm13, %v13988_v30, %v10506_v10  ;;  %vm6285_vm13 = vcmask 1046532  }
 0x68c   : > { %8631 = vmatmul.msk.bf16.gmra.mxu0 %vm13769_vm15, %v8630_v48  ;;  %v5576_v55 = vpack.c.bf16 %v5560_v46, %v5559_v32  ;;  %vm14179_vm14 = vmor %vm6284_vm2, %vm6285_vm13 }
 0x68e   : > { %5930 = vmatmul.bf16.gmra.mxu2 %v5571_v17 }
 0x696   : > { %5954 = vmatmul.bf16.gmra.mxu3 %v5568_v16 }
 0x69e   : > { %5935 = vmatmul.bf16.gmra.mxu2 %v5575_v15 }
 0x6a6   : > { %5959 = vmatmul.bf16.gmra.mxu3 %v5572_v14 }
 0x6b6   : > { %5964 = vmatmul.bf16.gmra.mxu3 %v5576_v55 }
 0x6ba   : > { %v5979_v49 = vpop.f32.mrf.mxu0 }
 0x6c2   : > { %v5981_v33 = vpop.f32.mrf.mxu0 }
 0x6c4   : > { %v5892_v18 = vpop.f32.mrf.mxu3 }
 0x6c5   : > { %v5893_v28 = vadd.f32 %v14146_v38, %v5892_v18 }
 0x6c8   : > { %v5921_v4 = vpop.f32.mrf.mxu2 }
 0x6c9   : > { %v5922_v57 = vadd.f32 %v5921_v4, %v5893_v28 }
 0x6cc   : > { %v5894_v20 = vpop.f32.mrf.mxu3 }
 0x6cd   : > { %v5895_v63 = vadd.f32 %v14146_v38, %v5894_v20 }
 0x6d0   : > { %v5923_v0 = vpop.f32.mrf.mxu2 }
 0x6d1   : > { %v5924_v24 = vadd.f32 %v5923_v0, %v5895_v63 }
 0x6d4   : > { %v14135_v45 = vpop.f32.mrf.mxu3 }
 0x6dc   : > { %v14137_v43 = vpop.f32.mrf.mxu3 }
 0x6e2   : > { %v5984_v0 = vpop.f32.mrf.mxu0 }
 0x6e8   : > { %v14139_v6 = vpop.f32.mrf.mxu3 }
 0x6f0   : > { %v14141_v11 = vpop.f32.mrf.mxu3 }
 0x6f9   : > { %v5907_v30 = vpop.f32.mrf.mxu3 }
 0x6fa   : > { %v14149_v23 = vadd.f32 %v14146_v38, %v5907_v30 }
 0x701   : > { %v5909_v8 = vpop.f32.mrf.mxu3  ;;  %v5926_v61 = vpop.f32.mrf.mxu2 }
 0x702   : > { %v14152_v35 = vadd.f32 %v14146_v38, %v5909_v8  ;;  %v5898_v8 = vadd.f32 %v14146_v38, %v14135_v45  ;;  %v15192_v45 = vmov 0.0  }
 0x709   : > { %v5950_v26 = vpop.f32.mrf.mxu3 }
 0x70a   : > { %v5951_v9 = vadd.f32 %v5950_v26, %v5922_v57  ;;  %v5927_v26 = vadd.f32 %v5926_v61, %v5898_v8 }
 0x70c   : > { %v5980_v37 = vadd.f32 %v5979_v49, %v5951_v9 }
 0x70e   : > { %v6009_v56 = vadd.f32 %v6008_v41, %v5980_v37 }
 0x710   : > { %v6028_v51 = vmax.f32 %v6009_v56, 0.0 }
 0x711   : > { %v5952_v3 = vpop.f32.mrf.mxu3 }
 0x712   : > { %v5953_v58 = vadd.f32 %v5952_v3, %v5924_v24  ;;  %v6044_v59 = vrot.slane %v6028_v51, 2  ;;  %v6045_v25 = vrot.slane %v6028_v51, 4  ;;  %v6046_v60 = vrot.slane %v6028_v51, 6  ;;  %v6013_v3 = vpop.f32.mrf.mxu1 }
 0x713   : > { %v6093_v5 = vsel %vm6092_vm1, %v6028_v51, -inf }
 0x714   : > { %v5982_v47 = vadd.f32 %v5981_v33, %v5953_v58  ;;  %v6102_v52 = vsel %vm6092_vm1, %v6044_v59, -inf  ;;  %v6111_v48 = vsel %vm6092_vm1, %v6045_v25, -inf  ;;  %v6120_v62 = vsel %vm6092_vm1, %v6046_v60, -inf  ;;  %v5928_v33 = vpop.f32.mrf.mxu2 }
 0x715   : > { %v5900_v25 = vadd.f32 %v14146_v38, %v14137_v43 }
 0x716   : > { %v6011_v29 = vadd.f32 %v6010_v39, %v5982_v47  ;;  %v6280_v47 = vrot.slane %v15192_v45, 4 }
 0x718   : > { %v6029_v7 = vmax.f32 %v6011_v29, 0.0 }
 0x719   : > { %v5955_v37 = vpop.f32.mrf.mxu3 }
 0x71a   : > { %v6047_v31 = vrot.slane %v6029_v7, 2  ;;  %v6048_v50 = vrot.slane %v6029_v7, 4  ;;  %v6049_v40 = vrot.slane %v6029_v7, 6  ;;  %v6094_v34 = vsel %vm6092_vm1, %v6029_v7, -inf }
 0x71b   : > { %v6095_v17 = vmax.f32 %v6093_v5, %v6094_v34  ;;  %v5956_v24 = vadd.f32 %v5955_v37, %v5927_v26  ;;  %v8636_v7 = vrot.slane %v15192_v45, 9  ;;  %v6289_v5 = vrot.slane %v6280_v47, 5  ;;  %v9485_v34 = vld [vmem:[%s14920_s11 + $0x218] sm:$0xff] }
 0x71c   : > { %v6103_v2 = vsel %vm6092_vm1, %v6047_v31, -inf  ;;  %v6112_v1 = vsel %vm6092_vm1, %v6048_v50, -inf  ;;  %v6121_v53 = vsel %vm6092_vm1, %v6049_v40, -inf  ;;  %v5929_v50 = vadd.f32 %v5928_v33, %v5900_v25 }
 0x71d   : > { %v6096_v44 = vrot.slane %v6095_v17, 4  ;;  %v6104_v16 = vmax.f32 %v6102_v52, %v6103_v2  ;;  %v6113_v13 = vmax.f32 %v6111_v48, %v6112_v1  ;;  %v6122_v27 = vmax.f32 %v6120_v62, %v6121_v53  ;;  %v6015_v2 = vpop.f32.mrf.mxu1 }
 0x71e   : > { %v5985_v39 = vadd.f32 %v5984_v0, %v5956_v24  ;;  %v14185_v43 = vsel %vm14179_vm14, %v8636_v7, %v6289_v5 }
 0x71f   : > { %v6097_v36 = vmax.f32 %v6095_v17, %v6096_v44  ;;  %v6105_v21 = vrot.slane %v6104_v16, 4  ;;  %v6114_v15 = vrot.slane %v6113_v13, 4  ;;  %v6123_v19 = vrot.slane %v6122_v27, 4  ;;  %v5986_v17 = vpop.f32.mrf.mxu0  ;;  %v5931_v44 = vpop.f32.mrf.mxu2 }
 0x720   : > { %v6014_v31 = vadd.f32 %v6013_v3, %v5985_v39 }
 0x721   : > { %v6098_v54 = vrot.slane %v6097_v36, 2  ;;  %v6106_v42 = vmax.f32 %v6104_v16, %v6105_v21  ;;  %v6115_v12 = vmax.f32 %v6113_v13, %v6114_v15  ;;  %v6124_v14 = vmax.f32 %v6122_v27, %v6123_v19  ;;  %v5957_v40 = vpop.f32.mrf.mxu3 }
 0x722   : > { %v5958_v48 = vadd.f32 %v5957_v40, %v5929_v50  ;;  %v6030_v62 = vmax.f32 %v6014_v31, 0.0  ;;  %v8640_v16 = vrot.slane %v15192_v45, 10  ;;  %v6307_v13 = vrot.slane %v6280_v47, 6  ;;  %v9353_v40 = vld [vmem:[%s14918_s9 + $0x38] sm:$0xff] }
 0x723   : > { %v6099_v22 = vmax.f32 %v6097_v36, %v6098_v54  ;;  %v6107_v10 = vrot.slane %v6106_v42, 2  ;;  %v6116_v32 = vrot.slane %v6115_v12, 2  ;;  %v6125_v46 = vrot.slane %v6124_v14, 2  ;;  %7019 = vmatpush.bf16.msrb.mxu2 %v9353_v40  ;;  %v9349_v40 = vld [vmem:[%s14918_s9 + $0x18] sm:$0xff]  ;;  %v9483_v54 = vld [vmem:[%s14920_s11 + $0x208] sm:$0xff] }
 0x724   : > { %v5987_v53 = vadd.f32 %v5986_v17, %v5958_v48  ;;  %v6050_v15 = vrot.slane %v6030_v62, 2  ;;  %v6051_v19 = vrot.slane %v6030_v62, 4  ;;  %v14206_v61 = vsel %vm14198_vm8, %v8640_v16, %v6307_v13 }
 0x725   : > { %v6100_v55 = vrot.slane %v6099_v22, 1  ;;  %v6108_v18 = vmax.f32 %v6106_v42, %v6107_v10  ;;  %v6117_v20 = vmax.f32 %v6115_v12, %v6116_v32  ;;  %v6126_v30 = vmax.f32 %v6124_v14, %v6125_v46  ;;  %v6018_v0 = vpop.f32.mrf.mxu1 }
 0x726   : > { %v6016_v21 = vadd.f32 %v6015_v2, %v5987_v53  ;;  %v6052_v42 = vrot.slane %v6030_v62, 6  ;;  %v5903_v14 = vadd.f32 %v14146_v38, %v14139_v6  ;;  %v6129_v10 = vsel %vm6092_vm1, %v6030_v62, -inf }
 0x727   : > { %v6109_v4 = vrot.slane %v6108_v18, 1  ;;  %v6118_v28 = vrot.slane %v6117_v20, 1  ;;  %v6127_v57 = vrot.slane %v6126_v30, 1  ;;  %v6101_v49 = vmax.f32 %v6099_v22, %v6100_v55 }
 0x728   : > { %v6031_v12 = vmax.f32 %v6016_v21, 0.0  ;;  %v6147_v8 = vsel %vm6092_vm1, %v6051_v19, -inf  ;;  %v6156_v6 = vsel %vm6092_vm1, %v6052_v42, -inf  ;;  %v5905_v2 = vadd.f32 %v14146_v38, %v14141_v11  ;;  %v9352_v21 = vld [vmem:[%s14918_s9 + $0x30] sm:$0xff] }
 0x729   : > { %v6110_v9 = vmax.f32 %v6108_v18, %v6109_v4  ;;  %v6119_v41 = vmax.f32 %v6117_v20, %v6118_v28  ;;  %v6128_v63 = vmax.f32 %v6126_v30, %v6127_v57  ;;  %v6138_v30 = vsel %vm6092_vm1, %v6050_v15, -inf  ;;  %7020 = vmatpush.bf16.msrb.mxu2 %v9352_v21 }
 0x72a   : > { %v6053_v32 = vrot.slane %v6031_v12, 2  ;;  %v6054_v46 = vrot.slane %v6031_v12, 4  ;;  %v6055_v55 = vrot.slane %v6031_v12, 6  ;;  %v6130_v18 = vsel %vm6092_vm1, %v6031_v12, -inf }
 0x72b   : > { %v6253_v56 = vsel %vm4610_vm5, %v6110_v9, %v6101_v49  ;;  %v6131_v4 = vmax.f32 %v6129_v10, %v6130_v18 }
 0x72c   : > { %v6254_v58 = vsel %vm4612_vm6, %v6119_v41, %v6253_v56  ;;  %v6139_v28 = vsel %vm6092_vm1, %v6053_v32, -inf  ;;  %v6148_v57 = vsel %vm6092_vm1, %v6054_v46, -inf  ;;  %v6157_v26 = vsel %vm6092_vm1, %v6055_v55, -inf }
 0x72d   : > { %v6255_v51 = vsel %vm4614_vm7, %v6128_v63, %v6254_v58  ;;  %v6132_v49 = vrot.slane %v6131_v4, 4  ;;  %v6140_v9 = vmax.f32 %v6138_v30, %v6139_v28  ;;  %v6149_v41 = vmax.f32 %v6147_v8, %v6148_v57  ;;  %v5989_v63 = vpop.f32.mrf.mxu0  ;;  %v5933_v58 = vpop.f32.mrf.mxu2  ;;  %v9351_v30 = vld [vmem:[%s14918_s9 + $0x28] sm:$0xff] }
 0x72e   : > { %v6269_v29 = vsel %vm504_vm0, 0.0, %v6255_v51  ;;  %v6158_v37 = vmax.f32 %v6156_v6, %v6157_v26  ;;  %v5932_v56 = vadd.f32 %v5931_v44, %v5903_v14  ;;  %v5934_v13 = vadd.f32 %v5933_v58, %v5905_v2  ;;  %v6020_v10 = vpop.f32.mrf.mxu1  ;;  %7021 = vmatpush.bf16.msrb.mxu2 %v9351_v30 }
 0x72f   : > { %v14172_v59 = vsel %vm1930_vm3, %v6269_v29, 0.0  ;;  %v6133_v33 = vmax.f32 %v6131_v4, %v6132_v49  ;;  %v6141_v51 = vrot.slane %v6140_v9, 4  ;;  %v6150_v47 = vrot.slane %v6149_v41, 4  ;;  %v5960_v29 = vpop.f32.mrf.mxu3 }
 0x730   : > { %v6281_v60 = vrot.slane %v14172_v59, 4  ;;  %6333 = vst [vmem:[#allocation1 + $0x1] ss:$2 sm:$0xff] %v14172_v59  ;;  %v8637_v1 = vrot.slane %v14172_v59, 9  ;;  %v8641_v20 = vrot.slane %v14172_v59, 10  ;;  %v6159_v39 = vrot.slane %v6158_v37, 4 }
 0x731   : > { %v5961_v25 = vadd.f32 %v5960_v29, %v5932_v56  ;;  %v6142_v7 = vmax.f32 %v6140_v9, %v6141_v51  ;;  %v6151_v5 = vmax.f32 %v6149_v41, %v6150_v47  ;;  %v9350_v41 = vld [vmem:[%s14918_s9 + $0x20] sm:$0xff] }
 0x732   : > { %v6293_v52 = vrot.slane %v6281_v60, 5  ;;  %v6311_v22 = vrot.slane %v6281_v60, 6  ;;  %v6134_v60 = vrot.slane %v6133_v33, 2  ;;  %v6160_v31 = vmax.f32 %v6158_v37, %v6159_v39  ;;  %v9360_v37 = vld [vmem:[%s14918_s9 + $0x70] sm:$0xff]  ;;  %7022 = vmatpush.bf16.msrb.mxu2 %v9350_v41 }
 0x733   : > { %v5990_v50 = vadd.f32 %v5989_v63, %v5961_v25  ;;  %v6143_v48 = vrot.slane %v6142_v7, 2  ;;  %v6152_v17 = vrot.slane %v6151_v5, 2 }
 0x734   : > { %v14193_v36 = vsel %vm14179_vm14, %v8637_v1, %v6293_v52  ;;  %v14219_v24 = vsel %vm14198_vm8, %v8641_v20, %v6311_v22  ;;  %v6135_v52 = vmax.f32 %v6133_v33, %v6134_v60  ;;  %v6161_v62 = vrot.slane %v6160_v31, 2  ;;  %v9361_v20 = vld [vmem:[%s14918_s9 + $0x78] sm:$0xff] }
 0x735   : > { %v6144_v53 = vmax.f32 %v6142_v7, %v6143_v48  ;;  %v6153_v44 = vmax.f32 %v6151_v5, %v6152_v17  ;;  %v6019_v14 = vadd.f32 %v6018_v0, %v5990_v50  ;;  %v5991_v11 = vpop.f32.mrf.mxu0  ;;  %v5936_v38 = vpop.f32.mrf.mxu2  ;;  %7033 = vmatpush.bf16.msrb.mxu3 %v9361_v20 }
 0x736   : > { %v6136_v1 = vrot.slane %v6135_v52, 1  ;;  %v6162_v16 = vmax.f32 %v6160_v31, %v6161_v62  ;;  %v5937_v49 = vadd.f32 %v5936_v38, %v14149_v23  ;;  %v6023_v48 = vpop.f32.mrf.mxu1  ;;  %7023 = vmatpush.bf16.msrb.mxu2 %v9349_v40  ;;  %v9348_v38 = vld [vmem:[%s14918_s9 + $0x10] sm:$0xff] }
 0x737   : > { %v14189_v27 = vld.sshfl [vmem:[#allocation1] sm:$0xff pattern:$0x75316420]  ;;  %v6145_v19 = vrot.slane %v6144_v53, 1  ;;  %v6154_v42 = vrot.slane %v6153_v44, 1  ;;  %v5962_v22 = vpop.f32.mrf.mxu3  ;;  %v6032_v6 = vmax.f32 %v6019_v14, 0.0 }
 0x738   : > { %6342 = vst [vmem:[#allocation1] ss:$2 sm:$0xff] %v14185_v43  ;;  %v6163_v12 = vrot.slane %v6162_v16, 1  ;;  %v6137_v32 = vmax.f32 %v6135_v52, %v6136_v1  ;;  %v5963_v18 = vadd.f32 %v5962_v22, %v5934_v13  ;;  %v9359_v52 = vld [vmem:[%s14918_s9 + $0x68] sm:$0xff] }
 0x739   : > { %6344 = vst [vmem:[#allocation1 + $0x1] ss:$2 sm:$0xff] %v14193_v36  ;;  %v6146_v46 = vmax.f32 %v6144_v53, %v6145_v19  ;;  %v6155_v55 = vmax.f32 %v6153_v44, %v6154_v42  ;;  %v6056_v63 = vrot.slane %v6032_v6, 2  ;;  %v6057_v56 = vrot.slane %v6032_v6, 4  ;;  %7034 = vmatpush.bf16.msrb.mxu3 %v9360_v37 }
 0x73a   : > { %v6164_v8 = vmax.f32 %v6162_v16, %v6163_v12  ;;  %v6058_v23 = vrot.slane %v6032_v6, 6  ;;  %v6165_v47 = vsel %vm6092_vm1, %v6032_v6, -inf  ;;  %7024 = vmatpush.bf16.msrb.mxu2 %v9348_v38 }
 0x73b   : > { %v6256_v4 = vsel %vm4610_vm5, %v6146_v46, %v6137_v32  ;;  %v6174_v62 = vsel %vm6092_vm1, %v6056_v63, -inf  ;;  %v6183_v44 = vsel %vm6092_vm1, %v6057_v56, -inf  ;;  %v9358_v32 = vld [vmem:[%s14918_s9 + $0x60] sm:$0xff]  ;;  %v9357_v56 = vld [vmem:[%s14918_s9 + $0x58] sm:$0xff] }
 0x73c   : > { %v6257_v28 = vsel %vm4612_vm6, %v6155_v55, %v6256_v4  ;;  %v6192_v16 = vsel %vm6092_vm1, %v6058_v23, -inf }
 0x73d   : > { %v6258_v57 = vsel %vm4614_vm7, %v6164_v8, %v6257_v28  ;;  %v5994_v29 = vpop.f32.mrf.mxu0  ;;  %v5938_v17 = vpop.f32.mrf.mxu2  ;;  %7035 = vmatpush.bf16.msrb.mxu3 %v9359_v52 }
 0x73e   : > { %v6270_v9 = vsel %vm504_vm0, 0.0, %v6258_v57  ;;  %v5939_v22 = vadd.f32 %v5938_v17, %v14152_v35  ;;  %v9369_v17 = vld [vmem:[%s14918_s9 + $0xb8] sm:$0xff] }
 0x73f   : > { %v14254_v0 = vsel %vm1930_vm3, %v6270_v9, 0.0  ;;  %v5965_v33 = vpop.f32.mrf.mxu3  ;;  %v9347_v9 = vld [vmem:[%s14918_s9 + $0x8] sm:$0xff] }
 0x740   : > { %v14221_v3 = vld.sshfl [vmem:[#allocation1] sm:$0xff pattern:$0x75316420]  ;;  %v6282_v51 = vrot.slane %v14254_v0, 4  ;;  %6335 = vst [vmem:[#allocation1 + $0x10] ss:$2 sm:$0xff] %v14254_v0  ;;  %v5966_v39 = vadd.f32 %v5965_v33, %v5937_v49  ;;  %7025 = vmatpush.bf16.msrb.mxu2 %v9347_v9 }
 0x741   : > { %6353 = vst [vmem:[#allocation1] ss:$2 sm:$0xff] %v14206_v61  ;;  %v8638_v46 = vrot.slane %v14254_v0, 9  ;;  %7036 = vmatpush.bf16.msrb.mxu3 %v9358_v32  ;;  %v9354_v9 = vld [vmem:[%s14918_s9 + $0x40] sm:$0xff] }
 0x742   : > { %6355 = vst [vmem:[#allocation1 + $0x1] ss:$2 sm:$0xff] %v14219_v24  ;;  %v5995_v50 = vadd.f32 %v5994_v29, %v5966_v39  ;;  %v6297_v19 = vrot.slane %v6282_v51, 5 }
 0x744   : > { %v6024_v14 = vadd.f32 %v6023_v48, %v5995_v50  ;;  %v14285_v6 = vsel %vm14179_vm14, %v8638_v46, %v6297_v19 }
 0x745   : > { %v5996_v41 = vpop.f32.mrf.mxu0  ;;  %7037 = vmatpush.bf16.msrb.mxu3 %v9357_v56 }
 0x746   : > { %v6034_v57 = vmax.f32 %v6024_v14, 0.0 }
 0x747   : > { %v5967_v20 = vpop.f32.mrf.mxu3 }
 0x748   : > { %v5968_v35 = vadd.f32 %v5967_v20, %v5939_v22  ;;  %v6063_v52 = vrot.slane %v6034_v57, 4  ;;  %v6064_v48 = vrot.slane %v6034_v57, 6 }
 0x749   : > { %v14233_v15 = vld.sshfl [vmem:[#allocation1] sm:$0xff pattern:$0x75316420] }
 0x74a   : > { %6364 = vst [vmem:[#allocation1] ss:$2 sm:$0xff] %v14172_v59  ;;  %v5992_v59 = vadd.f32 %v5991_v11, %v5963_v18  ;;  %v5997_v23 = vadd.f32 %v5996_v41, %v5968_v35  ;;  %v6219_v38 = vsel %vm6092_vm1, %v6063_v52, -inf  ;;  %v6228_v32 = vsel %vm6092_vm1, %v6064_v48, -inf }
 0x74b   : > { %6366 = vst [vmem:[#allocation1 + $0x1] ss:$2 sm:$0xff] %v14254_v0 }
 0x74c   : > { %v6021_v26 = vadd.f32 %v6020_v10, %v5992_v59 }
 0x74e   : > { %v6033_v58 = vmax.f32 %v6021_v26, 0.0 }
 0x750   : > { %v6059_v25 = vrot.slane %v6033_v58, 2  ;;  %v6060_v60 = vrot.slane %v6033_v58, 4  ;;  %v6061_v7 = vrot.slane %v6033_v58, 6  ;;  %v6166_v5 = vsel %vm6092_vm1, %v6033_v58, -inf }
 0x751   : > { %v6167_v31 = vmax.f32 %v6165_v47, %v6166_v5  ;;  %v6315_v58 = vrot.slane %v6282_v51, 6  ;;  %v6025_v47 = vpop.f32.mrf.mxu1  ;;  %v9356_v51 = vld [vmem:[%s14918_s9 + $0x50] sm:$0xff] }
 0x752   : > { %v6175_v2 = vsel %vm6092_vm1, %v6059_v25, -inf  ;;  %v6184_v1 = vsel %vm6092_vm1, %v6060_v60, -inf  ;;  %v6193_v53 = vsel %vm6092_vm1, %v6061_v7, -inf  ;;  %v14281_v30 = vld.sshfl [vmem:[#allocation1] sm:$0xff pattern:$0x75316420]  ;;  %v6026_v5 = vadd.f32 %v6025_v47, %v5997_v23  ;;  %7038 = vmatpush.bf16.msrb.mxu3 %v9356_v51 }
 0x753   : > { %v6168_v13 = vrot.slane %v6167_v31, 4  ;;  %v6176_v21 = vmax.f32 %v6174_v62, %v6175_v2  ;;  %v6185_v42 = vmax.f32 %v6183_v44, %v6184_v1  ;;  %v6194_v12 = vmax.f32 %v6192_v16, %v6193_v53  ;;  %6375 = vst [vmem:[#allocation1] ss:$2 sm:$0xff] %v14193_v36 }
 0x754   : > { %6377 = vst [vmem:[#allocation1 + $0x1] ss:$2 sm:$0xff] %v14285_v6  ;;  %v6062_v25 = vrot.slane %v6034_v57, 2  ;;  %v8642_v60 = vrot.slane %v14254_v0, 10  ;;  %v6035_v53 = vmax.f32 %v6026_v5, 0.0  ;;  %v9366_v5 = vld [vmem:[%s14918_s9 + $0xa0] sm:$0xff] }
 0x755   : > { %v6169_v10 = vmax.f32 %v6167_v31, %v6168_v13  ;;  %v6177_v11 = vrot.slane %v6176_v21, 4  ;;  %v6186_v55 = vrot.slane %v6185_v42, 4  ;;  %v6195_v18 = vrot.slane %v6194_v12, 4  ;;  %v9346_v31 = vld [vmem:[%s14918_s9] sm:$0xff] }
 0x756   : > { %v14307_v62 = vsel %vm14198_vm8, %v8642_v60, %v6315_v58  ;;  %7026 = vmatpush.bf16.msrb.mxu2 %v9346_v31  ;;  %v6210_v19 = vsel %vm6092_vm1, %v6062_v25, -inf  ;;  %v6066_v14 = vrot.slane %v6035_v53, 4  ;;  %v6067_v22 = vrot.slane %v6035_v53, 6  ;;  %v9376_v31 = vld [vmem:[%s14918_s9 + $0xf0] sm:$0xff] }
 0x757   : > { %v6170_v8 = vrot.slane %v6169_v10, 2  ;;  %v6178_v4 = vmax.f32 %v6176_v21, %v6177_v11  ;;  %v6187_v59 = vmax.f32 %v6185_v42, %v6186_v55  ;;  %v6196_v28 = vmax.f32 %v6194_v12, %v6195_v18 }
 0x758   : > { %v6201_v21 = vsel %vm6092_vm1, %v6034_v57, -inf  ;;  %v6065_v12 = vrot.slane %v6035_v53, 2  ;;  %v6202_v46 = vsel %vm6092_vm1, %v6035_v53, -inf }
 0x759   : > { %v6171_v26 = vmax.f32 %v6169_v10, %v6170_v8  ;;  %v6179_v49 = vrot.slane %v6178_v4, 2  ;;  %v6188_v37 = vrot.slane %v6187_v59, 2  ;;  %v6197_v63 = vrot.slane %v6196_v28, 2  ;;  %v9355_v10 = vld [vmem:[%s14918_s9 + $0x48] sm:$0xff] }
 0x75a   : > { %7047 = vmatpush.bf16.msra.mxu2 %v9369_v17  ;;  %v6203_v18 = vmax.f32 %v6201_v21, %v6202_v46  ;;  %v6211_v20 = vsel %vm6092_vm1, %v6065_v12, -inf  ;;  %v6220_v8 = vsel %vm6092_vm1, %v6066_v14, -inf  ;;  %7039 = vmatpush.bf16.msrb.mxu3 %v9355_v10  ;;  %v9384_v46 = vld [vmem:[%s14918_s9 + $0x130] sm:$0xff] }
 0x75b   : > { %v6172_v36 = vrot.slane %v6171_v26, 1  ;;  %v6180_v33 = vmax.f32 %v6178_v4, %v6179_v49  ;;  %v6189_v39 = vmax.f32 %v6187_v59, %v6188_v37  ;;  %v6198_v29 = vmax.f32 %v6196_v28, %v6197_v63  ;;  %v14309_v44 = vld.sshfl [vmem:[#allocation1] sm:$0xff pattern:$0x75316420] }
 0x75c   : > { %6386 = vst [vmem:[#allocation1] ss:$2 sm:$0xff] %v14219_v24  ;;  %v9368_v24 = vld [vmem:[%s14918_s9 + $0xb0] sm:$0xff]  ;;  %v6212_v35 = vmax.f32 %v6210_v19, %v6211_v20  ;;  %v6221_v59 = vmax.f32 %v6219_v38, %v6220_v8  ;;  %v6229_v28 = vsel %vm6092_vm1, %v6067_v22, -inf  ;;  %v9365_v19 = vld [vmem:[%s14918_s9 + $0x98] sm:$0xff]  ;;  %v9374_v20 = vld [vmem:[%s14918_s9 + $0xe0] sm:$0xff] }
 0x75d   : > { %v6181_v7 = vrot.slane %v6180_v33, 1  ;;  %v6190_v50 = vrot.slane %v6189_v39, 1  ;;  %v6199_v40 = vrot.slane %v6198_v29, 1  ;;  %v6173_v2 = vmax.f32 %v6171_v26, %v6172_v36  ;;  %6388 = vst [vmem:[#allocation1 + $0x1] ss:$2 sm:$0xff] %v14307_v62  ;;  %v9367_v36 = vld [vmem:[%s14918_s9 + $0xa8] sm:$0xff] }
 0x75e   : > { %7048 = vmatpush.bf16.msra.mxu2 %v9368_v24  ;;  %v6204_v26 = vrot.slane %v6203_v18, 4  ;;  %v6230_v49 = vmax.f32 %v6228_v32, %v6229_v28  ;;  %v6213_v37 = vrot.slane %v6212_v35, 4  ;;  %v6222_v56 = vrot.slane %v6221_v59, 4  ;;  %7040 = vmatpush.bf16.msrb.mxu3 %v9354_v9  ;;  %v9364_v24 = vld [vmem:[%s14918_s9 + $0x90] sm:$0xff]  ;;  %v9373_v9 = vld [vmem:[%s14918_s9 + $0xd8] sm:$0xff] }
 0x75f   : > { %v6182_v1 = vmax.f32 %v6180_v33, %v6181_v7  ;;  %v6191_v16 = vmax.f32 %v6189_v39, %v6190_v50  ;;  %v6200_v13 = vmax.f32 %v6198_v29, %v6199_v40  ;;  %v9377_v33 = vld [vmem:[%s14918_s9 + $0xf8] sm:$0xff] }
 0x760   : > { %v6205_v63 = vmax.f32 %v6203_v18, %v6204_v26  ;;  %v6231_v58 = vrot.slane %v6230_v49, 4  ;;  %v6214_v23 = vmax.f32 %v6212_v35, %v6213_v37  ;;  %v6223_v29 = vmax.f32 %v6221_v59, %v6222_v56  ;;  %v9383_v59 = vld [vmem:[%s14918_s9 + $0x128] sm:$0xff]  ;;  %v9362_v37 = vld [vmem:[%s14918_s9 + $0x80] sm:$0xff] }
 0x761   : > { %v6259_v42 = vsel %vm4610_vm5, %v6182_v1, %v6173_v2 }
 0x762   : > { %v6260_v11 = vsel %vm4612_vm6, %v6191_v16, %v6259_v42  ;;  %v6206_v39 = vrot.slane %v6205_v63, 2  ;;  %v6232_v25 = vmax.f32 %v6230_v49, %v6231_v58  ;;  %7049 = vmatpush.bf16.msra.mxu2 %v9367_v36  ;;  %7061 = vmatpush.bf16.msra.mxu3 %v9377_v33  ;;  %v6215_v7 = vrot.slane %v6214_v23, 2  ;;  %v9375_v42 = vld [vmem:[%s14918_s9 + $0xe8] sm:$0xff]  ;;  %v9372_v58 = vld [vmem:[%s14918_s9 + $0xd0] sm:$0xff] }
 0x763   : > { %v6261_v55 = vsel %vm4614_vm7, %v6200_v13, %v6260_v11  ;;  %v6224_v50 = vrot.slane %v6223_v29, 2  ;;  %v9385_v13 = vld [vmem:[%s14918_s9 + $0x138] sm:$0xff]  ;;  %v9363_v49 = vld [vmem:[%s14918_s9 + $0x88] sm:$0xff] }
 0x764   : > { %v6271_v4 = vsel %vm504_vm0, 0.0, %v6261_v55  ;;  %v14345_v47 = vld.sshfl [vmem:[#allocation1] sm:$0xff pattern:$0x75316420]  ;;  %v6207_v51 = vmax.f32 %v6205_v63, %v6206_v39  ;;  %v6233_v40 = vrot.slane %v6232_v25, 2  ;;  %v6216_v48 = vmax.f32 %v6214_v23, %v6215_v7  ;;  %7075 = vmatpush.bf16.msrb.mxu0 %v9385_v13  ;;  %v9391_v33 = vld [vmem:[%s14918_s9 + $0x168] sm:$0xff] }
 0x765   : > { %v14332_v57 = vsel %vm1930_vm3, %v6271_v4, 0.0  ;;  %6397 = vst [vmem:[#allocation1] ss:$2 sm:$0xff] %v14254_v0  ;;  %v6225_v2 = vmax.f32 %v6223_v29, %v6224_v50  ;;  %v9381_v23 = vld [vmem:[%s14918_s9 + $0x118] sm:$0xff]  ;;  %v9390_v7 = vld [vmem:[%s14918_s9 + $0x160] sm:$0xff] }
 0x766   : > { %v6283_v41 = vrot.slane %v14332_v57, 4  ;;  %6337 = vst [vmem:[#allocation1 + $0x11] ss:$2 sm:$0xff] %v14332_v57  ;;  %v8639_v52 = vrot.slane %v14332_v57, 9  ;;  %v6208_v0 = vrot.slane %v6207_v51, 1  ;;  %v6234_v1 = vmax.f32 %v6232_v25, %v6233_v40  ;;  %7050 = vmatpush.bf16.msra.mxu2 %v9366_v5  ;;  %7062 = vmatpush.bf16.msra.mxu3 %v9376_v31  ;;  %v9401_v29 = vld [vmem:[%s14918_s9 + $0x1b8] sm:$0xff] }
 0x767   : > { %6399 = vst [vmem:[#allocation1 + $0x1] ss:$2 sm:$0xff] %v14332_v57  ;;  %v6217_v16 = vrot.slane %v6216_v48, 1  ;;  %v6226_v12 = vrot.slane %v6225_v2, 1  ;;  %v8643_v4 = vrot.slane %v14332_v57, 10  ;;  %v9370_v5 = vld [vmem:[%s14918_s9 + $0xc0] sm:$0xff] }
 0x768   : > { %v6301_v60 = vrot.slane %v6283_v41, 5  ;;  %v6235_v14 = vrot.slane %v6234_v1, 1  ;;  %v6209_v22 = vmax.f32 %v6207_v51, %v6208_v0  ;;  %v6319_v55 = vrot.slane %v6283_v41, 6  ;;  %7076 = vmatpush.bf16.msrb.mxu0 %v9384_v46  ;;  %v9392_v41 = vld [vmem:[%s14918_s9 + $0x170] sm:$0xff]  ;;  %v9379_v51 = vld [vmem:[%s14918_s9 + $0x108] sm:$0xff]  ;;  %v9389_v50 = vld [vmem:[%s14918_s9 + $0x158] sm:$0xff] }
 0x769   : > { %v6218_v10 = vmax.f32 %v6216_v48, %v6217_v16  ;;  %v6227_v11 = vmax.f32 %v6225_v2, %v6226_v12  ;;  %v9399_v40 = vld [vmem:[%s14918_s9 + $0x1a8] sm:$0xff]  ;;  %v9409_v48 = vld [vmem:[%s14918_s9 + $0x1f8] sm:$0xff]  ;;  %v9388_v16 = vld [vmem:[%s14918_s9 + $0x150] sm:$0xff] }
 0x76a   : > { %v14358_v53 = vsel %vm14179_vm14, %v8639_v52, %v6301_v60  ;;  %7051 = vmatpush.bf16.msra.mxu2 %v9365_v19  ;;  %7063 = vmatpush.bf16.msra.mxu3 %v9375_v42  ;;  %v6236_v38 = vmax.f32 %v6234_v1, %v6235_v14  ;;  %v14397_v28 = vsel %vm14198_vm8, %v8643_v4, %v6319_v55  ;;  %v9378_v1 = vld [vmem:[%s14918_s9 + $0x100] sm:$0xff]  ;;  %v9397_v19 = vld [vmem:[%s14918_s9 + $0x198] sm:$0xff]  ;;  %v9407_v42 = vld [vmem:[%s14918_s9 + $0x1e8] sm:$0xff] }
 0x76b   : > { %v6262_v32 = vsel %vm4610_vm5, %v6218_v10, %v6209_v22  ;;  %v9398_v13 = vld [vmem:[%s14918_s9 + $0x1a0] sm:$0xff]  ;;  %v9417_v12 = vld [vmem:[%s14918_s9 + $0x238] sm:$0xff]  ;;  %v9404_v4 = vld [vmem:[%s14918_s9 + $0x1d0] sm:$0xff] }
 0x76c   : > { %v6263_v18 = vsel %vm4612_vm6, %v6227_v11, %v6262_v32  ;;  %7077 = vmatpush.bf16.msrb.mxu0 %v9383_v59  ;;  %v9396_v32 = vld [vmem:[%s14918_s9 + $0x190] sm:$0xff]  ;;  %v9406_v46 = vld [vmem:[%s14918_s9 + $0x1e0] sm:$0xff]  ;;  %v9405_v55 = vld [vmem:[%s14918_s9 + $0x1d8] sm:$0xff] }
 0x76d   : > { %v6339_v17 = vld.sshfl [vmem:[#allocation1 + $0x10] sm:$0xff pattern:$0x75316420]  ;;  %v6264_v8 = vsel %vm4614_vm7, %v6236_v38, %v6263_v18  ;;  %v9386_v38 = vld [vmem:[%s14918_s9 + $0x140] sm:$0xff]  ;;  %v9415_v18 = vld [vmem:[%s14918_s9 + $0x228] sm:$0xff] }
 0x76e   : > { %6346 = vst [vmem:[#allocation1 + $0x10] ss:$2 sm:$0xff] %v14285_v6  ;;  %v6430_v21 = vpack.c.bf16 %v6339_v17, %v14189_v27  ;;  %v14372_v27 = vld.sshfl [vmem:[#allocation1] sm:$0xff pattern:$0x75316420]  ;;  %7052 = vmatpush.bf16.msra.mxu2 %v9364_v24  ;;  %7064 = vmatpush.bf16.msra.mxu3 %v9374_v20  ;;  %v6272_v56 = vsel %vm504_vm0, 0.0, %v6264_v8 }
 0x76f   : > { %6348 = vst [vmem:[#allocation1 + $0x11] ss:$2 sm:$0xff] %v14358_v53  ;;  %v14426_v36 = vsel %vm1930_vm3, %v6272_v56, 0.0  ;;  %v9416_v24 = vld [vmem:[%s14918_s9 + $0x230] sm:$0xff]  ;;  %v9394_v20 = vld [vmem:[%s14918_s9 + $0x180] sm:$0xff]  ;;  %v9403_v59 = vld [vmem:[%s14918_s9 + $0x1c8] sm:$0xff] }
 0x770   : > { %7027 = vmatmul.bf16.vlgmr.msrb.gmra.mxu2 %v6430_v21  ;;  %6408 = vst [vmem:[#allocation1] ss:$2 sm:$0xff] %v14285_v6  ;;  %v9393_v6 = vld [vmem:[%s14918_s9 + $0x178] sm:$0xff]  ;;  %v6322_v60 = vrot.slane %v14426_v36, 4  ;;  %v8644_v52 = vrot.slane %v14426_v36, 9  ;;  %v9387_v21 = vld [vmem:[%s14918_s9 + $0x148] sm:$0xff] }
 0x771   : > { %6410 = vst [vmem:[#allocation1 + $0x1] ss:$2 sm:$0xff] %v14358_v53  ;;  %7089 = vmatpush.bf16.msrb.mxu1 %v9393_v6  ;;  %v8645_v14 = vrot.slane %v14426_v36, 10 }
 0x772   : > { %7053 = vmatpush.bf16.msra.mxu2 %v9363_v49  ;;  %7065 = vmatpush.bf16.msra.mxu3 %v9373_v9  ;;  %v6325_v31 = vrot.slane %v6322_v60, 5  ;;  %v9412_v49 = vld [vmem:[%s14918_s9 + $0x210] sm:$0xff] }
 0x774   : > { %v6326_v0 = vsel %vm14179_vm14, %v8644_v52, %v6325_v31 }
 0x775   : > { %7090 = vmatpush.bf16.msrb.mxu1 %v9392_v41  ;;  %v9411_v41 = vld [vmem:[%s14918_s9 + $0x208] sm:$0xff] }
 0x776   : > { %v6350_v35 = vld.sshfl [vmem:[#allocation1 + $0x10] sm:$0xff pattern:$0x75316420]  ;;  %7054 = vmatpush.bf16.msra.mxu2 %v9362_v37  ;;  %7066 = vmatpush.bf16.msra.mxu3 %v9372_v58 }
 0x777   : > { %6357 = vst [vmem:[#allocation1 + $0x10] ss:$2 sm:$0xff] %v14307_v62  ;;  %v6431_v26 = vpack.c.bf16 %v6350_v35, %v14221_v3  ;;  %v9382_v3 = vld [vmem:[%s14918_s9 + $0x120] sm:$0xff] }
 0x778   : > { %6359 = vst [vmem:[#allocation1 + $0x11] ss:$2 sm:$0xff] %v14397_v28  ;;  %v14417_v63 = vld.sshfl [vmem:[#allocation1] sm:$0xff pattern:$0x75316420]  ;;  %7078 = vmatpush.bf16.msrb.mxu0 %v9382_v3 }
 0x779   : > { %7041 = vmatmul.bf16.vlgmr.msrb.gmra.mxu3 %v6431_v26  ;;  %6419 = vst [vmem:[#allocation1] ss:$2 sm:$0xff] %v14307_v62  ;;  %v9371_v62 = vld [vmem:[%s14918_s9 + $0xc8] sm:$0xff]  ;;  %7091 = vmatpush.bf16.msrb.mxu1 %v9391_v33  ;;  %v9414_v35 = vld [vmem:[%s14918_s9 + $0x220] sm:$0xff] }
 0x77a   : > { %6421 = vst [vmem:[#allocation1 + $0x1] ss:$2 sm:$0xff] %v14397_v28  ;;  %7103 = vmatpush.bf16.msrb.mxu2 %v9401_v29  ;;  %7067 = vmatpush.bf16.msra.mxu3 %v9371_v62  ;;  %v9410_v3 = vld [vmem:[%s14918_s9 + $0x200] sm:$0xff] }
 0x77c   : > { %7079 = vmatpush.bf16.msrb.mxu0 %v9381_v23 }
 0x77d   : > { %7092 = vmatpush.bf16.msrb.mxu1 %v9390_v7 }
 0x77e   : > { %7068 = vmatpush.bf16.msra.mxu3 %v9370_v5 }
 0x77f   : > { %v6361_v39 = vld.sshfl [vmem:[#allocation1 + $0x10] sm:$0xff pattern:$0x75316420] }
 0x780   : > { %6368 = vst [vmem:[#allocation1 + $0x10] ss:$2 sm:$0xff] %v14332_v57  ;;  %v6432_v25 = vpack.c.bf16 %v6361_v39, %v14233_v15  ;;  %v9380_v15 = vld [vmem:[%s14918_s9 + $0x110] sm:$0xff] }
 0x781   : > { %6370 = vst [vmem:[#allocation1 + $0x11] ss:$2 sm:$0xff] %v14426_v36  ;;  %v9400_v57 = vld [vmem:[%s14918_s9 + $0x1b0] sm:$0xff]  ;;  %7080 = vmatpush.bf16.msrb.mxu0 %v9380_v15  ;;  %7093 = vmatpush.bf16.msrb.mxu1 %v9389_v50 }
 0x782   : > { %7055 = vmatmul.bf16.vlgmr.msra.gmra.mxu2 %v6432_v25  ;;  %7117 = vmatpush.bf16.msrb.mxu3 %v9409_v48  ;;  %v10512_v25 = vld [vmem:[%s14919_s10] ss:$0 sm:$0xff] }
 0x783   : > { %7104 = vmatpush.bf16.msrb.mxu2 %v9400_v57 }
 0x785   : > { %7081 = vmatpush.bf16.msrb.mxu0 %v9379_v51  ;;  %7094 = vmatpush.bf16.msrb.mxu1 %v9388_v16 }
 0x787   : > { %7105 = vmatpush.bf16.msrb.mxu2 %v9399_v40  ;;  %v9425_v40 = vld [vmem:[%s14920_s11 + $0x38] sm:$0xff] }
 0x788   : > { %v6372_v17 = vld.sshfl [vmem:[#allocation1 + $0x10] sm:$0xff pattern:$0x75316420] }
 0x789   : > { %6379 = vst [vmem:[#allocation1 + $0x10] ss:$2 sm:$0xff] %v14358_v53  ;;  %v6433_v2 = vpack.c.bf16 %v6372_v17, %v14281_v30  ;;  %v9408_v30 = vld [vmem:[%s14918_s9 + $0x1f0] sm:$0xff]  ;;  %7082 = vmatpush.bf16.msrb.mxu0 %v9378_v1  ;;  %v6329_v53 = vrot.slane %v6322_v60, 6  ;;  %7095 = vmatpush.bf16.msrb.mxu1 %v9387_v21 }
 0x78a   : > { %6381 = vst [vmem:[#allocation1 + $0x11] ss:$2 sm:$0xff] %v6326_v0  ;;  %7118 = vmatpush.bf16.msrb.mxu3 %v9408_v30  ;;  %v9424_v21 = vld [vmem:[%s14920_s11 + $0x30] sm:$0xff] }
 0x78b   : > { %7069 = vmatmul.bf16.vlgmr.msra.gmra.mxu3 %v6433_v2  ;;  %7106 = vmatpush.bf16.msrb.mxu2 %v9398_v13  ;;  %v6330_v10 = vsel %vm14198_vm8, %v8645_v14, %v6329_v53  ;;  %v9433_v14 = vld [vmem:[%s14920_s11 + $0x78] sm:$0xff] }
 0x78d   : > { %7131 = vmatpush.bf16.msra.mxu0 %v9417_v12  ;;  %7096 = vmatpush.bf16.msrb.mxu1 %v9386_v38  ;;  %v9423_v12 = vld [vmem:[%s14920_s11 + $0x28] sm:$0xff] }
 0x78e   : > { %7119 = vmatpush.bf16.msrb.mxu3 %v9407_v42 }
 0x78f   : > { %7107 = vmatpush.bf16.msrb.mxu2 %v9397_v19 }
 0x791   : > { %v6383_v22 = vld.sshfl [vmem:[#allocation1 + $0x10] sm:$0xff pattern:$0x75316420]  ;;  %7132 = vmatpush.bf16.msra.mxu0 %v9416_v24  ;;  %7906 = vmatpush.bf16.msra.mxu1 %v9425_v40 }
 0x792   : > { %6390 = vst [vmem:[#allocation1 + $0x10] ss:$2 sm:$0xff] %v14397_v28  ;;  %v6434_v11 = vpack.c.bf16 %v6383_v22, %v14309_v44  ;;  %7120 = vmatpush.bf16.msrb.mxu3 %v9406_v46  ;;  %v9395_v44 = vld [vmem:[%s14918_s9 + $0x188] sm:$0xff]  ;;  %v9413_v28 = vld [vmem:[%s14918_s9 + $0x218] sm:$0xff]  ;;  %v9436_v40 = vld [vmem:[%s14920_s11 + $0x90] sm:$0xff] }
 0x793   : > { %6392 = vst [vmem:[#allocation1 + $0x11] ss:$2 sm:$0xff] %v6330_v10  ;;  %7108 = vmatpush.bf16.msrb.mxu2 %v9396_v32  ;;  %v9432_v32 = vld [vmem:[%s14920_s11 + $0x70] sm:$0xff]  ;;  %v9441_v46 = vld [vmem:[%s14920_s11 + $0xb8] sm:$0xff] }
 0x794   : > { %7083 = vmatmul.bf16.vlgmr.msrb.gmra.mxu0 %v6434_v11 }
 0x795   : > { %7133 = vmatpush.bf16.msra.mxu0 %v9415_v18  ;;  %7907 = vmatpush.bf16.msra.mxu1 %v9424_v21  ;;  %v9440_v18 = vld [vmem:[%s14920_s11 + $0xb0] sm:$0xff] }
 0x796   : > { %7121 = vmatpush.bf16.msrb.mxu3 %v9405_v55  ;;  %v9422_v55 = vld [vmem:[%s14920_s11 + $0x20] sm:$0xff] }
 0x797   : > { %7109 = vmatpush.bf16.msrb.mxu2 %v9395_v44 }
 0x799   : > { %7134 = vmatpush.bf16.msra.mxu0 %v9414_v35  ;;  %7908 = vmatpush.bf16.msra.mxu1 %v9423_v12  ;;  %v9443_v12 = vld [vmem:[%s14920_s11 + $0xc8] sm:$0xff] }
 0x79a   : > { %v6394_v8 = vld.sshfl [vmem:[#allocation1 + $0x10] sm:$0xff pattern:$0x75316420]  ;;  %7122 = vmatpush.bf16.msrb.mxu3 %v9404_v4 }
 0x79b   : > { %6401 = vst [vmem:[#allocation1 + $0x10] ss:$2 sm:$0xff] %v14426_v36  ;;  %v6435_v6 = vpack.c.bf16 %v6394_v8, %v14345_v47  ;;  %7110 = vmatpush.bf16.msrb.mxu2 %v9394_v20  ;;  %v9402_v47 = vld [vmem:[%s14918_s9 + $0x1c0] sm:$0xff]  ;;  %v9449_v20 = vld [vmem:[%s14920_s11 + $0xf8] sm:$0xff] }
 0x79c   : > { %6403 = vst [vmem:[#allocation1 + $0x11] ss:$2 sm:$0xff] %v15192_v45 }
 0x79d   : > { %7097 = vmatmul.bf16.vlgmr.msrb.gmra.mxu1 %v6435_v6  ;;  %7135 = vmatpush.bf16.msra.mxu0 %v9413_v28  ;;  %v9431_v6 = vld [vmem:[%s14920_s11 + $0x68] sm:$0xff] }
 0x79e   : > { %7123 = vmatpush.bf16.msrb.mxu3 %v9403_v59  ;;  %v9448_v59 = vld [vmem:[%s14920_s11 + $0xf0] sm:$0xff]  ;;  %7909 = vmatpush.bf16.msra.mxu1 %v9422_v55 }
 0x79f   : > { %7920 = vmatpush.bf16.msra.mxu2 %v9433_v14 }
 0x7a1   : > { %7136 = vmatpush.bf16.msra.mxu0 %v9412_v49 }
 0x7a2   : > { %7124 = vmatpush.bf16.msrb.mxu3 %v9402_v47  ;;  %v9421_v47 = vld [vmem:[%s14920_s11 + $0x18] sm:$0xff] }
 0x7a3   : > { %v6405_v26 = vld.sshfl [vmem:[#allocation1 + $0x10] sm:$0xff pattern:$0x75316420]  ;;  %7921 = vmatpush.bf16.msra.mxu2 %v9432_v32  ;;  %7910 = vmatpush.bf16.msra.mxu1 %v9421_v47  ;;  %v9455_v32 = vld [vmem:[%s14920_s11 + $0x128] sm:$0xff]  ;;  %v9454_v47 = vld [vmem:[%s14920_s11 + $0x120] sm:$0xff] }
 0x7a4   : > { %6412 = vst [vmem:[#allocation1 + $0x10] ss:$2 sm:$0xff] %v6326_v0  ;;  %v6436_v9 = vpack.c.bf16 %v6405_v26, %v14372_v27  ;;  %v6426_v27 = vld.sshfl [vmem:[#allocation1] sm:$0xff pattern:$0x75316420]  ;;  %v9439_v26 = vld [vmem:[%s14920_s11 + $0xa8] sm:$0xff] }
 0x7a5   : > { %6414 = vst [vmem:[#allocation1 + $0x11] ss:$2 sm:$0xff] %v14185_v43  ;;  %7137 = vmatpush.bf16.msra.mxu0 %v9411_v41  ;;  %v9430_v41 = vld [vmem:[%s14920_s11 + $0x60] sm:$0xff] }
 0x7a6   : > { %7111 = vmatmul.bf16.vlgmr.msrb.gmra.mxu2 %v6436_v9  ;;  %7934 = vmatpush.bf16.msra.mxu3 %v9441_v46  ;;  %v9473_v46 = vld [vmem:[%s14920_s11 + $0x1b8] sm:$0xff] }
 0x7a7   : > { %7922 = vmatpush.bf16.msra.mxu2 %v9431_v6  ;;  %v9481_v6 = vld [vmem:[%s14920_s11 + $0x1f8] sm:$0xff] }
 0x7a9   : > { %7138 = vmatpush.bf16.msra.mxu0 %v9410_v3  ;;  %v9447_v3 = vld [vmem:[%s14920_s11 + $0xe8] sm:$0xff] }
 0x7aa   : > { %7935 = vmatpush.bf16.msra.mxu3 %v9440_v18  ;;  %v9464_v18 = vld [vmem:[%s14920_s11 + $0x170] sm:$0xff] }
 0x7ab   : > { %7923 = vmatpush.bf16.msra.mxu2 %v9430_v41 }
 0x7ac   : > { %v6416_v37 = vld.sshfl [vmem:[#allocation1 + $0x10] sm:$0xff pattern:$0x75316420] }
 0x7ad   : > { %6423 = vst [vmem:[#allocation1 + $0x10] ss:$2 sm:$0xff] %v6330_v10  ;;  %v6437_v56 = vpack.c.bf16 %v6416_v37, %v14417_v63  ;;  %7948 = vmatpush.bf16.msrb.mxu0 %v9449_v20 }
 0x7ae   : > { %6425 = vst [vmem:[#allocation1 + $0x11] ss:$2 sm:$0xff] %v14206_v61  ;;  %7936 = vmatpush.bf16.msra.mxu3 %v9439_v26 }
 0x7af   : > { %7125 = vmatmul.bf16.vlgmr.msrb.gmra.mxu3 %v6437_v56  ;;  %v9420_v56 = vld [vmem:[%s14920_s11 + $0x10] sm:$0xff] }
 0x7b0   : > { %7911 = vmatpush.bf16.msra.mxu1 %v9420_v56 }
 0x7b1   : > { %7949 = vmatpush.bf16.msrb.mxu0 %v9448_v59 }
 0x7b5   : > { %v6427_v58 = vld.sshfl [vmem:[#allocation1 + $0x10] sm:$0xff pattern:$0x75316420]  ;;  %7950 = vmatpush.bf16.msrb.mxu0 %v9447_v3 }
 0x7b6   : > { %v6438_v36 = vpack.c.bf16 %v6427_v58, %v6426_v27  ;;  %v9438_v27 = vld [vmem:[%s14920_s11 + $0xa0] sm:$0xff] }
 0x7b7   : > { %7937 = vmatpush.bf16.msra.mxu3 %v9438_v27  ;;  %v9471_v27 = vld [vmem:[%s14920_s11 + $0x1a8] sm:$0xff] }
 0x7b8   : > { %7139 = vmatmul.bf16.vlgmr.msra.gmra.mxu0 %v6438_v36 }
 0x7f3   : > { %v7028_v33 = vpop.f32.mrf.mxu2 }
 0x7f4   : > { %v7029_v7 = vadd.f32 %v10512_v25, %v7028_v33  ;;  %v9429_v33 = vld [vmem:[%s14920_s11 + $0x58] sm:$0xff] }
 0x7f5   : > { %7924 = vmatpush.bf16.msra.mxu2 %v9429_v33  ;;  %v9462_v33 = vld [vmem:[%s14920_s11 + $0x160] sm:$0xff] }
 0x7fb   : > { %v7030_v62 = vpop.f32.mrf.mxu2 }
 0x7fc   : > { %v7042_v23 = vpop.f32.mrf.mxu3  ;;  %v7031_v52 = vadd.f32 %v10512_v25, %v7030_v62  ;;  %v9446_v62 = vld [vmem:[%s14920_s11 + $0xe0] sm:$0xff]  ;;  %v9419_v25 = vld [vmem:[%s14920_s11 + $0x8] sm:$0xff] }
 0x7fd   : > { %v7043_v15 = vadd.f32 %v7042_v23, %v7029_v7  ;;  %v9437_v7 = vld [vmem:[%s14920_s11 + $0x98] sm:$0xff]  ;;  %7951 = vmatpush.bf16.msrb.mxu0 %v9446_v62  ;;  %7912 = vmatpush.bf16.msra.mxu1 %v9419_v25  ;;  %v9479_v25 = vld [vmem:[%s14920_s11 + $0x1e8] sm:$0xff] }
 0x7fe   : > { %7938 = vmatpush.bf16.msra.mxu3 %v9437_v7  ;;  %v9452_v7 = vld [vmem:[%s14920_s11 + $0x110] sm:$0xff] }
 0x802   : > { %7939 = vmatpush.bf16.msra.mxu3 %v9436_v40 }
 0x804   : > { %v7044_v39 = vpop.f32.mrf.mxu3 }
 0x805   : > { %v7056_v29 = vpop.f32.mrf.mxu2  ;;  %v7045_v17 = vadd.f32 %v7044_v39, %v7031_v52  ;;  %v9457_v52 = vld [vmem:[%s14920_s11 + $0x138] sm:$0xff] }
 0x806   : > { %v7057_v57 = vadd.f32 %v7056_v29, %v7043_v15  ;;  %v9428_v15 = vld [vmem:[%s14920_s11 + $0x50] sm:$0xff] }
 0x807   : > { %7925 = vmatpush.bf16.msra.mxu2 %v9428_v15 }
 0x80d   : > { %v7058_v5 = vpop.f32.mrf.mxu2 }
 0x80e   : > { %v7070_v60 = vpop.f32.mrf.mxu3  ;;  %v7059_v1 = vadd.f32 %v7058_v5, %v7045_v17  ;;  %v9427_v17 = vld [vmem:[%s14920_s11 + $0x48] sm:$0xff] }
 0x80f   : > { %v7071_v31 = vadd.f32 %v7070_v60, %v7057_v57  ;;  %v9445_v57 = vld [vmem:[%s14920_s11 + $0xd8] sm:$0xff]  ;;  %7926 = vmatpush.bf16.msra.mxu2 %v9427_v17 }
 0x810   : > { %7952 = vmatpush.bf16.msrb.mxu0 %v9445_v57  ;;  %v9461_v57 = vld [vmem:[%s14920_s11 + $0x158] sm:$0xff] }
 0x811   : > { %v7084_v63 = vpop.f32.mrf.mxu0  ;;  %v9469_v17 = vld [vmem:[%s14920_s11 + $0x198] sm:$0xff] }
 0x812   : > { %v7085_v0 = vadd.f32 %v7084_v63, %v7071_v31 }
 0x816   : > { %v7072_v51 = vpop.f32.mrf.mxu3 }
 0x817   : > { %v7073_v13 = vadd.f32 %v7072_v51, %v7059_v1 }
 0x819   : > { %v7086_v2 = vpop.f32.mrf.mxu0 }
 0x81a   : > { %v7098_v50 = vpop.f32.mrf.mxu1  ;;  %v7087_v22 = vadd.f32 %v7086_v2, %v7073_v13 }
 0x81b   : > { %v7099_v16 = vadd.f32 %v7098_v50, %v7085_v0  ;;  %v9418_v50 = vld [vmem:[%s14920_s11] sm:$0xff]  ;;  %v9444_v0 = vld [vmem:[%s14920_s11 + $0xd0] sm:$0xff] }
 0x81c   : > { %7913 = vmatpush.bf16.msra.mxu1 %v9418_v50  ;;  %7953 = vmatpush.bf16.msrb.mxu0 %v9444_v0  ;;  %v9451_v0 = vld [vmem:[%s14920_s11 + $0x108] sm:$0xff] }
 0x820   : > { %7962 = vmatpush.bf16.msrb.mxu1 %v9457_v52  ;;  %7954 = vmatpush.bf16.msrb.mxu0 %v9443_v12  ;;  %v9476_v12 = vld [vmem:[%s14920_s11 + $0x1d0] sm:$0xff] }
 0x822   : > { %v7100_v42 = vpop.f32.mrf.mxu1 }
 0x823   : > { %v7101_v24 = vadd.f32 %v7100_v42, %v7087_v22  ;;  %v9426_v42 = vld [vmem:[%s14920_s11 + $0x40] sm:$0xff] }
 0x824   : > { %7927 = vmatpush.bf16.msra.mxu2 %v9426_v42  ;;  %v9489_v42 = vld [vmem:[%s14920_s11 + $0x238] sm:$0xff] }
 0x829   : > { %v7112_v48 = vpop.f32.mrf.mxu2 }
 0x82a   : > { %v7113_v30 = vadd.f32 %v7112_v48, %v7099_v16  ;;  %v9435_v16 = vld [vmem:[%s14920_s11 + $0x88] sm:$0xff] }
 0x82b   : > { %7940 = vmatpush.bf16.msra.mxu3 %v9435_v16  ;;  %v9450_v16 = vld [vmem:[%s14920_s11 + $0x100] sm:$0xff] }
 0x831   : > { %v7114_v11 = vpop.f32.mrf.mxu2 }
 0x832   : > { %v7126_v53 = vpop.f32.mrf.mxu3  ;;  %v7115_v8 = vadd.f32 %v7114_v11, %v7101_v24  ;;  %v9465_v11 = vld [vmem:[%s14920_s11 + $0x178] sm:$0xff] }
 0x833   : > { %v7127_v19 = vadd.f32 %v7126_v53, %v7113_v30  ;;  %v9456_v53 = vld [vmem:[%s14920_s11 + $0x130] sm:$0xff]  ;;  %7976 = vmatpush.bf16.msrb.mxu2 %v9465_v11 }
 0x834   : > { %7963 = vmatpush.bf16.msrb.mxu1 %v9456_v53  ;;  %v9459_v53 = vld [vmem:[%s14920_s11 + $0x148] sm:$0xff] }
 0x835   : > { %v7140_v10 = vpop.f32.mrf.mxu0 }
 0x836   : > { %v7141_v38 = vadd.f32 %v7140_v10, %v7127_v19 }
 0x837   : > { %7977 = vmatpush.bf16.msrb.mxu2 %v9464_v18  ;;  %v9487_v18 = vld [vmem:[%s14920_s11 + $0x228] sm:$0xff] }
 0x838   : > { %v7145_v44 = vmax.f32 %v7141_v38, 0.0  ;;  %v9434_v38 = vld [vmem:[%s14920_s11 + $0x80] sm:$0xff]  ;;  %7964 = vmatpush.bf16.msrb.mxu1 %v9455_v32 }
 0x839   : > { %7941 = vmatpush.bf16.msra.mxu3 %v9434_v38  ;;  %v9458_v32 = vld [vmem:[%s14920_s11 + $0x140] sm:$0xff] }
 0x83a   : > { %v7149_v4 = vrot.slane %v7145_v44, 4  ;;  %7151 = vst [vmem:[#allocation1] ss:$2 sm:$0xff] %v7145_v44  ;;  %v7128_v35 = vpop.f32.mrf.mxu3  ;;  %v9442_v44 = vld [vmem:[%s14920_s11 + $0xc0] sm:$0xff] }
 0x83b   : > { %v7129_v28 = vadd.f32 %v7128_v35, %v7115_v8  ;;  %v9472_v35 = vld [vmem:[%s14920_s11 + $0x1b0] sm:$0xff]  ;;  %7955 = vmatpush.bf16.msrb.mxu0 %v9442_v44 }
 0x83c   : > { %7154 = vst [vmem:[#allocation1 + $0x10] ss:$2 sm:$0xff] %v7149_v4  ;;  %7965 = vmatpush.bf16.msrb.mxu1 %v9454_v47 }
 0x83d   : > { %v7142_v49 = vpop.f32.mrf.mxu0  ;;  %7990 = vmatpush.bf16.msrb.mxu3 %v9473_v46  ;;  %v9488_v46 = vld [vmem:[%s14920_s11 + $0x230] sm:$0xff] }
 0x83e   : > { %v7143_v9 = vadd.f32 %v7142_v49, %v7129_v28  ;;  %v9463_v49 = vld [vmem:[%s14920_s11 + $0x168] sm:$0xff] }
 0x83f   : > { %8004 = vmatpush.bf16.msra.mxu0 %v9481_v6  ;;  %7978 = vmatpush.bf16.msrb.mxu2 %v9463_v49 }
 0x840   : > { %v7146_v37 = vmax.f32 %v7143_v9, 0.0 }
 0x841   : > { %v7152_v58 = vld.sshfl [vmem:[#allocation1] sm:$0xff pattern:$0x75316420]  ;;  %7991 = vmatpush.bf16.msrb.mxu3 %v9472_v35 }
 0x842   : > { %7218 = vst [vmem:[#allocation1] ss:$2 sm:$0xff] %v15192_v45  ;;  %v7150_v36 = vrot.slane %v7146_v37, 4  ;;  %v7162_v23 = vrot.slane %v7152_v58, 7  ;;  %v9453_v58 = vld [vmem:[%s14920_s11 + $0x118] sm:$0xff] }
 0x843   : > { %v7155_v39 = vld.sshfl [vmem:[#allocation1 + $0x10] sm:$0xff pattern:$0x75316420]  ;;  %7157 = vst [vmem:[#allocation1 + $0x20] ss:$2 sm:$0xff] %v7146_v37  ;;  %7966 = vmatpush.bf16.msrb.mxu1 %v9453_v58  ;;  %7979 = vmatpush.bf16.msrb.mxu2 %v9462_v33 }
 0x844   : > { %v7163_v29 = vrot.slane %v7155_v39, 7  ;;  %7160 = vst [vmem:[#allocation1 + $0x30] ss:$2 sm:$0xff] %v7150_v36  ;;  %v7170_v60 = vsel %vm504_vm0, 0.0, %v7162_v23  ;;  %v9480_v37 = vld [vmem:[%s14920_s11 + $0x1f0] sm:$0xff] }
 0x845   : > { %v14626_v63 = vsel %vm1930_vm3, %v7170_v60, 0.0  ;;  %8005 = vmatpush.bf16.msra.mxu0 %v9480_v37  ;;  %7992 = vmatpush.bf16.msrb.mxu3 %v9471_v27 }
 0x846   : > { %v7171_v5 = vsel %vm504_vm0, 0.0, %v7163_v29  ;;  %7220 = vst [vmem:[#allocation1 + $0x1] ss:$2 sm:$0xff] %v14626_v63  ;;  %v7181_v51 = vrot.slane %v14626_v63, 4  ;;  %v8934_v21 = vrot.slane %v14626_v63, 9  ;;  %v8937_v26 = vrot.slane %v14626_v63, 10 }
 0x847   : > { %v14637_v31 = vsel %vm1930_vm3, %v7171_v5, 0.0  ;;  %v9470_v29 = vld [vmem:[%s14920_s11 + $0x1a0] sm:$0xff]  ;;  %7967 = vmatpush.bf16.msrb.mxu1 %v9452_v7  ;;  %7980 = vmatpush.bf16.msrb.mxu2 %v9461_v57 }
 0x848   : > { %7222 = vst [vmem:[#allocation1 + $0x10] ss:$2 sm:$0xff] %v14637_v31  ;;  %v7186_v1 = vrot.slane %v7181_v51, 5  ;;  %v7182_v14 = vrot.slane %v14637_v31, 4  ;;  %v8935_v8 = vrot.slane %v14637_v31, 9  ;;  %v7198_v4 = vrot.slane %v7181_v51, 6 }
 0x849   : > { %v8938_v60 = vrot.slane %v14637_v31, 10  ;;  %8006 = vmatpush.bf16.msra.mxu0 %v9479_v25  ;;  %v9478_v51 = vld [vmem:[%s14920_s11 + $0x1e0] sm:$0xff]  ;;  %7993 = vmatpush.bf16.msrb.mxu3 %v9470_v29 }
 0x84a   : > { %v7158_v48 = vld.sshfl [vmem:[#allocation1 + $0x20] sm:$0xff pattern:$0x75316420]  ;;  %v14679_v10 = vsel %vm14179_vm14, %v8934_v21, %v7186_v1  ;;  %v7190_v55 = vrot.slane %v7182_v14, 5  ;;  %v14731_v56 = vsel %vm14198_vm8, %v8937_v26, %v7198_v4  ;;  %v7202_v23 = vrot.slane %v7182_v14, 6 }
 0x84b   : > { %v7164_v2 = vrot.slane %v7158_v48, 7  ;;  %v7161_v62 = vld.sshfl [vmem:[#allocation1 + $0x30] sm:$0xff pattern:$0x75316420]  ;;  %7968 = vmatpush.bf16.msrb.mxu1 %v9451_v0 }
 0x84c   : > { %v14722_v41 = vsel %vm14179_vm14, %v8935_v8, %v7190_v55  ;;  %v7165_v50 = vrot.slane %v7161_v62, 7  ;;  %v14767_v52 = vsel %vm14198_vm8, %v8938_v60, %v7202_v23  ;;  %v9474_v8 = vld [vmem:[%s14920_s11 + $0x1c0] sm:$0xff] }
 0x84d   : > { %v7172_v13 = vsel %vm504_vm0, 0.0, %v7164_v2  ;;  %v7225_v30 = vld.sshfl [vmem:[#allocation1] sm:$0xff pattern:$0x75316420]  ;;  %v9460_v2 = vld [vmem:[%s14920_s11 + $0x150] sm:$0xff]  ;;  %8007 = vmatpush.bf16.msra.mxu0 %v9478_v51  ;;  %7994 = vmatpush.bf16.msrb.mxu3 %v9469_v17 }
 0x84e   : > { %v14665_v19 = vsel %vm1930_vm3, %v7172_v13, 0.0  ;;  %7229 = vst [vmem:[#allocation1] ss:$2 sm:$0xff] %v14185_v43  ;;  %v7173_v1 = vsel %vm504_vm0, 0.0, %v7165_v50  ;;  %v9477_v13 = vld [vmem:[%s14920_s11 + $0x1d8] sm:$0xff]  ;;  %7981 = vmatpush.bf16.msrb.mxu2 %v9460_v2  ;;  %vm8040_vm0 = vcmask 551936  }
 0x84f   : > { %v7183_v22 = vrot.slane %v14665_v19, 4  ;;  %7224 = vst [vmem:[#allocation1 + $0x11] ss:$2 sm:$0xff] %v14665_v19  ;;  %v8936_v20 = vrot.slane %v14665_v19, 9  ;;  %v8939_v39 = vrot.slane %v14665_v19, 10  ;;  %7969 = vmatpush.bf16.msrb.mxu1 %v9450_v16 }
 0x850   : > { %7231 = vst [vmem:[#allocation1 + $0x1] ss:$2 sm:$0xff] %v14679_v10 }
 0x851   : > { %v7194_v24 = vrot.slane %v7183_v22, 5  ;;  %v7206_v36 = vrot.slane %v7183_v22, 6  ;;  %8008 = vmatpush.bf16.msra.mxu0 %v9477_v13  ;;  %v9467_v22 = vld [vmem:[%s14920_s11 + $0x188] sm:$0xff] }
 0x852   : > { %7982 = vmatpush.bf16.msrb.mxu2 %v9459_v53 }
 0x853   : > { %v14710_v59 = vsel %vm14179_vm14, %v8936_v20, %v7194_v24  ;;  %v14756_v5 = vsel %vm14198_vm8, %v8939_v39, %v7206_v36  ;;  %v9466_v24 = vld [vmem:[%s14920_s11 + $0x180] sm:$0xff] }
 0x854   : > { %v9482_v36 = vld [vmem:[%s14920_s11 + $0x200] sm:$0xff] }
 0x855   : > { %8009 = vmatpush.bf16.msra.mxu0 %v9476_v12 }
 0x856   : > { %v7226_v28 = vld.sshfl [vmem:[#allocation1 + $0x10] sm:$0xff pattern:$0x75316420]  ;;  %7983 = vmatpush.bf16.msrb.mxu2 %v9458_v32 }
 0x857   : > { %v7317_v9 = vpack.c.bf16 %v7226_v28, %v7225_v30  ;;  %7235 = vst [vmem:[#allocation1 + $0x11] ss:$2 sm:$0xff] %v14710_v59  ;;  %v7236_v3 = vld.sshfl [vmem:[#allocation1] sm:$0xff pattern:$0x75316420]  ;;  %v14792_v30 = vsel %vm1930_vm3, %v7173_v1, 0.0 }
 0x858   : > { %7233 = vst [vmem:[#allocation1 + $0x10] ss:$2 sm:$0xff] %v14722_v41  ;;  %v7209_v11 = vrot.slane %v14792_v30, 4  ;;  %v8940_v55 = vrot.slane %v14792_v30, 9  ;;  %v9486_v28 = vld [vmem:[%s14920_s11 + $0x220] sm:$0xff]  ;;  %v8941_v26 = vrot.slane %v14792_v30, 10 }
 0x859   : > { %7914 = vmatmul.bf16.vlgmr.msra.gmra.mxu1 %v7317_v9  ;;  %7240 = vst [vmem:[#allocation1] ss:$2 sm:$0xff] %v14206_v61 }
 0x85a   : > { %7242 = vst [vmem:[#allocation1 + $0x1] ss:$2 sm:$0xff] %v14731_v56  ;;  %8018 = vmatpush.bf16.msra.mxu1 %v9489_v42  ;;  %v7212_v44 = vrot.slane %v7209_v11, 5  ;;  %v7216_v47 = vrot.slane %v7209_v11, 6 }
 0x85c   : > { %v7213_v4 = vsel %vm14179_vm14, %v8940_v55, %v7212_v44  ;;  %v7217_v9 = vsel %vm14198_vm8, %v8941_v26, %v7216_v47 }
 0x85e   : > { %8019 = vmatpush.bf16.msra.mxu1 %v9488_v46 }
 0x85f   : > { %v7237_v15 = vld.sshfl [vmem:[#allocation1 + $0x10] sm:$0xff pattern:$0x75316420] }
 0x860   : > { %v7318_v40 = vpack.c.bf16 %v7237_v15, %v7236_v3  ;;  %7246 = vst [vmem:[#allocation1 + $0x11] ss:$2 sm:$0xff] %v14756_v5  ;;  %v10513_v15 = vld [vmem:[%s14921_s12] ss:$0 sm:$0xff] }
 0x861   : > { %7244 = vst [vmem:[#allocation1 + $0x10] ss:$2 sm:$0xff] %v14767_v52  ;;  %v7247_v48 = vld.sshfl [vmem:[#allocation1] sm:$0xff pattern:$0x75316420] }
 0x862   : > { %7928 = vmatmul.bf16.vlgmr.msra.gmra.mxu2 %v7318_v40  ;;  %7251 = vst [vmem:[#allocation1] ss:$2 sm:$0xff] %v14626_v63  ;;  %v9468_v63 = vld [vmem:[%s14920_s11 + $0x190] sm:$0xff]  ;;  %8020 = vmatpush.bf16.msra.mxu1 %v9487_v18 }
 0x863   : > { %7253 = vst [vmem:[#allocation1 + $0x1] ss:$2 sm:$0xff] %v14637_v31  ;;  %7995 = vmatpush.bf16.msrb.mxu3 %v9468_v63 }
 0x866   : > { %8021 = vmatpush.bf16.msra.mxu1 %v9486_v28 }
 0x867   : > { %7996 = vmatpush.bf16.msrb.mxu3 %v9467_v22 }
 0x868   : > { %v7248_v21 = vld.sshfl [vmem:[#allocation1 + $0x10] sm:$0xff pattern:$0x75316420] }
 0x869   : > { %v7319_v14 = vpack.c.bf16 %v7248_v21, %v7247_v48  ;;  %7255 = vst [vmem:[#allocation1 + $0x10] ss:$2 sm:$0xff] %v14665_v19 }
 0x86a   : > { %7257 = vst [vmem:[#allocation1 + $0x11] ss:$2 sm:$0xff] %v14792_v30  ;;  %v7258_v38 = vld.sshfl [vmem:[#allocation1] sm:$0xff pattern:$0x75316420]  ;;  %8022 = vmatpush.bf16.msra.mxu1 %v9485_v34 }
 0x86b   : > { %7942 = vmatmul.bf16.vlgmr.msra.gmra.mxu3 %v7319_v14  ;;  %7262 = vst [vmem:[#allocation1] ss:$2 sm:$0xff] %v14679_v10  ;;  %v9475_v10 = vld [vmem:[%s14920_s11 + $0x1c8] sm:$0xff] }
 0x86c   : > { %7264 = vst [vmem:[#allocation1 + $0x1] ss:$2 sm:$0xff] %v14722_v41  ;;  %7997 = vmatpush.bf16.msrb.mxu3 %v9466_v24  ;;  %8010 = vmatpush.bf16.msra.mxu0 %v9475_v10 }
 0x870   : > { %8011 = vmatpush.bf16.msra.mxu0 %v9474_v8 }
 0x871   : > { %v7259_v20 = vld.sshfl [vmem:[#allocation1 + $0x10] sm:$0xff pattern:$0x75316420] }
 0x872   : > { %v7320_v35 = vpack.c.bf16 %v7259_v20, %v7258_v38  ;;  %7266 = vst [vmem:[#allocation1 + $0x10] ss:$2 sm:$0xff] %v14710_v59 }
 0x873   : > { %7268 = vst [vmem:[#allocation1 + $0x11] ss:$2 sm:$0xff] %v7213_v4  ;;  %v7269_v6 = vld.sshfl [vmem:[#allocation1] sm:$0xff pattern:$0x75316420] }
 0x874   : > { %7956 = vmatmul.bf16.vlgmr.msrb.gmra.mxu0 %v7320_v35  ;;  %7273 = vst [vmem:[#allocation1] ss:$2 sm:$0xff] %v14731_v56  ;;  %v9484_v56 = vld [vmem:[%s14920_s11 + $0x210] sm:$0xff] }
 0x875   : > { %7275 = vst [vmem:[#allocation1 + $0x1] ss:$2 sm:$0xff] %v14767_v52  ;;  %8023 = vmatpush.bf16.msra.mxu1 %v9484_v56 }
 0x879   : > { %8024 = vmatpush.bf16.msra.mxu1 %v9483_v54 }
 0x87a   : > { %v7270_v49 = vld.sshfl [vmem:[#allocation1 + $0x10] sm:$0xff pattern:$0x75316420] }
 0x87b   : > { %v7321_v3 = vpack.c.bf16 %v7270_v49, %v7269_v6  ;;  %7277 = vst [vmem:[#allocation1 + $0x10] ss:$2 sm:$0xff] %v14756_v5 }
 0x87c   : > { %7279 = vst [vmem:[#allocation1 + $0x11] ss:$2 sm:$0xff] %v7217_v9  ;;  %v7280_v37 = vld.sshfl [vmem:[#allocation1] sm:$0xff pattern:$0x75316420] }
 0x87d   : > { %7970 = vmatmul.bf16.vlgmr.msrb.gmra.mxu1 %v7321_v3  ;;  %7284 = vst [vmem:[#allocation1] ss:$2 sm:$0xff] %v14637_v31 }
 0x87e   : > { %7286 = vst [vmem:[#allocation1 + $0x1] ss:$2 sm:$0xff] %v14665_v19  ;;  %8025 = vmatpush.bf16.msra.mxu1 %v9482_v36 }
 0x883   : > { %v7281_v27 = vld.sshfl [vmem:[#allocation1 + $0x10] sm:$0xff pattern:$0x75316420] }
 0x884   : > { %v7322_v58 = vpack.c.bf16 %v7281_v27, %v7280_v37  ;;  %7288 = vst [vmem:[#allocation1 + $0x10] ss:$2 sm:$0xff] %v14792_v30 }
 0x885   : > { %7290 = vst [vmem:[#allocation1 + $0x11] ss:$2 sm:$0xff] %v15192_v45  ;;  %v7291_v33 = vld.sshfl [vmem:[#allocation1] sm:$0xff pattern:$0x75316420] }
 0x886   : > { %7984 = vmatmul.bf16.vlgmr.msrb.gmra.mxu2 %v7322_v58  ;;  %7295 = vst [vmem:[#allocation1] ss:$2 sm:$0xff] %v14722_v41 }
 0x887   : > { %7297 = vst [vmem:[#allocation1 + $0x1] ss:$2 sm:$0xff] %v14710_v59 }
 0x88c   : > { %v7292_v31 = vld.sshfl [vmem:[#allocation1 + $0x10] sm:$0xff pattern:$0x75316420] }
 0x88d   : > { %v7323_v19 = vpack.c.bf16 %v7292_v31, %v7291_v33  ;;  %7299 = vst [vmem:[#allocation1 + $0x10] ss:$2 sm:$0xff] %v7213_v4 }
 0x88e   : > { %7301 = vst [vmem:[#allocation1 + $0x11] ss:$2 sm:$0xff] %v14185_v43  ;;  %v7302_v23 = vld.sshfl [vmem:[#allocation1] sm:$0xff pattern:$0x75316420] }
 0x88f   : > { %7998 = vmatmul.bf16.vlgmr.msrb.gmra.mxu3 %v7323_v19  ;;  %7306 = vst [vmem:[#allocation1] ss:$2 sm:$0xff] %v14767_v52 }
 0x890   : > { %7308 = vst [vmem:[#allocation1 + $0x1] ss:$2 sm:$0xff] %v14756_v5 }
 0x895   : > { %v7303_v62 = vld.sshfl [vmem:[#allocation1 + $0x10] sm:$0xff pattern:$0x75316420] }
 0x896   : > { %v7324_v45 = vpack.c.bf16 %v7303_v62, %v7302_v23  ;;  %7310 = vst [vmem:[#allocation1 + $0x10] ss:$2 sm:$0xff] %v7217_v9 }
 0x897   : > { %7312 = vst [vmem:[#allocation1 + $0x11] ss:$2 sm:$0xff] %v14206_v61  ;;  %v7313_v41 = vld.sshfl [vmem:[#allocation1] sm:$0xff pattern:$0x75316420] }
 0x898   : > { %8012 = vmatmul.bf16.vlgmr.msra.gmra.mxu0 %v7324_v45 }
 0x89e   : > { %v7314_v59 = vld.sshfl [vmem:[#allocation1 + $0x10] sm:$0xff pattern:$0x75316420] }
 0x89f   : > { %v7325_v39 = vpack.c.bf16 %v7314_v59, %v7313_v41 }
 0x8a1   : > { %8026 = vmatmul.bf16.vlgmr.msra.gmra.mxu1 %v7325_v39 }
 0x8d6   : > { %v7915_v29 = vpop.f32.mrf.mxu1 }
 0x8d7   : > { %v7916_v57 = vadd.f32 %v10513_v15, %v7915_v29 }
 0x8de   : > { %v7917_v43 = vpop.f32.mrf.mxu1 }
 0x8df   : > { %v7918_v17 = vadd.f32 %v10513_v15, %v7917_v43 }
 0x8e5   : > { %v7929_v25 = vpop.f32.mrf.mxu2 }
 0x8e6   : > { %v7930_v61 = vadd.f32 %v7929_v25, %v7916_v57 }
 0x8ed   : > { %v7931_v5 = vpop.f32.mrf.mxu2 }
 0x8ee   : > { %v7943_v60 = vpop.f32.mrf.mxu3  ;;  %v7932_v1 = vadd.f32 %v7931_v5, %v7918_v17 }
 0x8ef   : > { %v7944_v40 = vadd.f32 %v7943_v60, %v7930_v61 }
 0x8f1   : > { %v7957_v7 = vpop.f32.mrf.mxu0 }
 0x8f2   : > { %v7958_v0 = vadd.f32 %v7957_v7, %v7944_v40 }
 0x8f6   : > { %v7945_v51 = vpop.f32.mrf.mxu3 }
 0x8f7   : > { %v7946_v13 = vadd.f32 %v7945_v51, %v7932_v1 }
 0x8f9   : > { %v7959_v52 = vpop.f32.mrf.mxu0 }
 0x8fa   : > { %v7971_v50 = vpop.f32.mrf.mxu1  ;;  %v7960_v42 = vadd.f32 %v7959_v52, %v7946_v13 }
 0x8fb   : > { %v7972_v63 = vadd.f32 %v7971_v50, %v7958_v0 }
 0x902   : > { %v7973_v16 = vpop.f32.mrf.mxu1 }
 0x903   : > { %v7974_v14 = vadd.f32 %v7973_v16, %v7960_v42 }
 0x909   : > { %v7985_v48 = vpop.f32.mrf.mxu2 }
 0x90a   : > { %v7986_v30 = vadd.f32 %v7985_v48, %v7972_v63 }
 0x911   : > { %v7987_v12 = vpop.f32.mrf.mxu2 }
 0x912   : > { %v7999_v2 = vpop.f32.mrf.mxu3  ;;  %v7988_v32 = vadd.f32 %v7987_v12, %v7974_v14 }
 0x913   : > { %v8000_v21 = vadd.f32 %v7999_v2, %v7986_v30 }
 0x915   : > { %v8013_v53 = vpop.f32.mrf.mxu0 }
 0x916   : > { %v8014_v22 = vadd.f32 %v8013_v53, %v8000_v21 }
 0x91a   : > { %v8001_v11 = vpop.f32.mrf.mxu3 }
 0x91b   : > { %v8002_v24 = vadd.f32 %v8001_v11, %v7988_v32 }
 0x91d   : > { %v8015_v10 = vpop.f32.mrf.mxu0 }
 0x91e   : > { %v8027_v38 = vpop.f32.mrf.mxu1  ;;  %v8016_v18 = vadd.f32 %v8015_v10, %v8002_v24 }
 0x91f   : > { %v8028_v46 = vadd.f32 %v8027_v38, %v8014_v22 }
 0x921   : > { %v8032_v44 = vmax.f32 %v8028_v46, 0.0 }
 0x923   : > { %v8036_v55 = vrot.slane %v8032_v44, 4  ;;  %8041 = vst.msk [vmem:[%s433_s15] sm:$0xf] %vm8040_vm0, %v8032_v44 }
 0x925   : > { %8042 = vst.msk [vmem:[%s433_s15 + $0x4] sm:$0xf] %vm8040_vm0, %v8036_v55 }
 0x926   : > { %v8029_v20 = vpop.f32.mrf.mxu1 }
 0x927   : > { %v8030_v8 = vadd.f32 %v8029_v20, %v8016_v18 }
 0x929   : > { %v8033_v4 = vmax.f32 %v8030_v8, 0.0 }
 0x92b   : > { %v8037_v35 = vrot.slane %v8033_v4, 4  ;;  %8043 = vst.msk [vmem:[%s433_s15 + $0x8] sm:$0xf] %vm8040_vm0, %v8033_v4 }
 0x92d   : > { %8044 = vst.msk [vmem:[%s433_s15 + $0xc] sm:$0xf] %vm8040_vm0, %v8037_v35 }
 0x92e   : > { %10544 = shalt.err (!%p10541_p3)
}
 0x92f   : > { %s10593_s1 = smov 4  }
 0x930   : > { %9491 = dma.vmem_to_hbm [thread:$0]  (%p10702_p5), %s8059_s20, 256, %s8061_s30, %s8046_s29, %s15028_s24, %s15028_s24, %s10593_s1  }
 0x931 PF: > { %p9497_p4 = scmp.ge.s32.totalorder %s10579_s28, 2  ;;  %s8075_s15 = sand.u32 1, %s10567_s25  }
 0x932   : > { %s8076_s23 = scalar_lea.sflag [#allocation3], %s8075_s15 }
 0x933   : > { %p9494_p7 = pnand %p9497_p4, %p10706_p6 }
 0x935   : > { %p9495_p8 = pneg %p9494_p7 }
 0x937   : > { %10562 = dma.done.wait (%p9495_p8), %s8076_s23, 256  }
 0x938   : > { %10564 = vsyncadd (%p9495_p8), %s8076_s23, 4294967040  ;;  %s15197_s17 = sld [smem:[#allocation5_spill]]  ;;  %p23_p9 = scmp.ge.s32.totalorder %s10689_s14, 4  }
 0x939   : > { %s15198_s27 = sld [smem:[#allocation6_spill]]  ;;  %s15199_s25 = smov %s10571_s26 }
 0x93a   : > { %s15201_s28 = smov %s10689_s14  ;;  %25 = sbr.rel (!%p23_p9) target bundleno = 6 (0x6), region = 164 }
 0x93e   : > { %s15200_s26 = smov %s15197_s17 }
 0x93f   :  { %8082 = vsyncpa [#allocation3], 1 }
 0x940   :  { %8084 = vsyncpa [#allocation3 + $0x1], 1 }

</bundles_post_ra>
